<compile_context>
chip_gen: v5e
topology: v5e:2x2
jax: 0.10.0
libtpu: 0.0.40
codegen_flags: <defaults>
</compile_context>

<pallas_src>
import functools

import jax
import jax.numpy as jnp
from jax import lax
from jax.experimental import pallas as pl
from jax.experimental.pallas import tpu as pltpu

EPS = 1e-5
LANE = 128
_MIB = 1024 * 1024

# Grid-invariant operands (constant index_map) only need a single VMEM buffer.
try:
    _SINGLE_BUF = pl.Buffered(1)
except Exception:                      # pragma: no cover - very old API fallback
    _SINGLE_BUF = None


def _round_up(x, m):
    return (x + m - 1) // m * m


def _vmem_cap_bytes():
    try:
        return int(getattr(pltpu.get_tpu_info(), "vmem_capacity_bytes"))
    except Exception:                  # pragma: no cover - best-effort query
        return 64 * _MIB               # worst-case (v7x per-core)


def _vmem_limit_bytes(estimate):
    """Per-call VMEM request computed from block sizes, clamped to the chip."""
    return int(min(max(estimate, 32 * _MIB), 100 * _MIB, 0.9 * _vmem_cap_bytes()))


# ----------------------------------------------------------------------------
# Kernel 1: fused 3x3 conv (in-VMEM tap construction) + bias + partial BN stats
# ----------------------------------------------------------------------------
def _conv3x3_stats_kernel(x_ref, w_ref, b_ref, y_ref, s_ref, q_ref, *, W, data_off):
    """One image per grid step.

    x_ref : (L, C)    flattened halo-padded image (compute dtype); real pixel
                      (h, w) lives at flat row data_off + h*W + w, halo rows 0.
    w_ref : (9, C, C) per-tap weight matrices, tap t = dy*3 + dx
    b_ref : (1, C)    conv bias (f32)
    y_ref : (HW, C)   pre-BN conv output
    s_ref : (1, C)    per-image per-channel sum            (f32)
    q_ref : (1, C)    per-image per-channel sum of squares (f32)
    """
    HW, Cp = y_ref.shape
    # Width-edge validity masks built in-kernel (cheap VALU filler under an
    # MXU-bound kernel) instead of DMA'd (HW, 1) arrays.
    wpos = lax.broadcasted_iota(jnp.int32, (HW, Cp), 0) % W
    not_left = wpos != 0               # tap (dy, 0) invalid where w == 0
    not_right = wpos != W - 1          # tap (dy, 2) invalid where w == W - 1

    acc = None
    for t in range(9):                 # fully unrolled: 9 MXU matmuls
        dy, dx = divmod(t, 3)
        # Output pixel p = h*W + w at tap (dy, dx) reads padded-image pixel
        # (h+dy-1, w+dx-1) == flat row p + data_off + (dy-1)*W + (dx-1);
        # width wrap-around at dx in {0, 2} is zeroed with the masks above,
        # height out-of-range rows land in the zeroed halo regions.
        tap = x_ref[pl.ds(data_off + (dy - 1) * W + (dx - 1), HW), :]
        if dx == 0:
            tap = jnp.where(not_left, tap, jnp.zeros_like(tap))
        elif dx == 2:
            tap = jnp.where(not_right, tap, jnp.zeros_like(tap))
        part = jnp.dot(tap, w_ref[t], preferred_element_type=jnp.float32)
        acc = part if acc is None else acc + part

    y = acc + b_ref[...]                                     # (HW, Cp) f32
    # Per-channel partial BN stats as sublane reductions (XLU/VALU have slack
    # here; keeps the M=1 stats work off the MXU critical path).
    s_ref[...] = jnp.sum(y, axis=0, keepdims=True)
    q_ref[...] = jnp.sum(y * y, axis=0, keepdims=True)
    y_ref[...] = y.astype(y_ref.dtype)


# ----------------------------------------------------------------------------
# Kernel 2a: BN1 scale/shift + ReLU, written directly into conv2's flat layout
# ----------------------------------------------------------------------------
def _bn1_relu_to_flat_kernel(y_ref, sc_ref, sh_ref, o_ref, *, data_off):
    HW, Cp = y_ref.shape
    L = o_ref.shape[0]
    act = jnp.maximum(y_ref[...].astype(jnp.float32) * sc_ref[...] + sh_ref[...], 0.0)
    # Zero halo/tail rows with sublane-aligned stores; overlap with the data
    # region (when HW is not a multiple of 32) is overwritten by the data store.
    hi_start = data_off + (HW // 32) * 32
    o_ref[pl.ds(0, data_off), :] = jnp.zeros((data_off, Cp), o_ref.dtype)
    o_ref[pl.ds(hi_start, L - hi_start), :] = jnp.zeros((L - hi_start, Cp), o_ref.dtype)
    o_ref[pl.ds(data_off, HW), :] = act.astype(o_ref.dtype)


# ----------------------------------------------------------------------------
# Kernel 2b: BN2 scale/shift + residual add + ReLU
# ----------------------------------------------------------------------------
def _bn2_add_relu_kernel(y_ref, sc_ref, sh_ref, r_ref, o_ref):
    y = y_ref[...].astype(jnp.float32)
    r = r_ref[...].astype(jnp.float32)
    o_ref[...] = jnp.maximum(y * sc_ref[...] + sh_ref[...] + r, 0.0).astype(o_ref.dtype)


# ----------------------------------------------------------------------------
# pallas_call wrappers
# ----------------------------------------------------------------------------
def _conv3x3_call(xflat, w9, b, *, H, W, data_off, y_dtype):
    N, L, Cp = xflat.shape
    HW = H * W
    isz = xflat.dtype.itemsize
    osz = jnp.dtype(y_dtype).itemsize
    kern = functools.partial(_conv3x3_stats_kernel, W=W, data_off=data_off)
    cost = pl.CostEstimate(
        flops=2 * 9 * N * HW * Cp * Cp,
        transcendentals=0,
        bytes_accessed=(N * L * Cp * isz + 9 * Cp * Cp * isz + Cp * 4
                        + N * HW * Cp * osz + 2 * N * Cp * 4))
    vmem = _vmem_limit_bytes(
        2 * L * Cp * isz              # x block (double-buffered)
        + 9 * Cp * Cp * isz           # weights (single-buffered, constant index)
        + 2 * HW * Cp * osz           # y out block (double-buffered)
        + 6 * HW * Cp * 4             # f32 acc / tap / mask / stats temps
        + 16 * Cp * 4)
    return pl.pallas_call(
        kern,
        grid=(N,),
        in_specs=[
            pl.BlockSpec((None, L, Cp), lambda n: (n, 0, 0)),    # one image / step
            pl.BlockSpec((9, Cp, Cp), lambda n: (0, 0, 0), pipeline_mode=_SINGLE_BUF),
            pl.BlockSpec((1, Cp), lambda n: (0, 0), pipeline_mode=_SINGLE_BUF),
        ],
        out_specs=[
            pl.BlockSpec((None, HW, Cp), lambda n: (n, 0, 0)),
            pl.BlockSpec((None, 1, Cp), lambda n: (n, 0, 0)),
            pl.BlockSpec((None, 1, Cp), lambda n: (n, 0, 0)),
        ],
        out_shape=[
            jax.ShapeDtypeStruct((N, HW, Cp), y_dtype),
            jax.ShapeDtypeStruct((N, 1, Cp), jnp.float32),
            jax.ShapeDtypeStruct((N, 1, Cp), jnp.float32),
        ],
        cost_estimate=cost,
        compiler_params=pltpu.CompilerParams(
            dimension_semantics=("parallel",),   # per-image partial stats -> no
            vmem_limit_bytes=vmem,               # cross-step accumulation needed
        ),
    )(xflat, w9, b)


def _bn1_apply_call(y, scale, shift, *, L, data_off, out_dtype):
    N, HW, Cp = y.shape
    isz = y.dtype.itemsize
    osz = jnp.dtype(out_dtype).itemsize
    kern = functools.partial(_bn1_relu_to_flat_kernel, data_off=data_off)
    cost = pl.CostEstimate(
        flops=3 * N * HW * Cp, transcendentals=0,
        bytes_accessed=N * HW * Cp * isz + N * L * Cp * osz + 2 * Cp * 4)
    vmem = _vmem_limit_bytes(2 * HW * Cp * isz + 2 * L * Cp * osz
                             + 4 * HW * Cp * 4 + 16 * Cp * 4)
    return pl.pallas_call(
        kern,
        grid=(N,),
        in_specs=[
            pl.BlockSpec((None, HW, Cp), lambda n: (n, 0, 0)),
            pl.BlockSpec((1, Cp), lambda n: (0, 0), pipeline_mode=_SINGLE_BUF),
            pl.BlockSpec((1, Cp), lambda n: (0, 0), pipeline_mode=_SINGLE_BUF),
        ],
        out_specs=pl.BlockSpec((None, L, Cp), lambda n: (n, 0, 0)),
        out_shape=jax.ShapeDtypeStruct((N, L, Cp), out_dtype),
        cost_estimate=cost,
        compiler_params=pltpu.CompilerParams(
            dimension_semantics=("parallel",), vmem_limit_bytes=vmem),
    )(y, scale, shift)


def _bn2_apply_call(y, scale, shift, residual, out_dtype):
    N, HW, Cp = y.shape
    isz = y.dtype.itemsize
    rsz = residual.dtype.itemsize
    osz = jnp.dtype(out_dtype).itemsize
    cost = pl.CostEstimate(
        flops=4 * N * HW * Cp, transcendentals=0,
        bytes_accessed=N * HW * Cp * (isz + rsz + osz) + 2 * Cp * 4)
    vmem = _vmem_limit_bytes(2 * HW * Cp * (isz + rsz + osz)
                             + 4 * HW * Cp * 4 + 16 * Cp * 4)
    row = lambda: pl.BlockSpec((None, HW, Cp), lambda n: (n, 0, 0))
    vec = lambda: pl.BlockSpec((1, Cp), lambda n: (0, 0), pipeline_mode=_SINGLE_BUF)
    return pl.pallas_call(
        _bn2_add_relu_kernel,
        grid=(N,),
        in_specs=[row(), vec(), vec(), row()],
        out_specs=row(),
        out_shape=jax.ShapeDtypeStruct((N, HW, Cp), out_dtype),
        cost_estimate=cost,
        compiler_params=pltpu.CompilerParams(
            dimension_semantics=("parallel",), vmem_limit_bytes=vmem),
    )(y, scale, shift, residual)


def _bn_scale_shift(s, q, gamma_p, beta_p, count):
    """Fold global batch statistics into per-channel scale/shift (tiny XLA op)."""
    mean = jnp.sum(s, axis=0)[0] / count                  # (Cp,)
    ex2 = jnp.sum(q, axis=0)[0] / count
    var = jnp.maximum(ex2 - mean * mean, 0.0)             # biased variance
    inv = lax.rsqrt(var + EPS)
    scale = gamma_p * inv
    shift = beta_p - mean * scale
    return scale.reshape(1, -1), shift.reshape(1, -1)


def _flatten_pad(img, L, data_off, cdt):
    """(N, H, W, Cp) -> (N, L, Cp): pixel (h, w) at flat row data_off + h*W + w,
    zeros elsewhere (top/bottom halo rows, front offset, tail padding)."""
    N, H, W, Cp = img.shape
    xf = img.reshape(N, H * W, Cp)
    xf = jnp.pad(xf, ((0, 0), (data_off, L - data_off - H * W), (0, 0)))
    return xf.astype(cdt)


# ----------------------------------------------------------------------------
# Forward pass
# ----------------------------------------------------------------------------
@functools.partial(jax.jit, static_argnames=("compute_dtype",))
def residual_block_forward(x_nchw, params, compute_dtype=jnp.bfloat16):
    """ResidualBlock forward. x: (N, C, H, W) f32 -> (N, C, H, W) f32."""
    w1, b1, g1, be1, w2, b2, g2, be2 = params
    N, C, H, W = x_nchw.shape
    HW = H * W
    Cp = _round_up(C, LANE)                       # lane-dense channel axis
    cdt = jnp.dtype(compute_dtype)
    # Flattened halo-padded image: data starts at a 32-aligned row so all
    # stores are sublane-aligned for f32 (8,128) and bf16 (16,128) tilings.
    data_off = _round_up(W + 1, 32)
    L = _round_up(data_off + HW + W + 1, 32)

    # NCHW -> NHWC; zero-pad channels to a multiple of 128 (inert: zero
    # weights/bias/gamma/beta -> zero output, sliced off at the end).
    x_nhwc = jnp.transpose(x_nchw, (0, 2, 3, 1))
    x_p = jnp.pad(x_nhwc, ((0, 0), (0, 0), (0, 0), (0, Cp - C)))
    residual = x_p.reshape(N, HW, Cp).astype(cdt)     # BN2 reads it in compute dtype

    def prep_w(w):   # (3,3,C,C) -> (9,Cp,Cp), zero-padded, compute dtype
        wp = jnp.zeros((3, 3, Cp, Cp), cdt).at[:, :, :C, :C].set(w.astype(cdt))
        return wp.reshape(9, Cp, Cp)

    def prep_vec(v):
        return jnp.zeros((Cp,), jnp.float32).at[:C].set(v.astype(jnp.float32))

    w1_9, w2_9 = prep_w(w1), prep_w(w2)
    b1_p, g1_p, be1_p = prep_vec(b1), prep_vec(g1), prep_vec(be1)
    b2_p, g2_p, be2_p = prep_vec(b2), prep_vec(g2), prep_vec(be2)
    count = N * HW

    # --- conv1 (+ partial BN1 stats) ---
    x1flat = _flatten_pad(x_p, L, data_off, cdt)
    y1, s1, q1 = _conv3x3_call(x1flat, w1_9, b1_p.reshape(1, Cp),
                               H=H, W=W, data_off=data_off, y_dtype=cdt)
    sc1, sh1 = _bn_scale_shift(s1, q1, g1_p, be1_p, count)
    # --- BN1 + ReLU, fused with conv2's input layout prep (no HBM round trip) ---
    x2flat = _bn1_apply_call(y1, sc1, sh1, L=L, data_off=data_off, out_dtype=cdt)

    # --- conv2 (+ partial BN2 stats) ---
    y2, s2, q2 = _conv3x3_call(x2flat, w2_9, b2_p.reshape(1, Cp),
                               H=H, W=W, data_off=data_off, y_dtype=cdt)
    sc2, sh2 = _bn_scale_shift(s2, q2, g2_p, be2_p, count)
    # --- BN2 + residual + ReLU ---
    out2 = _bn2_apply_call(y2, sc2, sh2, residual, jnp.float32)

    out = out2.reshape(N, H, W, Cp)[:, :, :, :C]
    return jnp.transpose(out, (0, 3, 1, 2))                  # NHWC -> NCHW


# ----------------------------------------------------------------------------
# Pure-JAX reference (correctness check)
# ----------------------------------------------------------------------------
def _reference(x_nchw, params):
    w1, b1, g1, be1, w2, b2, g2, be2 = params

    def conv(x, w, b):                                    # w: (3,3,Cin,Cout)
        w_oihw = jnp.transpose(w, (3, 2, 0, 1))
        y = lax.conv_general_dilated(x, w_oihw, (1, 1), "SAME",
                                     dimension_numbers=("NCHW", "OIHW", "NCHW"))
        return y + b.reshape(1, -1, 1, 1)

    def bn(x, g, be):                                     # training-mode batch norm
        m = x.mean(axis=(0, 2, 3), keepdims=True)
        v = ((x - m) ** 2).mean(axis=(0, 2, 3), keepdims=True)
        return (x - m) * lax.rsqrt(v + EPS) * g.reshape(1, -1, 1, 1) + be.reshape(1, -1, 1, 1)

    out = jax.nn.relu(bn(conv(x_nchw, w1, b1), g1, be1))
    out = bn(conv(out, w2, b2), g2, be2)
    return jax.nn.relu(out + x_nchw)


# ----------------------------------------------------------------------------
# Main
# ----------------------------------------------------------------------------
if __name__ == "__main__":
    key = jax.random.PRNGKey(0)
    N, C, H, W = 2, 4, 16, 16                             # in_channels == out_channels
    keys = jax.random.split(key, 9)
    x = jax.random.normal(keys[0], (N, C, H, W), jnp.float32)

    w1 = jax.random.normal(keys[1], (3, 3, C, C), jnp.float32) * 0.1
    b1 = jax.random.normal(keys[2], (C,), jnp.float32) * 0.1
    g1 = 1.0 + 0.1 * jax.random.normal(keys[3], (C,), jnp.float32)
    be1 = 0.1 * jax.random.normal(keys[4], (C,), jnp.float32)
    w2 = jax.random.normal(keys[5], (3, 3, C, C), jnp.float32) * 0.1
    b2 = jax.random.normal(keys[6], (C,), jnp.float32) * 0.1
    g2 = 1.0 + 0.1 * jax.random.normal(keys[7], (C,), jnp.float32)
    be2 = 0.1 * jax.random.normal(keys[8], (C,), jnp.float32)
    params = (w1, b1, g1, be1, w2, b2, g2, be2)

    def _run(dtype):
        return jax.block_until_ready(
            residual_block_forward(x, params, compute_dtype=dtype))

    # f32 MXU-feed path: tight correctness check against the pure-JAX reference.
    try:
        out_f32 = _run(jnp.float32)
    except Exception:
        # Fallback if this JAX build rejects single-buffered pipeline_mode on a
        # pallas_call BlockSpec: default double buffering (perf-only delta).
        _SINGLE_BUF = None
        jax.clear_caches()
        out_f32 = _run(jnp.float32)
    # bf16 MXU-feed path (default / production): f32 accumulation + f32 BN
    # stats, so only input/weight rounding error remains -> loose tolerance.
    out_bf16 = _run(jnp.bfloat16)

    ref = jax.block_until_ready(_reference(x, params))
    assert out_f32.shape == (N, C, H, W) and out_bf16.shape == (N, C, H, W)
    assert jnp.all(jnp.isfinite(out_bf16))
    assert jnp.allclose(out_f32, ref, atol=5e-4, rtol=5e-4), \
        float(jnp.abs(out_f32 - ref).max())
    assert jnp.allclose(out_bf16, ref, atol=1e-1, rtol=1e-1), \
        float(jnp.abs(out_bf16 - ref).max())

    print("KERNEL_OK")
</pallas_src>

<mosaic_0001>
module attributes {stable_mosaic.version = 11 : i64} {
  func.func @_conv3x3_stats_kernel(%arg0: i32, %arg1: memref<1x320x128xf32, #tpu.memory_space<vmem>>, %arg2: memref<9x128x128xf32, #tpu.memory_space<vmem>>, %arg3: memref<1x128xf32, #tpu.memory_space<vmem>>, %arg4: memref<1x256x128xf32, #tpu.memory_space<vmem>>, %arg5: memref<1x1x128xf32, #tpu.memory_space<vmem>>, %arg6: memref<1x1x128xf32, #tpu.memory_space<vmem>>) attributes {dimension_semantics = [#tpu.dimension_semantics<parallel>], iteration_bounds = array<i64: 2>, scalar_prefetch = 0 : i64, scratch_operands = 0 : i64, tpu.core_type = #tpu.core_type<tc>, window_params = [{transform_indices = @transform_0, window_bounds = array<i64: 1, 320, 128>}, {pipeline_mode = #tpu.pipeline_mode<synchronous>, transform_indices = @transform_1, window_bounds = array<i64: 9, 128, 128>}, {pipeline_mode = #tpu.pipeline_mode<synchronous>, transform_indices = @transform_2, window_bounds = array<i64: 1, 128>}, {transform_indices = @transform_3, window_bounds = array<i64: 1, 256, 128>}, {transform_indices = @transform_4, window_bounds = array<i64: 1, 1, 128>}, {transform_indices = @transform_5, window_bounds = array<i64: 1, 1, 128>}]} {
    %0 = tpu.iota {dimensions = array<i32: 0>} : vector<256x128xi32>
    %c16_i32 = arith.constant 16 : i32
    %c0_i32 = arith.constant 0 : i32
    %1 = arith.cmpi eq, %c16_i32, %c0_i32 : i32
    %c1_i32 = arith.constant 1 : i32
    %2 = arith.select %1, %c1_i32, %c16_i32 : i32
    %3 = vector.broadcast %2 : i32 to vector<256x128xi32>
    %4 = arith.remsi %0, %3 : vector<256x128xi32>
    %c0_i32_0 = arith.constant 0 : i32
    %5 = vector.broadcast %c0_i32_0 : i32 to vector<256x128xi32>
    %6 = arith.cmpi ne, %4, %5 : vector<256x128xi32>
    %c0_i32_1 = arith.constant 0 : i32
    %7 = vector.broadcast %c0_i32_1 : i32 to vector<256x128xi32>
    %8 = arith.cmpi slt, %4, %7 : vector<256x128xi32>
    %c0_i32_2 = arith.constant 0 : i32
    %9 = arith.cmpi slt, %2, %c0_i32_2 : i32
    %10 = vector.broadcast %9 : i1 to vector<256x128xi1>
    %11 = vector.broadcast %10 : vector<256x128xi1> to vector<256x128xi1>
    %12 = arith.xori %8, %11 : vector<256x128xi1>
    %13 = arith.andi %12, %6 : vector<256x128xi1>
    %14 = vector.broadcast %2 : i32 to vector<256x128xi32>
    %15 = arith.addi %4, %14 : vector<256x128xi32>
    %16 = arith.select %13, %15, %4 : vector<256x128xi1>, vector<256x128xi32>
    %c0_i32_3 = arith.constant 0 : i32
    %17 = vector.broadcast %c0_i32_3 : i32 to vector<256x128xi32>
    %18 = arith.cmpi ne, %16, %17 : vector<256x128xi32>
    %c15_i32 = arith.constant 15 : i32
    %19 = vector.broadcast %c15_i32 : i32 to vector<256x128xi32>
    %20 = arith.cmpi ne, %16, %19 : vector<256x128xi32>
    %c0 = arith.constant 0 : index
    %c15 = arith.constant 15 : index
    %c0_4 = arith.constant 0 : index
    %21 = vector.load %arg1[%c0, %c15, %c0_4] : memref<1x320x128xf32, #tpu.memory_space<vmem>>, vector<1x256x128xf32>
    %22 = vector.shape_cast %21 : vector<1x256x128xf32> to vector<256x128xf32>
    %cst = arith.constant 0.000000e+00 : f32
    %23 = vector.broadcast %cst : f32 to vector<256x128xf32>
    %24 = arith.select %18, %22, %23 : vector<256x128xi1>, vector<256x128xf32>
    %c0_5 = arith.constant 0 : index
    %c0_6 = arith.constant 0 : index
    %c0_7 = arith.constant 0 : index
    %25 = vector.load %arg2[%c0_5, %c0_6, %c0_7] : memref<9x128x128xf32, #tpu.memory_space<vmem>>, vector<1x128x128xf32>
    %26 = vector.shape_cast %25 : vector<1x128x128xf32> to vector<128x128xf32>
    %cst_8 = arith.constant dense<0.000000e+00> : vector<256x128xf32>
    %27 = tpu.matmul %24, %26, %cst_8 {dimension_numbers = #tpu.dot_dimension_numbers<[1], [0], [0], [1], [0, 0, 1, 1], [], []>} : vector<256x128xf32>, vector<128x128xf32>, vector<256x128xf32> -> vector<256x128xf32>
    %c0_9 = arith.constant 0 : index
    %c16 = arith.constant 16 : index
    %c0_10 = arith.constant 0 : index
    %28 = vector.load %arg1[%c0_9, %c16, %c0_10] : memref<1x320x128xf32, #tpu.memory_space<vmem>>, vector<1x256x128xf32>
    %29 = vector.shape_cast %28 : vector<1x256x128xf32> to vector<256x128xf32>
    %c1 = arith.constant 1 : index
    %c0_11 = arith.constant 0 : index
    %c0_12 = arith.constant 0 : index
    %30 = vector.load %arg2[%c1, %c0_11, %c0_12] : memref<9x128x128xf32, #tpu.memory_space<vmem>>, vector<1x128x128xf32>
    %31 = vector.shape_cast %30 : vector<1x128x128xf32> to vector<128x128xf32>
    %cst_13 = arith.constant dense<0.000000e+00> : vector<256x128xf32>
    %32 = tpu.matmul %29, %31, %cst_13 {dimension_numbers = #tpu.dot_dimension_numbers<[1], [0], [0], [1], [0, 0, 1, 1], [], []>} : vector<256x128xf32>, vector<128x128xf32>, vector<256x128xf32> -> vector<256x128xf32>
    %33 = arith.addf %27, %32 : vector<256x128xf32>
    %c0_14 = arith.constant 0 : index
    %c17 = arith.constant 17 : index
    %c0_15 = arith.constant 0 : index
    %34 = vector.load %arg1[%c0_14, %c17, %c0_15] : memref<1x320x128xf32, #tpu.memory_space<vmem>>, vector<1x256x128xf32>
    %35 = vector.shape_cast %34 : vector<1x256x128xf32> to vector<256x128xf32>
    %cst_16 = arith.constant 0.000000e+00 : f32
    %36 = vector.broadcast %cst_16 : f32 to vector<256x128xf32>
    %37 = arith.select %20, %35, %36 : vector<256x128xi1>, vector<256x128xf32>
    %c2 = arith.constant 2 : index
    %c0_17 = arith.constant 0 : index
    %c0_18 = arith.constant 0 : index
    %38 = vector.load %arg2[%c2, %c0_17, %c0_18] : memref<9x128x128xf32, #tpu.memory_space<vmem>>, vector<1x128x128xf32>
    %39 = vector.shape_cast %38 : vector<1x128x128xf32> to vector<128x128xf32>
    %cst_19 = arith.constant dense<0.000000e+00> : vector<256x128xf32>
    %40 = tpu.matmul %37, %39, %cst_19 {dimension_numbers = #tpu.dot_dimension_numbers<[1], [0], [0], [1], [0, 0, 1, 1], [], []>} : vector<256x128xf32>, vector<128x128xf32>, vector<256x128xf32> -> vector<256x128xf32>
    %41 = arith.addf %33, %40 : vector<256x128xf32>
    %c0_20 = arith.constant 0 : index
    %c31 = arith.constant 31 : index
    %c0_21 = arith.constant 0 : index
    %42 = vector.load %arg1[%c0_20, %c31, %c0_21] : memref<1x320x128xf32, #tpu.memory_space<vmem>>, vector<1x256x128xf32>
    %43 = vector.shape_cast %42 : vector<1x256x128xf32> to vector<256x128xf32>
    %cst_22 = arith.constant 0.000000e+00 : f32
    %44 = vector.broadcast %cst_22 : f32 to vector<256x128xf32>
    %45 = arith.select %18, %43, %44 : vector<256x128xi1>, vector<256x128xf32>
    %c3 = arith.constant 3 : index
    %c0_23 = arith.constant 0 : index
    %c0_24 = arith.constant 0 : index
    %46 = vector.load %arg2[%c3, %c0_23, %c0_24] : memref<9x128x128xf32, #tpu.memory_space<vmem>>, vector<1x128x128xf32>
    %47 = vector.shape_cast %46 : vector<1x128x128xf32> to vector<128x128xf32>
    %cst_25 = arith.constant dense<0.000000e+00> : vector<256x128xf32>
    %48 = tpu.matmul %45, %47, %cst_25 {dimension_numbers = #tpu.dot_dimension_numbers<[1], [0], [0], [1], [0, 0, 1, 1], [], []>} : vector<256x128xf32>, vector<128x128xf32>, vector<256x128xf32> -> vector<256x128xf32>
    %49 = arith.addf %41, %48 : vector<256x128xf32>
    %c0_26 = arith.constant 0 : index
    %c32 = arith.constant 32 : index
    %c0_27 = arith.constant 0 : index
    %50 = vector.load %arg1[%c0_26, %c32, %c0_27] : memref<1x320x128xf32, #tpu.memory_space<vmem>>, vector<1x256x128xf32>
    %51 = vector.shape_cast %50 : vector<1x256x128xf32> to vector<256x128xf32>
    %c4 = arith.constant 4 : index
    %c0_28 = arith.constant 0 : index
    %c0_29 = arith.constant 0 : index
    %52 = vector.load %arg2[%c4, %c0_28, %c0_29] : memref<9x128x128xf32, #tpu.memory_space<vmem>>, vector<1x128x128xf32>
    %53 = vector.shape_cast %52 : vector<1x128x128xf32> to vector<128x128xf32>
    %cst_30 = arith.constant dense<0.000000e+00> : vector<256x128xf32>
    %54 = tpu.matmul %51, %53, %cst_30 {dimension_numbers = #tpu.dot_dimension_numbers<[1], [0], [0], [1], [0, 0, 1, 1], [], []>} : vector<256x128xf32>, vector<128x128xf32>, vector<256x128xf32> -> vector<256x128xf32>
    %55 = arith.addf %49, %54 : vector<256x128xf32>
    %c0_31 = arith.constant 0 : index
    %c33 = arith.constant 33 : index
    %c0_32 = arith.constant 0 : index
    %56 = vector.load %arg1[%c0_31, %c33, %c0_32] : memref<1x320x128xf32, #tpu.memory_space<vmem>>, vector<1x256x128xf32>
    %57 = vector.shape_cast %56 : vector<1x256x128xf32> to vector<256x128xf32>
    %cst_33 = arith.constant 0.000000e+00 : f32
    %58 = vector.broadcast %cst_33 : f32 to vector<256x128xf32>
    %59 = arith.select %20, %57, %58 : vector<256x128xi1>, vector<256x128xf32>
    %c5 = arith.constant 5 : index
    %c0_34 = arith.constant 0 : index
    %c0_35 = arith.constant 0 : index
    %60 = vector.load %arg2[%c5, %c0_34, %c0_35] : memref<9x128x128xf32, #tpu.memory_space<vmem>>, vector<1x128x128xf32>
    %61 = vector.shape_cast %60 : vector<1x128x128xf32> to vector<128x128xf32>
    %cst_36 = arith.constant dense<0.000000e+00> : vector<256x128xf32>
    %62 = tpu.matmul %59, %61, %cst_36 {dimension_numbers = #tpu.dot_dimension_numbers<[1], [0], [0], [1], [0, 0, 1, 1], [], []>} : vector<256x128xf32>, vector<128x128xf32>, vector<256x128xf32> -> vector<256x128xf32>
    %63 = arith.addf %55, %62 : vector<256x128xf32>
    %c0_37 = arith.constant 0 : index
    %c47 = arith.constant 47 : index
    %c0_38 = arith.constant 0 : index
    %64 = vector.load %arg1[%c0_37, %c47, %c0_38] : memref<1x320x128xf32, #tpu.memory_space<vmem>>, vector<1x256x128xf32>
    %65 = vector.shape_cast %64 : vector<1x256x128xf32> to vector<256x128xf32>
    %cst_39 = arith.constant 0.000000e+00 : f32
    %66 = vector.broadcast %cst_39 : f32 to vector<256x128xf32>
    %67 = arith.select %18, %65, %66 : vector<256x128xi1>, vector<256x128xf32>
    %c6 = arith.constant 6 : index
    %c0_40 = arith.constant 0 : index
    %c0_41 = arith.constant 0 : index
    %68 = vector.load %arg2[%c6, %c0_40, %c0_41] : memref<9x128x128xf32, #tpu.memory_space<vmem>>, vector<1x128x128xf32>
    %69 = vector.shape_cast %68 : vector<1x128x128xf32> to vector<128x128xf32>
    %cst_42 = arith.constant dense<0.000000e+00> : vector<256x128xf32>
    %70 = tpu.matmul %67, %69, %cst_42 {dimension_numbers = #tpu.dot_dimension_numbers<[1], [0], [0], [1], [0, 0, 1, 1], [], []>} : vector<256x128xf32>, vector<128x128xf32>, vector<256x128xf32> -> vector<256x128xf32>
    %71 = arith.addf %63, %70 : vector<256x128xf32>
    %c0_43 = arith.constant 0 : index
    %c48 = arith.constant 48 : index
    %c0_44 = arith.constant 0 : index
    %72 = vector.load %arg1[%c0_43, %c48, %c0_44] : memref<1x320x128xf32, #tpu.memory_space<vmem>>, vector<1x256x128xf32>
    %73 = vector.shape_cast %72 : vector<1x256x128xf32> to vector<256x128xf32>
    %c7 = arith.constant 7 : index
    %c0_45 = arith.constant 0 : index
    %c0_46 = arith.constant 0 : index
    %74 = vector.load %arg2[%c7, %c0_45, %c0_46] : memref<9x128x128xf32, #tpu.memory_space<vmem>>, vector<1x128x128xf32>
    %75 = vector.shape_cast %74 : vector<1x128x128xf32> to vector<128x128xf32>
    %cst_47 = arith.constant dense<0.000000e+00> : vector<256x128xf32>
    %76 = tpu.matmul %73, %75, %cst_47 {dimension_numbers = #tpu.dot_dimension_numbers<[1], [0], [0], [1], [0, 0, 1, 1], [], []>} : vector<256x128xf32>, vector<128x128xf32>, vector<256x128xf32> -> vector<256x128xf32>
    %77 = arith.addf %71, %76 : vector<256x128xf32>
    %c0_48 = arith.constant 0 : index
    %c49 = arith.constant 49 : index
    %c0_49 = arith.constant 0 : index
    %78 = vector.load %arg1[%c0_48, %c49, %c0_49] : memref<1x320x128xf32, #tpu.memory_space<vmem>>, vector<1x256x128xf32>
    %79 = vector.shape_cast %78 : vector<1x256x128xf32> to vector<256x128xf32>
    %cst_50 = arith.constant 0.000000e+00 : f32
    %80 = vector.broadcast %cst_50 : f32 to vector<256x128xf32>
    %81 = arith.select %20, %79, %80 : vector<256x128xi1>, vector<256x128xf32>
    %c8 = arith.constant 8 : index
    %c0_51 = arith.constant 0 : index
    %c0_52 = arith.constant 0 : index
    %82 = vector.load %arg2[%c8, %c0_51, %c0_52] : memref<9x128x128xf32, #tpu.memory_space<vmem>>, vector<1x128x128xf32>
    %83 = vector.shape_cast %82 : vector<1x128x128xf32> to vector<128x128xf32>
    %cst_53 = arith.constant dense<0.000000e+00> : vector<256x128xf32>
    %84 = tpu.matmul %81, %83, %cst_53 {dimension_numbers = #tpu.dot_dimension_numbers<[1], [0], [0], [1], [0, 0, 1, 1], [], []>} : vector<256x128xf32>, vector<128x128xf32>, vector<256x128xf32> -> vector<256x128xf32>
    %85 = arith.addf %77, %84 : vector<256x128xf32>
    %c0_54 = arith.constant 0 : index
    %c0_55 = arith.constant 0 : index
    %86 = vector.load %arg3[%c0_54, %c0_55] : memref<1x128xf32, #tpu.memory_space<vmem>>, vector<1x128xf32>
    %87 = vector.broadcast %86 : vector<1x128xf32> to vector<256x128xf32>
    %88 = arith.addf %85, %87 : vector<256x128xf32>
    %cst_56 = arith.constant dense<0.000000e+00> : vector<128xf32>
    %89 = vector.multi_reduction <add>, %88, %cst_56 [0] : vector<256x128xf32> to vector<128xf32>
    %90 = vector.shape_cast %89 : vector<128xf32> to vector<1x128xf32>
    %c0_57 = arith.constant 0 : index
    %c0_58 = arith.constant 0 : index
    %c0_59 = arith.constant 0 : index
    %91 = vector.load %arg5[%c0_57, %c0_58, %c0_59] : memref<1x1x128xf32, #tpu.memory_space<vmem>>, vector<1x1x128xf32>
    %92 = vector.shape_cast %91 : vector<1x1x128xf32> to vector<1x128xf32>
    %93 = vector.shape_cast %90 : vector<1x128xf32> to vector<1x1x128xf32>
    tpu.vector_store %arg5[%c0_57, %c0_58, %c0_59], %93 {strides = array<i32>} : memref<1x1x128xf32, #tpu.memory_space<vmem>>, vector<1x1x128xf32>,
    %94 = arith.mulf %88, %88 : vector<256x128xf32>
    %cst_60 = arith.constant dense<0.000000e+00> : vector<128xf32>
    %95 = vector.multi_reduction <add>, %94, %cst_60 [0] : vector<256x128xf32> to vector<128xf32>
    %96 = vector.shape_cast %95 : vector<128xf32> to vector<1x128xf32>
    %c0_61 = arith.constant 0 : index
    %c0_62 = arith.constant 0 : index
    %c0_63 = arith.constant 0 : index
    %97 = vector.load %arg6[%c0_61, %c0_62, %c0_63] : memref<1x1x128xf32, #tpu.memory_space<vmem>>, vector<1x1x128xf32>
    %98 = vector.shape_cast %97 : vector<1x1x128xf32> to vector<1x128xf32>
    %99 = vector.shape_cast %96 : vector<1x128xf32> to vector<1x1x128xf32>
    tpu.vector_store %arg6[%c0_61, %c0_62, %c0_63], %99 {strides = array<i32>} : memref<1x1x128xf32, #tpu.memory_space<vmem>>, vector<1x1x128xf32>,
    %c0_64 = arith.constant 0 : index
    %c0_65 = arith.constant 0 : index
    %c0_66 = arith.constant 0 : index
    %100 = vector.load %arg4[%c0_64, %c0_65, %c0_66] : memref<1x256x128xf32, #tpu.memory_space<vmem>>, vector<1x256x128xf32>
    %101 = vector.shape_cast %100 : vector<1x256x128xf32> to vector<256x128xf32>
    %102 = vector.shape_cast %88 : vector<256x128xf32> to vector<1x256x128xf32>
    tpu.vector_store %arg4[%c0_64, %c0_65, %c0_66], %102 {strides = array<i32>} : memref<1x256x128xf32, #tpu.memory_space<vmem>>, vector<1x256x128xf32>,
    return
  }
  func.func @transform_0(%arg0: i32) -> (i32, i32, i32) {
    %c0_i32 = arith.constant 0 : i32
    %c0_i32_0 = arith.constant 0 : i32
    %c0_i32_1 = arith.constant 0 : i32
    return %arg0, %c0_i32, %c0_i32_0 : i32, i32, i32
  }
  func.func @transform_1(%arg0: i32) -> (i32, i32, i32) {
    %c0_i32 = arith.constant 0 : i32
    %c0_i32_0 = arith.constant 0 : i32
    %c0_i32_1 = arith.constant 0 : i32
    %c0_i32_2 = arith.constant 0 : i32
    return %c0_i32, %c0_i32_0, %c0_i32_1 : i32, i32, i32
  }
  func.func @transform_2(%arg0: i32) -> (i32, i32) {
    %c0_i32 = arith.constant 0 : i32
    %c0_i32_0 = arith.constant 0 : i32
    %c0_i32_1 = arith.constant 0 : i32
    return %c0_i32, %c0_i32_0 : i32, i32
  }
  func.func @transform_3(%arg0: i32) -> (i32, i32, i32) {
    %c0_i32 = arith.constant 0 : i32
    %c0_i32_0 = arith.constant 0 : i32
    %c0_i32_1 = arith.constant 0 : i32
    return %arg0, %c0_i32, %c0_i32_0 : i32, i32, i32
  }
  func.func @transform_4(%arg0: i32) -> (i32, i32, i32) {
    %c0_i32 = arith.constant 0 : i32
    %c0_i32_0 = arith.constant 0 : i32
    %c0_i32_1 = arith.constant 0 : i32
    return %arg0, %c0_i32, %c0_i32_0 : i32, i32, i32
  }
  func.func @transform_5(%arg0: i32) -> (i32, i32, i32) {
    %c0_i32 = arith.constant 0 : i32
    %c0_i32_0 = arith.constant 0 : i32
    %c0_i32_1 = arith.constant 0 : i32
    return %arg0, %c0_i32, %c0_i32_0 : i32, i32, i32
  }
}

module attributes {stable_mosaic.version = 11 : i64} {
  func.func @_bn1_relu_to_flat_kernel(%arg0: i32, %arg1: memref<1x256x128xf32, #tpu.memory_space<vmem>>, %arg2: memref<1x128xf32, #tpu.memory_space<vmem>>, %arg3: memref<1x128xf32, #tpu.memory_space<vmem>>, %arg4: memref<1x320x128xf32, #tpu.memory_space<vmem>>) attributes {dimension_semantics = [#tpu.dimension_semantics<parallel>], iteration_bounds = array<i64: 2>, scalar_prefetch = 0 : i64, scratch_operands = 0 : i64, tpu.core_type = #tpu.core_type<tc>, window_params = [{transform_indices = @transform_0, window_bounds = array<i64: 1, 256, 128>}, {pipeline_mode = #tpu.pipeline_mode<synchronous>, transform_indices = @transform_1, window_bounds = array<i64: 1, 128>}, {pipeline_mode = #tpu.pipeline_mode<synchronous>, transform_indices = @transform_2, window_bounds = array<i64: 1, 128>}, {transform_indices = @transform_3, window_bounds = array<i64: 1, 320, 128>}]} {
    %c0 = arith.constant 0 : index
    %c0_0 = arith.constant 0 : index
    %c0_1 = arith.constant 0 : index
    %0 = vector.load %arg1[%c0, %c0_0, %c0_1] : memref<1x256x128xf32, #tpu.memory_space<vmem>>, vector<1x256x128xf32>
    %1 = vector.shape_cast %0 : vector<1x256x128xf32> to vector<256x128xf32>
    %c0_2 = arith.constant 0 : index
    %c0_3 = arith.constant 0 : index
    %2 = vector.load %arg2[%c0_2, %c0_3] : memref<1x128xf32, #tpu.memory_space<vmem>>, vector<1x128xf32>
    %3 = vector.broadcast %2 : vector<1x128xf32> to vector<256x128xf32>
    %4 = arith.mulf %1, %3 : vector<256x128xf32>
    %c0_4 = arith.constant 0 : index
    %c0_5 = arith.constant 0 : index
    %5 = vector.load %arg3[%c0_4, %c0_5] : memref<1x128xf32, #tpu.memory_space<vmem>>, vector<1x128xf32>
    %6 = vector.broadcast %5 : vector<1x128xf32> to vector<256x128xf32>
    %7 = arith.addf %4, %6 : vector<256x128xf32>
    %cst = arith.constant 0.000000e+00 : f32
    %8 = vector.broadcast %cst : f32 to vector<256x128xf32>
    %9 = arith.maximumf %7, %8 : vector<256x128xf32>
    %cst_6 = arith.constant 0.000000e+00 : f32
    %10 = vector.broadcast %cst_6 : f32 to vector<32x128xf32>
    %c0_7 = arith.constant 0 : index
    %c0_8 = arith.constant 0 : index
    %c0_9 = arith.constant 0 : index
    %11 = vector.load %arg4[%c0_7, %c0_8, %c0_9] : memref<1x320x128xf32, #tpu.memory_space<vmem>>, vector<1x32x128xf32>
    %12 = vector.shape_cast %11 : vector<1x32x128xf32> to vector<32x128xf32>
    %13 = vector.shape_cast %10 : vector<32x128xf32> to vector<1x32x128xf32>
    tpu.vector_store %arg4[%c0_7, %c0_8, %c0_9], %13 {strides = array<i32>} : memref<1x320x128xf32, #tpu.memory_space<vmem>>, vector<1x32x128xf32>,
    %cst_10 = arith.constant 0.000000e+00 : f32
    %14 = vector.broadcast %cst_10 : f32 to vector<32x128xf32>
    %c0_11 = arith.constant 0 : index
    %c288 = arith.constant 288 : index
    %c0_12 = arith.constant 0 : index
    %15 = vector.load %arg4[%c0_11, %c288, %c0_12] : memref<1x320x128xf32, #tpu.memory_space<vmem>>, vector<1x32x128xf32>
    %16 = vector.shape_cast %15 : vector<1x32x128xf32> to vector<32x128xf32>
    %17 = vector.shape_cast %14 : vector<32x128xf32> to vector<1x32x128xf32>
    tpu.vector_store %arg4[%c0_11, %c288, %c0_12], %17 {strides = array<i32>} : memref<1x320x128xf32, #tpu.memory_space<vmem>>, vector<1x32x128xf32>,
    %c0_13 = arith.constant 0 : index
    %c32 = arith.constant 32 : index
    %c0_14 = arith.constant 0 : index
    %18 = vector.load %arg4[%c0_13, %c32, %c0_14] : memref<1x320x128xf32, #tpu.memory_space<vmem>>, vector<1x256x128xf32>
    %19 = vector.shape_cast %18 : vector<1x256x128xf32> to vector<256x128xf32>
    %20 = vector.shape_cast %9 : vector<256x128xf32> to vector<1x256x128xf32>
    tpu.vector_store %arg4[%c0_13, %c32, %c0_14], %20 {strides = array<i32>} : memref<1x320x128xf32, #tpu.memory_space<vmem>>, vector<1x256x128xf32>,
    return
  }
  func.func @transform_0(%arg0: i32) -> (i32, i32, i32) {
    %c0_i32 = arith.constant 0 : i32
    %c0_i32_0 = arith.constant 0 : i32
    %c0_i32_1 = arith.constant 0 : i32
    return %arg0, %c0_i32, %c0_i32_0 : i32, i32, i32
  }
  func.func @transform_1(%arg0: i32) -> (i32, i32) {
    %c0_i32 = arith.constant 0 : i32
    %c0_i32_0 = arith.constant 0 : i32
    %c0_i32_1 = arith.constant 0 : i32
    return %c0_i32, %c0_i32_0 : i32, i32
  }
  func.func @transform_2(%arg0: i32) -> (i32, i32) {
    %c0_i32 = arith.constant 0 : i32
    %c0_i32_0 = arith.constant 0 : i32
    %c0_i32_1 = arith.constant 0 : i32
    return %c0_i32, %c0_i32_0 : i32, i32
  }
  func.func @transform_3(%arg0: i32) -> (i32, i32, i32) {
    %c0_i32 = arith.constant 0 : i32
    %c0_i32_0 = arith.constant 0 : i32
    %c0_i32_1 = arith.constant 0 : i32
    return %arg0, %c0_i32, %c0_i32_0 : i32, i32, i32
  }
}

module attributes {stable_mosaic.version = 11 : i64} {
  func.func @_bn2_add_relu_kernel(%arg0: i32, %arg1: memref<1x256x128xf32, #tpu.memory_space<vmem>>, %arg2: memref<1x128xf32, #tpu.memory_space<vmem>>, %arg3: memref<1x128xf32, #tpu.memory_space<vmem>>, %arg4: memref<1x256x128xf32, #tpu.memory_space<vmem>>, %arg5: memref<1x256x128xf32, #tpu.memory_space<vmem>>) attributes {dimension_semantics = [#tpu.dimension_semantics<parallel>], iteration_bounds = array<i64: 2>, scalar_prefetch = 0 : i64, scratch_operands = 0 : i64, tpu.core_type = #tpu.core_type<tc>, window_params = [{transform_indices = @transform_0, window_bounds = array<i64: 1, 256, 128>}, {pipeline_mode = #tpu.pipeline_mode<synchronous>, transform_indices = @transform_1, window_bounds = array<i64: 1, 128>}, {pipeline_mode = #tpu.pipeline_mode<synchronous>, transform_indices = @transform_2, window_bounds = array<i64: 1, 128>}, {transform_indices = @transform_3, window_bounds = array<i64: 1, 256, 128>}, {transform_indices = @transform_4, window_bounds = array<i64: 1, 256, 128>}]} {
    %c0 = arith.constant 0 : index
    %c0_0 = arith.constant 0 : index
    %c0_1 = arith.constant 0 : index
    %0 = vector.load %arg1[%c0, %c0_0, %c0_1] : memref<1x256x128xf32, #tpu.memory_space<vmem>>, vector<1x256x128xf32>
    %1 = vector.shape_cast %0 : vector<1x256x128xf32> to vector<256x128xf32>
    %c0_2 = arith.constant 0 : index
    %c0_3 = arith.constant 0 : index
    %c0_4 = arith.constant 0 : index
    %2 = vector.load %arg4[%c0_2, %c0_3, %c0_4] : memref<1x256x128xf32, #tpu.memory_space<vmem>>, vector<1x256x128xf32>
    %3 = vector.shape_cast %2 : vector<1x256x128xf32> to vector<256x128xf32>
    %c0_5 = arith.constant 0 : index
    %c0_6 = arith.constant 0 : index
    %4 = vector.load %arg2[%c0_5, %c0_6] : memref<1x128xf32, #tpu.memory_space<vmem>>, vector<1x128xf32>
    %5 = vector.broadcast %4 : vector<1x128xf32> to vector<256x128xf32>
    %6 = arith.mulf %1, %5 : vector<256x128xf32>
    %c0_7 = arith.constant 0 : index
    %c0_8 = arith.constant 0 : index
    %7 = vector.load %arg3[%c0_7, %c0_8] : memref<1x128xf32, #tpu.memory_space<vmem>>, vector<1x128xf32>
    %8 = vector.broadcast %7 : vector<1x128xf32> to vector<256x128xf32>
    %9 = arith.addf %6, %8 : vector<256x128xf32>
    %10 = arith.addf %9, %3 : vector<256x128xf32>
    %cst = arith.constant 0.000000e+00 : f32
    %11 = vector.broadcast %cst : f32 to vector<256x128xf32>
    %12 = arith.maximumf %10, %11 : vector<256x128xf32>
    %c0_9 = arith.constant 0 : index
    %c0_10 = arith.constant 0 : index
    %c0_11 = arith.constant 0 : index
    %13 = vector.load %arg5[%c0_9, %c0_10, %c0_11] : memref<1x256x128xf32, #tpu.memory_space<vmem>>, vector<1x256x128xf32>
    %14 = vector.shape_cast %13 : vector<1x256x128xf32> to vector<256x128xf32>
    %15 = vector.shape_cast %12 : vector<256x128xf32> to vector<1x256x128xf32>
    tpu.vector_store %arg5[%c0_9, %c0_10, %c0_11], %15 {strides = array<i32>} : memref<1x256x128xf32, #tpu.memory_space<vmem>>, vector<1x256x128xf32>,
    return
  }
  func.func @transform_0(%arg0: i32) -> (i32, i32, i32) {
    %c0_i32 = arith.constant 0 : i32
    %c0_i32_0 = arith.constant 0 : i32
    %c0_i32_1 = arith.constant 0 : i32
    return %arg0, %c0_i32, %c0_i32_0 : i32, i32, i32
  }
  func.func @transform_1(%arg0: i32) -> (i32, i32) {
    %c0_i32 = arith.constant 0 : i32
    %c0_i32_0 = arith.constant 0 : i32
    %c0_i32_1 = arith.constant 0 : i32
    return %c0_i32, %c0_i32_0 : i32, i32
  }
  func.func @transform_2(%arg0: i32) -> (i32, i32) {
    %c0_i32 = arith.constant 0 : i32
    %c0_i32_0 = arith.constant 0 : i32
    %c0_i32_1 = arith.constant 0 : i32
    return %c0_i32, %c0_i32_0 : i32, i32
  }
  func.func @transform_3(%arg0: i32) -> (i32, i32, i32) {
    %c0_i32 = arith.constant 0 : i32
    %c0_i32_0 = arith.constant 0 : i32
    %c0_i32_1 = arith.constant 0 : i32
    return %arg0, %c0_i32, %c0_i32_0 : i32, i32, i32
  }
  func.func @transform_4(%arg0: i32) -> (i32, i32, i32) {
    %c0_i32 = arith.constant 0 : i32
    %c0_i32_0 = arith.constant 0 : i32
    %c0_i32_1 = arith.constant 0 : i32
    return %arg0, %c0_i32, %c0_i32_0 : i32, i32, i32
  }
}

module attributes {stable_mosaic.version = 11 : i64} {
  func.func @_conv3x3_stats_kernel(%arg0: i32, %arg1: memref<1x320x128xf32, #tpu.memory_space<vmem>>, %arg2: memref<9x128x128xf32, #tpu.memory_space<vmem>>, %arg3: memref<1x128xf32, #tpu.memory_space<vmem>>, %arg4: memref<1x256x128xf32, #tpu.memory_space<vmem>>, %arg5: memref<1x1x128xf32, #tpu.memory_space<vmem>>, %arg6: memref<1x1x128xf32, #tpu.memory_space<vmem>>) attributes {dimension_semantics = [#tpu.dimension_semantics<parallel>], iteration_bounds = array<i64: 2>, scalar_prefetch = 0 : i64, scratch_operands = 0 : i64, tpu.core_type = #tpu.core_type<tc>, window_params = [{transform_indices = @transform_0, window_bounds = array<i64: 1, 320, 128>}, {pipeline_mode = #tpu.pipeline_mode<synchronous>, transform_indices = @transform_1, window_bounds = array<i64: 9, 128, 128>}, {pipeline_mode = #tpu.pipeline_mode<synchronous>, transform_indices = @transform_2, window_bounds = array<i64: 1, 128>}, {transform_indices = @transform_3, window_bounds = array<i64: 1, 256, 128>}, {transform_indices = @transform_4, window_bounds = array<i64: 1, 1, 128>}, {transform_indices = @transform_5, window_bounds = array<i64: 1, 1, 128>}]} {
    %0 = tpu.iota {dimensions = array<i32: 0>} : vector<256x128xi32>
    %c16_i32 = arith.constant 16 : i32
    %c0_i32 = arith.constant 0 : i32
    %1 = arith.cmpi eq, %c16_i32, %c0_i32 : i32
    %c1_i32 = arith.constant 1 : i32
    %2 = arith.select %1, %c1_i32, %c16_i32 : i32
    %3 = vector.broadcast %2 : i32 to vector<256x128xi32>
    %4 = arith.remsi %0, %3 : vector<256x128xi32>
    %c0_i32_0 = arith.constant 0 : i32
    %5 = vector.broadcast %c0_i32_0 : i32 to vector<256x128xi32>
    %6 = arith.cmpi ne, %4, %5 : vector<256x128xi32>
    %c0_i32_1 = arith.constant 0 : i32
    %7 = vector.broadcast %c0_i32_1 : i32 to vector<256x128xi32>
    %8 = arith.cmpi slt, %4, %7 : vector<256x128xi32>
    %c0_i32_2 = arith.constant 0 : i32
    %9 = arith.cmpi slt, %2, %c0_i32_2 : i32
    %10 = vector.broadcast %9 : i1 to vector<256x128xi1>
    %11 = vector.broadcast %10 : vector<256x128xi1> to vector<256x128xi1>
    %12 = arith.xori %8, %11 : vector<256x128xi1>
    %13 = arith.andi %12, %6 : vector<256x128xi1>
    %14 = vector.broadcast %2 : i32 to vector<256x128xi32>
    %15 = arith.addi %4, %14 : vector<256x128xi32>
    %16 = arith.select %13, %15, %4 : vector<256x128xi1>, vector<256x128xi32>
    %c0_i32_3 = arith.constant 0 : i32
    %17 = vector.broadcast %c0_i32_3 : i32 to vector<256x128xi32>
    %18 = arith.cmpi ne, %16, %17 : vector<256x128xi32>
    %c15_i32 = arith.constant 15 : i32
    %19 = vector.broadcast %c15_i32 : i32 to vector<256x128xi32>
    %20 = arith.cmpi ne, %16, %19 : vector<256x128xi32>
    %c0 = arith.constant 0 : index
    %c15 = arith.constant 15 : index
    %c0_4 = arith.constant 0 : index
    %21 = vector.load %arg1[%c0, %c15, %c0_4] : memref<1x320x128xf32, #tpu.memory_space<vmem>>, vector<1x256x128xf32>
    %22 = vector.shape_cast %21 : vector<1x256x128xf32> to vector<256x128xf32>
    %cst = arith.constant 0.000000e+00 : f32
    %23 = vector.broadcast %cst : f32 to vector<256x128xf32>
    %24 = arith.select %18, %22, %23 : vector<256x128xi1>, vector<256x128xf32>
    %c0_5 = arith.constant 0 : index
    %c0_6 = arith.constant 0 : index
    %c0_7 = arith.constant 0 : index
    %25 = vector.load %arg2[%c0_5, %c0_6, %c0_7] : memref<9x128x128xf32, #tpu.memory_space<vmem>>, vector<1x128x128xf32>
    %26 = vector.shape_cast %25 : vector<1x128x128xf32> to vector<128x128xf32>
    %cst_8 = arith.constant dense<0.000000e+00> : vector<256x128xf32>
    %27 = tpu.matmul %24, %26, %cst_8 {dimension_numbers = #tpu.dot_dimension_numbers<[1], [0], [0], [1], [0, 0, 1, 1], [], []>} : vector<256x128xf32>, vector<128x128xf32>, vector<256x128xf32> -> vector<256x128xf32>
    %c0_9 = arith.constant 0 : index
    %c16 = arith.constant 16 : index
    %c0_10 = arith.constant 0 : index
    %28 = vector.load %arg1[%c0_9, %c16, %c0_10] : memref<1x320x128xf32, #tpu.memory_space<vmem>>, vector<1x256x128xf32>
    %29 = vector.shape_cast %28 : vector<1x256x128xf32> to vector<256x128xf32>
    %c1 = arith.constant 1 : index
    %c0_11 = arith.constant 0 : index
    %c0_12 = arith.constant 0 : index
    %30 = vector.load %arg2[%c1, %c0_11, %c0_12] : memref<9x128x128xf32, #tpu.memory_space<vmem>>, vector<1x128x128xf32>
    %31 = vector.shape_cast %30 : vector<1x128x128xf32> to vector<128x128xf32>
    %cst_13 = arith.constant dense<0.000000e+00> : vector<256x128xf32>
    %32 = tpu.matmul %29, %31, %cst_13 {dimension_numbers = #tpu.dot_dimension_numbers<[1], [0], [0], [1], [0, 0, 1, 1], [], []>} : vector<256x128xf32>, vector<128x128xf32>, vector<256x128xf32> -> vector<256x128xf32>
    %33 = arith.addf %27, %32 : vector<256x128xf32>
    %c0_14 = arith.constant 0 : index
    %c17 = arith.constant 17 : index
    %c0_15 = arith.constant 0 : index
    %34 = vector.load %arg1[%c0_14, %c17, %c0_15] : memref<1x320x128xf32, #tpu.memory_space<vmem>>, vector<1x256x128xf32>
    %35 = vector.shape_cast %34 : vector<1x256x128xf32> to vector<256x128xf32>
    %cst_16 = arith.constant 0.000000e+00 : f32
    %36 = vector.broadcast %cst_16 : f32 to vector<256x128xf32>
    %37 = arith.select %20, %35, %36 : vector<256x128xi1>, vector<256x128xf32>
    %c2 = arith.constant 2 : index
    %c0_17 = arith.constant 0 : index
    %c0_18 = arith.constant 0 : index
    %38 = vector.load %arg2[%c2, %c0_17, %c0_18] : memref<9x128x128xf32, #tpu.memory_space<vmem>>, vector<1x128x128xf32>
    %39 = vector.shape_cast %38 : vector<1x128x128xf32> to vector<128x128xf32>
    %cst_19 = arith.constant dense<0.000000e+00> : vector<256x128xf32>
    %40 = tpu.matmul %37, %39, %cst_19 {dimension_numbers = #tpu.dot_dimension_numbers<[1], [0], [0], [1], [0, 0, 1, 1], [], []>} : vector<256x128xf32>, vector<128x128xf32>, vector<256x128xf32> -> vector<256x128xf32>
    %41 = arith.addf %33, %40 : vector<256x128xf32>
    %c0_20 = arith.constant 0 : index
    %c31 = arith.constant 31 : index
    %c0_21 = arith.constant 0 : index
    %42 = vector.load %arg1[%c0_20, %c31, %c0_21] : memref<1x320x128xf32, #tpu.memory_space<vmem>>, vector<1x256x128xf32>
    %43 = vector.shape_cast %42 : vector<1x256x128xf32> to vector<256x128xf32>
    %cst_22 = arith.constant 0.000000e+00 : f32
    %44 = vector.broadcast %cst_22 : f32 to vector<256x128xf32>
    %45 = arith.select %18, %43, %44 : vector<256x128xi1>, vector<256x128xf32>
    %c3 = arith.constant 3 : index
    %c0_23 = arith.constant 0 : index
    %c0_24 = arith.constant 0 : index
    %46 = vector.load %arg2[%c3, %c0_23, %c0_24] : memref<9x128x128xf32, #tpu.memory_space<vmem>>, vector<1x128x128xf32>
    %47 = vector.shape_cast %46 : vector<1x128x128xf32> to vector<128x128xf32>
    %cst_25 = arith.constant dense<0.000000e+00> : vector<256x128xf32>
    %48 = tpu.matmul %45, %47, %cst_25 {dimension_numbers = #tpu.dot_dimension_numbers<[1], [0], [0], [1], [0, 0, 1, 1], [], []>} : vector<256x128xf32>, vector<128x128xf32>, vector<256x128xf32> -> vector<256x128xf32>
    %49 = arith.addf %41, %48 : vector<256x128xf32>
    %c0_26 = arith.constant 0 : index
    %c32 = arith.constant 32 : index
    %c0_27 = arith.constant 0 : index
    %50 = vector.load %arg1[%c0_26, %c32, %c0_27] : memref<1x320x128xf32, #tpu.memory_space<vmem>>, vector<1x256x128xf32>
    %51 = vector.shape_cast %50 : vector<1x256x128xf32> to vector<256x128xf32>
    %c4 = arith.constant 4 : index
    %c0_28 = arith.constant 0 : index
    %c0_29 = arith.constant 0 : index
    %52 = vector.load %arg2[%c4, %c0_28, %c0_29] : memref<9x128x128xf32, #tpu.memory_space<vmem>>, vector<1x128x128xf32>
    %53 = vector.shape_cast %52 : vector<1x128x128xf32> to vector<128x128xf32>
    %cst_30 = arith.constant dense<0.000000e+00> : vector<256x128xf32>
    %54 = tpu.matmul %51, %53, %cst_30 {dimension_numbers = #tpu.dot_dimension_numbers<[1], [0], [0], [1], [0, 0, 1, 1], [], []>} : vector<256x128xf32>, vector<128x128xf32>, vector<256x128xf32> -> vector<256x128xf32>
    %55 = arith.addf %49, %54 : vector<256x128xf32>
    %c0_31 = arith.constant 0 : index
    %c33 = arith.constant 33 : index
    %c0_32 = arith.constant 0 : index
    %56 = vector.load %arg1[%c0_31, %c33, %c0_32] : memref<1x320x128xf32, #tpu.memory_space<vmem>>, vector<1x256x128xf32>
    %57 = vector.shape_cast %56 : vector<1x256x128xf32> to vector<256x128xf32>
    %cst_33 = arith.constant 0.000000e+00 : f32
    %58 = vector.broadcast %cst_33 : f32 to vector<256x128xf32>
    %59 = arith.select %20, %57, %58 : vector<256x128xi1>, vector<256x128xf32>
    %c5 = arith.constant 5 : index
    %c0_34 = arith.constant 0 : index
    %c0_35 = arith.constant 0 : index
    %60 = vector.load %arg2[%c5, %c0_34, %c0_35] : memref<9x128x128xf32, #tpu.memory_space<vmem>>, vector<1x128x128xf32>
    %61 = vector.shape_cast %60 : vector<1x128x128xf32> to vector<128x128xf32>
    %cst_36 = arith.constant dense<0.000000e+00> : vector<256x128xf32>
    %62 = tpu.matmul %59, %61, %cst_36 {dimension_numbers = #tpu.dot_dimension_numbers<[1], [0], [0], [1], [0, 0, 1, 1], [], []>} : vector<256x128xf32>, vector<128x128xf32>, vector<256x128xf32> -> vector<256x128xf32>
    %63 = arith.addf %55, %62 : vector<256x128xf32>
    %c0_37 = arith.constant 0 : index
    %c47 = arith.constant 47 : index
    %c0_38 = arith.constant 0 : index
    %64 = vector.load %arg1[%c0_37, %c47, %c0_38] : memref<1x320x128xf32, #tpu.memory_space<vmem>>, vector<1x256x128xf32>
    %65 = vector.shape_cast %64 : vector<1x256x128xf32> to vector<256x128xf32>
    %cst_39 = arith.constant 0.000000e+00 : f32
    %66 = vector.broadcast %cst_39 : f32 to vector<256x128xf32>
    %67 = arith.select %18, %65, %66 : vector<256x128xi1>, vector<256x128xf32>
    %c6 = arith.constant 6 : index
    %c0_40 = arith.constant 0 : index
    %c0_41 = arith.constant 0 : index
    %68 = vector.load %arg2[%c6, %c0_40, %c0_41] : memref<9x128x128xf32, #tpu.memory_space<vmem>>, vector<1x128x128xf32>
    %69 = vector.shape_cast %68 : vector<1x128x128xf32> to vector<128x128xf32>
    %cst_42 = arith.constant dense<0.000000e+00> : vector<256x128xf32>
    %70 = tpu.matmul %67, %69, %cst_42 {dimension_numbers = #tpu.dot_dimension_numbers<[1], [0], [0], [1], [0, 0, 1, 1], [], []>} : vector<256x128xf32>, vector<128x128xf32>, vector<256x128xf32> -> vector<256x128xf32>
    %71 = arith.addf %63, %70 : vector<256x128xf32>
    %c0_43 = arith.constant 0 : index
    %c48 = arith.constant 48 : index
    %c0_44 = arith.constant 0 : index
    %72 = vector.load %arg1[%c0_43, %c48, %c0_44] : memref<1x320x128xf32, #tpu.memory_space<vmem>>, vector<1x256x128xf32>
    %73 = vector.shape_cast %72 : vector<1x256x128xf32> to vector<256x128xf32>
    %c7 = arith.constant 7 : index
    %c0_45 = arith.constant 0 : index
    %c0_46 = arith.constant 0 : index
    %74 = vector.load %arg2[%c7, %c0_45, %c0_46] : memref<9x128x128xf32, #tpu.memory_space<vmem>>, vector<1x128x128xf32>
    %75 = vector.shape_cast %74 : vector<1x128x128xf32> to vector<128x128xf32>
    %cst_47 = arith.constant dense<0.000000e+00> : vector<256x128xf32>
    %76 = tpu.matmul %73, %75, %cst_47 {dimension_numbers = #tpu.dot_dimension_numbers<[1], [0], [0], [1], [0, 0, 1, 1], [], []>} : vector<256x128xf32>, vector<128x128xf32>, vector<256x128xf32> -> vector<256x128xf32>
    %77 = arith.addf %71, %76 : vector<256x128xf32>
    %c0_48 = arith.constant 0 : index
    %c49 = arith.constant 49 : index
    %c0_49 = arith.constant 0 : index
    %78 = vector.load %arg1[%c0_48, %c49, %c0_49] : memref<1x320x128xf32, #tpu.memory_space<vmem>>, vector<1x256x128xf32>
    %79 = vector.shape_cast %78 : vector<1x256x128xf32> to vector<256x128xf32>
    %cst_50 = arith.constant 0.000000e+00 : f32
    %80 = vector.broadcast %cst_50 : f32 to vector<256x128xf32>
    %81 = arith.select %20, %79, %80 : vector<256x128xi1>, vector<256x128xf32>
    %c8 = arith.constant 8 : index
    %c0_51 = arith.constant 0 : index
    %c0_52 = arith.constant 0 : index
    %82 = vector.load %arg2[%c8, %c0_51, %c0_52] : memref<9x128x128xf32, #tpu.memory_space<vmem>>, vector<1x128x128xf32>
    %83 = vector.shape_cast %82 : vector<1x128x128xf32> to vector<128x128xf32>
    %cst_53 = arith.constant dense<0.000000e+00> : vector<256x128xf32>
    %84 = tpu.matmul %81, %83, %cst_53 {dimension_numbers = #tpu.dot_dimension_numbers<[1], [0], [0], [1], [0, 0, 1, 1], [], []>} : vector<256x128xf32>, vector<128x128xf32>, vector<256x128xf32> -> vector<256x128xf32>
    %85 = arith.addf %77, %84 : vector<256x128xf32>
    %c0_54 = arith.constant 0 : index
    %c0_55 = arith.constant 0 : index
    %86 = vector.load %arg3[%c0_54, %c0_55] : memref<1x128xf32, #tpu.memory_space<vmem>>, vector<1x128xf32>
    %87 = vector.broadcast %86 : vector<1x128xf32> to vector<256x128xf32>
    %88 = arith.addf %85, %87 : vector<256x128xf32>
    %cst_56 = arith.constant dense<0.000000e+00> : vector<128xf32>
    %89 = vector.multi_reduction <add>, %88, %cst_56 [0] : vector<256x128xf32> to vector<128xf32>
    %90 = vector.shape_cast %89 : vector<128xf32> to vector<1x128xf32>
    %c0_57 = arith.constant 0 : index
    %c0_58 = arith.constant 0 : index
    %c0_59 = arith.constant 0 : index
    %91 = vector.load %arg5[%c0_57, %c0_58, %c0_59] : memref<1x1x128xf32, #tpu.memory_space<vmem>>, vector<1x1x128xf32>
    %92 = vector.shape_cast %91 : vector<1x1x128xf32> to vector<1x128xf32>
    %93 = vector.shape_cast %90 : vector<1x128xf32> to vector<1x1x128xf32>
    tpu.vector_store %arg5[%c0_57, %c0_58, %c0_59], %93 {strides = array<i32>} : memref<1x1x128xf32, #tpu.memory_space<vmem>>, vector<1x1x128xf32>,
    %94 = arith.mulf %88, %88 : vector<256x128xf32>
    %cst_60 = arith.constant dense<0.000000e+00> : vector<128xf32>
    %95 = vector.multi_reduction <add>, %94, %cst_60 [0] : vector<256x128xf32> to vector<128xf32>
    %96 = vector.shape_cast %95 : vector<128xf32> to vector<1x128xf32>
    %c0_61 = arith.constant 0 : index
    %c0_62 = arith.constant 0 : index
    %c0_63 = arith.constant 0 : index
    %97 = vector.load %arg6[%c0_61, %c0_62, %c0_63] : memref<1x1x128xf32, #tpu.memory_space<vmem>>, vector<1x1x128xf32>
    %98 = vector.shape_cast %97 : vector<1x1x128xf32> to vector<1x128xf32>
    %99 = vector.shape_cast %96 : vector<1x128xf32> to vector<1x1x128xf32>
    tpu.vector_store %arg6[%c0_61, %c0_62, %c0_63], %99 {strides = array<i32>} : memref<1x1x128xf32, #tpu.memory_space<vmem>>, vector<1x1x128xf32>,
    %c0_64 = arith.constant 0 : index
    %c0_65 = arith.constant 0 : index
    %c0_66 = arith.constant 0 : index
    %100 = vector.load %arg4[%c0_64, %c0_65, %c0_66] : memref<1x256x128xf32, #tpu.memory_space<vmem>>, vector<1x256x128xf32>
    %101 = vector.shape_cast %100 : vector<1x256x128xf32> to vector<256x128xf32>
    %102 = vector.shape_cast %88 : vector<256x128xf32> to vector<1x256x128xf32>
    tpu.vector_store %arg4[%c0_64, %c0_65, %c0_66], %102 {strides = array<i32>} : memref<1x256x128xf32, #tpu.memory_space<vmem>>, vector<1x256x128xf32>,
    return
  }
  func.func @transform_0(%arg0: i32) -> (i32, i32, i32) {
    %c0_i32 = arith.constant 0 : i32
    %c0_i32_0 = arith.constant 0 : i32
    %c0_i32_1 = arith.constant 0 : i32
    return %arg0, %c0_i32, %c0_i32_0 : i32, i32, i32
  }
  func.func @transform_1(%arg0: i32) -> (i32, i32, i32) {
    %c0_i32 = arith.constant 0 : i32
    %c0_i32_0 = arith.constant 0 : i32
    %c0_i32_1 = arith.constant 0 : i32
    %c0_i32_2 = arith.constant 0 : i32
    return %c0_i32, %c0_i32_0, %c0_i32_1 : i32, i32, i32
  }
  func.func @transform_2(%arg0: i32) -> (i32, i32) {
    %c0_i32 = arith.constant 0 : i32
    %c0_i32_0 = arith.constant 0 : i32
    %c0_i32_1 = arith.constant 0 : i32
    return %c0_i32, %c0_i32_0 : i32, i32
  }
  func.func @transform_3(%arg0: i32) -> (i32, i32, i32) {
    %c0_i32 = arith.constant 0 : i32
    %c0_i32_0 = arith.constant 0 : i32
    %c0_i32_1 = arith.constant 0 : i32
    return %arg0, %c0_i32, %c0_i32_0 : i32, i32, i32
  }
  func.func @transform_4(%arg0: i32) -> (i32, i32, i32) {
    %c0_i32 = arith.constant 0 : i32
    %c0_i32_0 = arith.constant 0 : i32
    %c0_i32_1 = arith.constant 0 : i32
    return %arg0, %c0_i32, %c0_i32_0 : i32, i32, i32
  }
  func.func @transform_5(%arg0: i32) -> (i32, i32, i32) {
    %c0_i32 = arith.constant 0 : i32
    %c0_i32_0 = arith.constant 0 : i32
    %c0_i32_1 = arith.constant 0 : i32
    return %arg0, %c0_i32, %c0_i32_0 : i32, i32, i32
  }
}

module attributes {stable_mosaic.version = 11 : i64} {
  func.func @_bn2_add_relu_kernel(%arg0: i32, %arg1: memref<1x256x128xf32, #tpu.memory_space<vmem>>, %arg2: memref<1x128xf32, #tpu.memory_space<vmem>>, %arg3: memref<1x128xf32, #tpu.memory_space<vmem>>, %arg4: memref<1x256x128xf32, #tpu.memory_space<vmem>>, %arg5: memref<1x256x128xf32, #tpu.memory_space<vmem>>) attributes {dimension_semantics = [#tpu.dimension_semantics<parallel>], iteration_bounds = array<i64: 2>, scalar_prefetch = 0 : i64, scratch_operands = 0 : i64, tpu.core_type = #tpu.core_type<tc>, window_params = [{transform_indices = @transform_0, window_bounds = array<i64: 1, 256, 128>}, {pipeline_mode = #tpu.pipeline_mode<synchronous>, transform_indices = @transform_1, window_bounds = array<i64: 1, 128>}, {pipeline_mode = #tpu.pipeline_mode<synchronous>, transform_indices = @transform_2, window_bounds = array<i64: 1, 128>}, {transform_indices = @transform_3, window_bounds = array<i64: 1, 256, 128>}, {transform_indices = @transform_4, window_bounds = array<i64: 1, 256, 128>}]} {
    %c0 = arith.constant 0 : index
    %c0_0 = arith.constant 0 : index
    %c0_1 = arith.constant 0 : index
    %0 = vector.load %arg1[%c0, %c0_0, %c0_1] : memref<1x256x128xf32, #tpu.memory_space<vmem>>, vector<1x256x128xf32>
    %1 = vector.shape_cast %0 : vector<1x256x128xf32> to vector<256x128xf32>
    %c0_2 = arith.constant 0 : index
    %c0_3 = arith.constant 0 : index
    %c0_4 = arith.constant 0 : index
    %2 = vector.load %arg4[%c0_2, %c0_3, %c0_4] : memref<1x256x128xf32, #tpu.memory_space<vmem>>, vector<1x256x128xf32>
    %3 = vector.shape_cast %2 : vector<1x256x128xf32> to vector<256x128xf32>
    %c0_5 = arith.constant 0 : index
    %c0_6 = arith.constant 0 : index
    %4 = vector.load %arg2[%c0_5, %c0_6] : memref<1x128xf32, #tpu.memory_space<vmem>>, vector<1x128xf32>
    %5 = vector.broadcast %4 : vector<1x128xf32> to vector<256x128xf32>
    %6 = arith.mulf %1, %5 : vector<256x128xf32>
    %c0_7 = arith.constant 0 : index
    %c0_8 = arith.constant 0 : index
    %7 = vector.load %arg3[%c0_7, %c0_8] : memref<1x128xf32, #tpu.memory_space<vmem>>, vector<1x128xf32>
    %8 = vector.broadcast %7 : vector<1x128xf32> to vector<256x128xf32>
    %9 = arith.addf %6, %8 : vector<256x128xf32>
    %10 = arith.addf %9, %3 : vector<256x128xf32>
    %cst = arith.constant 0.000000e+00 : f32
    %11 = vector.broadcast %cst : f32 to vector<256x128xf32>
    %12 = arith.maximumf %10, %11 : vector<256x128xf32>
    %c0_9 = arith.constant 0 : index
    %c0_10 = arith.constant 0 : index
    %c0_11 = arith.constant 0 : index
    %13 = vector.load %arg5[%c0_9, %c0_10, %c0_11] : memref<1x256x128xf32, #tpu.memory_space<vmem>>, vector<1x256x128xf32>
    %14 = vector.shape_cast %13 : vector<1x256x128xf32> to vector<256x128xf32>
    %15 = vector.shape_cast %12 : vector<256x128xf32> to vector<1x256x128xf32>
    tpu.vector_store %arg5[%c0_9, %c0_10, %c0_11], %15 {strides = array<i32>} : memref<1x256x128xf32, #tpu.memory_space<vmem>>, vector<1x256x128xf32>,
    return
  }
  func.func @transform_0(%arg0: i32) -> (i32, i32, i32) {
    %c0_i32 = arith.constant 0 : i32
    %c0_i32_0 = arith.constant 0 : i32
    %c0_i32_1 = arith.constant 0 : i32
    return %arg0, %c0_i32, %c0_i32_0 : i32, i32, i32
  }
  func.func @transform_1(%arg0: i32) -> (i32, i32) {
    %c0_i32 = arith.constant 0 : i32
    %c0_i32_0 = arith.constant 0 : i32
    %c0_i32_1 = arith.constant 0 : i32
    return %c0_i32, %c0_i32_0 : i32, i32
  }
  func.func @transform_2(%arg0: i32) -> (i32, i32) {
    %c0_i32 = arith.constant 0 : i32
    %c0_i32_0 = arith.constant 0 : i32
    %c0_i32_1 = arith.constant 0 : i32
    return %c0_i32, %c0_i32_0 : i32, i32
  }
  func.func @transform_3(%arg0: i32) -> (i32, i32, i32) {
    %c0_i32 = arith.constant 0 : i32
    %c0_i32_0 = arith.constant 0 : i32
    %c0_i32_1 = arith.constant 0 : i32
    return %arg0, %c0_i32, %c0_i32_0 : i32, i32, i32
  }
  func.func @transform_4(%arg0: i32) -> (i32, i32, i32) {
    %c0_i32 = arith.constant 0 : i32
    %c0_i32_0 = arith.constant 0 : i32
    %c0_i32_1 = arith.constant 0 : i32
    return %arg0, %c0_i32, %c0_i32_0 : i32, i32, i32
  }
}

module attributes {stable_mosaic.version = 11 : i64} {
  func.func @_bn1_relu_to_flat_kernel(%arg0: i32, %arg1: memref<1x256x128xf32, #tpu.memory_space<vmem>>, %arg2: memref<1x128xf32, #tpu.memory_space<vmem>>, %arg3: memref<1x128xf32, #tpu.memory_space<vmem>>, %arg4: memref<1x320x128xf32, #tpu.memory_space<vmem>>) attributes {dimension_semantics = [#tpu.dimension_semantics<parallel>], iteration_bounds = array<i64: 2>, scalar_prefetch = 0 : i64, scratch_operands = 0 : i64, tpu.core_type = #tpu.core_type<tc>, window_params = [{transform_indices = @transform_0, window_bounds = array<i64: 1, 256, 128>}, {pipeline_mode = #tpu.pipeline_mode<synchronous>, transform_indices = @transform_1, window_bounds = array<i64: 1, 128>}, {pipeline_mode = #tpu.pipeline_mode<synchronous>, transform_indices = @transform_2, window_bounds = array<i64: 1, 128>}, {transform_indices = @transform_3, window_bounds = array<i64: 1, 320, 128>}]} {
    %c0 = arith.constant 0 : index
    %c0_0 = arith.constant 0 : index
    %c0_1 = arith.constant 0 : index
    %0 = vector.load %arg1[%c0, %c0_0, %c0_1] : memref<1x256x128xf32, #tpu.memory_space<vmem>>, vector<1x256x128xf32>
    %1 = vector.shape_cast %0 : vector<1x256x128xf32> to vector<256x128xf32>
    %c0_2 = arith.constant 0 : index
    %c0_3 = arith.constant 0 : index
    %2 = vector.load %arg2[%c0_2, %c0_3] : memref<1x128xf32, #tpu.memory_space<vmem>>, vector<1x128xf32>
    %3 = vector.broadcast %2 : vector<1x128xf32> to vector<256x128xf32>
    %4 = arith.mulf %1, %3 : vector<256x128xf32>
    %c0_4 = arith.constant 0 : index
    %c0_5 = arith.constant 0 : index
    %5 = vector.load %arg3[%c0_4, %c0_5] : memref<1x128xf32, #tpu.memory_space<vmem>>, vector<1x128xf32>
    %6 = vector.broadcast %5 : vector<1x128xf32> to vector<256x128xf32>
    %7 = arith.addf %4, %6 : vector<256x128xf32>
    %cst = arith.constant 0.000000e+00 : f32
    %8 = vector.broadcast %cst : f32 to vector<256x128xf32>
    %9 = arith.maximumf %7, %8 : vector<256x128xf32>
    %cst_6 = arith.constant 0.000000e+00 : f32
    %10 = vector.broadcast %cst_6 : f32 to vector<32x128xf32>
    %c0_7 = arith.constant 0 : index
    %c0_8 = arith.constant 0 : index
    %c0_9 = arith.constant 0 : index
    %11 = vector.load %arg4[%c0_7, %c0_8, %c0_9] : memref<1x320x128xf32, #tpu.memory_space<vmem>>, vector<1x32x128xf32>
    %12 = vector.shape_cast %11 : vector<1x32x128xf32> to vector<32x128xf32>
    %13 = vector.shape_cast %10 : vector<32x128xf32> to vector<1x32x128xf32>
    tpu.vector_store %arg4[%c0_7, %c0_8, %c0_9], %13 {strides = array<i32>} : memref<1x320x128xf32, #tpu.memory_space<vmem>>, vector<1x32x128xf32>,
    %cst_10 = arith.constant 0.000000e+00 : f32
    %14 = vector.broadcast %cst_10 : f32 to vector<32x128xf32>
    %c0_11 = arith.constant 0 : index
    %c288 = arith.constant 288 : index
    %c0_12 = arith.constant 0 : index
    %15 = vector.load %arg4[%c0_11, %c288, %c0_12] : memref<1x320x128xf32, #tpu.memory_space<vmem>>, vector<1x32x128xf32>
    %16 = vector.shape_cast %15 : vector<1x32x128xf32> to vector<32x128xf32>
    %17 = vector.shape_cast %14 : vector<32x128xf32> to vector<1x32x128xf32>
    tpu.vector_store %arg4[%c0_11, %c288, %c0_12], %17 {strides = array<i32>} : memref<1x320x128xf32, #tpu.memory_space<vmem>>, vector<1x32x128xf32>,
    %c0_13 = arith.constant 0 : index
    %c32 = arith.constant 32 : index
    %c0_14 = arith.constant 0 : index
    %18 = vector.load %arg4[%c0_13, %c32, %c0_14] : memref<1x320x128xf32, #tpu.memory_space<vmem>>, vector<1x256x128xf32>
    %19 = vector.shape_cast %18 : vector<1x256x128xf32> to vector<256x128xf32>
    %20 = vector.shape_cast %9 : vector<256x128xf32> to vector<1x256x128xf32>
    tpu.vector_store %arg4[%c0_13, %c32, %c0_14], %20 {strides = array<i32>} : memref<1x320x128xf32, #tpu.memory_space<vmem>>, vector<1x256x128xf32>,
    return
  }
  func.func @transform_0(%arg0: i32) -> (i32, i32, i32) {
    %c0_i32 = arith.constant 0 : i32
    %c0_i32_0 = arith.constant 0 : i32
    %c0_i32_1 = arith.constant 0 : i32
    return %arg0, %c0_i32, %c0_i32_0 : i32, i32, i32
  }
  func.func @transform_1(%arg0: i32) -> (i32, i32) {
    %c0_i32 = arith.constant 0 : i32
    %c0_i32_0 = arith.constant 0 : i32
    %c0_i32_1 = arith.constant 0 : i32
    return %c0_i32, %c0_i32_0 : i32, i32
  }
  func.func @transform_2(%arg0: i32) -> (i32, i32) {
    %c0_i32 = arith.constant 0 : i32
    %c0_i32_0 = arith.constant 0 : i32
    %c0_i32_1 = arith.constant 0 : i32
    return %c0_i32, %c0_i32_0 : i32, i32
  }
  func.func @transform_3(%arg0: i32) -> (i32, i32, i32) {
    %c0_i32 = arith.constant 0 : i32
    %c0_i32_0 = arith.constant 0 : i32
    %c0_i32_1 = arith.constant 0 : i32
    return %arg0, %c0_i32, %c0_i32_0 : i32, i32, i32
  }
}

</mosaic_0001>

<bundles_post_ra>
// kernel: residual_block_forward.5
= control target key start
LH: loop header
LB: loop body
LE: loop exit
PB: predicated region body
PF: predicated region fallthrough
CT: control target
= control target key end

     0   :  { %s454_s12 = smov 0   ;;  %s621_s0 = inlined_call_operand.vmem [shape: f32[2,256,128], index: 0, kind: input, shape index: {}]   ;;  %s622_s1 = inlined_call_operand.vmem [shape: f32[1,128], index: 1, kind: input, shape index: {}]   ;;  %s623_s2 = inlined_call_operand.vmem [shape: f32[1,128], index: 2, kind: input, shape index: {}]   ;;  %s624_s3 = inlined_call_operand.vmem [shape: f32[2,320,128], index: 3, kind: output, shape index: {}]  }
   0x1 LB: > { %s402_s13 = sadd.s32 4294967295, %s431_s12   ;;  %p406_p0 = scmp.ge.s32.totalorder %s431_s12, 1  ;;  %s431_s12 = sphi %s454_s12, %s13_s12  }
   0x2   : > { %p137_p1 = scmp.lt.s32.totalorder %s431_s12, 3 }
   0x4   : > { %p138_p2 = pnand %p406_p0, %p137_p1 }
   0x5   : > { %p161_p3 = scmp.lt.s32.totalorder (!%p138_p2), %s402_s13, 1 }
   0x6   : > { %141 = sbr.rel (%p138_p2) target bundleno = 55 (0x37), region = 32 }
   0xb   : > { %s626_s13 = smov (!%p161_p3, %s402_s13), 1  ;;  %v465_v0 = vld [vmem:[%s622_s1] ss:$0 sm:$0xff]  ;;  %v433_v5 = vmov 0.0  }
   0xc   : > { %s413_s16 = smul.u32 320, %s626_s13  ;;  %s412_s17 = sshll.u32 %s626_s13, 8  ;;  %v475_v1 = vld [vmem:[%s623_s2] ss:$0 sm:$0xff] }
   0xd   : > { %s470_s20 = scalar_lea.vmem %s621_s0, %s412_s17 }
   0xe   : > { %s480_s25 = scalar_lea.vmem %s624_s3, %s413_s16  ;;  %v171_v2 = vld [vmem:[%s470_s20] sm:$0xff]  ;;  %v172_v3 = vld [vmem:[%s470_s20 + $0x8] sm:$0xff]  ;;  %v173_v4 = vld [vmem:[%s470_s20 + $0x10] sm:$0xff] }
   0xf   : > { %307 = vst [vmem:[%s480_s25] sm:$0xff] %v433_v5  ;;  %v207_v6 = vmul.f32 %v465_v0, %v171_v2  ;;  %v208_v7 = vmul.f32 %v465_v0, %v172_v3  ;;  %v209_v8 = vmul.f32 %v465_v0, %v173_v4  ;;  %v174_v9 = vld [vmem:[%s470_s20 + $0x18] sm:$0xff]  ;;  %v175_v10 = vld [vmem:[%s470_s20 + $0x20] sm:$0xff]  ;;  %v176_v11 = vld [vmem:[%s470_s20 + $0x28] sm:$0xff] }
  0x10   : > { %308 = vst [vmem:[%s480_s25 + $0x8] sm:$0xff] %v433_v5  ;;  %v210_v12 = vmul.f32 %v465_v0, %v174_v9  ;;  %v211_v13 = vmul.f32 %v465_v0, %v175_v10  ;;  %v212_v14 = vmul.f32 %v465_v0, %v176_v11  ;;  %v177_v15 = vld [vmem:[%s470_s20 + $0x30] sm:$0xff]  ;;  %v178_v16 = vld [vmem:[%s470_s20 + $0x38] sm:$0xff]  ;;  %v179_v23 = vld [vmem:[%s470_s20 + $0x40] sm:$0xff] }
  0x11   : > { %309 = vst [vmem:[%s480_s25 + $0x10] sm:$0xff] %v433_v5  ;;  %v243_v17 = vadd.f32 %v475_v1, %v207_v6  ;;  %v244_v18 = vadd.f32 %v475_v1, %v208_v7  ;;  %v245_v19 = vadd.f32 %v475_v1, %v209_v8  ;;  %v213_v20 = vmul.f32 %v465_v0, %v177_v15  ;;  %v180_v24 = vld [vmem:[%s470_s20 + $0x48] sm:$0xff]  ;;  %v181_v25 = vld [vmem:[%s470_s20 + $0x50] sm:$0xff]  ;;  %v182_v28 = vld [vmem:[%s470_s20 + $0x58] sm:$0xff] }
  0x12   : > { %310 = vst [vmem:[%s480_s25 + $0x18] sm:$0xff] %v433_v5  ;;  %v246_v21 = vadd.f32 %v475_v1, %v210_v12  ;;  %v214_v22 = vmul.f32 %v465_v0, %v178_v16  ;;  %v247_v27 = vadd.f32 %v475_v1, %v211_v13  ;;  %v248_v31 = vadd.f32 %v475_v1, %v212_v14  ;;  %v183_v32 = vld [vmem:[%s470_s20 + $0x60] sm:$0xff]  ;;  %v184_v37 = vld [vmem:[%s470_s20 + $0x68] sm:$0xff]  ;;  %v185_v41 = vld [vmem:[%s470_s20 + $0x70] sm:$0xff] }
  0x13   : > { %311 = vst [vmem:[%s480_s25 + $0x120] sm:$0xff] %v433_v5  ;;  %v275_v26 = vmax.f32 %v243_v17, 0.0  ;;  %v276_v29 = vmax.f32 %v244_v18, 0.0  ;;  %v277_v30 = vmax.f32 %v245_v19, 0.0  ;;  %v249_v33 = vadd.f32 %v475_v1, %v213_v20  ;;  %v186_v45 = vld [vmem:[%s470_s20 + $0x78] sm:$0xff]  ;;  %v187_v49 = vld [vmem:[%s470_s20 + $0x80] sm:$0xff] }
  0x14   : > { %312 = vst [vmem:[%s480_s25 + $0x128] sm:$0xff] %v433_v5  ;;  %v215_v34 = vmul.f32 %v465_v0, %v179_v23  ;;  %v216_v35 = vmul.f32 %v465_v0, %v180_v24  ;;  %v217_v36 = vmul.f32 %v465_v0, %v181_v25  ;;  %v278_v38 = vmax.f32 %v246_v21, 0.0  ;;  %v188_v53 = vld [vmem:[%s470_s20 + $0x88] sm:$0xff]  ;;  %v189_v57 = vld [vmem:[%s470_s20 + $0x90] sm:$0xff]  ;;  %v190_v61 = vld [vmem:[%s470_s20 + $0x98] sm:$0xff] }
  0x15   : > { %313 = vst [vmem:[%s480_s25 + $0x130] sm:$0xff] %v433_v5  ;;  %v250_v39 = vadd.f32 %v475_v1, %v214_v22  ;;  %v218_v40 = vmul.f32 %v465_v0, %v182_v28  ;;  %v279_v42 = vmax.f32 %v247_v27, 0.0  ;;  %v219_v44 = vmul.f32 %v465_v0, %v183_v32  ;;  %v191_v3 = vld [vmem:[%s470_s20 + $0xa0] sm:$0xff]  ;;  %v192_v7 = vld [vmem:[%s470_s20 + $0xa8] sm:$0xff]  ;;  %v193_v11 = vld [vmem:[%s470_s20 + $0xb0] sm:$0xff] }
  0x16   : > { %314 = vst [vmem:[%s480_s25 + $0x138] sm:$0xff] %v433_v5  ;;  %v251_v43 = vadd.f32 %v475_v1, %v215_v34  ;;  %v280_v46 = vmax.f32 %v248_v31, 0.0  ;;  %v252_v47 = vadd.f32 %v475_v1, %v216_v35  ;;  %v220_v48 = vmul.f32 %v465_v0, %v184_v37  ;;  %v194_v15 = vld [vmem:[%s470_s20 + $0xb8] sm:$0xff]  ;;  %v195_v19 = vld [vmem:[%s470_s20 + $0xc0] sm:$0xff]  ;;  %v196_v23 = vld [vmem:[%s470_s20 + $0xc8] sm:$0xff] }
  0x17   : > { %315 = vst [vmem:[%s480_s25 + $0x20] sm:$0xff] %v275_v26  ;;  %v281_v50 = vmax.f32 %v249_v33, 0.0  ;;  %v253_v51 = vadd.f32 %v475_v1, %v217_v36  ;;  %v221_v52 = vmul.f32 %v465_v0, %v185_v41  ;;  %v282_v54 = vmax.f32 %v250_v39, 0.0  ;;  %v197_v27 = vld [vmem:[%s470_s20 + $0xd0] sm:$0xff]  ;;  %v198_v31 = vld [vmem:[%s470_s20 + $0xd8] sm:$0xff]  ;;  %v199_v35 = vld [vmem:[%s470_s20 + $0xe0] sm:$0xff] }
  0x18   : > { %316 = vst [vmem:[%s480_s25 + $0x28] sm:$0xff] %v276_v29  ;;  %v254_v55 = vadd.f32 %v475_v1, %v218_v40  ;;  %v222_v56 = vmul.f32 %v465_v0, %v186_v45  ;;  %v283_v58 = vmax.f32 %v251_v43, 0.0  ;;  %v255_v59 = vadd.f32 %v475_v1, %v219_v44  ;;  %v200_v39 = vld [vmem:[%s470_s20 + $0xe8] sm:$0xff]  ;;  %v201_v43 = vld [vmem:[%s470_s20 + $0xf0] sm:$0xff] }
  0x19   : > { %317 = vst [vmem:[%s480_s25 + $0x30] sm:$0xff] %v277_v30  ;;  %v223_v60 = vmul.f32 %v465_v0, %v187_v49  ;;  %v284_v62 = vmax.f32 %v252_v47, 0.0  ;;  %v256_v63 = vadd.f32 %v475_v1, %v220_v48  ;;  %v224_v2 = vmul.f32 %v465_v0, %v188_v53  ;;  %v202_v47 = vld [vmem:[%s470_s20 + $0xf8] sm:$0xff] }
  0x1a   : > { %318 = vst [vmem:[%s480_s25 + $0x38] sm:$0xff] %v278_v38  ;;  %v285_v4 = vmax.f32 %v253_v51, 0.0  ;;  %v257_v5 = vadd.f32 %v475_v1, %v221_v52  ;;  %v225_v6 = vmul.f32 %v465_v0, %v189_v57  ;;  %v286_v8 = vmax.f32 %v254_v55, 0.0 }
  0x1b   : > { %319 = vst [vmem:[%s480_s25 + $0x40] sm:$0xff] %v279_v42  ;;  %v258_v9 = vadd.f32 %v475_v1, %v222_v56  ;;  %v226_v10 = vmul.f32 %v465_v0, %v190_v61  ;;  %v287_v12 = vmax.f32 %v255_v59, 0.0  ;;  %v259_v13 = vadd.f32 %v475_v1, %v223_v60 }
  0x1c   : > { %320 = vst [vmem:[%s480_s25 + $0x48] sm:$0xff] %v280_v46  ;;  %v227_v14 = vmul.f32 %v465_v0, %v191_v3  ;;  %v288_v16 = vmax.f32 %v256_v63, 0.0  ;;  %v260_v17 = vadd.f32 %v475_v1, %v224_v2  ;;  %v228_v18 = vmul.f32 %v465_v0, %v192_v7 }
  0x1d   : > { %321 = vst [vmem:[%s480_s25 + $0x50] sm:$0xff] %v281_v50  ;;  %v289_v20 = vmax.f32 %v257_v5, 0.0  ;;  %v261_v21 = vadd.f32 %v475_v1, %v225_v6  ;;  %v229_v22 = vmul.f32 %v465_v0, %v193_v11  ;;  %v290_v24 = vmax.f32 %v258_v9, 0.0 }
  0x1e   : > { %322 = vst [vmem:[%s480_s25 + $0x58] sm:$0xff] %v282_v54  ;;  %v262_v25 = vadd.f32 %v475_v1, %v226_v10  ;;  %v230_v26 = vmul.f32 %v465_v0, %v194_v15  ;;  %v291_v28 = vmax.f32 %v259_v13, 0.0  ;;  %v263_v29 = vadd.f32 %v475_v1, %v227_v14 }
  0x1f   : > { %323 = vst [vmem:[%s480_s25 + $0x60] sm:$0xff] %v283_v58  ;;  %v231_v30 = vmul.f32 %v465_v0, %v195_v19  ;;  %v292_v32 = vmax.f32 %v260_v17, 0.0  ;;  %v264_v33 = vadd.f32 %v475_v1, %v228_v18  ;;  %v232_v34 = vmul.f32 %v465_v0, %v196_v23 }
  0x20   : > { %324 = vst [vmem:[%s480_s25 + $0x68] sm:$0xff] %v284_v62  ;;  %v293_v36 = vmax.f32 %v261_v21, 0.0  ;;  %v265_v37 = vadd.f32 %v475_v1, %v229_v22  ;;  %v233_v38 = vmul.f32 %v465_v0, %v197_v27  ;;  %v294_v40 = vmax.f32 %v262_v25, 0.0 }
  0x21   : > { %325 = vst [vmem:[%s480_s25 + $0x70] sm:$0xff] %v285_v4  ;;  %v266_v41 = vadd.f32 %v475_v1, %v230_v26  ;;  %v234_v42 = vmul.f32 %v465_v0, %v198_v31  ;;  %v295_v44 = vmax.f32 %v263_v29, 0.0  ;;  %v267_v45 = vadd.f32 %v475_v1, %v231_v30 }
  0x22   : > { %326 = vst [vmem:[%s480_s25 + $0x78] sm:$0xff] %v286_v8  ;;  %v235_v46 = vmul.f32 %v465_v0, %v199_v35  ;;  %v296_v48 = vmax.f32 %v264_v33, 0.0  ;;  %v268_v49 = vadd.f32 %v475_v1, %v232_v34  ;;  %v236_v50 = vmul.f32 %v465_v0, %v200_v39 }
  0x23   : > { %327 = vst [vmem:[%s480_s25 + $0x80] sm:$0xff] %v287_v12  ;;  %v297_v51 = vmax.f32 %v265_v37, 0.0  ;;  %v269_v52 = vadd.f32 %v475_v1, %v233_v38  ;;  %v237_v53 = vmul.f32 %v465_v0, %v201_v43  ;;  %v298_v54 = vmax.f32 %v266_v41, 0.0 }
  0x24   : > { %328 = vst [vmem:[%s480_s25 + $0x88] sm:$0xff] %v288_v16  ;;  %v270_v55 = vadd.f32 %v475_v1, %v234_v42  ;;  %v238_v56 = vmul.f32 %v465_v0, %v202_v47  ;;  %v299_v57 = vmax.f32 %v267_v45, 0.0  ;;  %v271_v58 = vadd.f32 %v475_v1, %v235_v46 }
  0x25   : > { %329 = vst [vmem:[%s480_s25 + $0x90] sm:$0xff] %v289_v20  ;;  %v300_v59 = vmax.f32 %v268_v49, 0.0  ;;  %v272_v60 = vadd.f32 %v475_v1, %v236_v50  ;;  %v301_v61 = vmax.f32 %v269_v52, 0.0  ;;  %v273_v62 = vadd.f32 %v475_v1, %v237_v53 }
  0x26   : > { %330 = vst [vmem:[%s480_s25 + $0x98] sm:$0xff] %v290_v24  ;;  %v302_v0 = vmax.f32 %v270_v55, 0.0  ;;  %v274_v63 = vadd.f32 %v475_v1, %v238_v56  ;;  %v303_v2 = vmax.f32 %v271_v58, 0.0 }
  0x27   : > { %331 = vst [vmem:[%s480_s25 + $0xa0] sm:$0xff] %v291_v28  ;;  %v304_v3 = vmax.f32 %v272_v60, 0.0  ;;  %v305_v4 = vmax.f32 %v273_v62, 0.0 }
  0x28   : > { %332 = vst [vmem:[%s480_s25 + $0xa8] sm:$0xff] %v292_v32  ;;  %v306_v5 = vmax.f32 %v274_v63, 0.0 }
  0x29   : > { %333 = vst [vmem:[%s480_s25 + $0xb0] sm:$0xff] %v293_v36 }
  0x2a   : > { %334 = vst [vmem:[%s480_s25 + $0xb8] sm:$0xff] %v294_v40 }
  0x2b   : > { %335 = vst [vmem:[%s480_s25 + $0xc0] sm:$0xff] %v295_v44 }
  0x2c   : > { %336 = vst [vmem:[%s480_s25 + $0xc8] sm:$0xff] %v296_v48 }
  0x2d   : > { %337 = vst [vmem:[%s480_s25 + $0xd0] sm:$0xff] %v297_v51 }
  0x2e   : > { %338 = vst [vmem:[%s480_s25 + $0xd8] sm:$0xff] %v298_v54 }
  0x2f   : > { %339 = vst [vmem:[%s480_s25 + $0xe0] sm:$0xff] %v299_v57 }
  0x30   : > { %340 = vst [vmem:[%s480_s25 + $0xe8] sm:$0xff] %v300_v59 }
  0x31   : > { %341 = vst [vmem:[%s480_s25 + $0xf0] sm:$0xff] %v301_v61 }
  0x32   : > { %342 = vst [vmem:[%s480_s25 + $0xf8] sm:$0xff] %v302_v0 }
  0x33   : > { %343 = vst [vmem:[%s480_s25 + $0x100] sm:$0xff] %v303_v2 }
  0x34   : > { %344 = vst [vmem:[%s480_s25 + $0x108] sm:$0xff] %v304_v3 }
  0x35   : > { %345 = vst [vmem:[%s480_s25 + $0x110] sm:$0xff] %v305_v4 }
  0x36   : > { %346 = vst [vmem:[%s480_s25 + $0x118] sm:$0xff] %v306_v5 }
  0x37 PF: > { %s13_s12 = sadd.s32 1, %s431_s12  }
  0x38   : > { %p10_p4 = scmp.ge.s32.totalorder %s13_s12, 4  }
  0x3a   :  { %12 = sbr.rel (!%p10_p4) target bundleno = 1 (0x1), region = 62 }

// kernel: residual_block_forward.7
= control target key start
LH: loop header
LB: loop body
LE: loop exit
PB: predicated region body
PF: predicated region fallthrough
CT: control target
= control target key end

     0   :  { %s576_s15 = smov 0   ;;  %s777_s0 = inlined_call_operand.vmem [shape: f32[2,256,128], index: 0, kind: input, shape index: {}]   ;;  %s778_s1 = inlined_call_operand.vmem [shape: f32[1,128], index: 1, kind: input, shape index: {}]   ;;  %s779_s2 = inlined_call_operand.vmem [shape: f32[1,128], index: 2, kind: input, shape index: {}]   ;;  %s780_s3 = inlined_call_operand.vmem [shape: f32[2,256,128], index: 3, kind: input, shape index: {}]   ;;  %s781_s4 = inlined_call_operand.vmem [shape: f32[2,256,128], index: 4, kind: output, shape index: {}]  }
   0x1 LB: > { %s517_s16 = sadd.s32 4294967295, %s549_s15   ;;  %p521_p0 = scmp.ge.s32.totalorder %s549_s15, 1  ;;  %s549_s15 = sphi %s576_s15, %s14_s15  }
   0x2   : > { %p172_p1 = scmp.lt.s32.totalorder %s549_s15, 3 }
   0x4   : > { %p173_p2 = pnand %p521_p0, %p172_p1 }
   0x5   : > { %p203_p3 = scmp.lt.s32.totalorder (!%p173_p2), %s517_s16, 1 }
   0x6   : > { %176 = sbr.rel (%p173_p2) target bundleno = 55 (0x37), region = 36 }
   0xb   : > { %s783_s16 = smov (!%p203_p3, %s517_s16), 1  ;;  %v587_v0 = vld [vmem:[%s778_s1] ss:$0 sm:$0xff] }
   0xc   : > { %s589_s19 = sshll.u32 %s783_s16, 8  ;;  %v606_v1 = vld [vmem:[%s779_s2] ss:$0 sm:$0xff] }
   0xd   : > { %s595_s22 = scalar_lea.vmem %s777_s0, %s589_s19  ;;  %s601_s25 = scalar_lea.vmem %s780_s3, %s589_s19 }
   0xe   : > { %v218_v2 = vld [vmem:[%s595_s22] sm:$0xff]  ;;  %v219_v3 = vld [vmem:[%s595_s22 + $0x8] sm:$0xff]  ;;  %v220_v7 = vld [vmem:[%s595_s22 + $0x10] sm:$0xff]  ;;  %s637_s30 = scalar_lea.vmem %s781_s4, %s589_s19 }
   0xf   : > { %v250_v4 = vld [vmem:[%s601_s25] sm:$0xff]  ;;  %v286_v5 = vmul.f32 %v587_v0, %v218_v2  ;;  %v287_v6 = vmul.f32 %v587_v0, %v219_v3  ;;  %v251_v8 = vld [vmem:[%s601_s25 + $0x8] sm:$0xff]  ;;  %v288_v9 = vmul.f32 %v587_v0, %v220_v7  ;;  %v221_v10 = vld [vmem:[%s595_s22 + $0x18] sm:$0xff] }
  0x10   : > { %v222_v11 = vld [vmem:[%s595_s22 + $0x20] sm:$0xff]  ;;  %v252_v14 = vld [vmem:[%s601_s25 + $0x10] sm:$0xff]  ;;  %v253_v15 = vld [vmem:[%s601_s25 + $0x18] sm:$0xff]  ;;  %v289_v16 = vmul.f32 %v587_v0, %v221_v10 }
  0x11   : > { %v322_v12 = vadd.f32 %v606_v1, %v286_v5  ;;  %v323_v13 = vadd.f32 %v606_v1, %v287_v6  ;;  %v290_v17 = vmul.f32 %v587_v0, %v222_v11  ;;  %v223_v18 = vld [vmem:[%s595_s22 + $0x28] sm:$0xff]  ;;  %v324_v19 = vadd.f32 %v606_v1, %v288_v9  ;;  %v254_v20 = vld [vmem:[%s601_s25 + $0x20] sm:$0xff]  ;;  %v224_v22 = vld [vmem:[%s595_s22 + $0x30] sm:$0xff] }
  0x12   : > { %v291_v21 = vmul.f32 %v587_v0, %v223_v18  ;;  %v225_v23 = vld [vmem:[%s595_s22 + $0x38] sm:$0xff]  ;;  %v325_v26 = vadd.f32 %v606_v1, %v289_v16  ;;  %v255_v28 = vld [vmem:[%s601_s25 + $0x28] sm:$0xff]  ;;  %v292_v31 = vmul.f32 %v587_v0, %v224_v22  ;;  %v226_v33 = vld [vmem:[%s595_s22 + $0x40] sm:$0xff] }
  0x13   : > { %v354_v24 = vadd.f32 %v322_v12, %v250_v4  ;;  %v355_v25 = vadd.f32 %v323_v13, %v251_v8  ;;  %v326_v27 = vadd.f32 %v606_v1, %v290_v17  ;;  %v356_v29 = vadd.f32 %v324_v19, %v252_v14  ;;  %v227_v34 = vld [vmem:[%s595_s22 + $0x48] sm:$0xff]  ;;  %v256_v39 = vld [vmem:[%s601_s25 + $0x30] sm:$0xff]  ;;  %v257_v40 = vld [vmem:[%s601_s25 + $0x38] sm:$0xff] }
  0x14   : > { %v327_v30 = vadd.f32 %v606_v1, %v291_v21  ;;  %v293_v32 = vmul.f32 %v587_v0, %v225_v23  ;;  %v357_v37 = vadd.f32 %v325_v26, %v253_v15  ;;  %v228_v41 = vld [vmem:[%s595_s22 + $0x50] sm:$0xff]  ;;  %v328_v44 = vadd.f32 %v606_v1, %v292_v31  ;;  %v229_v46 = vld [vmem:[%s595_s22 + $0x58] sm:$0xff]  ;;  %v230_v47 = vld [vmem:[%s595_s22 + $0x60] sm:$0xff] }
  0x15   : > { %v386_v35 = vmax.f32 %v354_v24, 0.0  ;;  %v387_v36 = vmax.f32 %v355_v25, 0.0  ;;  %v358_v38 = vadd.f32 %v326_v27, %v254_v20  ;;  %v388_v42 = vmax.f32 %v356_v29, 0.0  ;;  %v231_v52 = vld [vmem:[%s595_s22 + $0x68] sm:$0xff]  ;;  %v258_v56 = vld [vmem:[%s601_s25 + $0x40] sm:$0xff]  ;;  %v260_v61 = vld [vmem:[%s601_s25 + $0x50] sm:$0xff] }
  0x16   : > { %v359_v43 = vadd.f32 %v327_v30, %v255_v28  ;;  %v329_v45 = vadd.f32 %v606_v1, %v293_v32  ;;  %v389_v48 = vmax.f32 %v357_v37, 0.0  ;;  %v294_v50 = vmul.f32 %v587_v0, %v226_v33  ;;  %v259_v57 = vld [vmem:[%s601_s25 + $0x48] sm:$0xff]  ;;  %v232_v2 = vld [vmem:[%s595_s22 + $0x70] sm:$0xff]  ;;  %v233_v3 = vld [vmem:[%s595_s22 + $0x78] sm:$0xff] }
  0x17   : > { %418 = vst [vmem:[%s637_s30] sm:$0xff] %v386_v35  ;;  %v390_v49 = vmax.f32 %v358_v38, 0.0  ;;  %v295_v51 = vmul.f32 %v587_v0, %v227_v34  ;;  %v360_v54 = vadd.f32 %v328_v44, %v256_v39  ;;  %v296_v58 = vmul.f32 %v587_v0, %v228_v41  ;;  %v261_v7 = vld [vmem:[%s601_s25 + $0x58] sm:$0xff]  ;;  %v262_v8 = vld [vmem:[%s601_s25 + $0x60] sm:$0xff]  ;;  %v263_v14 = vld [vmem:[%s601_s25 + $0x68] sm:$0xff] }
  0x18   : > { %419 = vst [vmem:[%s637_s30 + $0x8] sm:$0xff] %v387_v36  ;;  %v391_v53 = vmax.f32 %v359_v43, 0.0  ;;  %v361_v55 = vadd.f32 %v329_v45, %v257_v40  ;;  %v330_v59 = vadd.f32 %v606_v1, %v294_v50  ;;  %v297_v62 = vmul.f32 %v587_v0, %v229_v46  ;;  %v234_v19 = vld [vmem:[%s595_s22 + $0x80] sm:$0xff]  ;;  %v235_v20 = vld [vmem:[%s595_s22 + $0x88] sm:$0xff]  ;;  %v264_v25 = vld [vmem:[%s601_s25 + $0x70] sm:$0xff] }
  0x19   : > { %420 = vst [vmem:[%s637_s30 + $0x10] sm:$0xff] %v388_v42  ;;  %v331_v60 = vadd.f32 %v606_v1, %v295_v51  ;;  %v298_v63 = vmul.f32 %v587_v0, %v230_v47  ;;  %v392_v4 = vmax.f32 %v360_v54, 0.0  ;;  %v332_v6 = vadd.f32 %v606_v1, %v296_v58  ;;  %v265_v26 = vld [vmem:[%s601_s25 + $0x78] sm:$0xff]  ;;  %v236_v27 = vld [vmem:[%s595_s22 + $0x90] sm:$0xff]  ;;  %v238_v33 = vld [vmem:[%s595_s22 + $0xa0] sm:$0xff] }
  0x1a   : > { %421 = vst [vmem:[%s637_s30 + $0x18] sm:$0xff] %v389_v48  ;;  %v393_v5 = vmax.f32 %v361_v55, 0.0  ;;  %v299_v9 = vmul.f32 %v587_v0, %v231_v52  ;;  %v362_v10 = vadd.f32 %v330_v59, %v258_v56  ;;  %v333_v12 = vadd.f32 %v606_v1, %v297_v62  ;;  %v237_v32 = vld [vmem:[%s595_s22 + $0x98] sm:$0xff]  ;;  %v239_v38 = vld [vmem:[%s595_s22 + $0xa8] sm:$0xff]  ;;  %v266_v42 = vld [vmem:[%s601_s25 + $0x80] sm:$0xff] }
  0x1b   : > { %422 = vst [vmem:[%s637_s30 + $0x20] sm:$0xff] %v390_v49  ;;  %v363_v11 = vadd.f32 %v331_v60, %v259_v57  ;;  %v334_v13 = vadd.f32 %v606_v1, %v298_v63  ;;  %v364_v15 = vadd.f32 %v332_v6, %v260_v61  ;;  %v300_v17 = vmul.f32 %v587_v0, %v232_v2  ;;  %v267_v43 = vld [vmem:[%s601_s25 + $0x88] sm:$0xff]  ;;  %v268_v47 = vld [vmem:[%s601_s25 + $0x90] sm:$0xff]  ;;  %v241_v51 = vld [vmem:[%s595_s22 + $0xb8] sm:$0xff] }
  0x1c   : > { %423 = vst [vmem:[%s637_s30 + $0x28] sm:$0xff] %v391_v53  ;;  %v335_v16 = vadd.f32 %v606_v1, %v299_v9  ;;  %v301_v18 = vmul.f32 %v587_v0, %v233_v3  ;;  %v394_v21 = vmax.f32 %v362_v10, 0.0  ;;  %v365_v23 = vadd.f32 %v333_v12, %v261_v7  ;;  %v240_v50 = vld [vmem:[%s595_s22 + $0xb0] sm:$0xff]  ;;  %v269_v55 = vld [vmem:[%s601_s25 + $0x98] sm:$0xff]  ;;  %v270_v56 = vld [vmem:[%s601_s25 + $0xa0] sm:$0xff] }
  0x1d   : > { %424 = vst [vmem:[%s637_s30 + $0x30] sm:$0xff] %v392_v4  ;;  %v395_v22 = vmax.f32 %v363_v11, 0.0  ;;  %v366_v24 = vadd.f32 %v334_v13, %v262_v8  ;;  %v396_v28 = vmax.f32 %v364_v15, 0.0  ;;  %v336_v30 = vadd.f32 %v606_v1, %v300_v17  ;;  %v271_v62 = vld [vmem:[%s601_s25 + $0xa8] sm:$0xff]  ;;  %v272_v11 = vld [vmem:[%s601_s25 + $0xb0] sm:$0xff]  ;;  %v273_v12 = vld [vmem:[%s601_s25 + $0xb8] sm:$0xff] }
  0x1e   : > { %425 = vst [vmem:[%s637_s30 + $0x38] sm:$0xff] %v393_v5  ;;  %v367_v29 = vadd.f32 %v335_v16, %v263_v14  ;;  %v337_v31 = vadd.f32 %v606_v1, %v301_v18  ;;  %v397_v34 = vmax.f32 %v365_v23, 0.0  ;;  %v302_v36 = vmul.f32 %v587_v0, %v234_v19  ;;  %v242_v5 = vld [vmem:[%s595_s22 + $0xc0] sm:$0xff]  ;;  %v243_v6 = vld [vmem:[%s595_s22 + $0xc8] sm:$0xff]  ;;  %v244_v13 = vld [vmem:[%s595_s22 + $0xd0] sm:$0xff] }
  0x1f   : > { %426 = vst [vmem:[%s637_s30 + $0x40] sm:$0xff] %v394_v21  ;;  %v398_v35 = vmax.f32 %v366_v24, 0.0  ;;  %v303_v37 = vmul.f32 %v587_v0, %v235_v20  ;;  %v368_v40 = vadd.f32 %v336_v30, %v264_v25  ;;  %v304_v44 = vmul.f32 %v587_v0, %v236_v27  ;;  %v245_v18 = vld [vmem:[%s595_s22 + $0xd8] sm:$0xff]  ;;  %v246_v19 = vld [vmem:[%s595_s22 + $0xe0] sm:$0xff]  ;;  %v247_v24 = vld [vmem:[%s595_s22 + $0xe8] sm:$0xff] }
  0x20   : > { %427 = vst [vmem:[%s637_s30 + $0x48] sm:$0xff] %v395_v22  ;;  %v399_v39 = vmax.f32 %v367_v29, 0.0  ;;  %v369_v41 = vadd.f32 %v337_v31, %v265_v26  ;;  %v338_v45 = vadd.f32 %v606_v1, %v302_v36  ;;  %v305_v48 = vmul.f32 %v587_v0, %v237_v32  ;;  %v275_v29 = vld [vmem:[%s601_s25 + $0xc8] sm:$0xff]  ;;  %v248_v36 = vld [vmem:[%s595_s22 + $0xf0] sm:$0xff] }
  0x21   : > { %428 = vst [vmem:[%s637_s30 + $0x50] sm:$0xff] %v396_v28  ;;  %v339_v46 = vadd.f32 %v606_v1, %v303_v37  ;;  %v306_v49 = vmul.f32 %v587_v0, %v238_v33  ;;  %v400_v52 = vmax.f32 %v368_v40, 0.0  ;;  %v340_v54 = vadd.f32 %v606_v1, %v304_v44  ;;  %v274_v28 = vld [vmem:[%s601_s25 + $0xc0] sm:$0xff]  ;;  %v276_v33 = vld [vmem:[%s601_s25 + $0xd0] sm:$0xff]  ;;  %v249_v37 = vld [vmem:[%s595_s22 + $0xf8] sm:$0xff] }
  0x22   : > { %429 = vst [vmem:[%s637_s30 + $0x58] sm:$0xff] %v397_v34  ;;  %v401_v53 = vmax.f32 %v369_v41, 0.0  ;;  %v307_v57 = vmul.f32 %v587_v0, %v239_v38  ;;  %v370_v58 = vadd.f32 %v338_v45, %v266_v42  ;;  %v341_v60 = vadd.f32 %v606_v1, %v305_v48  ;;  %v277_v41 = vld [vmem:[%s601_s25 + $0xd8] sm:$0xff]  ;;  %v278_v42 = vld [vmem:[%s601_s25 + $0xe0] sm:$0xff]  ;;  %v279_v48 = vld [vmem:[%s601_s25 + $0xe8] sm:$0xff] }
  0x23   : > { %430 = vst [vmem:[%s637_s30 + $0x60] sm:$0xff] %v398_v35  ;;  %v371_v59 = vadd.f32 %v339_v46, %v267_v43  ;;  %v342_v61 = vadd.f32 %v606_v1, %v306_v49  ;;  %v372_v63 = vadd.f32 %v340_v54, %v268_v47  ;;  %v308_v3 = vmul.f32 %v587_v0, %v240_v50 }
  0x24   : > { %431 = vst [vmem:[%s637_s30 + $0x68] sm:$0xff] %v399_v39  ;;  %v343_v2 = vadd.f32 %v606_v1, %v307_v57  ;;  %v309_v4 = vmul.f32 %v587_v0, %v241_v51  ;;  %v402_v7 = vmax.f32 %v370_v58, 0.0  ;;  %v373_v9 = vadd.f32 %v341_v60, %v269_v55  ;;  %v280_v57 = vld [vmem:[%s601_s25 + $0xf0] sm:$0xff]  ;;  %v281_v58 = vld [vmem:[%s601_s25 + $0xf8] sm:$0xff] }
  0x25   : > { %432 = vst [vmem:[%s637_s30 + $0x70] sm:$0xff] %v400_v52  ;;  %v403_v8 = vmax.f32 %v371_v59, 0.0  ;;  %v374_v10 = vadd.f32 %v342_v61, %v270_v56  ;;  %v404_v14 = vmax.f32 %v372_v63, 0.0  ;;  %v344_v16 = vadd.f32 %v606_v1, %v308_v3 }
  0x26   : > { %433 = vst [vmem:[%s637_s30 + $0x78] sm:$0xff] %v401_v53  ;;  %v375_v15 = vadd.f32 %v343_v2, %v271_v62  ;;  %v345_v17 = vadd.f32 %v606_v1, %v309_v4  ;;  %v405_v20 = vmax.f32 %v373_v9, 0.0  ;;  %v310_v22 = vmul.f32 %v587_v0, %v242_v5 }
  0x27   : > { %434 = vst [vmem:[%s637_s30 + $0x80] sm:$0xff] %v402_v7  ;;  %v406_v21 = vmax.f32 %v374_v10, 0.0  ;;  %v311_v23 = vmul.f32 %v587_v0, %v243_v6  ;;  %v376_v26 = vadd.f32 %v344_v16, %v272_v11  ;;  %v312_v30 = vmul.f32 %v587_v0, %v244_v13 }
  0x28   : > { %435 = vst [vmem:[%s637_s30 + $0x88] sm:$0xff] %v403_v8  ;;  %v407_v25 = vmax.f32 %v375_v15, 0.0  ;;  %v377_v27 = vadd.f32 %v345_v17, %v273_v12  ;;  %v346_v31 = vadd.f32 %v606_v1, %v310_v22  ;;  %v313_v34 = vmul.f32 %v587_v0, %v245_v18 }
  0x29   : > { %436 = vst [vmem:[%s637_s30 + $0x90] sm:$0xff] %v404_v14  ;;  %v347_v32 = vadd.f32 %v606_v1, %v311_v23  ;;  %v314_v35 = vmul.f32 %v587_v0, %v246_v19  ;;  %v408_v38 = vmax.f32 %v376_v26, 0.0  ;;  %v348_v40 = vadd.f32 %v606_v1, %v312_v30 }
  0x2a   : > { %437 = vst [vmem:[%s637_s30 + $0x98] sm:$0xff] %v405_v20  ;;  %v409_v39 = vmax.f32 %v377_v27, 0.0  ;;  %v315_v43 = vmul.f32 %v587_v0, %v247_v24  ;;  %v378_v44 = vadd.f32 %v346_v31, %v274_v28  ;;  %v349_v46 = vadd.f32 %v606_v1, %v313_v34 }
  0x2b   : > { %438 = vst [vmem:[%s637_s30 + $0xa0] sm:$0xff] %v406_v21  ;;  %v379_v45 = vadd.f32 %v347_v32, %v275_v29  ;;  %v350_v47 = vadd.f32 %v606_v1, %v314_v35  ;;  %v380_v49 = vadd.f32 %v348_v40, %v276_v33  ;;  %v316_v51 = vmul.f32 %v587_v0, %v248_v36 }
  0x2c   : > { %439 = vst [vmem:[%s637_s30 + $0xa8] sm:$0xff] %v407_v25  ;;  %v351_v50 = vadd.f32 %v606_v1, %v315_v43  ;;  %v317_v52 = vmul.f32 %v587_v0, %v249_v37  ;;  %v410_v53 = vmax.f32 %v378_v44, 0.0  ;;  %v381_v55 = vadd.f32 %v349_v46, %v277_v41 }
  0x2d   : > { %440 = vst [vmem:[%s637_s30 + $0xb0] sm:$0xff] %v408_v38  ;;  %v411_v54 = vmax.f32 %v379_v45, 0.0  ;;  %v382_v56 = vadd.f32 %v350_v47, %v278_v42  ;;  %v412_v59 = vmax.f32 %v380_v49, 0.0  ;;  %v352_v61 = vadd.f32 %v606_v1, %v316_v51 }
  0x2e   : > { %441 = vst [vmem:[%s637_s30 + $0xb8] sm:$0xff] %v409_v39  ;;  %v383_v60 = vadd.f32 %v351_v50, %v279_v48  ;;  %v353_v0 = vadd.f32 %v606_v1, %v317_v52  ;;  %v413_v62 = vmax.f32 %v381_v55, 0.0 }
  0x2f   : > { %442 = vst [vmem:[%s637_s30 + $0xc0] sm:$0xff] %v410_v53  ;;  %v414_v63 = vmax.f32 %v382_v56, 0.0  ;;  %v384_v3 = vadd.f32 %v352_v61, %v280_v57 }
  0x30   : > { %443 = vst [vmem:[%s637_s30 + $0xc8] sm:$0xff] %v411_v54  ;;  %v415_v2 = vmax.f32 %v383_v60, 0.0  ;;  %v385_v4 = vadd.f32 %v353_v0, %v281_v58 }
  0x31   : > { %444 = vst [vmem:[%s637_s30 + $0xd0] sm:$0xff] %v412_v59  ;;  %v416_v5 = vmax.f32 %v384_v3, 0.0 }
  0x32   : > { %445 = vst [vmem:[%s637_s30 + $0xd8] sm:$0xff] %v413_v62  ;;  %v417_v6 = vmax.f32 %v385_v4, 0.0 }
  0x33   : > { %446 = vst [vmem:[%s637_s30 + $0xe0] sm:$0xff] %v414_v63 }
  0x34   : > { %447 = vst [vmem:[%s637_s30 + $0xe8] sm:$0xff] %v415_v2 }
  0x35   : > { %448 = vst [vmem:[%s637_s30 + $0xf0] sm:$0xff] %v416_v5 }
  0x36   : > { %449 = vst [vmem:[%s637_s30 + $0xf8] sm:$0xff] %v417_v6 }
  0x37 PF: > { %s14_s15 = sadd.s32 1, %s549_s15  }
  0x38   : > { %p11_p4 = scmp.ge.s32.totalorder %s14_s15, 4  }
  0x3a   :  { %13 = sbr.rel (!%p11_p4) target bundleno = 1 (0x1), region = 69 }

// kernel: residual_block_forward.4
= control target key start
LH: loop header
LB: loop body
LE: loop exit
PB: predicated region body
PF: predicated region fallthrough
CT: control target
= control target key end

     0   :  { %s3208_s18 = smov 0   ;;  %s4586_s0 = inlined_call_operand.vmem [shape: f32[2,320,128], index: 0, kind: input, shape index: {}]   ;;  %s4587_s1 = inlined_call_operand.vmem [shape: f32[9,128,128], index: 1, kind: input, shape index: {}]   ;;  %s4588_s2 = inlined_call_operand.vmem [shape: f32[1,128], index: 2, kind: input, shape index: {}]   ;;  %s4589_s3 = inlined_call_operand.vmem [shape: f32[2,256,128], index: 3, kind: output, shape index: {0}]   ;;  %s4590_s4 = inlined_call_operand.vmem [shape: f32[2,1,128], index: 4, kind: output, shape index: {1}]   ;;  %s4591_s5 = inlined_call_operand.vmem [shape: f32[2,1,128], index: 5, kind: output, shape index: {2}]  }
   0x1 LB: > { %s2877_s19 = sadd.s32 4294967295, %s3176_s18   ;;  %p2881_p0 = scmp.ge.s32.totalorder %s3176_s18, 1  ;;  %s3176_s18 = sphi %s3208_s18, %s16_s18  }
   0x2   : > { %p192_p1 = scmp.lt.s32.totalorder %s3176_s18, 3 }
   0x4   : > { %p193_p2 = pnand %p2881_p0, %p192_p1 }
   0x6   : > { %196 = sbr.rel (%p193_p2) target bundleno = 768 (0x300), region = 32 }
   0xb   : > { %v2900_v0 = vld [vmem:[%s4587_s1 + $0xf8] sm:$0xff]  ;;  %v2899_v1 = vld [vmem:[%s4587_s1 + $0xf0] sm:$0xff]  ;;  %v2898_v2 = vld [vmem:[%s4587_s1 + $0xe8] sm:$0xff]  ;;  %p226_p3 = scmp.lt.s32.totalorder %s2877_s19, 1 }
   0xc   : > { %3112 = vmatpush.msra.mxu1 %v2900_v0  ;;  %3113 = vmatpush.msra.mxu2 %v2900_v0  ;;  %v2897_v3 = vld [vmem:[%s4587_s1 + $0xe0] sm:$0xff]  ;;  %v2896_v4 = vld [vmem:[%s4587_s1 + $0xd8] sm:$0xff]  ;;  %v2895_v5 = vld [vmem:[%s4587_s1 + $0xd0] sm:$0xff] }
   0xd   : > { %3114 = vmatpush.msra.mxu3 %v2900_v0  ;;  %852 = vmatpush.msra.mxu0 %v2900_v0  ;;  %v2894_v6 = vld [vmem:[%s4587_s1 + $0xc8] sm:$0xff]  ;;  %v2893_v7 = vld [vmem:[%s4587_s1 + $0xc0] sm:$0xff]  ;;  %v2892_v8 = vld [vmem:[%s4587_s1 + $0xb8] sm:$0xff]  ;;  %s4747_s19 = smov (!%p226_p3, %s2877_s19), 1 }
   0xe   : > { %3115 = vmatpush.msra.mxu1 %v2899_v1  ;;  %3116 = vmatpush.msra.mxu2 %v2899_v1  ;;  %v2891_v9 = vld [vmem:[%s4587_s1 + $0xb0] sm:$0xff]  ;;  %v2890_v10 = vld [vmem:[%s4587_s1 + $0xa8] sm:$0xff]  ;;  %v2889_v11 = vld [vmem:[%s4587_s1 + $0xa0] sm:$0xff]  ;;  %s3160_s23 = smul.u32 320, %s4747_s19  ;;  %s3111_s24 = sshll.u32 %s4747_s19, 8 }
   0xf   : > { %3117 = vmatpush.msra.mxu3 %v2899_v1  ;;  %853 = vmatpush.msra.mxu0 %v2899_v1  ;;  %v2888_v12 = vld [vmem:[%s4587_s1 + $0x98] sm:$0xff]  ;;  %v2887_v13 = vld [vmem:[%s4587_s1 + $0x90] sm:$0xff]  ;;  %v2886_v14 = vld [vmem:[%s4587_s1 + $0x88] sm:$0xff]  ;;  %s4391_s29 = scalar_lea.vmem %s4589_s3, %s3111_s24  ;;  %s238_s7 = scalar_lea.vmem %s4590_s4, %s4747_s19 }
  0x10   : > { %3118 = vmatpush.msra.mxu1 %v2898_v2  ;;  %3119 = vmatpush.msra.mxu2 %v2898_v2  ;;  %s3271_s30 = scalar_lea.vmem %s4586_s0, %s3160_s23  ;;  %v2885_v15 = vld [vmem:[%s4587_s1 + $0x80] sm:$0xff]  ;;  %v2932_v18 = vld [vmem:[%s4587_s1 + $0x178] sm:$0xff]  ;;  %v2931_v22 = vld [vmem:[%s4587_s1 + $0x170] sm:$0xff]  ;;  %s241_s10 = scalar_lea.vmem %s4591_s5, %s4747_s19 }
  0x11   : > { %3120 = vmatpush.msra.mxu3 %v2898_v2  ;;  %854 = vmatpush.msra.mxu0 %v2898_v2  ;;  %v3277_v16 = vld [vmem:[%s3271_s30 + $0x50] sm:$0xff]  ;;  %v802_v20 = vld [vmem:[%s4587_s1 + $0x78] sm:$0xff]  ;;  %v2930_v25 = vld [vmem:[%s4587_s1 + $0x168] sm:$0xff] }
  0x12   : > { %3121 = vmatpush.msra.mxu1 %v2897_v3  ;;  %3122 = vmatpush.msra.mxu2 %v2897_v3  ;;  %v3280_v17 = vld [vmem:[%s3271_s30 + $0x90] sm:$0xff]  ;;  %v2964_v21 = vld [vmem:[%s4587_s1 + $0x1f8] sm:$0xff]  ;;  %v800_v27 = vld [vmem:[%s4587_s1 + $0x68] sm:$0xff] }
  0x13   : > { %3123 = vmatpush.msra.mxu3 %v2897_v3  ;;  %855 = vmatpush.msra.mxu0 %v2897_v3  ;;  %v827_v19 = vld [vmem:[%s3271_s30 + $0xd0] sm:$0xff]  ;;  %v2962_v28 = vld [vmem:[%s4587_s1 + $0x1e8] sm:$0xff]  ;;  %v2996_v29 = vld [vmem:[%s4587_s1 + $0x278] sm:$0xff] }
  0x14   : > { %3124 = vmatpush.msra.mxu1 %v2896_v4  ;;  %3125 = vmatpush.msra.mxu2 %v2896_v4  ;;  %v801_v23 = vld [vmem:[%s4587_s1 + $0x70] sm:$0xff]  ;;  %v3317_v30 = vld [vmem:[%s3271_s30 + $0x58] sm:$0xff]  ;;  %v2929_v32 = vld [vmem:[%s4587_s1 + $0x160] sm:$0xff] }
  0x15   : > { %3126 = vmatpush.msra.mxu3 %v2896_v4  ;;  %856 = vmatpush.msra.mxu0 %v2896_v4  ;;  %v2963_v24 = vld [vmem:[%s4587_s1 + $0x1f0] sm:$0xff]  ;;  %v3320_v31 = vld [vmem:[%s3271_s30 + $0x98] sm:$0xff]  ;;  %v2961_v33 = vld [vmem:[%s4587_s1 + $0x1e0] sm:$0xff] }
  0x16   : > { %3127 = vmatpush.msra.mxu1 %v2895_v5  ;;  %3128 = vmatpush.msra.mxu2 %v2895_v5  ;;  %v803_v26 = vld [vmem:[%s3271_s30 + $0x10] sm:$0xff]  ;;  %v828_v34 = vld [vmem:[%s3271_s30 + $0xd8] sm:$0xff]  ;;  %v799_v36 = vld [vmem:[%s4587_s1 + $0x60] sm:$0xff] }
  0x17   : > { %3129 = vmatpush.msra.mxu3 %v2895_v5  ;;  %857 = vmatpush.msra.mxu0 %v2895_v5  ;;  %v2995_v35 = vld [vmem:[%s4587_s1 + $0x270] sm:$0xff]  ;;  %v2928_v37 = vld [vmem:[%s4587_s1 + $0x158] sm:$0xff]  ;;  %v2994_v39 = vld [vmem:[%s4587_s1 + $0x268] sm:$0xff] }
  0x18   : > { %3130 = vmatpush.msra.mxu1 %v2894_v6  ;;  %3131 = vmatpush.msra.mxu2 %v2894_v6  ;;  %v2960_v38 = vld [vmem:[%s4587_s1 + $0x1d8] sm:$0xff]  ;;  %v2927_v41 = vld [vmem:[%s4587_s1 + $0x150] sm:$0xff]  ;;  %v2993_v44 = vld [vmem:[%s4587_s1 + $0x260] sm:$0xff] }
  0x19   : > { %3132 = vmatpush.msra.mxu3 %v2894_v6  ;;  %858 = vmatpush.msra.mxu0 %v2894_v6  ;;  %v798_v40 = vld [vmem:[%s4587_s1 + $0x58] sm:$0xff]  ;;  %v2959_v43 = vld [vmem:[%s4587_s1 + $0x1d0] sm:$0xff]  ;;  %v3363_v46 = vld [vmem:[%s3271_s30 + $0x60] sm:$0xff] }
  0x1a   : > { %3133 = vmatpush.msra.mxu1 %v2893_v7  ;;  %3134 = vmatpush.msra.mxu2 %v2893_v7  ;;  %v804_v42 = vld [vmem:[%s3271_s30 + $0x18] sm:$0xff]  ;;  %v797_v45 = vld [vmem:[%s4587_s1 + $0x50] sm:$0xff]  ;;  %v3366_v47 = vld [vmem:[%s3271_s30 + $0xa0] sm:$0xff] }
  0x1b   : > { %3135 = vmatpush.msra.mxu3 %v2893_v7  ;;  %859 = vmatpush.msra.mxu0 %v2893_v7  ;;  %v2926_v48 = vld [vmem:[%s4587_s1 + $0x148] sm:$0xff]  ;;  %v829_v50 = vld [vmem:[%s3271_s30 + $0xe0] sm:$0xff]  ;;  %v2992_v51 = vld [vmem:[%s4587_s1 + $0x258] sm:$0xff] }
  0x1c   : > { %3136 = vmatpush.msra.mxu1 %v2892_v8  ;;  %3137 = vmatpush.msra.mxu2 %v2892_v8  ;;  %v2958_v49 = vld [vmem:[%s4587_s1 + $0x1c8] sm:$0xff]  ;;  %v2925_v53 = vld [vmem:[%s4587_s1 + $0x140] sm:$0xff]  ;;  %v2991_v55 = vld [vmem:[%s4587_s1 + $0x250] sm:$0xff] }
  0x1d   : > { %3138 = vmatpush.msra.mxu3 %v2892_v8  ;;  %860 = vmatpush.msra.mxu0 %v2892_v8  ;;  %v796_v52 = vld [vmem:[%s4587_s1 + $0x48] sm:$0xff]  ;;  %v2957_v54 = vld [vmem:[%s4587_s1 + $0x1c0] sm:$0xff]  ;;  %v2924_v57 = vld [vmem:[%s4587_s1 + $0x138] sm:$0xff] }
  0x1e   : > { %3139 = vmatpush.msra.mxu1 %v2891_v9  ;;  %3140 = vmatpush.msra.mxu2 %v2891_v9  ;;  %v795_v56 = vld [vmem:[%s4587_s1 + $0x40] sm:$0xff]  ;;  %v2956_v59 = vld [vmem:[%s4587_s1 + $0x1b8] sm:$0xff]  ;;  %v2990_v60 = vld [vmem:[%s4587_s1 + $0x248] sm:$0xff] }
  0x1f   : > { %3141 = vmatpush.msra.mxu3 %v2891_v9  ;;  %861 = vmatpush.msra.mxu0 %v2891_v9  ;;  %v3399_v58 = vld [vmem:[%s3271_s30 + $0x20] sm:$0xff]  ;;  %v794_v61 = vld [vmem:[%s4587_s1 + $0x38] sm:$0xff]  ;;  %v3411_v62 = vld [vmem:[%s3271_s30 + $0x68] sm:$0xff] }
  0x20   : > { %3142 = vmatpush.msra.mxu1 %v2890_v10  ;;  %3143 = vmatpush.msra.mxu2 %v2890_v10  ;;  %v3414_v63 = vld [vmem:[%s3271_s30 + $0xa8] sm:$0xff]  ;;  %v2923_v0 = vld [vmem:[%s4587_s1 + $0x130] sm:$0xff]  ;;  %v2989_v3 = vld [vmem:[%s4587_s1 + $0x240] sm:$0xff] }
  0x21   : > { %3144 = vmatpush.msra.mxu3 %v2890_v10  ;;  %862 = vmatpush.msra.mxu0 %v2890_v10  ;;  %v2955_v1 = vld [vmem:[%s4587_s1 + $0x1b0] sm:$0xff]  ;;  %v830_v2 = vld [vmem:[%s3271_s30 + $0xe8] sm:$0xff]  ;;  %v2988_v7 = vld [vmem:[%s4587_s1 + $0x238] sm:$0xff] }
  0x22   : > { %3145 = vmatpush.msra.mxu1 %v2889_v11  ;;  %3146 = vmatpush.msra.mxu2 %v2889_v11  ;;  %v793_v4 = vld [vmem:[%s4587_s1 + $0x30] sm:$0xff]  ;;  %v2922_v5 = vld [vmem:[%s4587_s1 + $0x128] sm:$0xff]  ;;  %v2921_v9 = vld [vmem:[%s4587_s1 + $0x120] sm:$0xff] }
  0x23   : > { %3147 = vmatpush.msra.mxu3 %v2889_v11  ;;  %863 = vmatpush.msra.mxu0 %v2889_v11  ;;  %v2954_v6 = vld [vmem:[%s4587_s1 + $0x1a8] sm:$0xff]  ;;  %v2953_v11 = vld [vmem:[%s4587_s1 + $0x1a0] sm:$0xff] }
  0x24   : > { %3148 = vmatpush.msra.mxu1 %v2888_v12  ;;  %3149 = vmatpush.msra.mxu2 %v2888_v12  ;;  %v792_v8 = vld [vmem:[%s4587_s1 + $0x28] sm:$0xff] }
  0x25   : > { %3150 = vmatpush.msra.mxu3 %v2888_v12  ;;  %864 = vmatpush.msra.mxu0 %v2888_v12  ;;  %v3448_v10 = vld [vmem:[%s3271_s30 + $0x28] sm:$0xff]  ;;  %v2987_v12 = vld [vmem:[%s4587_s1 + $0x230] sm:$0xff] }
  0x26   : > { %3151 = vmatpush.msra.mxu1 %v2887_v13  ;;  %3152 = vmatpush.msra.mxu2 %v2887_v13 }
  0x27   : > { %3153 = vmatpush.msra.mxu3 %v2887_v13  ;;  %865 = vmatpush.msra.mxu0 %v2887_v13  ;;  %v791_v13 = vld [vmem:[%s4587_s1 + $0x20] sm:$0xff] }
  0x28   : > { %3154 = vmatpush.msra.mxu1 %v2886_v14  ;;  %3155 = vmatpush.msra.mxu2 %v2886_v14 }
  0x29   : > { %3156 = vmatpush.msra.mxu3 %v2886_v14  ;;  %866 = vmatpush.msra.mxu0 %v2886_v14  ;;  %v3460_v14 = vld [vmem:[%s3271_s30 + $0x70] sm:$0xff] }
  0x2a   : > { %3157 = vmatpush.msra.mxu1 %v2885_v15  ;;  %3158 = vmatpush.msra.mxu2 %v2885_v15 }
  0x2b   : > { %892 = vmatmul.f32.vlgmr.msra.gmra.mxu1 %v3277_v16  ;;  %916 = vmatmul.f32.vlgmr.msra.gmra.mxu2 %v3280_v17 }
  0x2c   : > { %1159 = vmatpush.msrb.mxu2 %v2932_v18  ;;  %3159 = vmatpush.msra.mxu3 %v2885_v15  ;;  %v2920_v18 = vld [vmem:[%s4587_s1 + $0x118] sm:$0xff] }
  0x2d   : > { %940 = vmatmul.f32.vlgmr.msra.gmra.mxu3 %v827_v19  ;;  %965 = vmatpush.msrb.mxu1 %v802_v20  ;;  %v2952_v19 = vld [vmem:[%s4587_s1 + $0x198] sm:$0xff]  ;;  %v831_v20 = vld [vmem:[%s3271_s30 + $0xf0] sm:$0xff] }
  0x2e   : > { %1385 = vmatpush.msrb.mxu3 %v2964_v21  ;;  %1160 = vmatpush.msrb.mxu2 %v2931_v22  ;;  %v2986_v21 = vld [vmem:[%s4587_s1 + $0x228] sm:$0xff]  ;;  %v790_v22 = vld [vmem:[%s4587_s1 + $0x18] sm:$0xff] }
  0x2f   : > { %966 = vmatpush.msrb.mxu1 %v801_v23  ;;  %867 = vmatpush.msra.mxu0 %v2885_v15  ;;  %v3463_v15 = vld [vmem:[%s3271_s30 + $0xb0] sm:$0xff] }
  0x30   : > { %1386 = vmatpush.msrb.mxu3 %v2963_v24  ;;  %1161 = vmatpush.msrb.mxu2 %v2930_v25  ;;  %v2919_v23 = vld [vmem:[%s4587_s1 + $0x110] sm:$0xff]  ;;  %v2985_v25 = vld [vmem:[%s4587_s1 + $0x220] sm:$0xff] }
  0x31   : > { %868 = vmatmul.f32.vlgmr.msra.gmra.mxu0 %v803_v26  ;;  %967 = vmatpush.msrb.mxu1 %v800_v27  ;;  %v2951_v24 = vld [vmem:[%s4587_s1 + $0x190] sm:$0xff]  ;;  %v2918_v27 = vld [vmem:[%s4587_s1 + $0x108] sm:$0xff] }
  0x32   : > { %1387 = vmatpush.msrb.mxu3 %v2962_v28  ;;  %1579 = vmatpush.msrb.mxu0 %v2996_v29  ;;  %v789_v26 = vld [vmem:[%s4587_s1 + $0x10] sm:$0xff]  ;;  %v2950_v29 = vld [vmem:[%s4587_s1 + $0x188] sm:$0xff] }
  0x33   : > { %895 = vmatmul.f32.gmra.mxu1 %v3317_v30  ;;  %919 = vmatmul.f32.gmra.mxu2 %v3320_v31  ;;  %v3497_v28 = vld [vmem:[%s3271_s30 + $0x30] sm:$0xff] }
  0x34   : > { %1162 = vmatpush.msrb.mxu2 %v2929_v32  ;;  %1388 = vmatpush.msrb.mxu3 %v2961_v33  ;;  %v2984_v32 = vld [vmem:[%s4587_s1 + $0x218] sm:$0xff]  ;;  %v788_v33 = vld [vmem:[%s4587_s1 + $0x8] sm:$0xff] }
  0x35   : > { %943 = vmatmul.f32.gmra.mxu3 %v828_v34  ;;  %1580 = vmatpush.msrb.mxu0 %v2995_v35  ;;  %v3509_v34 = vld [vmem:[%s3271_s30 + $0x78] sm:$0xff] }
  0x36   : > { %968 = vmatpush.msrb.mxu1 %v799_v36  ;;  %1163 = vmatpush.msrb.mxu2 %v2928_v37  ;;  %v3512_v35 = vld [vmem:[%s3271_s30 + $0xb8] sm:$0xff]  ;;  %v2917_v36 = vld [vmem:[%s4587_s1 + $0x100] sm:$0xff] }
  0x37   : > { %1389 = vmatpush.msrb.mxu3 %v2960_v38  ;;  %1581 = vmatpush.msrb.mxu0 %v2994_v39  ;;  %v2949_v37 = vld [vmem:[%s4587_s1 + $0x180] sm:$0xff]  ;;  %v832_v38 = vld [vmem:[%s3271_s30 + $0xf8] sm:$0xff]  ;;  %v2983_v39 = vld [vmem:[%s4587_s1 + $0x210] sm:$0xff] }
  0x38   : > { %969 = vmatpush.msrb.mxu1 %v798_v40  ;;  %1164 = vmatpush.msrb.mxu2 %v2927_v41  ;;  %v787_v40 = vld [vmem:[%s4587_s1] sm:$0xff]  ;;  %v3044_v41 = vld [vmem:[%s4587_s1 + $0x378] sm:$0xff] }
  0x39   : > { %871 = vmatmul.f32.gmra.mxu0 %v804_v42  ;;  %1390 = vmatpush.msrb.mxu3 %v2959_v43  ;;  %v2982_v42 = vld [vmem:[%s4587_s1 + $0x208] sm:$0xff]  ;;  %v3076_v43 = vld [vmem:[%s4587_s1 + $0x3f8] sm:$0xff] }
  0x3a   : > { %1582 = vmatpush.msrb.mxu0 %v2993_v44  ;;  %970 = vmatpush.msrb.mxu1 %v797_v45  ;;  %v3012_v44 = vld [vmem:[%s4587_s1 + $0x2f8] sm:$0xff] }
  0x3b   : > { %898 = vmatmul.f32.gmra.mxu1 %v3363_v46  ;;  %922 = vmatmul.f32.gmra.mxu2 %v3366_v47  ;;  %v3543_v45 = vld [vmem:[%s3271_s30 + $0x38] sm:$0xff] }
  0x3c   : > { %1165 = vmatpush.msrb.mxu2 %v2926_v48  ;;  %1391 = vmatpush.msrb.mxu3 %v2958_v49  ;;  %v2981_v48 = vld [vmem:[%s4587_s1 + $0x200] sm:$0xff] }
  0x3d   : > { %946 = vmatmul.f32.gmra.mxu3 %v829_v50  ;;  %1583 = vmatpush.msrb.mxu0 %v2992_v51  ;;  %v3549_v49 = vld [vmem:[%s3271_s30 + $0x80] sm:$0xff]  ;;  %v3092_v51 = vld [vmem:[%s4587_s1 + $0x478] sm:$0xff] }
  0x3e   : > { %971 = vmatpush.msrb.mxu1 %v796_v52  ;;  %1166 = vmatpush.msrb.mxu2 %v2925_v53  ;;  %v3552_v50 = vld [vmem:[%s3271_s30 + $0xc0] sm:$0xff]  ;;  %v3043_v53 = vld [vmem:[%s4587_s1 + $0x370] sm:$0xff] }
  0x3f   : > { %1392 = vmatpush.msrb.mxu3 %v2957_v54  ;;  %1584 = vmatpush.msrb.mxu0 %v2991_v55  ;;  %v833_v52 = vld [vmem:[%s3271_s30 + $0x100] sm:$0xff]  ;;  %v242_v54 = vlaneseq  ;;  %v3075_v55 = vld [vmem:[%s4587_s1 + $0x3f0] sm:$0xff] }
  0x40   : > { %972 = vmatpush.msrb.mxu1 %v795_v56  ;;  %1167 = vmatpush.msrb.mxu2 %v2924_v57  ;;  %v3011_v56 = vld [vmem:[%s4587_s1 + $0x2f0] sm:$0xff]  ;;  %v3571_v57 = vld [vmem:[%s3271_s30 + $0x40] sm:$0xff] }
  0x41   : > { %874 = vmatmul.f32.gmra.mxu0 %v3399_v58  ;;  %1393 = vmatpush.msrb.mxu3 %v2956_v59  ;;  %v3574_v59 = vld [vmem:[%s3271_s30 + $0x88] sm:$0xff] }
  0x42   : > { %1585 = vmatpush.msrb.mxu0 %v2990_v60  ;;  %973 = vmatpush.msrb.mxu1 %v794_v61  ;;  %v3577_v60 = vld [vmem:[%s3271_s30 + $0xc8] sm:$0xff]  ;;  %v3579_v61 = vshrl.u32 %v242_v54, 7  ;;  %v1083_v54 = vld [vmem:[%s3271_s30 + $0x39] sm:$0xff] }
  0x43   : > { %901 = vmatmul.f32.gmra.mxu1 %v3411_v62  ;;  %925 = vmatmul.f32.gmra.mxu2 %v3414_v63 }
  0x44   : > { %1168 = vmatpush.msrb.mxu2 %v2923_v0  ;;  %1394 = vmatpush.msrb.mxu3 %v2955_v1  ;;  %v834_v0 = vld [vmem:[%s3271_s30 + $0x108] sm:$0xff]  ;;  %v279_v1 = vand.u32 15, %v3579_v61 }
  0x45   : > { %949 = vmatmul.f32.gmra.mxu3 %v830_v2  ;;  %1586 = vmatpush.msrb.mxu0 %v2989_v3  ;;  %v3091_v2 = vld [vmem:[%s4587_s1 + $0x470] sm:$0xff]  ;;  %v3590_v3 = vld [vmem:[%s3271_s30 + $0x48] sm:$0xff] }
  0x46   : > { %974 = vmatpush.msrb.mxu1 %v793_v4  ;;  %1169 = vmatpush.msrb.mxu2 %v2922_v5  ;;  %vm3592_vm0 = vcmp.ne.s32.totalorder %v279_v1, 0  ;;  %v723_v5 = vld [vmem:[%s3271_s30 + $0xf] sm:$0xff]  ;;  %v3088_v1 = vld [vmem:[%s4587_s1 + $0x458] sm:$0xff] }
  0x47   : > { %1395 = vmatpush.msrb.mxu3 %v2954_v6  ;;  %1587 = vmatpush.msrb.mxu0 %v2988_v7  ;;  %v1078_v6 = vld [vmem:[%s3271_s30 + $0x11] sm:$0xff]  ;;  %v244_v7 = vadd.s32 8, %v3579_v61 }
  0x48   : > { %975 = vmatpush.msrb.mxu1 %v792_v8  ;;  %1170 = vmatpush.msrb.mxu2 %v2921_v9  ;;  %v1304_v8 = vld [vmem:[%s3271_s30 + $0x1f] sm:$0xff]  ;;  %v3042_v9 = vld [vmem:[%s4587_s1 + $0x368] sm:$0xff] }
  0x49   : > { %877 = vmatmul.f32.gmra.mxu0 %v3448_v10  ;;  %1396 = vmatpush.msrb.mxu3 %v2953_v11  ;;  %v286_v11 = vand.u32 15, %v244_v7  ;;  %v3039_v7 = vld [vmem:[%s4587_s1 + $0x350] sm:$0xff] }
  0x4a   : > { %1588 = vmatpush.msrb.mxu0 %v2987_v12  ;;  %976 = vmatpush.msrb.mxu1 %v791_v13  ;;  %v3074_v12 = vld [vmem:[%s4587_s1 + $0x3e8] sm:$0xff] }
  0x4b   : > { %904 = vmatmul.f32.gmra.mxu1 %v3460_v14  ;;  %928 = vmatmul.f32.gmra.mxu2 %v3463_v15  ;;  %v3010_v13 = vld [vmem:[%s4587_s1 + $0x2e8] sm:$0xff]  ;;  %vm3615_vm1 = vcmp.ne.s32.totalorder %v286_v11, 15  ;;  %v1959_v11 = vld [vmem:[%s3271_s30 + $0x77] sm:$0xff] }
  0x4c   : > { %1171 = vmatpush.msrb.mxu2 %v2920_v18  ;;  %1397 = vmatpush.msrb.mxu3 %v2952_v19  ;;  %v724_v18 = vld [vmem:[%s3271_s30 + $0x17] sm:$0xff]  ;;  %v1953_v19 = vld [vmem:[%s3271_s30 + $0x47] sm:$0xff] }
  0x4d   : > { %952 = vmatmul.f32.gmra.mxu3 %v831_v20  ;;  %1589 = vmatpush.msrb.mxu0 %v2986_v21  ;;  %v1079_v20 = vld [vmem:[%s3271_s30 + $0x19] sm:$0xff]  ;;  %v245_v21 = vadd.s32 16, %v3579_v61 }
  0x4e   : > { %977 = vmatpush.msrb.mxu1 %v790_v22  ;;  %1172 = vmatpush.msrb.mxu2 %v2919_v23  ;;  %v1305_v22 = vld [vmem:[%s3271_s30 + $0x27] sm:$0xff] }
  0x4f   : > { %1398 = vmatpush.msrb.mxu3 %v2951_v24  ;;  %1590 = vmatpush.msrb.mxu0 %v2985_v25  ;;  %v293_v23 = vand.u32 15, %v245_v21  ;;  %v3090_v24 = vld [vmem:[%s4587_s1 + $0x468] sm:$0xff]  ;;  %v3087_v21 = vld [vmem:[%s4587_s1 + $0x450] sm:$0xff] }
  0x50   : > { %978 = vmatpush.msrb.mxu1 %v789_v26  ;;  %1173 = vmatpush.msrb.mxu2 %v2918_v27  ;;  %v1080_v26 = vld [vmem:[%s3271_s30 + $0x21] sm:$0xff]  ;;  %v1306_v27 = vld [vmem:[%s3271_s30 + $0x2f] sm:$0xff] }
  0x51   : > { %880 = vmatmul.f32.gmra.mxu0 %v3497_v28  ;;  %1399 = vmatpush.msrb.mxu3 %v2950_v29  ;;  %vm3628_vm2 = vcmp.ne.s32.totalorder %v293_v23, 0  ;;  %v3041_v29 = vld [vmem:[%s4587_s1 + $0x360] sm:$0xff] }
  0x52   : > { %1591 = vmatpush.msrb.mxu0 %v2984_v32  ;;  %979 = vmatpush.msrb.mxu1 %v788_v33  ;;  %v3073_v33 = vld [vmem:[%s4587_s1 + $0x3e0] sm:$0xff] }
  0x53   : > { %907 = vmatmul.f32.gmra.mxu1 %v3509_v34  ;;  %931 = vmatmul.f32.gmra.mxu2 %v3512_v35 }
  0x54   : > { %1174 = vmatpush.msrb.mxu2 %v2917_v36  ;;  %1400 = vmatpush.msrb.mxu3 %v2949_v37  ;;  %v1081_v37 = vld [vmem:[%s3271_s30 + $0x29] sm:$0xff]  ;;  %v1955_v36 = vld [vmem:[%s3271_s30 + $0x57] sm:$0xff] }
  0x55   : > { %955 = vmatmul.f32.gmra.mxu3 %v832_v38  ;;  %1592 = vmatpush.msrb.mxu0 %v2983_v39  ;;  %v247_v38 = vadd.s32 32, %v3579_v61  ;;  %v1307_v39 = vld [vmem:[%s3271_s30 + $0x37] sm:$0xff] }
  0x56   : > { %980 = vmatpush.msrb.mxu1 %v787_v40  ;;  %2031 = vmatpush.msra.mxu2 %v3044_v41  ;;  %v3089_v41 = vld [vmem:[%s4587_s1 + $0x460] sm:$0xff] }
  0x57   : > { %1593 = vmatpush.msrb.mxu0 %v2982_v42  ;;  %2225 = vmatpush.msra.mxu3 %v3076_v43  ;;  %v307_v40 = vand.u32 15, %v247_v38  ;;  %v1082_v43 = vld [vmem:[%s3271_s30 + $0x31] sm:$0xff]  ;;  %v1961_v38 = vld [vmem:[%s3271_s30 + $0x87] sm:$0xff] }
  0x58   : > { %1805 = vmatpush.msra.mxu1 %v3012_v44  ;;  %2032 = vmatpush.msra.mxu2 %v3043_v53  ;;  %v1308_v44 = vld [vmem:[%s3271_s30 + $0x3f] sm:$0xff]  ;;  %v1957_v53 = vld [vmem:[%s3271_s30 + $0x67] sm:$0xff] }
  0x59   : > { %883 = vmatmul.f32.gmra.mxu0 %v3543_v45  ;;  %2226 = vmatpush.msra.mxu3 %v3075_v55  ;;  %vm3662_vm4 = vcmp.ne.s32.totalorder %v307_v40, 0  ;;  %v249_v55 = vadd.s32 48, %v3579_v61  ;;  %v253_v40 = vadd.s32 80, %v3579_v61 }
  0x5a   : > { %1594 = vmatpush.msrb.mxu0 %v2981_v48  ;;  %1806 = vmatpush.msra.mxu1 %v3011_v56  ;;  %v3040_v48 = vld [vmem:[%s4587_s1 + $0x358] sm:$0xff]  ;;  %v1309_v56 = vld [vmem:[%s3271_s30 + $0x47] sm:$0xff] }
  0x5b   : > { %910 = vmatmul.f32.gmra.mxu1 %v3549_v49  ;;  %934 = vmatmul.f32.gmra.mxu2 %v3552_v50 }
  0x5c   : > { %2451 = vmatpush.msra.mxu0 %v3092_v51  ;;  %2033 = vmatpush.msra.mxu2 %v3042_v9  ;;  %v3071_v9 = vld [vmem:[%s4587_s1 + $0x3d0] sm:$0xff] }
  0x5d   : > { %958 = vmatmul.f32.gmra.mxu3 %v833_v52  ;;  %1807 = vmatpush.msra.mxu1 %v3010_v13  ;;  %v3072_v52 = vld [vmem:[%s4587_s1 + $0x3d8] sm:$0xff]  ;;  %v251_v13 = vadd.s32 64, %v3579_v61 }
  0x5e   : > { %2452 = vmatpush.msra.mxu0 %v3091_v2  ;;  %2227 = vmatpush.msra.mxu3 %v3074_v12  ;;  %v1085_v12 = vld [vmem:[%s3271_s30 + $0x49] sm:$0xff] }
  0x5f   : > { %2034 = vmatpush.msra.mxu2 %v3041_v29 }
  0x60   : > { %2453 = vmatpush.msra.mxu0 %v3090_v24  ;;  %2228 = vmatpush.msra.mxu3 %v3073_v33  ;;  %v1086_v24 = vld [vmem:[%s3271_s30 + $0x51] sm:$0xff]  ;;  %v3006_v33 = vld [vmem:[%s4587_s1 + $0x2c8] sm:$0xff] }
  0x61   : > { %886 = vmatmul.f32.gmra.mxu0 %v3571_v57  ;;  %2035 = vmatpush.msra.mxu2 %v3040_v48 }
  0x62   : > { %2454 = vmatpush.msra.mxu0 %v3089_v41  ;;  %2229 = vmatpush.msra.mxu3 %v3072_v52  ;;  %v1313_v41 = vld [vmem:[%s3271_s30 + $0x67] sm:$0xff] }
  0x63   : > { %913 = vmatmul.f32.gmra.mxu1 %v3574_v59  ;;  %937 = vmatmul.f32.gmra.mxu2 %v3577_v60 }
  0x64   : > { %2455 = vmatpush.msra.mxu0 %v3088_v1  ;;  %2036 = vmatpush.msra.mxu2 %v3039_v7 }
  0x65   : > { %961 = vmatmul.f32.gmra.mxu3 %v834_v0  ;;  %v321_v0 = vand.u32 15, %v249_v55  ;;  %v1314_v55 = vld [vmem:[%s3271_s30 + $0x6f] sm:$0xff] }
  0x66   : > { %2230 = vmatpush.msra.mxu3 %v3071_v9  ;;  %2456 = vmatpush.msra.mxu0 %v3087_v21  ;;  %v1089_v9 = vld [vmem:[%s3271_s30 + $0x69] sm:$0xff] }
  0x67   : > { %vm3696_vm6 = vcmp.ne.s32.totalorder %v321_v0, 0 }
  0x69   : > { %889 = vmatmul.f32.gmra.mxu0 %v3590_v3 }
  0x6b   : > { %2901 = vmatmul.msk.f32.vlgmr.msrb.gmra.mxu1 %vm3592_vm0, %v723_v5  ;;  %1175 = vmatmul.f32.vlgmr.msrb.gmra.mxu2 %v1078_v6  ;;  %v1084_v5 = vld [vmem:[%s3271_s30 + $0x41] sm:$0xff]  ;;  %v1310_v6 = vld [vmem:[%s3271_s30 + $0x4f] sm:$0xff] }
  0x6d   : > { %2965 = vmatmul.msk.f32.vlgmr.msrb.gmra.mxu3 %vm3592_vm0, %v1304_v8 }
  0x71   : > { %1595 = vmatmul.f32.vlgmr.msrb.gmra.mxu0 %v3399_v58  ;;  %v246_v58 = vadd.s32 24, %v3579_v61 }
  0x73   : > { %984 = vmatmul.f32.gmra.mxu1 %v724_v18  ;;  %2933 = vmatmul.msk.f32.gmra.mxu2 %vm3615_vm1, %v1079_v20  ;;  %v300_v32 = vand.u32 15, %v246_v58  ;;  %v1311_v18 = vld [vmem:[%s3271_s30 + $0x57] sm:$0xff]  ;;  %v335_v20 = vand.u32 15, %v251_v13  ;;  %v3038_v58 = vld [vmem:[%s4587_s1 + $0x348] sm:$0xff] }
  0x74   : > { %2037 = vmatpush.msra.mxu2 %v3038_v58  ;;  %v256_v58 = vadd.s32 104, %v3579_v61 }
  0x75   : > { %1404 = vmatmul.f32.gmra.mxu3 %v1305_v22  ;;  %vm3649_vm3 = vcmp.ne.s32.totalorder %v300_v32, 15  ;;  %vm3732_vm8 = vcmp.ne.s32.totalorder %v335_v20, 0 }
  0x79   : > { %1598 = vmatmul.f32.gmra.mxu0 %v3448_v10  ;;  %v3009_v10 = vld [vmem:[%s4587_s1 + $0x2e0] sm:$0xff] }
  0x7a   : > { %1808 = vmatpush.msra.mxu1 %v3009_v10 }
  0x7b   : > { %2902 = vmatmul.msk.f32.gmra.mxu1 %vm3628_vm2, %v1304_v8  ;;  %1181 = vmatmul.f32.gmra.mxu2 %v1080_v26  ;;  %v1312_v26 = vld [vmem:[%s3271_s30 + $0x5f] sm:$0xff] }
  0x7d   : > { %2966 = vmatmul.msk.f32.gmra.mxu3 %vm3628_vm2, %v1306_v27 }
  0x81   : > { %1601 = vmatmul.f32.gmra.mxu0 %v3497_v28  ;;  %v248_v28 = vadd.s32 40, %v3579_v61 }
  0x83   : > { %990 = vmatmul.f32.gmra.mxu1 %v1305_v22  ;;  %2934 = vmatmul.msk.f32.gmra.mxu2 %vm3649_vm3, %v1081_v37  ;;  %v314_v51 = vand.u32 15, %v248_v28  ;;  %v3086_v28 = vld [vmem:[%s4587_s1 + $0x448] sm:$0xff] }
  0x84   : > { %2457 = vmatpush.msra.mxu0 %v3086_v28 }
  0x85   : > { %1410 = vmatmul.f32.gmra.mxu3 %v1307_v39  ;;  %vm3683_vm5 = vcmp.ne.s32.totalorder %v314_v51, 15 }
  0x89   : > { %1604 = vmatmul.f32.gmra.mxu0 %v3543_v45  ;;  %v3008_v45 = vld [vmem:[%s4587_s1 + $0x2d8] sm:$0xff] }
  0x8a   : > { %1809 = vmatpush.msra.mxu1 %v3008_v45  ;;  %v1088_v45 = vld [vmem:[%s3271_s30 + $0x61] sm:$0xff] }
  0x8b   : > { %2903 = vmatmul.msk.f32.gmra.mxu1 %vm3662_vm4, %v1306_v27  ;;  %1187 = vmatmul.f32.gmra.mxu2 %v1082_v43  ;;  %v349_v43 = vand.u32 15, %v253_v40 }
  0x8d   : > { %2967 = vmatmul.msk.f32.gmra.mxu3 %vm3662_vm4, %v1308_v44  ;;  %vm3782_vm10 = vcmp.ne.s32.totalorder %v349_v43, 0 }
  0x91   : > { %1607 = vmatmul.f32.gmra.mxu0 %v3571_v57  ;;  %v250_v57 = vadd.s32 56, %v3579_v61 }
  0x93   : > { %996 = vmatmul.f32.gmra.mxu1 %v1307_v39  ;;  %2935 = vmatmul.msk.f32.gmra.mxu2 %vm3683_vm5, %v1083_v54  ;;  %v328_v8 = vand.u32 15, %v250_v57  ;;  %v1087_v39 = vld [vmem:[%s3271_s30 + $0x59] sm:$0xff]  ;;  %v254_v54 = vadd.s32 88, %v3579_v61 }
  0x94   : > { %v3005_v57 = vld [vmem:[%s4587_s1 + $0x2c0] sm:$0xff] }
  0x95   : > { %1416 = vmatmul.f32.gmra.mxu3 %v1309_v56  ;;  %vm3717_vm7 = vcmp.ne.s32.totalorder %v328_v8, 15  ;;  %v356_v0 = vand.u32 15, %v254_v54  ;;  %v1091_v54 = vld [vmem:[%s3271_s30 + $0x79] sm:$0xff] }
  0x96   : > { %v1963_v8 = vld [vmem:[%s3271_s30 + $0x97] sm:$0xff] }
  0x97   : > { %vm3811_vm11 = vcmp.ne.s32.totalorder %v356_v0, 15 }
  0x99   : > { %1610 = vmatmul.f32.gmra.mxu0 %v3590_v3  ;;  %v3007_v3 = vld [vmem:[%s4587_s1 + $0x2d0] sm:$0xff] }
  0x9a   : > { %1810 = vmatpush.msra.mxu1 %v3007_v3  ;;  %v255_v3 = vadd.s32 96, %v3579_v61 }
  0x9b   : > { %2904 = vmatmul.msk.f32.gmra.mxu1 %vm3696_vm6, %v1308_v44  ;;  %1193 = vmatmul.f32.gmra.mxu2 %v1084_v5 }
  0x9c   : > { %1811 = vmatpush.msra.mxu1 %v3006_v33  ;;  %v363_v13 = vand.u32 15, %v255_v3  ;;  %v370_v33 = vand.u32 15, %v256_v58  ;;  %v3035_v58 = vld [vmem:[%s4587_s1 + $0x330] sm:$0xff] }
  0x9d   : > { %2968 = vmatmul.msk.f32.gmra.mxu3 %vm3696_vm6, %v1310_v6 }
  0x9e   : > { %1812 = vmatpush.msra.mxu1 %v3005_v57  ;;  %vm3832_vm12 = vcmp.ne.s32.totalorder %v363_v13, 0  ;;  %vm3861_vm13 = vcmp.ne.s32.totalorder %v370_v33, 15  ;;  %v1092_v13 = vld [vmem:[%s3271_s30 + $0x81] sm:$0xff] }
  0xa1   : > { %1613 = vmatmul.f32.gmra.mxu0 %v3277_v16  ;;  %v252_v16 = vadd.s32 72, %v3579_v61 }
  0xa3   : > { %1002 = vmatmul.f32.gmra.mxu1 %v1309_v56  ;;  %2936 = vmatmul.msk.f32.gmra.mxu2 %vm3717_vm7, %v1085_v12  ;;  %v342_v27 = vand.u32 15, %v252_v16  ;;  %v3037_v56 = vld [vmem:[%s4587_s1 + $0x340] sm:$0xff]  ;;  %v1315_v12 = vld [vmem:[%s3271_s30 + $0x77] sm:$0xff] }
  0xa4   : > { %2038 = vmatpush.msra.mxu2 %v3037_v56  ;;  %v1317_v56 = vld [vmem:[%s3271_s30 + $0x87] sm:$0xff] }
  0xa5   : > { %1422 = vmatmul.f32.gmra.mxu3 %v1311_v18  ;;  %vm3761_vm9 = vcmp.ne.s32.totalorder %v342_v27, 15  ;;  %v1316_v27 = vld [vmem:[%s3271_s30 + $0x7f] sm:$0xff] }
  0xa8   : > { %v3730_v22 = vpop.f32.mrf.mxu1 }
  0xa9   : > { %1616 = vmatmul.f32.gmra.mxu0 %v3317_v30  ;;  %v3070_v30 = vld [vmem:[%s4587_s1 + $0x3c8] sm:$0xff] }
  0xaa   : > { %2231 = vmatpush.msra.mxu3 %v3070_v30  ;;  %v3036_v30 = vld [vmem:[%s4587_s1 + $0x338] sm:$0xff] }
  0xab   : > { %2905 = vmatmul.msk.f32.gmra.mxu1 %vm3732_vm8, %v1310_v6  ;;  %1199 = vmatmul.f32.gmra.mxu2 %v1086_v24 }
  0xac   : > { %2039 = vmatpush.msra.mxu2 %v3036_v30 }
  0xad   : > { %2969 = vmatmul.msk.f32.gmra.mxu3 %vm3732_vm8, %v1312_v26 }
  0xae   : > { %v3750_v29 = vpop.f32.mrf.mxu2  ;;  %v3752_v32 = vpop.f32.mrf.mxu0  ;;  %2040 = vmatpush.msra.mxu2 %v3035_v58  ;;  %v3083_v58 = vld [vmem:[%s4587_s1 + $0x430] sm:$0xff] }
  0xb0   : > { %v3757_v10 = vpop.f32.mrf.mxu1  ;;  %v3759_v37 = vpop.f32.mrf.mxu3 }
  0xb1   : > { %1619 = vmatmul.f32.gmra.mxu0 %v3363_v46 }
  0xb3   : > { %1008 = vmatmul.f32.gmra.mxu1 %v1311_v18  ;;  %2937 = vmatmul.msk.f32.gmra.mxu2 %vm3761_vm9, %v1087_v39  ;;  %v3085_v18 = vld [vmem:[%s4587_s1 + $0x440] sm:$0xff] }
  0xb4   : > { %2458 = vmatpush.msra.mxu0 %v3085_v18  ;;  %v258_v18 = vadd.s32 120, %v3579_v61 }
  0xb5   : > { %1428 = vmatmul.f32.gmra.mxu3 %v1313_v41 }
  0xb6   : > { %v3774_v44 = vpop.f32.mrf.mxu2  ;;  %v3776_v48 = vpop.f32.mrf.mxu0  ;;  %v384_v30 = vand.u32 15, %v258_v18 }
  0xb8   : > { %v3778_v51 = vpop.f32.mrf.mxu1  ;;  %v3780_v46 = vpop.f32.mrf.mxu3  ;;  %vm3911_vm15 = vcmp.ne.s32.totalorder %v384_v30, 15 }
  0xb9   : > { %1622 = vmatmul.f32.gmra.mxu0 %v3411_v62  ;;  %v3069_v62 = vld [vmem:[%s4587_s1 + $0x3c0] sm:$0xff] }
  0xba   : > { %2232 = vmatpush.msra.mxu3 %v3069_v62  ;;  %v3084_v62 = vld [vmem:[%s4587_s1 + $0x438] sm:$0xff] }
  0xbb   : > { %2906 = vmatmul.msk.f32.gmra.mxu1 %vm3782_vm10, %v1312_v26  ;;  %1205 = vmatmul.f32.gmra.mxu2 %v1088_v45  ;;  %v1090_v26 = vld [vmem:[%s3271_s30 + $0x71] sm:$0xff]  ;;  %v4658_v45 = vmov 0 }
  0xbc   : > { %v4659_v45 = vsel %vm3861_vm13, 4294967295, %v4658_v45  ;;  %2459 = vmatpush.msra.mxu0 %v3084_v62  ;;  %v259_v62 = vadd.s32 128, %v3579_v61 }
  0xbd   : > { %2970 = vmatmul.msk.f32.gmra.mxu3 %vm3782_vm10, %v1314_v55  ;;  %4660 = vst [vmem:[#allocation2_spill] sm:$0xff] %v4659_v45 }
  0xbe   : > { %v3800_v1 = vpop.f32.mrf.mxu2  ;;  %v3802_v5 = vpop.f32.mrf.mxu0  ;;  %v391_v18 = vand.u32 15, %v259_v62  ;;  %2460 = vmatpush.msra.mxu0 %v3083_v58  ;;  %v1320_v62 = vld [vmem:[%s3271_s30 + $0x9f] sm:$0xff]  ;;  %v3034_v58 = vld [vmem:[%s4587_s1 + $0x328] sm:$0xff] }
  0xbf   : > { %2041 = vmatpush.msra.mxu2 %v3034_v58 }
  0xc0   : > { %v3807_v6 = vpop.f32.mrf.mxu1  ;;  %v3809_v7 = vpop.f32.mrf.mxu3 }
  0xc1   : > { %1625 = vmatmul.f32.gmra.mxu0 %v3460_v14 }
  0xc3   : > { %1014 = vmatmul.f32.gmra.mxu1 %v1313_v41  ;;  %2938 = vmatmul.msk.f32.gmra.mxu2 %vm3811_vm11, %v1089_v9  ;;  %v3004_v41 = vld [vmem:[%s4587_s1 + $0x2b8] sm:$0xff] }
  0xc4   : > { %1813 = vmatpush.msra.mxu1 %v3004_v41 }
  0xc5   : > { %1434 = vmatmul.f32.gmra.mxu3 %v1315_v12 }
  0xc6   : > { %v3824_v20 = vpop.f32.mrf.mxu2  ;;  %v3826_v21 = vpop.f32.mrf.mxu0 }
  0xc8   : > { %v3828_v24 = vpop.f32.mrf.mxu1  ;;  %v3830_v14 = vpop.f32.mrf.mxu3 }
  0xc9   : > { %1628 = vmatmul.f32.gmra.mxu0 %v3509_v34  ;;  %v3068_v34 = vld [vmem:[%s4587_s1 + $0x3b8] sm:$0xff] }
  0xca   : > { %2233 = vmatpush.msra.mxu3 %v3068_v34 }
  0xcb   : > { %2907 = vmatmul.msk.f32.gmra.mxu1 %vm3832_vm12, %v1314_v55  ;;  %1211 = vmatmul.f32.gmra.mxu2 %v1090_v26  ;;  %v257_v55 = vadd.s32 112, %v3579_v61  ;;  %v1318_v26 = vld [vmem:[%s3271_s30 + $0x8f] sm:$0xff] }
  0xcd   : > { %2971 = vmatmul.msk.f32.gmra.mxu3 %vm3832_vm12, %v1316_v27  ;;  %v377_v0 = vand.u32 15, %v257_v55  ;;  %v4666_v55 = vmov 0 }
  0xce   : > { %v3850_v39 = vpop.f32.mrf.mxu2  ;;  %v3852_v40 = vpop.f32.mrf.mxu0  ;;  %v4667_v55 = vsel %vm3911_vm15, 4294967295, %v4666_v55 }
  0xcf   : > { %vm3882_vm14 = vcmp.ne.s32.totalorder %v377_v0, 0  ;;  %4668 = vst [vmem:[#allocation6_spill] sm:$0xff] %v4667_v55  ;;  %v1093_v0 = vld [vmem:[%s3271_s30 + $0x89] sm:$0xff] }
  0xd0   : > { %v3857_v43 = vpop.f32.mrf.mxu1  ;;  %v3859_v28 = vpop.f32.mrf.mxu3 }
  0xd1   : > { %1631 = vmatmul.f32.gmra.mxu0 %v3549_v49 }
  0xd3   : > { %1020 = vmatmul.f32.gmra.mxu1 %v1315_v12  ;;  %2939 = vmatmul.msk.f32.gmra.mxu2 %vm3861_vm13, %v1091_v54  ;;  %v4662_v12 = vmov 0 }
  0xd4   : > { %v4663_v12 = vsel %vm3882_vm14, 4294967295, %v4662_v12 }
  0xd5   : > { %1440 = vmatmul.f32.gmra.mxu3 %v1317_v56  ;;  %4664 = vst [vmem:[#allocation4_spill] sm:$0xff] %v4663_v12  ;;  %v3002_v12 = vld [vmem:[%s4587_s1 + $0x2a8] sm:$0xff] }
  0xd6   : > { %v3874_v57 = vpop.f32.mrf.mxu2  ;;  %v3876_v9 = vpop.f32.mrf.mxu0 }
  0xd8   : > { %v3878_v3 = vpop.f32.mrf.mxu1  ;;  %v3880_v49 = vpop.f32.mrf.mxu3 }
  0xd9   : > { %4661 = vst [vmem:[#allocation3_spill] sm:$0xff] %v3880_v49  ;;  %1634 = vmatmul.f32.gmra.mxu0 %v3574_v59  ;;  %v3067_v59 = vld [vmem:[%s4587_s1 + $0x3b0] sm:$0xff] }
  0xda   : > { %2234 = vmatpush.msra.mxu3 %v3067_v59 }
  0xdb   : > { %2908 = vmatmul.msk.f32.gmra.mxu1 %vm3882_vm14, %v1316_v27  ;;  %1217 = vmatmul.f32.gmra.mxu2 %v1092_v13  ;;  %v3003_v27 = vld [vmem:[%s4587_s1 + $0x2b0] sm:$0xff] }
  0xdc   : > { %1814 = vmatpush.msra.mxu1 %v3003_v27  ;;  %v1319_v13 = vld [vmem:[%s3271_s30 + $0x97] sm:$0xff] }
  0xdd   : > { %2972 = vmatmul.msk.f32.gmra.mxu3 %vm3882_vm14, %v1318_v26  ;;  %vm3930_vm14 = vcmp.ne.s32.totalorder %v391_v18, 0 }
  0xde   : > { %v3900_v33 = vpop.f32.mrf.mxu2  ;;  %v3902_v34 = vpop.f32.mrf.mxu0  ;;  %1815 = vmatpush.msra.mxu1 %v3002_v12  ;;  %v3082_v12 = vld [vmem:[%s4587_s1 + $0x428] sm:$0xff] }
  0xdf   : > { %2461 = vmatpush.msra.mxu0 %v3082_v12 }
  0xe0   : > { %v3907_v41 = vpop.f32.mrf.mxu1  ;;  %v3909_v54 = vpop.f32.mrf.mxu3 }
  0xe1   : > { %4665 = vst [vmem:[#allocation5_spill] sm:$0xff] %v3909_v54  ;;  %1637 = vmatmul.f32.gmra.mxu0 %v3280_v17  ;;  %v4670_v54 = vmov 0 }
  0xe2   : > { %v4671_v54 = vsel %vm3930_vm14, 4294967295, %v4670_v54 }
  0xe3   : > { %1026 = vmatmul.f32.gmra.mxu1 %v1317_v56  ;;  %2940 = vmatmul.msk.f32.gmra.mxu2 %vm3911_vm15, %v1093_v0  ;;  %4672 = vst [vmem:[#allocation8_spill] sm:$0xff] %v4671_v54  ;;  %v1094_v56 = vld [vmem:[%s3271_s30 + $0x91] sm:$0xff]  ;;  %v260_v0 = vadd.s32 136, %v3579_v61  ;;  %v261_v54 = vadd.s32 144, %v3579_v61 }
  0xe5   : > { %1446 = vmatmul.f32.gmra.mxu3 %v1319_v13 }
  0xe6   : > { %v3924_v30 = vpop.f32.mrf.mxu2  ;;  %v3926_v59 = vpop.f32.mrf.mxu0 }
  0xe8   : > { %v3928_v27 = vpop.f32.mrf.mxu3  ;;  %v982_v17 = vpop.f32.mrf.mxu1 }
  0xe9   : > { %4669 = vst [vmem:[#allocation7_spill] sm:$0xff] %v3928_v27  ;;  %1640 = vmatmul.f32.gmra.mxu0 %v3320_v31  ;;  %v398_v27 = vand.u32 15, %v260_v0  ;;  %v983_v18 = vadd.f32 %v982_v17, %v3752_v32  ;;  %v3066_v31 = vld [vmem:[%s4587_s1 + $0x3a8] sm:$0xff]  ;;  %v4673_v32 = vmov 0  ;;  %v1095_v17 = vld [vmem:[%s3271_s30 + $0x99] sm:$0xff] }
  0xea   : > { %2235 = vmatpush.msra.mxu3 %v3066_v31  ;;  %v1321_v31 = vld [vmem:[%s3271_s30 + $0xa7] sm:$0xff] }
  0xeb   : > { %2909 = vmatmul.msk.f32.gmra.mxu1 %vm3930_vm14, %v1318_v26  ;;  %1223 = vmatmul.f32.gmra.mxu2 %v1094_v56  ;;  %vm3952_vm15 = vcmp.ne.s32.totalorder %v398_v27, 15  ;;  %v405_v27 = vand.u32 15, %v261_v54  ;;  %v262_v54 = vadd.s32 152, %v3579_v61 }
  0xec   : > { %v4674_v32 = vsel %vm3952_vm15, 4294967295, %v4673_v32 }
  0xed   : > { %2973 = vmatmul.msk.f32.gmra.mxu3 %vm3930_vm14, %v1320_v62  ;;  %vm3968_vm14 = vcmp.ne.s32.totalorder %v405_v27, 0  ;;  %v3033_v27 = vld [vmem:[%s4587_s1 + $0x320] sm:$0xff] }
  0xee   : > { %v1176_v55 = vpop.f32.mrf.mxu2  ;;  %v1596_v26 = vpop.f32.mrf.mxu0  ;;  %2042 = vmatpush.msra.mxu2 %v3033_v27  ;;  %v1323_v27 = vld [vmem:[%s3271_s30 + $0xb7] sm:$0xff] }
  0xef   : > { %v1272_v56 = vadd.f32 %v1176_v55, %v983_v18 }
  0xf0   : > { %v985_v0 = vpop.f32.mrf.mxu1  ;;  %v1402_v58 = vpop.f32.mrf.mxu3 }
  0xf1   : > { %v1498_v49 = vadd.f32 %v1402_v58, %v1272_v56  ;;  %1643 = vmatmul.f32.gmra.mxu0 %v3366_v47  ;;  %v986_v18 = vadd.f32 %v985_v0, %v3776_v48  ;;  %v1322_v48 = vld [vmem:[%s3271_s30 + $0xaf] sm:$0xff] }
  0xf3   : > { %v3960_v55 = vadd.f32 %v1596_v26, %v1498_v49  ;;  %1032 = vmatmul.f32.gmra.mxu1 %v1319_v13  ;;  %2941 = vmatmul.msk.f32.gmra.mxu2 %vm3952_vm15, %v1095_v17  ;;  %v4675_v13 = vmov 0  ;;  %v1096_v26 = vld [vmem:[%s3271_s30 + $0xa1] sm:$0xff] }
  0xf4   : > { %v4676_v13 = vsel %vm3968_vm14, 4294967295, %v4675_v13 }
  0xf5   : > { %1452 = vmatmul.f32.gmra.mxu3 %v1321_v31 }
  0xf6   : > { %v1179_v56 = vpop.f32.mrf.mxu2  ;;  %v1599_v58 = vpop.f32.mrf.mxu0 }
  0xf7   : > { %v1273_v47 = vadd.f32 %v1179_v56, %v986_v18  ;;  %v412_v18 = vand.u32 15, %v262_v54  ;;  %v263_v54 = vadd.s32 160, %v3579_v61 }
  0xf8   : > { %v988_v45 = vpop.f32.mrf.mxu1  ;;  %v1405_v49 = vpop.f32.mrf.mxu3 }
  0xf9   : > { %v1499_v17 = vadd.f32 %v1405_v49, %v1273_v47  ;;  %1646 = vmatmul.f32.gmra.mxu0 %v3414_v63  ;;  %v989_v12 = vadd.f32 %v988_v45, %v3802_v5  ;;  %v3065_v63 = vld [vmem:[%s4587_s1 + $0x3a0] sm:$0xff]  ;;  %vm3992_vm15 = vcmp.ne.s32.totalorder %v412_v18, 15  ;;  %v4677_v5 = vmov 0  ;;  %v1097_v45 = vld [vmem:[%s3271_s30 + $0xa9] sm:$0xff] }
  0xfa   : > { %2236 = vmatpush.msra.mxu3 %v3065_v63  ;;  %v3001_v47 = vld [vmem:[%s4587_s1 + $0x2a0] sm:$0xff]  ;;  %v4678_v5 = vsel %vm3992_vm15, 4294967295, %v4677_v5  ;;  %v419_v18 = vand.u32 15, %v263_v54  ;;  %v264_v54 = vadd.s32 168, %v3579_v61 }
  0xfb   : > { %v3976_v0 = vadd.f32 %v1599_v58, %v1499_v17  ;;  %2910 = vmatmul.msk.f32.gmra.mxu1 %vm3968_vm14, %v1320_v62  ;;  %1229 = vmatmul.f32.gmra.mxu2 %v1096_v26 }
  0xfc   : > { %1816 = vmatpush.msra.mxu1 %v3001_v47 }
  0xfd   : > { %2974 = vmatmul.msk.f32.gmra.mxu3 %vm3968_vm14, %v1322_v48  ;;  %vm4008_vm14 = vcmp.ne.s32.totalorder %v419_v18, 0  ;;  %v3032_v18 = vld [vmem:[%s4587_s1 + $0x318] sm:$0xff] }
  0xfe   : > { %v1182_v56 = vpop.f32.mrf.mxu2  ;;  %v1602_v62 = vpop.f32.mrf.mxu0  ;;  %2043 = vmatpush.msra.mxu2 %v3032_v18  ;;  %v1325_v18 = vld [vmem:[%s3271_s30 + $0xc7] sm:$0xff] }
  0xff   : > { %v1274_v58 = vadd.f32 %v1182_v56, %v989_v12  ;;  %v3081_v56 = vld [vmem:[%s4587_s1 + $0x420] sm:$0xff] }
 0x100   : > { %v991_v49 = vpop.f32.mrf.mxu1  ;;  %v1408_v26 = vpop.f32.mrf.mxu3  ;;  %2462 = vmatpush.msra.mxu0 %v3081_v56 }
 0x101   : > { %v1500_v17 = vadd.f32 %v1408_v26, %v1274_v58  ;;  %1649 = vmatmul.f32.gmra.mxu0 %v3463_v15  ;;  %v992_v63 = vadd.f32 %v991_v49, %v3826_v21  ;;  %v1324_v21 = vld [vmem:[%s3271_s30 + $0xbf] sm:$0xff] }
 0x103   : > { %v4000_v12 = vadd.f32 %v1602_v62, %v1500_v17  ;;  %1038 = vmatmul.f32.gmra.mxu1 %v1321_v31  ;;  %2942 = vmatmul.msk.f32.gmra.mxu2 %vm3992_vm15, %v1097_v45  ;;  %v4679_v31 = vmov 0  ;;  %v1098_v45 = vld [vmem:[%s3271_s30 + $0xb1] sm:$0xff] }
 0x104   : > { %v4680_v31 = vsel %vm4008_vm14, 4294967295, %v4679_v31 }
 0x105   : > { %1458 = vmatmul.f32.gmra.mxu3 %v1323_v27 }
 0x106   : > { %v1185_v58 = vpop.f32.mrf.mxu2  ;;  %v1605_v47 = vpop.f32.mrf.mxu0 }
 0x107   : > { %v1275_v15 = vadd.f32 %v1185_v58, %v992_v63  ;;  %v426_v63 = vand.u32 15, %v264_v54  ;;  %v265_v54 = vadd.s32 176, %v3579_v61 }
 0x108   : > { %v994_v26 = vpop.f32.mrf.mxu1  ;;  %v1411_v62 = vpop.f32.mrf.mxu3 }
 0x109   : > { %v1501_v17 = vadd.f32 %v1411_v62, %v1275_v15  ;;  %1652 = vmatmul.f32.gmra.mxu0 %v3512_v35  ;;  %v995_v56 = vadd.f32 %v994_v26, %v3852_v40  ;;  %v3064_v35 = vld [vmem:[%s4587_s1 + $0x398] sm:$0xff]  ;;  %vm4032_vm15 = vcmp.ne.s32.totalorder %v426_v63, 15  ;;  %v4681_v40 = vmov 0 }
 0x10a   : > { %2237 = vmatpush.msra.mxu3 %v3064_v35  ;;  %v3000_v15 = vld [vmem:[%s4587_s1 + $0x298] sm:$0xff]  ;;  %v4682_v40 = vsel %vm4032_vm15, 4294967295, %v4681_v40  ;;  %v433_v63 = vand.u32 15, %v265_v54  ;;  %v266_v54 = vadd.s32 184, %v3579_v61 }
 0x10b   : > { %v4016_v49 = vadd.f32 %v1605_v47, %v1501_v17  ;;  %2911 = vmatmul.msk.f32.gmra.mxu1 %vm4008_vm14, %v1322_v48  ;;  %1235 = vmatmul.f32.gmra.mxu2 %v1098_v45  ;;  %v1099_v26 = vld [vmem:[%s3271_s30 + $0xb9] sm:$0xff] }
 0x10c   : > { %1817 = vmatpush.msra.mxu1 %v3000_v15 }
 0x10d   : > { %2975 = vmatmul.msk.f32.gmra.mxu3 %vm4008_vm14, %v1324_v21  ;;  %vm4048_vm14 = vcmp.ne.s32.totalorder %v433_v63, 0  ;;  %v3031_v63 = vld [vmem:[%s4587_s1 + $0x310] sm:$0xff] }
 0x10e   : > { %v1188_v58 = vpop.f32.mrf.mxu2  ;;  %v1608_v48 = vpop.f32.mrf.mxu0  ;;  %2044 = vmatpush.msra.mxu2 %v3031_v63 }
 0x10f   : > { %v1276_v47 = vadd.f32 %v1188_v58, %v995_v56  ;;  %v3080_v58 = vld [vmem:[%s4587_s1 + $0x418] sm:$0xff] }
 0x110   : > { %v997_v62 = vpop.f32.mrf.mxu1  ;;  %v1414_v45 = vpop.f32.mrf.mxu3  ;;  %2463 = vmatpush.msra.mxu0 %v3080_v58 }
 0x111   : > { %v1502_v17 = vadd.f32 %v1414_v45, %v1276_v47  ;;  %1655 = vmatmul.f32.gmra.mxu0 %v3552_v50  ;;  %v998_v35 = vadd.f32 %v997_v62, %v3876_v9  ;;  %v1326_v62 = vld [vmem:[%s3271_s30 + $0xcf] sm:$0xff] }
 0x113   : > { %v4040_v56 = vadd.f32 %v1608_v48, %v1502_v17  ;;  %1044 = vmatmul.f32.gmra.mxu1 %v1323_v27  ;;  %2943 = vmatmul.msk.f32.gmra.mxu2 %vm4032_vm15, %v1099_v26  ;;  %v4683_v27 = vmov 0  ;;  %v1100_v26 = vld [vmem:[%s3271_s30 + $0xc1] sm:$0xff] }
 0x114   : > { %v4684_v27 = vsel %vm4048_vm14, 4294967295, %v4683_v27 }
 0x115   : > { %1464 = vmatmul.f32.gmra.mxu3 %v1325_v18  ;;  %4685 = vst [vmem:[#allocation9_spill] sm:$0xff] %v4684_v27  ;;  %v1327_v27 = vld [vmem:[%s3271_s30 + $0xd7] sm:$0xff] }
 0x116   : > { %v1191_v47 = vpop.f32.mrf.mxu2  ;;  %v1611_v15 = vpop.f32.mrf.mxu0 }
 0x117   : > { %v1277_v50 = vadd.f32 %v1191_v47, %v998_v35  ;;  %v440_v35 = vand.u32 15, %v266_v54 }
 0x118   : > { %v1000_v45 = vpop.f32.mrf.mxu1  ;;  %v1417_v48 = vpop.f32.mrf.mxu3 }
 0x119   : > { %v1503_v9 = vadd.f32 %v1417_v48, %v1277_v50  ;;  %1658 = vmatmul.f32.gmra.mxu0 %v3577_v60  ;;  %v1001_v58 = vadd.f32 %v1000_v45, %v3902_v34  ;;  %v3063_v60 = vld [vmem:[%s4587_s1 + $0x390] sm:$0xff]  ;;  %vm4073_vm15 = vcmp.ne.s32.totalorder %v440_v35, 15  ;;  %v4686_v34 = vmov 0 }
 0x11a   : > { %2238 = vmatpush.msra.mxu3 %v3063_v60  ;;  %v2999_v48 = vld [vmem:[%s4587_s1 + $0x290] sm:$0xff]  ;;  %v4687_v34 = vsel %vm4073_vm15, 4294967295, %v4686_v34 }
 0x11b   : > { %v4056_v17 = vadd.f32 %v1611_v15, %v1503_v9  ;;  %2912 = vmatmul.msk.f32.gmra.mxu1 %vm4048_vm14, %v1324_v21  ;;  %1241 = vmatmul.f32.gmra.mxu2 %v1100_v26  ;;  %v1552_v15 = vld [vmem:[%s3271_s30 + $0xd0] sm:$0xff]  ;;  %4688 = vst [vmem:[#allocation10_spill] sm:$0xff] %v4687_v34  ;;  %v267_v9 = vadd.s32 192, %v3579_v61 }
 0x11c   : > { %v1101_v45 = vld [vmem:[%s3271_s30 + $0xc9] sm:$0xff]  ;;  %1818 = vmatpush.msra.mxu1 %v2999_v48 }
 0x11d   : > { %2976 = vmatmul.msk.f32.gmra.mxu3 %vm4048_vm14, %v1326_v62  ;;  %v447_v60 = vand.u32 15, %v267_v9  ;;  %v1328_v9 = vld [vmem:[%s3271_s30 + $0xdf] sm:$0xff] }
 0x11e   : > { %v1194_v47 = vpop.f32.mrf.mxu2  ;;  %v1614_v21 = vpop.f32.mrf.mxu0 }
 0x11f   : > { %v1278_v50 = vadd.f32 %v1194_v47, %v1001_v58  ;;  %v3079_v47 = vld [vmem:[%s4587_s1 + $0x410] sm:$0xff]  ;;  %vm4089_vm14 = vcmp.ne.s32.totalorder %v447_v60, 0  ;;  %v3030_v60 = vld [vmem:[%s4587_s1 + $0x308] sm:$0xff] }
 0x120   : > { %v1003_v26 = vpop.f32.mrf.mxu1  ;;  %v1420_v54 = vpop.f32.mrf.mxu3  ;;  %2464 = vmatpush.msra.mxu0 %v3079_v47  ;;  %2045 = vmatpush.msra.mxu2 %v3030_v60 }
 0x121   : > { %v1504_v63 = vadd.f32 %v1420_v54, %v1278_v50  ;;  %1661 = vmatmul.f32.gmra.mxu0 %v1552_v15  ;;  %v1004_v35 = vadd.f32 %v1003_v26, %v3926_v59  ;;  %v1553_v15 = vld [vmem:[%s3271_s30 + $0xd8] sm:$0xff]  ;;  %v268_v59 = vadd.s32 200, %v3579_v61 }
 0x123   : > { %v4080_v58 = vadd.f32 %v1614_v21, %v1504_v63  ;;  %1050 = vmatmul.f32.gmra.mxu1 %v1325_v18  ;;  %2944 = vmatmul.msk.f32.gmra.mxu2 %vm4073_vm15, %v1101_v45  ;;  %v4689_v18 = vmov 0  ;;  %v1102_v45 = vld [vmem:[%s3271_s30 + $0xd1] sm:$0xff] }
 0x124   : > { %v4690_v18 = vsel %vm4089_vm14, 4294967295, %v4689_v18 }
 0x125   : > { %1470 = vmatmul.f32.gmra.mxu3 %v1327_v27  ;;  %4691 = vst [vmem:[#allocation11_spill] sm:$0xff] %v4690_v18  ;;  %v1329_v18 = vld [vmem:[%s3271_s30 + $0xe7] sm:$0xff] }
 0x126   : > { %v1197_v48 = vpop.f32.mrf.mxu2  ;;  %v1617_v50 = vpop.f32.mrf.mxu0 }
 0x127   : > { %v1279_v54 = vadd.f32 %v1197_v48, %v1004_v35  ;;  %v454_v35 = vand.u32 15, %v268_v59  ;;  %v3062_v48 = vld [vmem:[%s4587_s1 + $0x388] sm:$0xff] }
 0x128   : > { %v1006_v21 = vpop.f32.mrf.mxu1  ;;  %v1423_v63 = vpop.f32.mrf.mxu3  ;;  %2239 = vmatpush.msra.mxu3 %v3062_v48 }
 0x129   : > { %v1505_v26 = vadd.f32 %v1423_v63, %v1279_v54  ;;  %1664 = vmatmul.f32.gmra.mxu0 %v1553_v15  ;;  %v1007_v47 = vadd.f32 %v1006_v21, %v3730_v22  ;;  %v1554_v15 = vld [vmem:[%s3271_s30 + $0xe0] sm:$0xff]  ;;  %v2998_v63 = vld [vmem:[%s4587_s1 + $0x288] sm:$0xff]  ;;  %vm4113_vm15 = vcmp.ne.s32.totalorder %v454_v35, 15  ;;  %v4692_v22 = vmov 0 }
 0x12a   : > { %v4693_v22 = vsel %vm4113_vm15, 4294967295, %v4692_v22  ;;  %v1103_v21 = vld [vmem:[%s3271_s30 + $0xd9] sm:$0xff]  ;;  %1819 = vmatpush.msra.mxu1 %v2998_v63 }
 0x12b   : > { %v4096_v34 = vadd.f32 %v1617_v50, %v1505_v26  ;;  %2913 = vmatmul.msk.f32.gmra.mxu1 %vm4089_vm14, %v1326_v62  ;;  %1247 = vmatmul.f32.gmra.mxu2 %v1102_v45  ;;  %4694 = vst [vmem:[#allocation12_spill] sm:$0xff] %v4693_v22  ;;  %v269_v26 = vadd.s32 208, %v3579_v61 }
 0x12d   : > { %2977 = vmatmul.msk.f32.gmra.mxu3 %vm4089_vm14, %v1328_v9  ;;  %v461_v48 = vand.u32 15, %v269_v26  ;;  %v1330_v26 = vld [vmem:[%s3271_s30 + $0xef] sm:$0xff] }
 0x12e   : > { %v1200_v50 = vpop.f32.mrf.mxu2  ;;  %v1620_v62 = vpop.f32.mrf.mxu0 }
 0x12f   : > { %v1280_v54 = vadd.f32 %v1200_v50, %v1007_v47  ;;  %v3078_v50 = vld [vmem:[%s4587_s1 + $0x408] sm:$0xff]  ;;  %vm4129_vm14 = vcmp.ne.s32.totalorder %v461_v48, 0  ;;  %v3029_v48 = vld [vmem:[%s4587_s1 + $0x300] sm:$0xff] }
 0x130   : > { %v1009_v45 = vpop.f32.mrf.mxu1  ;;  %v1426_v59 = vpop.f32.mrf.mxu3  ;;  %2465 = vmatpush.msra.mxu0 %v3078_v50  ;;  %2046 = vmatpush.msra.mxu2 %v3029_v48 }
 0x131   : > { %v1506_v60 = vadd.f32 %v1426_v59, %v1280_v54  ;;  %1667 = vmatmul.f32.gmra.mxu0 %v1554_v15  ;;  %v1010_v35 = vadd.f32 %v1009_v45, %v3757_v10  ;;  %v1555_v15 = vld [vmem:[%s3271_s30 + $0xe8] sm:$0xff]  ;;  %v270_v10 = vadd.s32 216, %v3579_v61 }
 0x133   : > { %v4120_v47 = vadd.f32 %v1620_v62, %v1506_v60  ;;  %1056 = vmatmul.f32.gmra.mxu1 %v1327_v27  ;;  %2945 = vmatmul.msk.f32.gmra.mxu2 %vm4113_vm15, %v1103_v21  ;;  %v4695_v27 = vmov 0  ;;  %v1104_v21 = vld [vmem:[%s3271_s30 + $0xe1] sm:$0xff] }
 0x134   : > { %v4696_v27 = vsel %vm4129_vm14, 4294967295, %v4695_v27 }
 0x135   : > { %1476 = vmatmul.f32.gmra.mxu3 %v1329_v18  ;;  %4697 = vst [vmem:[#allocation13_spill] sm:$0xff] %v4696_v27  ;;  %v1331_v27 = vld [vmem:[%s3271_s30 + $0xf7] sm:$0xff] }
 0x136   : > { %v1203_v63 = vpop.f32.mrf.mxu2  ;;  %v1623_v54 = vpop.f32.mrf.mxu0 }
 0x137   : > { %v1281_v59 = vadd.f32 %v1203_v63, %v1010_v35  ;;  %v468_v35 = vand.u32 15, %v270_v10  ;;  %v3061_v63 = vld [vmem:[%s4587_s1 + $0x380] sm:$0xff] }
 0x138   : > { %v1012_v62 = vpop.f32.mrf.mxu1  ;;  %v1429_v60 = vpop.f32.mrf.mxu3  ;;  %2240 = vmatpush.msra.mxu3 %v3061_v63 }
 0x139   : > { %v1507_v45 = vadd.f32 %v1429_v60, %v1281_v59  ;;  %1670 = vmatmul.f32.gmra.mxu0 %v1555_v15  ;;  %v1013_v50 = vadd.f32 %v1012_v62, %v3778_v51  ;;  %v1556_v15 = vld [vmem:[%s3271_s30 + $0xf0] sm:$0xff]  ;;  %v2997_v60 = vld [vmem:[%s4587_s1 + $0x280] sm:$0xff]  ;;  %vm4153_vm15 = vcmp.ne.s32.totalorder %v468_v35, 15  ;;  %v4699_v51 = vmov 0 }
 0x13a   : > { %v4700_v51 = vsel %vm4153_vm15, 4294967295, %v4699_v51  ;;  %v1105_v62 = vld [vmem:[%s3271_s30 + $0xe9] sm:$0xff]  ;;  %1820 = vmatpush.msra.mxu1 %v2997_v60 }
 0x13b   : > { %v4136_v22 = vadd.f32 %v1623_v54, %v1507_v45  ;;  %2914 = vmatmul.msk.f32.gmra.mxu1 %vm4129_vm14, %v1328_v9  ;;  %1253 = vmatmul.f32.gmra.mxu2 %v1104_v21  ;;  %4701 = vst [vmem:[#allocation15_spill] sm:$0xff] %v4700_v51  ;;  %v271_v45 = vadd.s32 224, %v3579_v61 }
 0x13d   : > { %4698 = vst [vmem:[#allocation14_spill] sm:$0xff] %v4136_v22  ;;  %2978 = vmatmul.msk.f32.gmra.mxu3 %vm4129_vm14, %v1330_v26  ;;  %v475_v63 = vand.u32 15, %v271_v45  ;;  %v1332_v45 = vld [vmem:[%s3271_s30 + $0xff] sm:$0xff] }
 0x13e   : > { %v1206_v54 = vpop.f32.mrf.mxu2  ;;  %v1626_v9 = vpop.f32.mrf.mxu0 }
 0x13f   : > { %v1282_v59 = vadd.f32 %v1206_v54, %v1013_v50  ;;  %v3077_v54 = vld [vmem:[%s4587_s1 + $0x400] sm:$0xff]  ;;  %vm4169_vm14 = vcmp.ne.s32.totalorder %v475_v63, 0 }
 0x140   : > { %v1015_v21 = vpop.f32.mrf.mxu1  ;;  %v1432_v10 = vpop.f32.mrf.mxu3  ;;  %2466 = vmatpush.msra.mxu0 %v3077_v54 }
 0x141   : > { %v1508_v48 = vadd.f32 %v1432_v10, %v1282_v59  ;;  %1673 = vmatmul.f32.gmra.mxu0 %v1556_v15  ;;  %v1016_v35 = vadd.f32 %v1015_v21, %v3807_v6  ;;  %v1557_v15 = vld [vmem:[%s3271_s30 + $0xf8] sm:$0xff]  ;;  %v272_v6 = vadd.s32 232, %v3579_v61 }
 0x143   : > { %v4160_v50 = vadd.f32 %v1626_v9, %v1508_v48  ;;  %1062 = vmatmul.f32.gmra.mxu1 %v1329_v18  ;;  %2946 = vmatmul.msk.f32.gmra.mxu2 %vm4153_vm15, %v1105_v62  ;;  %v4703_v48 = vmov 0  ;;  %v1106_v62 = vld [vmem:[%s3271_s30 + $0xf1] sm:$0xff] }
 0x144   : > { %v4704_v48 = vsel %vm4169_vm14, 4294967295, %v4703_v48 }
 0x145   : > { %4702 = vst [vmem:[#allocation16_spill] sm:$0xff] %v4160_v50  ;;  %1482 = vmatmul.f32.gmra.mxu3 %v1331_v27  ;;  %v1558_v50 = vld [vmem:[%s3271_s30 + $0x100] sm:$0xff] }
 0x146   : > { %v1209_v60 = vpop.f32.mrf.mxu2  ;;  %v1629_v59 = vpop.f32.mrf.mxu0  ;;  %4705 = vst [vmem:[#allocation17_spill] sm:$0xff] %v4704_v48  ;;  %v1559_v48 = vld [vmem:[%s3271_s30 + $0x108] sm:$0xff] }
 0x147   : > { %v1283_v10 = vadd.f32 %v1209_v60, %v1016_v35  ;;  %v482_v35 = vand.u32 15, %v272_v6 }
 0x148   : > { %v1018_v9 = vpop.f32.mrf.mxu1  ;;  %v1435_v18 = vpop.f32.mrf.mxu3 }
 0x149   : > { %v1509_v21 = vadd.f32 %v1435_v18, %v1283_v10  ;;  %1676 = vmatmul.f32.gmra.mxu0 %v1557_v15  ;;  %v1019_v63 = vadd.f32 %v1018_v9, %v3828_v24  ;;  %vm4184_vm15 = vcmp.ne.s32.totalorder %v482_v35, 15  ;;  %v1333_v24 = vld [vmem:[%s3271_s30 + $0x107] sm:$0xff] }
 0x14b   : > { %v4176_v51 = vadd.f32 %v1629_v59, %v1509_v21  ;;  %2915 = vmatmul.msk.f32.gmra.mxu1 %vm4169_vm14, %v1330_v26  ;;  %1259 = vmatmul.f32.gmra.mxu2 %v1106_v62  ;;  %v4707_v59 = vmov 0  ;;  %v1107_v26 = vld [vmem:[%s3271_s30 + $0xf9] sm:$0xff]  ;;  %v273_v62 = vadd.s32 240, %v3579_v61 }
 0x14c   : > { %v4708_v59 = vsel %vm4184_vm15, 4294967295, %v4707_v59 }
 0x14d   : > { %4706 = vst [vmem:[#allocation18_spill] sm:$0xff] %v4176_v51  ;;  %2979 = vmatmul.msk.f32.gmra.mxu3 %vm4169_vm14, %v1332_v45  ;;  %v489_v21 = vand.u32 15, %v273_v62 }
 0x14e   : > { %v1212_v54 = vpop.f32.mrf.mxu2  ;;  %v1632_v60 = vpop.f32.mrf.mxu0 }
 0x14f   : > { %v1284_v10 = vadd.f32 %v1212_v54, %v1019_v63  ;;  %vm4197_vm14 = vcmp.ne.s32.totalorder %v489_v21, 0 }
 0x150   : > { %v1021_v18 = vpop.f32.mrf.mxu1  ;;  %v1438_v15 = vpop.f32.mrf.mxu3 }
 0x151   : > { %v1510_v6 = vadd.f32 %v1438_v15, %v1284_v10  ;;  %1679 = vmatmul.f32.gmra.mxu0 %v1558_v50  ;;  %v1022_v35 = vadd.f32 %v1021_v18, %v3857_v43 }
 0x153   : > { %v4191_v9 = vadd.f32 %v1632_v60, %v1510_v6  ;;  %1068 = vmatmul.f32.gmra.mxu1 %v1331_v27  ;;  %2947 = vmatmul.msk.f32.gmra.mxu2 %vm4184_vm15, %v1107_v26  ;;  %v1108_v27 = vld [vmem:[%s3271_s30 + $0x101] sm:$0xff]  ;;  %v274_v60 = vadd.s32 248, %v3579_v61  ;;  %v1334_v26 = vld [vmem:[%s3271_s30 + $0x10f] sm:$0xff] }
 0x154   : > { %v1560_v61 = vld [vmem:[%s3271_s30 + $0x110] sm:$0xff] }
 0x155   : > { %1488 = vmatmul.f32.gmra.mxu3 %v1333_v24  ;;  %v496_v18 = vand.u32 15, %v274_v60 }
 0x156   : > { %v1215_v63 = vpop.f32.mrf.mxu2  ;;  %v1635_v54 = vpop.f32.mrf.mxu0 }
 0x157   : > { %v1285_v51 = vadd.f32 %v1215_v63, %v1022_v35  ;;  %vm4212_vm15 = vcmp.ne.s32.totalorder %v496_v18, 15 }
 0x158   : > { %v1024_v22 = vpop.f32.mrf.mxu1  ;;  %v1441_v10 = vpop.f32.mrf.mxu3 }
 0x159   : > { %v1511_v15 = vadd.f32 %v1441_v10, %v1285_v51  ;;  %1682 = vmatmul.f32.gmra.mxu0 %v1559_v48  ;;  %v1025_v62 = vadd.f32 %v1024_v22, %v3878_v3  ;;  %v1335_v3 = vld [vmem:[%s3271_s30 + $0x117] sm:$0xff] }
 0x15b   : > { %v4204_v43 = vadd.f32 %v1635_v54, %v1511_v15  ;;  %2916 = vmatmul.msk.f32.gmra.mxu1 %vm4197_vm14, %v1332_v45  ;;  %1265 = vmatmul.f32.gmra.mxu2 %v1108_v27  ;;  %v1109_v45 = vld [vmem:[%s3271_s30 + $0x109] sm:$0xff]  ;;  %v1561_v15 = vld [vmem:[%s3271_s30 + $0x118] sm:$0xff] }
 0x15d   : > { %2980 = vmatmul.msk.f32.gmra.mxu3 %vm4197_vm14, %v1334_v26 }
 0x15e   : > { %v1218_v6 = vpop.f32.mrf.mxu2  ;;  %v1638_v21 = vpop.f32.mrf.mxu0 }
 0x15f   : > { %v1286_v51 = vadd.f32 %v1218_v6, %v1025_v62  ;;  %v1724_v6 = vld [vmem:[%s3271_s30 + $0x21] sm:$0xff] }
 0x160   : > { %v1027_v48 = vpop.f32.mrf.mxu1  ;;  %v1444_v35 = vpop.f32.mrf.mxu3 }
 0x161   : > { %v1512_v54 = vadd.f32 %v1444_v35, %v1286_v51  ;;  %1685 = vmatmul.f32.gmra.mxu0 %v1560_v61  ;;  %v1028_v10 = vadd.f32 %v1027_v48, %v3907_v41  ;;  %v1950_v61 = vld [vmem:[%s3271_s30 + $0x2f] sm:$0xff] }
 0x163   : > { %v4218_v22 = vadd.f32 %v1638_v21, %v1512_v54  ;;  %1074 = vmatmul.f32.gmra.mxu1 %v1333_v24  ;;  %2948 = vmatmul.msk.f32.gmra.mxu2 %vm4212_vm15, %v1109_v45  ;;  %v2176_v24 = vld [vmem:[%s3271_s30 + $0x30] sm:$0xff] }
 0x164   : > { %v2370_v45 = vld [vmem:[%s3271_s30 + $0x31] sm:$0xff] }
 0x165   : > { %1494 = vmatmul.f32.gmra.mxu3 %v1335_v3 }
 0x166   : > { %v1221_v27 = vpop.f32.mrf.mxu2  ;;  %v1641_v60 = vpop.f32.mrf.mxu0 }
 0x167   : > { %v1287_v26 = vadd.f32 %v1221_v27, %v1028_v10  ;;  %v1725_v27 = vld [vmem:[%s3271_s30 + $0x29] sm:$0xff] }
 0x168   : > { %v1030_v18 = vpop.f32.mrf.mxu1  ;;  %v1447_v62 = vpop.f32.mrf.mxu3 }
 0x169   : > { %v1513_v21 = vadd.f32 %v1447_v62, %v1287_v26  ;;  %1688 = vmatmul.f32.gmra.mxu0 %v1561_v15  ;;  %v1031_v41 = vadd.f32 %v1030_v18, %v3750_v29  ;;  %v1951_v15 = vld [vmem:[%s3271_s30 + $0x37] sm:$0xff] }
 0x16b   : > { %v4227_v51 = vadd.f32 %v1641_v60, %v1513_v21  ;;  %1821 = vmatmul.f32.vlgmr.msra.gmra.mxu1 %v1724_v6  ;;  %3045 = vmatmul.msk.f32.vlgmr.msra.gmra.mxu2 %vm3592_vm0, %v1950_v61  ;;  %v2177_v60 = vld [vmem:[%s3271_s30 + $0x38] sm:$0xff] }
 0x16c   : > { %v2371_v6 = vld [vmem:[%s3271_s30 + $0x39] sm:$0xff] }
 0x16d   : > { %2241 = vmatmul.f32.vlgmr.msra.gmra.mxu3 %v2176_v24 }
 0x16e   : > { %v1224_v48 = vpop.f32.mrf.mxu2  ;;  %v1644_v35 = vpop.f32.mrf.mxu0 }
 0x16f   : > { %v1288_v54 = vadd.f32 %v1224_v48, %v1031_v41  ;;  %v1952_v41 = vld [vmem:[%s3271_s30 + $0x3f] sm:$0xff] }
 0x170   : > { %v1033_v3 = vpop.f32.mrf.mxu1  ;;  %v1450_v10 = vpop.f32.mrf.mxu3 }
 0x171   : > { %v1514_v26 = vadd.f32 %v1450_v10, %v1288_v54  ;;  %2467 = vmatmul.f32.vlgmr.msra.gmra.mxu0 %v2370_v45  ;;  %v1034_v4 = vadd.f32 %v1033_v3, %v3774_v44 }
 0x173   : > { %v4236_v62 = vadd.f32 %v1644_v35, %v1514_v26  ;;  %3013 = vmatmul.msk.f32.gmra.mxu1 %vm3615_vm1, %v1725_v27  ;;  %2050 = vmatmul.f32.gmra.mxu2 %v1951_v15  ;;  %v2178_v35 = vld [vmem:[%s3271_s30 + $0x40] sm:$0xff] }
 0x174   : > { %v2372_v27 = vld [vmem:[%s3271_s30 + $0x41] sm:$0xff] }
 0x175   : > { %2244 = vmatmul.f32.gmra.mxu3 %v2177_v60 }
 0x176   : > { %v1227_v29 = vpop.f32.mrf.mxu2  ;;  %v1647_v18 = vpop.f32.mrf.mxu0 }
 0x177   : > { %v1289_v61 = vadd.f32 %v1227_v29, %v1034_v4  ;;  %v2179_v29 = vld [vmem:[%s3271_s30 + $0x48] sm:$0xff] }
 0x178   : > { %v1036_v21 = vpop.f32.mrf.mxu1  ;;  %v1453_v24 = vpop.f32.mrf.mxu3 }
 0x179   : > { %v1515_v48 = vadd.f32 %v1453_v24, %v1289_v61  ;;  %3093 = vmatmul.msk.f32.gmra.mxu0 %vm3615_vm1, %v2371_v6  ;;  %v1037_v44 = vadd.f32 %v1036_v21, %v3800_v1  ;;  %v2373_v61 = vld [vmem:[%s3271_s30 + $0x49] sm:$0xff] }
 0x17b   : > { %v4246_v54 = vadd.f32 %v1647_v18, %v1515_v48  ;;  %1827 = vmatmul.f32.gmra.mxu1 %v2370_v45  ;;  %3046 = vmatmul.msk.f32.gmra.mxu2 %vm3628_vm2, %v1952_v41  ;;  %v1954_v48 = vld [vmem:[%s3271_s30 + $0x4f] sm:$0xff] }
 0x17d   : > { %2247 = vmatmul.f32.gmra.mxu3 %v2178_v35 }
 0x17e   : > { %v1230_v3 = vpop.f32.mrf.mxu2  ;;  %v1650_v10 = vpop.f32.mrf.mxu0 }
 0x17f   : > { %v1290_v15 = vadd.f32 %v1230_v3, %v1037_v44  ;;  %v2180_v44 = vld [vmem:[%s3271_s30 + $0x50] sm:$0xff] }
 0x180   : > { %v1039_v26 = vpop.f32.mrf.mxu1  ;;  %v1456_v60 = vpop.f32.mrf.mxu3 }
 0x181   : > { %v1516_v4 = vadd.f32 %v1456_v60, %v1290_v15  ;;  %2473 = vmatmul.f32.gmra.mxu0 %v2372_v27  ;;  %v1040_v25 = vadd.f32 %v1039_v26, %v3824_v20  ;;  %v2374_v15 = vld [vmem:[%s3271_s30 + $0x51] sm:$0xff] }
 0x183   : > { %v4254_v45 = vadd.f32 %v1650_v10, %v1516_v4  ;;  %3014 = vmatmul.msk.f32.gmra.mxu1 %vm3649_vm3, %v2371_v6  ;;  %2056 = vmatmul.f32.gmra.mxu2 %v1953_v19 }
 0x185   : > { %2250 = vmatmul.f32.gmra.mxu3 %v2179_v29  ;;  %v2181_v29 = vld [vmem:[%s3271_s30 + $0x58] sm:$0xff] }
 0x186   : > { %v1233_v1 = vpop.f32.mrf.mxu2  ;;  %v1653_v18 = vpop.f32.mrf.mxu0 }
 0x187   : > { %v1291_v21 = vadd.f32 %v1233_v1, %v1040_v25  ;;  %v2375_v1 = vld [vmem:[%s3271_s30 + $0x59] sm:$0xff] }
 0x188   : > { %v1042_v24 = vpop.f32.mrf.mxu1  ;;  %v1459_v41 = vpop.f32.mrf.mxu3 }
 0x189   : > { %v1517_v35 = vadd.f32 %v1459_v41, %v1291_v21  ;;  %3094 = vmatmul.msk.f32.gmra.mxu0 %vm3649_vm3, %v2373_v61  ;;  %v1043_v20 = vadd.f32 %v1042_v24, %v3850_v39  ;;  %v1956_v41 = vld [vmem:[%s3271_s30 + $0x5f] sm:$0xff]  ;;  %vm4723_vm3 = vnez %v4674_v32 }
 0x18b   : > { %v4264_v6 = vadd.f32 %v1653_v18, %v1517_v35  ;;  %1833 = vmatmul.f32.gmra.mxu1 %v2372_v27  ;;  %3047 = vmatmul.msk.f32.gmra.mxu2 %vm3662_vm4, %v1954_v48  ;;  %v2182_v35 = vld [vmem:[%s3271_s30 + $0x60] sm:$0xff]  ;;  %vm4724_vm4 = vnez %v4676_v13 }
 0x18d   : > { %2253 = vmatmul.f32.gmra.mxu3 %v2180_v44 }
 0x18e   : > { %v1236_v3 = vpop.f32.mrf.mxu2  ;;  %v1656_v10 = vpop.f32.mrf.mxu0 }
 0x18f   : > { %v1292_v26 = vadd.f32 %v1236_v3, %v1043_v20  ;;  %v2376_v3 = vld [vmem:[%s3271_s30 + $0x61] sm:$0xff] }
 0x190   : > { %v1045_v60 = vpop.f32.mrf.mxu1  ;;  %v1462_v19 = vpop.f32.mrf.mxu3 }
 0x191   : > { %v1518_v4 = vadd.f32 %v1462_v19, %v1292_v26  ;;  %2479 = vmatmul.f32.gmra.mxu0 %v2374_v15  ;;  %v1046_v42 = vadd.f32 %v1045_v60, %v3874_v57 }
 0x193   : > { %v4272_v27 = vadd.f32 %v1656_v10, %v1518_v4  ;;  %3015 = vmatmul.msk.f32.gmra.mxu1 %vm3683_vm5, %v2373_v61  ;;  %2062 = vmatmul.f32.gmra.mxu2 %v1955_v36  ;;  %v2183_v36 = vld [vmem:[%s3271_s30 + $0x68] sm:$0xff] }
 0x195   : > { %2256 = vmatmul.f32.gmra.mxu3 %v2181_v29  ;;  %v2377_v29 = vld [vmem:[%s3271_s30 + $0x69] sm:$0xff] }
 0x196   : > { %v1239_v39 = vpop.f32.mrf.mxu2  ;;  %v1659_v25 = vpop.f32.mrf.mxu0 }
 0x197   : > { %v1293_v18 = vadd.f32 %v1239_v39, %v1046_v42 }
 0x198   : > { %v1048_v21 = vpop.f32.mrf.mxu1  ;;  %v1465_v24 = vpop.f32.mrf.mxu3 }
 0x199   : > { %v1519_v48 = vadd.f32 %v1465_v24, %v1293_v18  ;;  %3095 = vmatmul.msk.f32.gmra.mxu0 %vm3683_vm5, %v2375_v1  ;;  %v1049_v57 = vadd.f32 %v1048_v21, %v3900_v33  ;;  %v1958_v18 = vld [vmem:[%s3271_s30 + $0x6f] sm:$0xff]  ;;  %vm4725_vm5 = vnez %v4678_v5 }
 0x19a   : > { %v2184_v24 = vld [vmem:[%s3271_s30 + $0x70] sm:$0xff] }
 0x19b   : > { %v4282_v61 = vadd.f32 %v1659_v25, %v1519_v48  ;;  %1839 = vmatmul.f32.gmra.mxu1 %v2374_v15  ;;  %3048 = vmatmul.msk.f32.gmra.mxu2 %vm3696_vm6, %v1956_v41  ;;  %vm4726_vm6 = vnez %v4680_v31 }
 0x19d   : > { %2259 = vmatmul.f32.gmra.mxu3 %v2182_v35  ;;  %v2378_v35 = vld [vmem:[%s3271_s30 + $0x71] sm:$0xff] }
 0x19e   : > { %v1242_v44 = vpop.f32.mrf.mxu2  ;;  %v1662_v20 = vpop.f32.mrf.mxu0 }
 0x19f   : > { %v1294_v10 = vadd.f32 %v1242_v44, %v1049_v57 }
 0x1a0   : > { %v1051_v26 = vpop.f32.mrf.mxu1  ;;  %v1468_v60 = vpop.f32.mrf.mxu3 }
 0x1a1   : > { %v1520_v19 = vadd.f32 %v1468_v60, %v1294_v10  ;;  %2485 = vmatmul.f32.gmra.mxu0 %v2376_v3  ;;  %v1052_v2 = vadd.f32 %v1051_v26, %v3924_v30  ;;  %v2185_v26 = vld [vmem:[%s3271_s30 + $0x78] sm:$0xff] }
 0x1a3   : > { %v4290_v15 = vadd.f32 %v1662_v20, %v1520_v19  ;;  %3016 = vmatmul.msk.f32.gmra.mxu1 %vm3717_vm7, %v2375_v1  ;;  %2068 = vmatmul.f32.gmra.mxu2 %v1957_v53  ;;  %v2379_v53 = vld [vmem:[%s3271_s30 + $0x79] sm:$0xff] }
 0x1a5   : > { %2262 = vmatmul.f32.gmra.mxu3 %v2183_v36 }
 0x1a6   : > { %v1245_v33 = vpop.f32.mrf.mxu2  ;;  %v1665_v4 = vpop.f32.mrf.mxu0 }
 0x1a7   : > { %v1295_v42 = vadd.f32 %v1245_v33, %v1052_v2  ;;  %v1960_v33 = vld [vmem:[%s3271_s30 + $0x7f] sm:$0xff] }
 0x1a8   : > { %v1054_v39 = vpop.f32.mrf.mxu1  ;;  %v1471_v25 = vpop.f32.mrf.mxu3 }
 0x1a9   : > { %v1521_v21 = vadd.f32 %v1471_v25, %v1295_v42  ;;  %3096 = vmatmul.msk.f32.gmra.mxu0 %vm3717_vm7, %v2377_v29  ;;  %v1055_v30 = vadd.f32 %v1054_v39, %v3759_v37  ;;  %v2186_v42 = vld [vmem:[%s3271_s30 + $0x80] sm:$0xff]  ;;  %vm4727_vm7 = vnez %v4682_v40 }
 0x1ab   : > { %v4300_v1 = vadd.f32 %v1665_v4, %v1521_v21  ;;  %1845 = vmatmul.f32.gmra.mxu1 %v2376_v3  ;;  %3049 = vmatmul.msk.f32.gmra.mxu2 %vm3732_vm8, %v1958_v18  ;;  %v2380_v18 = vld [vmem:[%s3271_s30 + $0x81] sm:$0xff] }
 0x1ad   : > { %2265 = vmatmul.f32.gmra.mxu3 %v2184_v24 }
 0x1ae   : > { %v1248_v41 = vpop.f32.mrf.mxu2  ;;  %v1668_v48 = vpop.f32.mrf.mxu0 }
 0x1af   : > { %v1296_v57 = vadd.f32 %v1248_v41, %v1055_v30 }
 0x1b0   : > { %v1057_v44 = vpop.f32.mrf.mxu1  ;;  %v1474_v20 = vpop.f32.mrf.mxu3 }
 0x1b1   : > { %v1522_v10 = vadd.f32 %v1474_v20, %v1296_v57  ;;  %2491 = vmatmul.f32.gmra.mxu0 %v2378_v35  ;;  %v1058_v23 = vadd.f32 %v1057_v44, %v3780_v46  ;;  %v2381_v44 = vld [vmem:[%s3271_s30 + $0x89] sm:$0xff] }
 0x1b3   : > { %v4308_v3 = vadd.f32 %v1668_v48, %v1522_v10  ;;  %3017 = vmatmul.msk.f32.gmra.mxu1 %vm3761_vm9, %v2377_v29  ;;  %2074 = vmatmul.f32.gmra.mxu2 %v1959_v11  ;;  %v2187_v48 = vld [vmem:[%s3271_s30 + $0x88] sm:$0xff] }
 0x1b5   : > { %2268 = vmatmul.f32.gmra.mxu3 %v2185_v26  ;;  %v1962_v26 = vld [vmem:[%s3271_s30 + $0x8f] sm:$0xff] }
 0x1b6   : > { %v1251_v37 = vpop.f32.mrf.mxu2  ;;  %v1671_v60 = vpop.f32.mrf.mxu0 }
 0x1b7   : > { %v1297_v19 = vadd.f32 %v1251_v37, %v1058_v23  ;;  %v2188_v37 = vld [vmem:[%s3271_s30 + $0x90] sm:$0xff] }
 0x1b8   : > { %v1060_v36 = vpop.f32.mrf.mxu1  ;;  %v1477_v2 = vpop.f32.mrf.mxu3 }
 0x1b9   : > { %v1523_v4 = vadd.f32 %v1477_v2, %v1297_v19  ;;  %3097 = vmatmul.msk.f32.gmra.mxu0 %vm3761_vm9, %v2379_v53  ;;  %v1061_v46 = vadd.f32 %v1060_v36, %v3809_v7  ;;  %v2382_v36 = vld [vmem:[%s3271_s30 + $0x91] sm:$0xff] }
 0x1bb   : > { %v4318_v29 = vadd.f32 %v1671_v60, %v1523_v4  ;;  %1851 = vmatmul.f32.gmra.mxu1 %v2378_v35  ;;  %3050 = vmatmul.msk.f32.gmra.mxu2 %vm3782_vm10, %v1960_v33 }
 0x1bd   : > { %2271 = vmatmul.f32.gmra.mxu3 %v2186_v42 }
 0x1be   : > { %v1254_v39 = vpop.f32.mrf.mxu2  ;;  %v1674_v25 = vpop.f32.mrf.mxu0 }
 0x1bf   : > { %v1298_v21 = vadd.f32 %v1254_v39, %v1061_v46  ;;  %v2189_v46 = vld [vmem:[%s3271_s30 + $0x98] sm:$0xff] }
 0x1c0   : > { %v1063_v24 = vpop.f32.mrf.mxu1  ;;  %v1480_v30 = vpop.f32.mrf.mxu3 }
 0x1c1   : > { %v1524_v41 = vadd.f32 %v1480_v30, %v1298_v21  ;;  %2497 = vmatmul.f32.gmra.mxu0 %v2380_v18  ;;  %v1064_v52 = vadd.f32 %v1063_v24, %v3830_v14  ;;  %v2383_v24 = vld [vmem:[%s3271_s30 + $0x99] sm:$0xff] }
 0x1c3   : > { %v4326_v35 = vadd.f32 %v1674_v25, %v1524_v41  ;;  %3018 = vmatmul.msk.f32.gmra.mxu1 %vm3811_vm11, %v2379_v53  ;;  %2080 = vmatmul.f32.gmra.mxu2 %v1961_v38 }
 0x1c5   : > { %2274 = vmatmul.f32.gmra.mxu3 %v2187_v48  ;;  %v1964_v48 = vld [vmem:[%s3271_s30 + $0x9f] sm:$0xff] }
 0x1c6   : > { %v1257_v7 = vpop.f32.mrf.mxu2  ;;  %v1677_v57 = vpop.f32.mrf.mxu0 }
 0x1c7   : > { %v1299_v20 = vadd.f32 %v1257_v7, %v1064_v52  ;;  %v2190_v7 = vld [vmem:[%s3271_s30 + $0xa0] sm:$0xff] }
 0x1c8   : > { %v1066_v11 = vpop.f32.mrf.mxu1  ;;  %v1483_v10 = vpop.f32.mrf.mxu3 }
 0x1c9   : > { %v1525_v23 = vadd.f32 %v1483_v10, %v1299_v20  ;;  %3098 = vmatmul.msk.f32.gmra.mxu0 %vm3811_vm11, %v2381_v44  ;;  %v1067_v14 = vadd.f32 %v1066_v11, %v3859_v28  ;;  %v4714_v28 = vld [vmem:[#allocation3_spill] sm:$0xff]  ;;  %v4717_v20 = vld [vmem:[#allocation5_spill] sm:$0xff] }
 0x1cb   : > { %v4336_v60 = vadd.f32 %v1677_v57, %v1525_v23  ;;  %1857 = vmatmul.f32.gmra.mxu1 %v2380_v18  ;;  %3051 = vmatmul.msk.f32.gmra.mxu2 %vm3832_vm12, %v1962_v26  ;;  %v2384_v23 = vld [vmem:[%s3271_s30 + $0xa1] sm:$0xff] }
 0x1cd   : > { %2277 = vmatmul.f32.gmra.mxu3 %v2188_v37 }
 0x1ce   : > { %v1260_v53 = vpop.f32.mrf.mxu2  ;;  %v1680_v19 = vpop.f32.mrf.mxu0 }
 0x1cf   : > { %v1300_v2 = vadd.f32 %v1260_v53, %v1067_v14 }
 0x1d0   : > { %v1069_v33 = vpop.f32.mrf.mxu1  ;;  %v1486_v4 = vpop.f32.mrf.mxu3 }
 0x1d1   : > { %v1526_v42 = vadd.f32 %v1486_v4, %v1300_v2  ;;  %2503 = vmatmul.f32.gmra.mxu0 %v2382_v36  ;;  %v1070_v25 = vadd.f32 %v1069_v33, %v4714_v28  ;;  %v2191_v33 = vld [vmem:[%s3271_s30 + $0xa8] sm:$0xff]  ;;  %v4718_v4 = vld [vmem:[#allocation6_spill] sm:$0xff] }
 0x1d2   : > { %vm4719_vm1 = vnez %v4718_v4  ;;  %v2385_v28 = vld [vmem:[%s3271_s30 + $0xa9] sm:$0xff] }
 0x1d3   : > { %v4344_v39 = vadd.f32 %v1680_v19, %v1526_v42  ;;  %3019 = vmatmul.msk.f32.gmra.mxu1 %vm3861_vm13, %v2381_v44  ;;  %2086 = vmatmul.f32.gmra.mxu2 %v1963_v8  ;;  %v4715_v44 = vld [vmem:[#allocation4_spill] sm:$0xff]  ;;  %v1965_v19 = vld [vmem:[%s3271_s30 + $0xa7] sm:$0xff] }
 0x1d4   : > { %vm4716_vm0 = vnez %v4715_v44  ;;  %v4720_v8 = vld [vmem:[#allocation7_spill] sm:$0xff] }
 0x1d5   : > { %2280 = vmatmul.f32.gmra.mxu3 %v2189_v46 }
 0x1d6   : > { %v1263_v18 = vpop.f32.mrf.mxu2  ;;  %v1683_v21 = vpop.f32.mrf.mxu0 }
 0x1d7   : > { %v1301_v30 = vadd.f32 %v1263_v18, %v1070_v25 }
 0x1d8   : > { %v1072_v38 = vpop.f32.mrf.mxu1  ;;  %v1489_v41 = vpop.f32.mrf.mxu3 }
 0x1d9   : > { %v1527_v52 = vadd.f32 %v1489_v41, %v1301_v30  ;;  %3099 = vmatmul.msk.f32.gmra.mxu0 %vm3861_vm13, %v2383_v24  ;;  %v1073_v11 = vadd.f32 %v1072_v38, %v4717_v20  ;;  %v1966_v30 = vld [vmem:[%s3271_s30 + $0xaf] sm:$0xff] }
 0x1da   : > { %v2192_v41 = vld [vmem:[%s3271_s30 + $0xb0] sm:$0xff] }
 0x1db   : > { %v4354_v57 = vadd.f32 %v1683_v21, %v1527_v52  ;;  %1863 = vmatmul.f32.gmra.mxu1 %v2382_v36  ;;  %3052 = vmatmul.msk.f32.gmra.mxu2 %vm4716_vm0, %v1964_v48  ;;  %v4721_v48 = vld [vmem:[#allocation8_spill] sm:$0xff] }
 0x1dc   : > { %vm4722_vm2 = vnez %v4721_v48  ;;  %v2386_v20 = vld [vmem:[%s3271_s30 + $0xb1] sm:$0xff]  ;;  %v2388_v48 = vld [vmem:[%s3271_s30 + $0xc1] sm:$0xff] }
 0x1dd   : > { %2283 = vmatmul.f32.gmra.mxu3 %v2190_v7 }
 0x1de   : > { %v1266_v10 = vpop.f32.mrf.mxu2  ;;  %v1686_v26 = vpop.f32.mrf.mxu0 }
 0x1df   : > { %v1302_v37 = vadd.f32 %v1266_v10, %v1073_v11 }
 0x1e0   : > { %v1075_v14 = vpop.f32.mrf.mxu1  ;;  %v1492_v53 = vpop.f32.mrf.mxu3 }
 0x1e1   : > { %v1528_v2 = vadd.f32 %v1492_v53, %v1302_v37  ;;  %2509 = vmatmul.f32.gmra.mxu0 %v2384_v23  ;;  %v1076_v42 = vadd.f32 %v1075_v14, %v4720_v8  ;;  %v1967_v37 = vld [vmem:[%s3271_s30 + $0xb7] sm:$0xff] }
 0x1e2   : > { %v2193_v53 = vld [vmem:[%s3271_s30 + $0xb8] sm:$0xff] }
 0x1e3   : > { %v4362_v36 = vadd.f32 %v1686_v26, %v1528_v2  ;;  %3020 = vmatmul.msk.f32.gmra.mxu1 %vm4719_vm1, %v2383_v24  ;;  %2092 = vmatmul.f32.gmra.mxu2 %v1965_v19  ;;  %v2387_v8 = vld [vmem:[%s3271_s30 + $0xb9] sm:$0xff] }
 0x1e5   : > { %2286 = vmatmul.f32.gmra.mxu3 %v2191_v33 }
 0x1e6   : > { %v1269_v46 = vpop.f32.mrf.mxu2  ;;  %v1689_v16 = vpop.f32.mrf.mxu0 }
 0x1e7   : > { %v1303_v25 = vadd.f32 %v1269_v46, %v1076_v42 }
 0x1e8   : > { %v1495_v18 = vpop.f32.mrf.mxu3  ;;  %v1822_v21 = vpop.f32.mrf.mxu1 }
 0x1e9   : > { %v1529_v38 = vadd.f32 %v1495_v18, %v1303_v25  ;;  %3100 = vmatmul.msk.f32.gmra.mxu0 %vm4719_vm1, %v2385_v28  ;;  %v1918_v52 = vadd.f32 %v1822_v21, %v3960_v55  ;;  %v2194_v18 = vld [vmem:[%s3271_s30 + $0xc0] sm:$0xff]  ;;  %vm4745_vm1 = vnez %v4708_v59 }
 0x1eb   : > { %v4372_v24 = vadd.f32 %v1689_v16, %v1529_v38  ;;  %1869 = vmatmul.f32.gmra.mxu1 %v2384_v23  ;;  %3053 = vmatmul.msk.f32.gmra.mxu2 %vm4722_vm2, %v1966_v30  ;;  %v4383_v23 = vld [vmem:[%s4588_s2] ss:$0 sm:$0xff] }
 0x1ed   : > { %2289 = vmatmul.f32.gmra.mxu3 %v2192_v41 }
 0x1ee   : > { %v2048_v7 = vpop.f32.mrf.mxu2  ;;  %v2468_v44 = vpop.f32.mrf.mxu0 }
 0x1ef   : > { %v2144_v11 = vadd.f32 %v2048_v7, %v1918_v52 }
 0x1f0   : > { %v1825_v10 = vpop.f32.mrf.mxu1  ;;  %v2242_v26 = vpop.f32.mrf.mxu3 }
 0x1f1   : > { %v2338_v14 = vadd.f32 %v2242_v26, %v2144_v11  ;;  %2515 = vmatmul.f32.gmra.mxu0 %v2386_v20  ;;  %v1919_v19 = vadd.f32 %v1825_v10, %v3976_v0  ;;  %v1969_v10 = vld [vmem:[%s3271_s30 + $0xc7] sm:$0xff] }
 0x1f3   : > { %v2564_v55 = vadd.f32 %v2468_v44, %v2338_v14  ;;  %3021 = vmatmul.msk.f32.gmra.mxu1 %vm4723_vm3, %v2385_v28  ;;  %2098 = vmatmul.f32.gmra.mxu2 %v1967_v37  ;;  %v1968_v28 = vld [vmem:[%s3271_s30 + $0xbf] sm:$0xff] }
 0x1f5   : > { %v2600_v2 = vadd.f32 %v4383_v23, %v2564_v55  ;;  %2292 = vmatmul.f32.gmra.mxu3 %v2193_v53 }
 0x1f6   : > { %v2051_v33 = vpop.f32.mrf.mxu2  ;;  %v2471_v4 = vpop.f32.mrf.mxu0 }
 0x1f7   : > { %2740 = vst [vmem:[%s4391_s29] sm:$0xff] %v2600_v2  ;;  %v2145_v42 = vadd.f32 %v2051_v33, %v1919_v19  ;;  %v2670_v52 = vmul.f32 %v2600_v2, %v2600_v2 }
 0x1f8   : > { %v1828_v46 = vpop.f32.mrf.mxu1  ;;  %v2245_v16 = vpop.f32.mrf.mxu3 }
 0x1f9   : > { %v2339_v25 = vadd.f32 %v2245_v16, %v2145_v42  ;;  %3101 = vmatmul.msk.f32.gmra.mxu0 %vm4723_vm3, %v2387_v8  ;;  %v1920_v0 = vadd.f32 %v1828_v46, %v4000_v12  ;;  %v2195_v12 = vld [vmem:[%s3271_s30 + $0xc8] sm:$0xff] }
 0x1fb   : > { %v2565_v21 = vadd.f32 %v2471_v4, %v2339_v25  ;;  %1875 = vmatmul.f32.gmra.mxu1 %v2386_v20  ;;  %3054 = vmatmul.msk.f32.gmra.mxu2 %vm4724_vm4, %v1968_v28  ;;  %v1970_v28 = vld [vmem:[%s3271_s30 + $0xcf] sm:$0xff] }
 0x1fd   : > { %v2601_v30 = vadd.f32 %v4383_v23, %v2565_v21  ;;  %2295 = vmatmul.f32.gmra.mxu3 %v2194_v18 }
 0x1fe   : > { %v2054_v38 = vpop.f32.mrf.mxu2  ;;  %v2474_v41 = vpop.f32.mrf.mxu0 }
 0x1ff   : > { %v2632_v7 = vadd.f32 %v2601_v30, %v2600_v2  ;;  %v2671_v32 = vmul.f32 %v2601_v30, %v2601_v30  ;;  %2741 = vst [vmem:[%s4391_s29 + $0x8] sm:$0xff] %v2601_v30  ;;  %v2146_v44 = vadd.f32 %v2054_v38, %v1920_v0  ;;  %v2389_v2 = vld [vmem:[%s3271_s30 + $0xc9] sm:$0xff] }
 0x200   : > { %v1831_v11 = vpop.f32.mrf.mxu1  ;;  %v2248_v20 = vpop.f32.mrf.mxu3 }
 0x201   : > { %v2702_v13 = vadd.f32 %v2671_v32, %v2670_v52  ;;  %v2340_v26 = vadd.f32 %v2248_v20, %v2146_v44  ;;  %2521 = vmatmul.f32.gmra.mxu0 %v2388_v48  ;;  %v1921_v14 = vadd.f32 %v1831_v11, %v4016_v49  ;;  %v2196_v49 = vld [vmem:[%s3271_s30 + $0xd0] sm:$0xff] }
 0x203   : > { %v2566_v37 = vadd.f32 %v2474_v41, %v2340_v26  ;;  %3022 = vmatmul.msk.f32.gmra.mxu1 %vm4725_vm5, %v2387_v8  ;;  %2104 = vmatmul.f32.gmra.mxu2 %v1969_v10  ;;  %v2390_v41 = vld [vmem:[%s3271_s30 + $0xd1] sm:$0xff] }
 0x205   : > { %v2602_v53 = vadd.f32 %v4383_v23, %v2566_v37  ;;  %2298 = vmatmul.f32.gmra.mxu3 %v2195_v12  ;;  %v2391_v37 = vld [vmem:[%s3271_s30 + $0xd9] sm:$0xff] }
 0x206   : > { %v2057_v55 = vpop.f32.mrf.mxu2  ;;  %v2477_v19 = vpop.f32.mrf.mxu0 }
 0x207   : > { %v2633_v33 = vadd.f32 %v2632_v7, %v2602_v53  ;;  %v2672_v4 = vmul.f32 %v2602_v53, %v2602_v53  ;;  %2742 = vst [vmem:[%s4391_s29 + $0x10] sm:$0xff] %v2602_v53  ;;  %v2147_v42 = vadd.f32 %v2057_v55, %v1921_v14 }
 0x208   : > { %v1834_v46 = vpop.f32.mrf.mxu1  ;;  %v2251_v16 = vpop.f32.mrf.mxu3 }
 0x209   : > { %v2703_v8 = vadd.f32 %v2702_v13, %v2672_v4  ;;  %v2341_v25 = vadd.f32 %v2251_v16, %v2147_v42  ;;  %3102 = vmatmul.msk.f32.gmra.mxu0 %vm4725_vm5, %v2389_v2  ;;  %v1922_v21 = vadd.f32 %v1834_v46, %v4040_v56  ;;  %v2197_v56 = vld [vmem:[%s3271_s30 + $0xd8] sm:$0xff] }
 0x20a   : > { %v1972_v4 = vld [vmem:[%s3271_s30 + $0xdf] sm:$0xff] }
 0x20b   : > { %v2567_v18 = vadd.f32 %v2477_v19, %v2341_v25  ;;  %1881 = vmatmul.f32.gmra.mxu1 %v2388_v48  ;;  %3055 = vmatmul.msk.f32.gmra.mxu2 %vm4726_vm6, %v1970_v28  ;;  %v1971_v48 = vld [vmem:[%s3271_s30 + $0xd7] sm:$0xff] }
 0x20c   : > { %v4728_v16 = vld [vmem:[#allocation9_spill] sm:$0xff] }
 0x20d   : > { %v2603_v0 = vadd.f32 %v4383_v23, %v2567_v18  ;;  %2301 = vmatmul.f32.gmra.mxu3 %v2196_v49  ;;  %vm4729_vm8 = vnez %v4728_v16  ;;  %v2392_v18 = vld [vmem:[%s3271_s30 + $0xe1] sm:$0xff] }
 0x20e   : > { %v2060_v30 = vpop.f32.mrf.mxu2  ;;  %v2480_v38 = vpop.f32.mrf.mxu0 }
 0x20f   : > { %v2634_v52 = vadd.f32 %v2633_v33, %v2603_v0  ;;  %v2673_v7 = vmul.f32 %v2603_v0, %v2603_v0  ;;  %2743 = vst [vmem:[%s4391_s29 + $0x18] sm:$0xff] %v2603_v0  ;;  %v2148_v5 = vadd.f32 %v2060_v30, %v1922_v21 }
 0x210   : > { %v1837_v32 = vpop.f32.mrf.mxu1  ;;  %v2254_v44 = vpop.f32.mrf.mxu3 }
 0x211   : > { %v2704_v31 = vadd.f32 %v2703_v8, %v2673_v7  ;;  %v2342_v11 = vadd.f32 %v2254_v44, %v2148_v5  ;;  %2527 = vmatmul.f32.gmra.mxu0 %v2390_v41  ;;  %v1923_v10 = vadd.f32 %v1837_v32, %v4056_v17  ;;  %v2198_v17 = vld [vmem:[%s3271_s30 + $0xe0] sm:$0xff] }
 0x212   : > { %v4730_v32 = vld [vmem:[#allocation10_spill] sm:$0xff] }
 0x213   : > { %v2568_v20 = vadd.f32 %v2480_v38, %v2342_v11  ;;  %3023 = vmatmul.msk.f32.gmra.mxu1 %vm4727_vm7, %v2389_v2  ;;  %2110 = vmatmul.f32.gmra.mxu2 %v1971_v48  ;;  %vm4731_vm9 = vnez %v4730_v32 }
 0x215   : > { %v2604_v13 = vadd.f32 %v4383_v23, %v2568_v20  ;;  %2304 = vmatmul.f32.gmra.mxu3 %v2197_v56  ;;  %v2393_v56 = vld [vmem:[%s3271_s30 + $0xe9] sm:$0xff] }
 0x216   : > { %v2063_v26 = vpop.f32.mrf.mxu2  ;;  %v2483_v12 = vpop.f32.mrf.mxu0 }
 0x217   : > { %v2635_v14 = vadd.f32 %v2634_v52, %v2604_v13  ;;  %v2674_v53 = vmul.f32 %v2604_v13, %v2604_v13  ;;  %2744 = vst [vmem:[%s4391_s29 + $0x20] sm:$0xff] %v2604_v13  ;;  %v2149_v55 = vadd.f32 %v2063_v26, %v1923_v10 }
 0x218   : > { %v1840_v19 = vpop.f32.mrf.mxu1  ;;  %v2257_v33 = vpop.f32.mrf.mxu3 }
 0x219   : > { %v2705_v2 = vadd.f32 %v2704_v31, %v2674_v53  ;;  %v2343_v42 = vadd.f32 %v2257_v33, %v2149_v55  ;;  %3103 = vmatmul.msk.f32.gmra.mxu0 %vm4727_vm7, %v2391_v37  ;;  %v1924_v28 = vadd.f32 %v1840_v19, %v4080_v58  ;;  %v2199_v58 = vld [vmem:[%s3271_s30 + $0xe8] sm:$0xff] }
 0x21a   : > { %v4732_v19 = vld [vmem:[#allocation11_spill] sm:$0xff] }
 0x21b   : > { %v2569_v46 = vadd.f32 %v2483_v12, %v2343_v42  ;;  %1887 = vmatmul.f32.gmra.mxu1 %v2390_v41  ;;  %3056 = vmatmul.msk.f32.gmra.mxu2 %vm4729_vm8, %v1972_v4  ;;  %v1973_v41 = vld [vmem:[%s3271_s30 + $0xe7] sm:$0xff]  ;;  %vm4733_vm10 = vnez %v4732_v19 }
 0x21d   : > { %v2605_v8 = vadd.f32 %v4383_v23, %v2569_v46  ;;  %2307 = vmatmul.f32.gmra.mxu3 %v2198_v17  ;;  %v2394_v17 = vld [vmem:[%s3271_s30 + $0xf1] sm:$0xff] }
 0x21e   : > { %v2066_v25 = vpop.f32.mrf.mxu2  ;;  %v2486_v49 = vpop.f32.mrf.mxu0 }
 0x21f   : > { %v2636_v21 = vadd.f32 %v2635_v14, %v2605_v8  ;;  %v2675_v0 = vmul.f32 %v2605_v8, %v2605_v8  ;;  %2745 = vst [vmem:[%s4391_s29 + $0x28] sm:$0xff] %v2605_v8  ;;  %v2150_v40 = vadd.f32 %v2066_v25, %v1924_v28  ;;  %v1974_v14 = vld [vmem:[%s3271_s30 + $0xef] sm:$0xff] }
 0x220   : > { %v1843_v30 = vpop.f32.mrf.mxu1  ;;  %v2260_v38 = vpop.f32.mrf.mxu3 }
 0x221   : > { %v2706_v52 = vadd.f32 %v2705_v2, %v2675_v0  ;;  %v2344_v7 = vadd.f32 %v2260_v38, %v2150_v40  ;;  %2533 = vmatmul.f32.gmra.mxu0 %v2392_v18  ;;  %v1925_v44 = vadd.f32 %v1843_v30, %v4096_v34  ;;  %v2200_v34 = vld [vmem:[%s3271_s30 + $0xf0] sm:$0xff]  ;;  %v4736_v30 = vld [vmem:[#allocation14_spill] sm:$0xff] }
 0x222   : > { %v4734_v40 = vld [vmem:[#allocation12_spill] sm:$0xff] }
 0x223   : > { %v2570_v5 = vadd.f32 %v2486_v49, %v2344_v7  ;;  %3024 = vmatmul.msk.f32.gmra.mxu1 %vm4731_vm9, %v2391_v37  ;;  %2116 = vmatmul.f32.gmra.mxu2 %v1973_v41  ;;  %v1975_v49 = vld [vmem:[%s3271_s30 + $0xf7] sm:$0xff]  ;;  %vm4735_vm11 = vnez %v4734_v40  ;;  %v2397_v40 = vld [vmem:[%s3271_s30 + $0x109] sm:$0xff] }
 0x225   : > { %v2606_v48 = vadd.f32 %v4383_v23, %v2570_v5  ;;  %2310 = vmatmul.f32.gmra.mxu3 %v2199_v58  ;;  %v2395_v58 = vld [vmem:[%s3271_s30 + $0xf9] sm:$0xff] }
 0x226   : > { %v2069_v31 = vpop.f32.mrf.mxu2  ;;  %v2489_v11 = vpop.f32.mrf.mxu0 }
 0x227   : > { %v2637_v20 = vadd.f32 %v2636_v21, %v2606_v48  ;;  %v2676_v10 = vmul.f32 %v2606_v48, %v2606_v48  ;;  %2746 = vst [vmem:[%s4391_s29 + $0x30] sm:$0xff] %v2606_v48  ;;  %v2151_v13 = vadd.f32 %v2069_v31, %v1925_v44 }
 0x228   : > { %v1846_v26 = vpop.f32.mrf.mxu1  ;;  %v2263_v12 = vpop.f32.mrf.mxu3 }
 0x229   : > { %v2707_v37 = vadd.f32 %v2706_v52, %v2676_v10  ;;  %v2345_v53 = vadd.f32 %v2263_v12, %v2151_v13  ;;  %3104 = vmatmul.msk.f32.gmra.mxu0 %vm4731_vm9, %v2393_v56  ;;  %v1926_v33 = vadd.f32 %v1846_v26, %v4120_v47  ;;  %v2201_v47 = vld [vmem:[%s3271_s30 + $0xf8] sm:$0xff]  ;;  %v2202_v10 = vld [vmem:[%s3271_s30 + $0x100] sm:$0xff]  ;;  %v4739_v12 = vld [vmem:[#allocation16_spill] sm:$0xff] }
 0x22a   : > { %v4737_v26 = vld [vmem:[#allocation13_spill] sm:$0xff] }
 0x22b   : > { %v2571_v55 = vadd.f32 %v2489_v11, %v2345_v53  ;;  %1893 = vmatmul.f32.gmra.mxu1 %v2392_v18  ;;  %3057 = vmatmul.msk.f32.gmra.mxu2 %vm4733_vm10, %v1974_v14  ;;  %v1976_v11 = vld [vmem:[%s3271_s30 + $0xff] sm:$0xff]  ;;  %vm4738_vm12 = vnez %v4737_v26 }
 0x22d   : > { %v2607_v4 = vadd.f32 %v4383_v23, %v2571_v55  ;;  %2313 = vmatmul.f32.gmra.mxu3 %v2200_v34  ;;  %v2396_v55 = vld [vmem:[%s3271_s30 + $0x101] sm:$0xff] }
 0x22e   : > { %v2072_v2 = vpop.f32.mrf.mxu2  ;;  %v2492_v42 = vpop.f32.mrf.mxu0 }
 0x22f   : > { %v2638_v46 = vadd.f32 %v2637_v20, %v2607_v4  ;;  %v2677_v16 = vmul.f32 %v2607_v4, %v2607_v4  ;;  %2747 = vst [vmem:[%s4391_s29 + $0x38] sm:$0xff] %v2607_v4  ;;  %v2152_v28 = vadd.f32 %v2072_v2, %v1926_v33 }
 0x230   : > { %v1849_v8 = vpop.f32.mrf.mxu1  ;;  %v2266_v25 = vpop.f32.mrf.mxu3 }
 0x231   : > { %v2708_v18 = vadd.f32 %v2707_v37, %v2677_v16  ;;  %v2346_v21 = vadd.f32 %v2266_v25, %v2152_v28  ;;  %2539 = vmatmul.f32.gmra.mxu0 %v2394_v17  ;;  %v1927_v38 = vadd.f32 %v1849_v8, %v4736_v30  ;;  %v2203_v28 = vld [vmem:[%s3271_s30 + $0x108] sm:$0xff] }
 0x232   : > { %v4740_v25 = vld [vmem:[#allocation15_spill] sm:$0xff] }
 0x233   : > { %v2572_v0 = vadd.f32 %v2492_v42, %v2346_v21  ;;  %3025 = vmatmul.msk.f32.gmra.mxu1 %vm4735_vm11, %v2393_v56  ;;  %2122 = vmatmul.f32.gmra.mxu2 %v1975_v49  ;;  %vm4741_vm13 = vnez %v4740_v25  ;;  %v4742_v49 = vld [vmem:[#allocation18_spill] sm:$0xff] }
 0x235   : > { %v2608_v41 = vadd.f32 %v4383_v23, %v2572_v0  ;;  %2316 = vmatmul.f32.gmra.mxu3 %v2201_v47 }
 0x236   : > { %v2075_v52 = vpop.f32.mrf.mxu2  ;;  %v2495_v7 = vpop.f32.mrf.mxu0 }
 0x237   : > { %v2639_v5 = vadd.f32 %v2638_v46, %v2608_v41  ;;  %v2678_v32 = vmul.f32 %v2608_v41, %v2608_v41  ;;  %2748 = vst [vmem:[%s4391_s29 + $0x40] sm:$0xff] %v2608_v41  ;;  %v2153_v44 = vadd.f32 %v2075_v52, %v1927_v38 }
 0x238   : > { %v1852_v48 = vpop.f32.mrf.mxu1  ;;  %v2269_v31 = vpop.f32.mrf.mxu3 }
 0x239   : > { %v2709_v56 = vadd.f32 %v2708_v18, %v2678_v32  ;;  %v2347_v20 = vadd.f32 %v2269_v31, %v2153_v44  ;;  %3105 = vmatmul.msk.f32.gmra.mxu0 %vm4735_vm11, %v2395_v58  ;;  %v1928_v14 = vadd.f32 %v1852_v48, %v4739_v12  ;;  %v2204_v44 = vld [vmem:[%s3271_s30 + $0x110] sm:$0xff]  ;;  %v4743_v31 = vld [vmem:[#allocation17_spill] sm:$0xff] }
 0x23a   : > { %vm4744_vm0 = vnez %v4743_v31 }
 0x23b   : > { %v2573_v13 = vadd.f32 %v2495_v7, %v2347_v20  ;;  %1899 = vmatmul.f32.gmra.mxu1 %v2394_v17  ;;  %3058 = vmatmul.msk.f32.gmra.mxu2 %vm4738_vm12, %v1976_v11  ;;  %v1977_v17 = vld [vmem:[%s3271_s30 + $0x107] sm:$0xff] }
 0x23d   : > { %v2609_v37 = vadd.f32 %v4383_v23, %v2573_v13  ;;  %2319 = vmatmul.f32.gmra.mxu3 %v2202_v10  ;;  %v2398_v13 = vld [vmem:[%s3271_s30 + $0x111] sm:$0xff] }
 0x23e   : > { %v2078_v53 = vpop.f32.mrf.mxu2  ;;  %v2498_v34 = vpop.f32.mrf.mxu0 }
 0x23f   : > { %v2640_v19 = vadd.f32 %v2639_v5, %v2609_v37  ;;  %v2679_v33 = vmul.f32 %v2609_v37, %v2609_v37  ;;  %2749 = vst [vmem:[%s4391_s29 + $0x48] sm:$0xff] %v2609_v37  ;;  %v2154_v4 = vadd.f32 %v2078_v53, %v1928_v14  ;;  %v1978_v5 = vld [vmem:[%s3271_s30 + $0x10f] sm:$0xff] }
 0x240   : > { %v1855_v2 = vpop.f32.mrf.mxu1  ;;  %v2272_v42 = vpop.f32.mrf.mxu3 }
 0x241   : > { %v2710_v46 = vadd.f32 %v2709_v56, %v2679_v33  ;;  %v2348_v16 = vadd.f32 %v2272_v42, %v2154_v4  ;;  %2545 = vmatmul.f32.gmra.mxu0 %v2396_v55  ;;  %v1929_v18 = vadd.f32 %v1855_v2, %v4742_v49 }
 0x243   : > { %v2574_v8 = vadd.f32 %v2498_v34, %v2348_v16  ;;  %3026 = vmatmul.msk.f32.gmra.mxu1 %vm4741_vm13, %v2395_v58  ;;  %2128 = vmatmul.f32.gmra.mxu2 %v1977_v17  ;;  %v1979_v34 = vld [vmem:[%s3271_s30 + $0x117] sm:$0xff] }
 0x245   : > { %v2610_v21 = vadd.f32 %v4383_v23, %v2574_v8  ;;  %2322 = vmatmul.f32.gmra.mxu3 %v2203_v28 }
 0x246   : > { %v2081_v47 = vpop.f32.mrf.mxu2  ;;  %v2501_v0 = vpop.f32.mrf.mxu0 }
 0x247   : > { %v2641_v30 = vadd.f32 %v2640_v19, %v2610_v21  ;;  %v2680_v38 = vmul.f32 %v2610_v21, %v2610_v21  ;;  %2750 = vst [vmem:[%s4391_s29 + $0x50] sm:$0xff] %v2610_v21  ;;  %v2155_v41 = vadd.f32 %v2081_v47, %v1929_v18  ;;  %v1980_v18 = vld [vmem:[%s3271_s30 + $0x11f] sm:$0xff] }
 0x248   : > { %v1858_v52 = vpop.f32.mrf.mxu1  ;;  %v2275_v7 = vpop.f32.mrf.mxu3 }
 0x249   : > { %v2711_v58 = vadd.f32 %v2710_v46, %v2680_v38  ;;  %v2349_v32 = vadd.f32 %v2275_v7, %v2155_v41  ;;  %3106 = vmatmul.msk.f32.gmra.mxu0 %vm4741_vm13, %v2397_v40  ;;  %v1930_v11 = vadd.f32 %v1858_v52, %v4191_v9  ;;  %v2205_v9 = vld [vmem:[%s3271_s30 + $0x118] sm:$0xff]  ;;  %v2400_v52 = vld [vmem:[%s3271_s30 + $0x121] sm:$0xff] }
 0x24a   : > { %v2399_v46 = vld [vmem:[%s3271_s30 + $0x119] sm:$0xff] }
 0x24b   : > { %v2575_v48 = vadd.f32 %v2501_v0, %v2349_v32  ;;  %1905 = vmatmul.f32.gmra.mxu1 %v2396_v55  ;;  %3059 = vmatmul.msk.f32.gmra.mxu2 %vm4744_vm0, %v1978_v5 }
 0x24d   : > { %v2611_v56 = vadd.f32 %v4383_v23, %v2575_v48  ;;  %2325 = vmatmul.f32.gmra.mxu3 %v2204_v44  ;;  %v1981_v44 = vld [vmem:[%s3271_s30 + $0x127] sm:$0xff] }
 0x24e   : > { %v2084_v20 = vpop.f32.mrf.mxu2  ;;  %v2504_v10 = vpop.f32.mrf.mxu0 }
 0x24f   : > { %v2642_v26 = vadd.f32 %v2641_v30, %v2611_v56  ;;  %v2681_v12 = vmul.f32 %v2611_v56, %v2611_v56  ;;  %2751 = vst [vmem:[%s4391_s29 + $0x58] sm:$0xff] %v2611_v56  ;;  %v2156_v14 = vadd.f32 %v2084_v20, %v1930_v11 }
 0x250   : > { %v1861_v37 = vpop.f32.mrf.mxu1  ;;  %v2278_v53 = vpop.f32.mrf.mxu3 }
 0x251   : > { %v2712_v55 = vadd.f32 %v2711_v58, %v2681_v12  ;;  %v2350_v19 = vadd.f32 %v2278_v53, %v2156_v14  ;;  %2551 = vmatmul.f32.gmra.mxu0 %v2398_v13  ;;  %v1931_v4 = vadd.f32 %v1861_v37, %v4204_v43  ;;  %v2206_v43 = vld [vmem:[%s3271_s30 + $0x120] sm:$0xff] }
 0x253   : > { %v2576_v33 = vadd.f32 %v2504_v10, %v2350_v19  ;;  %3027 = vmatmul.msk.f32.gmra.mxu1 %vm4745_vm1, %v2397_v40  ;;  %2134 = vmatmul.f32.gmra.mxu2 %v1979_v34 }
 0x255   : > { %v2612_v2 = vadd.f32 %v4383_v23, %v2576_v33  ;;  %2328 = vmatmul.f32.gmra.mxu3 %v2205_v9 }
 0x256   : > { %v2087_v42 = vpop.f32.mrf.mxu2  ;;  %v2507_v17 = vpop.f32.mrf.mxu0 }
 0x257   : > { %v2643_v16 = vadd.f32 %v2642_v26, %v2612_v2  ;;  %v2682_v28 = vmul.f32 %v2612_v2, %v2612_v2  ;;  %2752 = vst [vmem:[%s4391_s29 + $0x60] sm:$0xff] %v2612_v2  ;;  %v2157_v8 = vadd.f32 %v2087_v42, %v1931_v4 }
 0x258   : > { %v1864_v25 = vpop.f32.mrf.mxu1  ;;  %v2281_v49 = vpop.f32.mrf.mxu3 }
 0x259   : > { %v2713_v21 = vadd.f32 %v2712_v55, %v2682_v28  ;;  %v2351_v47 = vadd.f32 %v2281_v49, %v2157_v8  ;;  %3107 = vmatmul.msk.f32.gmra.mxu0 %vm4745_vm1, %v2399_v46  ;;  %v1932_v40 = vadd.f32 %v1864_v25, %v4218_v22  ;;  %v2207_v22 = vld [vmem:[%s3271_s30 + $0x128] sm:$0xff] }
 0x25b   : > { %v2577_v0 = vadd.f32 %v2507_v17, %v2351_v47  ;;  %1911 = vmatmul.f32.gmra.mxu1 %v2398_v13  ;;  %3060 = vmatmul.msk.f32.gmra.mxu2 %vm4197_vm14, %v1980_v18  ;;  %v2401_v13 = vld [vmem:[%s3271_s30 + $0x129] sm:$0xff] }
 0x25d   : > { %v2613_v30 = vadd.f32 %v4383_v23, %v2577_v0  ;;  %2331 = vmatmul.f32.gmra.mxu3 %v2206_v43 }
 0x25e   : > { %v2090_v38 = vpop.f32.mrf.mxu2  ;;  %v2510_v41 = vpop.f32.mrf.mxu0 }
 0x25f   : > { %v2644_v7 = vadd.f32 %v2643_v16, %v2613_v30  ;;  %v2683_v5 = vmul.f32 %v2613_v30, %v2613_v30  ;;  %2753 = vst [vmem:[%s4391_s29 + $0x68] sm:$0xff] %v2613_v30  ;;  %v2158_v59 = vadd.f32 %v2090_v38, %v1932_v40 }
 0x260   : > { %v1867_v58 = vpop.f32.mrf.mxu1  ;;  %v2284_v32 = vpop.f32.mrf.mxu3 }
 0x261   : > { %v2714_v50 = vadd.f32 %v2713_v21, %v2683_v5  ;;  %v2352_v48 = vadd.f32 %v2284_v32, %v2158_v59  ;;  %2557 = vmatmul.f32.gmra.mxu0 %v2400_v52  ;;  %v1933_v11 = vadd.f32 %v1867_v58, %v4227_v51 }
 0x263   : > { %v2578_v31 = vadd.f32 %v2510_v41, %v2352_v48  ;;  %3028 = vmatmul.msk.f32.gmra.mxu1 %vm4212_vm15, %v2399_v46  ;;  %2140 = vmatmul.f32.gmra.mxu2 %v1981_v44 }
 0x265   : > { %v2614_v56 = vadd.f32 %v4383_v23, %v2578_v31  ;;  %2334 = vmatmul.f32.gmra.mxu3 %v2207_v22 }
 0x266   : > { %v2093_v20 = vpop.f32.mrf.mxu2  ;;  %v2513_v10 = vpop.f32.mrf.mxu0 }
 0x267   : > { %v2645_v26 = vadd.f32 %v2644_v7, %v2614_v56  ;;  %v2684_v12 = vmul.f32 %v2614_v56, %v2614_v56  ;;  %2754 = vst [vmem:[%s4391_s29 + $0x70] sm:$0xff] %v2614_v56  ;;  %v2159_v14 = vadd.f32 %v2093_v20, %v1933_v11 }
 0x268   : > { %v1870_v37 = vpop.f32.mrf.mxu1  ;;  %v2287_v53 = vpop.f32.mrf.mxu3 }
 0x269   : > { %v2715_v34 = vadd.f32 %v2714_v50, %v2684_v12  ;;  %v2353_v55 = vadd.f32 %v2287_v53, %v2159_v14  ;;  %3108 = vmatmul.msk.f32.gmra.mxu0 %vm4212_vm15, %v2401_v13  ;;  %v1934_v51 = vadd.f32 %v1870_v37, %v4236_v62 }
 0x26b   : > { %v2579_v19 = vadd.f32 %v2513_v10, %v2353_v55 }
 0x26d   : > { %v2615_v9 = vadd.f32 %v4383_v23, %v2579_v19 }
 0x26e   : > { %v2096_v33 = vpop.f32.mrf.mxu2  ;;  %v2516_v4 = vpop.f32.mrf.mxu0 }
 0x26f   : > { %v2646_v2 = vadd.f32 %v2645_v26, %v2615_v9  ;;  %v2685_v42 = vmul.f32 %v2615_v9, %v2615_v9  ;;  %2755 = vst [vmem:[%s4391_s29 + $0x78] sm:$0xff] %v2615_v9  ;;  %v2160_v17 = vadd.f32 %v2096_v33, %v1934_v51 }
 0x270   : > { %v1873_v46 = vpop.f32.mrf.mxu1  ;;  %v2290_v16 = vpop.f32.mrf.mxu3 }
 0x271   : > { %v2716_v28 = vadd.f32 %v2715_v34, %v2685_v42  ;;  %v2354_v8 = vadd.f32 %v2290_v16, %v2160_v17  ;;  %v1935_v63 = vadd.f32 %v1873_v46, %v4246_v54 }
 0x273   : > { %v2580_v25 = vadd.f32 %v2516_v4, %v2354_v8 }
 0x275   : > { %v2616_v49 = vadd.f32 %v4383_v23, %v2580_v25 }
 0x276   : > { %v2099_v18 = vpop.f32.mrf.mxu2  ;;  %v2519_v62 = vpop.f32.mrf.mxu0 }
 0x277   : > { %v2647_v21 = vadd.f32 %v2646_v2, %v2616_v49  ;;  %v2686_v47 = vmul.f32 %v2616_v49, %v2616_v49  ;;  %2756 = vst [vmem:[%s4391_s29 + $0x80] sm:$0xff] %v2616_v49  ;;  %v2161_v43 = vadd.f32 %v2099_v18, %v1935_v63 }
 0x278   : > { %v1876_v0 = vpop.f32.mrf.mxu1  ;;  %v2293_v40 = vpop.f32.mrf.mxu3 }
 0x279   : > { %v2717_v30 = vadd.f32 %v2716_v28, %v2686_v47  ;;  %v2355_v38 = vadd.f32 %v2293_v40, %v2161_v43  ;;  %v1936_v52 = vadd.f32 %v1876_v0, %v4254_v45 }
 0x27b   : > { %v2581_v41 = vadd.f32 %v2519_v62, %v2355_v38 }
 0x27d   : > { %v2617_v7 = vadd.f32 %v4383_v23, %v2581_v41 }
 0x27e   : > { %v2102_v5 = vpop.f32.mrf.mxu2  ;;  %v2522_v54 = vpop.f32.mrf.mxu0 }
 0x27f   : > { %v2648_v59 = vadd.f32 %v2647_v21, %v2617_v7  ;;  %v2687_v58 = vmul.f32 %v2617_v7, %v2617_v7  ;;  %2757 = vst [vmem:[%s4391_s29 + $0x88] sm:$0xff] %v2617_v7  ;;  %v2162_v32 = vadd.f32 %v2102_v5, %v1936_v52 }
 0x280   : > { %v1879_v44 = vpop.f32.mrf.mxu1  ;;  %v2296_v50 = vpop.f32.mrf.mxu3 }
 0x281   : > { %v2718_v48 = vadd.f32 %v2717_v30, %v2687_v58  ;;  %v2356_v22 = vadd.f32 %v2296_v50, %v2162_v32  ;;  %v1937_v11 = vadd.f32 %v1879_v44, %v4264_v6 }
 0x283   : > { %v2582_v31 = vadd.f32 %v2522_v54, %v2356_v22 }
 0x285   : > { %v2618_v56 = vadd.f32 %v4383_v23, %v2582_v31 }
 0x286   : > { %v2105_v20 = vpop.f32.mrf.mxu2  ;;  %v2525_v45 = vpop.f32.mrf.mxu0 }
 0x287   : > { %v2649_v10 = vadd.f32 %v2648_v59, %v2618_v56  ;;  %v2688_v13 = vmul.f32 %v2618_v56, %v2618_v56  ;;  %2758 = vst [vmem:[%s4391_s29 + $0x90] sm:$0xff] %v2618_v56  ;;  %v2163_v26 = vadd.f32 %v2105_v20, %v1937_v11 }
 0x288   : > { %v1882_v12 = vpop.f32.mrf.mxu1  ;;  %v2299_v14 = vpop.f32.mrf.mxu3 }
 0x289   : > { %v2719_v37 = vadd.f32 %v2718_v48, %v2688_v13  ;;  %v2357_v53 = vadd.f32 %v2299_v14, %v2163_v26  ;;  %v1938_v55 = vadd.f32 %v1882_v12, %v4272_v27 }
 0x28b   : > { %v2583_v34 = vadd.f32 %v2525_v45, %v2357_v53 }
 0x28d   : > { %v2619_v19 = vadd.f32 %v4383_v23, %v2583_v34 }
 0x28e   : > { %v2108_v51 = vpop.f32.mrf.mxu2  ;;  %v2528_v6 = vpop.f32.mrf.mxu0 }
 0x28f   : > { %v2650_v9 = vadd.f32 %v2649_v10, %v2619_v19  ;;  %v2689_v33 = vmul.f32 %v2619_v19, %v2619_v19  ;;  %2759 = vst [vmem:[%s4391_s29 + $0x98] sm:$0xff] %v2619_v19  ;;  %v2164_v4 = vadd.f32 %v2108_v51, %v1938_v55 }
 0x290   : > { %v1885_v2 = vpop.f32.mrf.mxu1  ;;  %v2302_v42 = vpop.f32.mrf.mxu3 }
 0x291   : > { %v2720_v17 = vadd.f32 %v2719_v37, %v2689_v33  ;;  %v2358_v46 = vadd.f32 %v2302_v42, %v2164_v4  ;;  %v1939_v28 = vadd.f32 %v1885_v2, %v4282_v61 }
 0x293   : > { %v2584_v16 = vadd.f32 %v2528_v6, %v2358_v46 }
 0x295   : > { %v2620_v8 = vadd.f32 %v4383_v23, %v2584_v16 }
 0x296   : > { %v2111_v25 = vpop.f32.mrf.mxu2  ;;  %v2531_v27 = vpop.f32.mrf.mxu0 }
 0x297   : > { %v2651_v63 = vadd.f32 %v2650_v9, %v2620_v8  ;;  %v2690_v49 = vmul.f32 %v2620_v8, %v2620_v8  ;;  %2760 = vst [vmem:[%s4391_s29 + $0xa0] sm:$0xff] %v2620_v8  ;;  %v2165_v18 = vadd.f32 %v2111_v25, %v1939_v28 }
 0x298   : > { %v1888_v62 = vpop.f32.mrf.mxu1  ;;  %v2305_v21 = vpop.f32.mrf.mxu3 }
 0x299   : > { %v2721_v47 = vadd.f32 %v2720_v17, %v2690_v49  ;;  %v2359_v43 = vadd.f32 %v2305_v21, %v2165_v18  ;;  %v1940_v40 = vadd.f32 %v1888_v62, %v4290_v15 }
 0x29b   : > { %v2585_v0 = vadd.f32 %v2531_v27, %v2359_v43 }
 0x29d   : > { %v2621_v30 = vadd.f32 %v4383_v23, %v2585_v0 }
 0x29e   : > { %v2114_v38 = vpop.f32.mrf.mxu2  ;;  %v2534_v61 = vpop.f32.mrf.mxu0 }
 0x29f   : > { %v2652_v41 = vadd.f32 %v2651_v63, %v2621_v30  ;;  %v2691_v52 = vmul.f32 %v2621_v30, %v2621_v30  ;;  %2761 = vst [vmem:[%s4391_s29 + $0xa8] sm:$0xff] %v2621_v30  ;;  %v2166_v7 = vadd.f32 %v2114_v38, %v1940_v40 }
 0x2a0   : > { %v1891_v5 = vpop.f32.mrf.mxu1  ;;  %v2308_v54 = vpop.f32.mrf.mxu3 }
 0x2a1   : > { %v2722_v59 = vadd.f32 %v2721_v47, %v2691_v52  ;;  %v2360_v58 = vadd.f32 %v2308_v54, %v2166_v7  ;;  %v1941_v44 = vadd.f32 %v1891_v5, %v4300_v1 }
 0x2a3   : > { %v2586_v32 = vadd.f32 %v2534_v61, %v2360_v58 }
 0x2a5   : > { %v2622_v50 = vadd.f32 %v4383_v23, %v2586_v32 }
 0x2a6   : > { %v2117_v48 = vpop.f32.mrf.mxu2  ;;  %v2537_v15 = vpop.f32.mrf.mxu0 }
 0x2a7   : > { %v2653_v22 = vadd.f32 %v2652_v41, %v2622_v50  ;;  %v2692_v31 = vmul.f32 %v2622_v50, %v2622_v50  ;;  %2762 = vst [vmem:[%s4391_s29 + $0xb0] sm:$0xff] %v2622_v50  ;;  %v2167_v11 = vadd.f32 %v2117_v48, %v1941_v44 }
 0x2a8   : > { %v1894_v56 = vpop.f32.mrf.mxu1  ;;  %v2311_v20 = vpop.f32.mrf.mxu3 }
 0x2a9   : > { %v2723_v45 = vadd.f32 %v2722_v59, %v2692_v31  ;;  %v2361_v10 = vadd.f32 %v2311_v20, %v2167_v11  ;;  %v1942_v26 = vadd.f32 %v1894_v56, %v4308_v3 }
 0x2ab   : > { %v2587_v13 = vadd.f32 %v2537_v15, %v2361_v10 }
 0x2ad   : > { %v2623_v12 = vadd.f32 %v4383_v23, %v2587_v13 }
 0x2ae   : > { %v2120_v14 = vpop.f32.mrf.mxu2  ;;  %v2540_v1 = vpop.f32.mrf.mxu0 }
 0x2af   : > { %v2654_v37 = vadd.f32 %v2653_v22, %v2623_v12  ;;  %v2693_v53 = vmul.f32 %v2623_v12, %v2623_v12  ;;  %2763 = vst [vmem:[%s4391_s29 + $0xb8] sm:$0xff] %v2623_v12  ;;  %v2168_v34 = vadd.f32 %v2120_v14, %v1942_v26 }
 0x2b0   : > { %v1897_v55 = vpop.f32.mrf.mxu1  ;;  %v2314_v19 = vpop.f32.mrf.mxu3 }
 0x2b1   : > { %v2724_v51 = vadd.f32 %v2723_v45, %v2693_v53  ;;  %v2362_v6 = vadd.f32 %v2314_v19, %v2168_v34  ;;  %v1943_v33 = vadd.f32 %v1897_v55, %v4318_v29 }
 0x2b3   : > { %v2588_v9 = vadd.f32 %v2540_v1, %v2362_v6 }
 0x2b5   : > { %v2624_v4 = vadd.f32 %v4383_v23, %v2588_v9 }
 0x2b6   : > { %v2123_v2 = vpop.f32.mrf.mxu2  ;;  %v2543_v3 = vpop.f32.mrf.mxu0 }
 0x2b7   : > { %v2655_v42 = vadd.f32 %v2654_v37, %v2624_v4  ;;  %v2694_v17 = vmul.f32 %v2624_v4, %v2624_v4  ;;  %2764 = vst [vmem:[%s4391_s29 + $0xc0] sm:$0xff] %v2624_v4  ;;  %v2169_v46 = vadd.f32 %v2123_v2, %v1943_v33 }
 0x2b8   : > { %v1900_v16 = vpop.f32.mrf.mxu1  ;;  %v2317_v28 = vpop.f32.mrf.mxu3 }
 0x2b9   : > { %v2725_v8 = vadd.f32 %v2724_v51, %v2694_v17  ;;  %v2363_v25 = vadd.f32 %v2317_v28, %v2169_v46  ;;  %v1944_v63 = vadd.f32 %v1900_v16, %v4326_v35 }
 0x2bb   : > { %v2589_v27 = vadd.f32 %v2543_v3, %v2363_v25 }
 0x2bd   : > { %v2625_v49 = vadd.f32 %v4383_v23, %v2589_v27 }
 0x2be   : > { %v2126_v18 = vpop.f32.mrf.mxu2  ;;  %v2546_v29 = vpop.f32.mrf.mxu0 }
 0x2bf   : > { %v2656_v62 = vadd.f32 %v2655_v42, %v2625_v49  ;;  %v2695_v21 = vmul.f32 %v2625_v49, %v2625_v49  ;;  %2765 = vst [vmem:[%s4391_s29 + $0xc8] sm:$0xff] %v2625_v49  ;;  %v2170_v47 = vadd.f32 %v2126_v18, %v1944_v63 }
 0x2c0   : > { %v1903_v43 = vpop.f32.mrf.mxu1  ;;  %v2320_v0 = vpop.f32.mrf.mxu3 }
 0x2c1   : > { %v2726_v40 = vadd.f32 %v2725_v8, %v2695_v21  ;;  %v2364_v30 = vadd.f32 %v2320_v0, %v2170_v47  ;;  %v1945_v61 = vadd.f32 %v1903_v43, %v4336_v60 }
 0x2c3   : > { %v2590_v38 = vadd.f32 %v2546_v29, %v2364_v30 }
 0x2c5   : > { %v2626_v41 = vadd.f32 %v4383_v23, %v2590_v38 }
 0x2c6   : > { %v2129_v52 = vpop.f32.mrf.mxu2  ;;  %v2549_v35 = vpop.f32.mrf.mxu0 }
 0x2c7   : > { %v2657_v7 = vadd.f32 %v2656_v62, %v2626_v41  ;;  %v2696_v5 = vmul.f32 %v2626_v41, %v2626_v41  ;;  %2766 = vst [vmem:[%s4391_s29 + $0xd0] sm:$0xff] %v2626_v41  ;;  %v2171_v54 = vadd.f32 %v2129_v52, %v1945_v61 }
 0x2c8   : > { %v1906_v59 = vpop.f32.mrf.mxu1  ;;  %v2323_v58 = vpop.f32.mrf.mxu3 }
 0x2c9   : > { %v2727_v32 = vadd.f32 %v2726_v40, %v2696_v5  ;;  %v2365_v44 = vadd.f32 %v2323_v58, %v2171_v54  ;;  %v1946_v48 = vadd.f32 %v1906_v59, %v4344_v39 }
 0x2cb   : > { %v2591_v50 = vadd.f32 %v2549_v35, %v2365_v44 }
 0x2cd   : > { %v2627_v15 = vadd.f32 %v4383_v23, %v2591_v50 }
 0x2ce   : > { %v2132_v22 = vpop.f32.mrf.mxu2  ;;  %v2552_v60 = vpop.f32.mrf.mxu0 }
 0x2cf   : > { %v2658_v31 = vadd.f32 %v2657_v7, %v2627_v15  ;;  %v2697_v11 = vmul.f32 %v2627_v15, %v2627_v15  ;;  %2767 = vst [vmem:[%s4391_s29 + $0xd8] sm:$0xff] %v2627_v15  ;;  %v2172_v56 = vadd.f32 %v2132_v22, %v1946_v48 }
 0x2d0   : > { %v1909_v20 = vpop.f32.mrf.mxu1  ;;  %v2326_v45 = vpop.f32.mrf.mxu3 }
 0x2d1   : > { %v2728_v10 = vadd.f32 %v2727_v32, %v2697_v11  ;;  %v2366_v13 = vadd.f32 %v2326_v45, %v2172_v56  ;;  %v1947_v12 = vadd.f32 %v1909_v20, %v4354_v57 }
 0x2d3   : > { %v2592_v26 = vadd.f32 %v2552_v60, %v2366_v13 }
 0x2d5   : > { %v2628_v14 = vadd.f32 %v4383_v23, %v2592_v26 }
 0x2d6   : > { %v2135_v1 = vpop.f32.mrf.mxu2  ;;  %v2555_v39 = vpop.f32.mrf.mxu0 }
 0x2d7   : > { %v2659_v37 = vadd.f32 %v2658_v31, %v2628_v14  ;;  %v2698_v53 = vmul.f32 %v2628_v14, %v2628_v14  ;;  %2768 = vst [vmem:[%s4391_s29 + $0xe0] sm:$0xff] %v2628_v14  ;;  %v2173_v34 = vadd.f32 %v2135_v1, %v1947_v12 }
 0x2d8   : > { %v1912_v55 = vpop.f32.mrf.mxu1  ;;  %v2329_v19 = vpop.f32.mrf.mxu3 }
 0x2d9   : > { %v2729_v51 = vadd.f32 %v2728_v10, %v2698_v53  ;;  %v2367_v6 = vadd.f32 %v2329_v19, %v2173_v34  ;;  %v1948_v33 = vadd.f32 %v1912_v55, %v4362_v36 }
 0x2db   : > { %v2593_v9 = vadd.f32 %v2555_v39, %v2367_v6 }
 0x2dd   : > { %v2629_v4 = vadd.f32 %v4383_v23, %v2593_v9 }
 0x2de   : > { %v2138_v2 = vpop.f32.mrf.mxu2  ;;  %v2558_v57 = vpop.f32.mrf.mxu0 }
 0x2df   : > { %v2660_v3 = vadd.f32 %v2659_v37, %v2629_v4  ;;  %v2699_v42 = vmul.f32 %v2629_v4, %v2629_v4  ;;  %2769 = vst [vmem:[%s4391_s29 + $0xe8] sm:$0xff] %v2629_v4  ;;  %v2174_v17 = vadd.f32 %v2138_v2, %v1948_v33 }
 0x2e0   : > { %v2332_v46 = vpop.f32.mrf.mxu3  ;;  %v1915_v8 = vpop.f32.mrf.mxu1 }
 0x2e1   : > { %v2730_v16 = vadd.f32 %v2729_v51, %v2699_v42  ;;  %v2368_v28 = vadd.f32 %v2332_v46, %v2174_v17  ;;  %v1949_v27 = vadd.f32 %v1915_v8, %v4372_v24 }
 0x2e3   : > { %v2594_v25 = vadd.f32 %v2558_v57, %v2368_v28 }
 0x2e5   : > { %v2630_v63 = vadd.f32 %v4383_v23, %v2594_v25 }
 0x2e6   : > { %v2141_v36 = vpop.f32.mrf.mxu2  ;;  %v2561_v21 = vpop.f32.mrf.mxu0 }
 0x2e7   : > { %v2661_v49 = vadd.f32 %v2660_v3, %v2630_v63  ;;  %v2700_v18 = vmul.f32 %v2630_v63, %v2630_v63  ;;  %2770 = vst [vmem:[%s4391_s29 + $0xf0] sm:$0xff] %v2630_v63  ;;  %v2175_v29 = vadd.f32 %v2141_v36, %v1949_v27 }
 0x2e8   : > { %v2335_v62 = vpop.f32.mrf.mxu3 }
 0x2e9   : > { %v2731_v47 = vadd.f32 %v2730_v16, %v2700_v18  ;;  %v2369_v43 = vadd.f32 %v2335_v62, %v2175_v29 }
 0x2eb   : > { %v2595_v0 = vadd.f32 %v2561_v21, %v2369_v43 }
 0x2ed   : > { %v2631_v40 = vadd.f32 %v4383_v23, %v2595_v0 }
 0x2ef   : > { %v2662_v30 = vadd.f32 %v2661_v49, %v2631_v40  ;;  %v2701_v38 = vmul.f32 %v2631_v40, %v2631_v40  ;;  %2771 = vst [vmem:[%s4391_s29 + $0xf8] sm:$0xff] %v2631_v40 }
 0x2f1   : > { %v2663_v24 = vrot.slane %v2662_v30, 4  ;;  %v2732_v61 = vadd.f32 %v2731_v47, %v2701_v38 }
 0x2f3   : > { %v2664_v41 = vadd.f32 %v2663_v24, %v2662_v30  ;;  %v2733_v52 = vrot.slane %v2732_v61, 4 }
 0x2f5   : > { %v2665_v35 = vrot.slane %v2664_v41, 2  ;;  %v2734_v7 = vadd.f32 %v2733_v52, %v2732_v61 }
 0x2f7   : > { %v2666_v5 = vadd.f32 %v2665_v35, %v2664_v41  ;;  %v2735_v54 = vrot.slane %v2734_v7, 2 }
 0x2f9   : > { %v2667_v59 = vrot.slane %v2666_v5, 1  ;;  %v2736_v58 = vadd.f32 %v2735_v54, %v2734_v7 }
 0x2fb   : > { %v2668_v32 = vadd.f32 %v2667_v59, %v2666_v5  ;;  %v2737_v23 = vrot.slane %v2736_v58, 1 }
 0x2fd   : > { %2669 = vst [vmem:[%s238_s7] sm:$0x1] %v2668_v32  ;;  %v2738_v44 = vadd.f32 %v2737_v23, %v2736_v58 }
 0x2ff   : > { %2739 = vst [vmem:[%s241_s10] sm:$0x1] %v2738_v44 }
 0x300 PF: > { %s16_s18 = sadd.s32 1, %s3176_s18  }
 0x301   : > { %p13_p4 = scmp.ge.s32.totalorder %s16_s18, 4  }
 0x303   :  { %15 = sbr.rel (!%p13_p4) target bundleno = 1 (0x1), region = 94 }

// kernel: residual_block_forward.7
= control target key start
LH: loop header
LB: loop body
LE: loop exit
PB: predicated region body
PF: predicated region fallthrough
CT: control target
= control target key end

     0   :  { %s576_s15 = smov 0   ;;  %s777_s0 = inlined_call_operand.vmem [shape: f32[2,256,128], index: 0, kind: input, shape index: {}]   ;;  %s778_s1 = inlined_call_operand.vmem [shape: f32[1,128], index: 1, kind: input, shape index: {}]   ;;  %s779_s2 = inlined_call_operand.vmem [shape: f32[1,128], index: 2, kind: input, shape index: {}]   ;;  %s780_s3 = inlined_call_operand.vmem [shape: f32[2,256,128], index: 3, kind: input, shape index: {}]   ;;  %s781_s4 = inlined_call_operand.vmem [shape: f32[2,256,128], index: 4, kind: output, shape index: {}]  }
   0x1 LB: > { %s517_s16 = sadd.s32 4294967295, %s549_s15   ;;  %p521_p0 = scmp.ge.s32.totalorder %s549_s15, 1  ;;  %s549_s15 = sphi %s576_s15, %s14_s15  }
   0x2   : > { %p172_p1 = scmp.lt.s32.totalorder %s549_s15, 3 }
   0x4   : > { %p173_p2 = pnand %p521_p0, %p172_p1 }
   0x5   : > { %p203_p3 = scmp.lt.s32.totalorder (!%p173_p2), %s517_s16, 1 }
   0x6   : > { %176 = sbr.rel (%p173_p2) target bundleno = 55 (0x37), region = 36 }
   0xb   : > { %s783_s16 = smov (!%p203_p3, %s517_s16), 1  ;;  %v587_v0 = vld [vmem:[%s778_s1] ss:$0 sm:$0xff] }
   0xc   : > { %s589_s19 = sshll.u32 %s783_s16, 8  ;;  %v606_v1 = vld [vmem:[%s779_s2] ss:$0 sm:$0xff] }
   0xd   : > { %s595_s22 = scalar_lea.vmem %s777_s0, %s589_s19  ;;  %s601_s25 = scalar_lea.vmem %s780_s3, %s589_s19 }
   0xe   : > { %v218_v2 = vld [vmem:[%s595_s22] sm:$0xff]  ;;  %v219_v3 = vld [vmem:[%s595_s22 + $0x8] sm:$0xff]  ;;  %v220_v7 = vld [vmem:[%s595_s22 + $0x10] sm:$0xff]  ;;  %s637_s30 = scalar_lea.vmem %s781_s4, %s589_s19 }
   0xf   : > { %v250_v4 = vld [vmem:[%s601_s25] sm:$0xff]  ;;  %v286_v5 = vmul.f32 %v587_v0, %v218_v2  ;;  %v287_v6 = vmul.f32 %v587_v0, %v219_v3  ;;  %v251_v8 = vld [vmem:[%s601_s25 + $0x8] sm:$0xff]  ;;  %v288_v9 = vmul.f32 %v587_v0, %v220_v7  ;;  %v221_v10 = vld [vmem:[%s595_s22 + $0x18] sm:$0xff] }
  0x10   : > { %v222_v11 = vld [vmem:[%s595_s22 + $0x20] sm:$0xff]  ;;  %v252_v14 = vld [vmem:[%s601_s25 + $0x10] sm:$0xff]  ;;  %v253_v15 = vld [vmem:[%s601_s25 + $0x18] sm:$0xff]  ;;  %v289_v16 = vmul.f32 %v587_v0, %v221_v10 }
  0x11   : > { %v322_v12 = vadd.f32 %v606_v1, %v286_v5  ;;  %v323_v13 = vadd.f32 %v606_v1, %v287_v6  ;;  %v290_v17 = vmul.f32 %v587_v0, %v222_v11  ;;  %v223_v18 = vld [vmem:[%s595_s22 + $0x28] sm:$0xff]  ;;  %v324_v19 = vadd.f32 %v606_v1, %v288_v9  ;;  %v254_v20 = vld [vmem:[%s601_s25 + $0x20] sm:$0xff]  ;;  %v224_v22 = vld [vmem:[%s595_s22 + $0x30] sm:$0xff] }
  0x12   : > { %v291_v21 = vmul.f32 %v587_v0, %v223_v18  ;;  %v225_v23 = vld [vmem:[%s595_s22 + $0x38] sm:$0xff]  ;;  %v325_v26 = vadd.f32 %v606_v1, %v289_v16  ;;  %v255_v28 = vld [vmem:[%s601_s25 + $0x28] sm:$0xff]  ;;  %v292_v31 = vmul.f32 %v587_v0, %v224_v22  ;;  %v226_v33 = vld [vmem:[%s595_s22 + $0x40] sm:$0xff] }
  0x13   : > { %v354_v24 = vadd.f32 %v322_v12, %v250_v4  ;;  %v355_v25 = vadd.f32 %v323_v13, %v251_v8  ;;  %v326_v27 = vadd.f32 %v606_v1, %v290_v17  ;;  %v356_v29 = vadd.f32 %v324_v19, %v252_v14  ;;  %v227_v34 = vld [vmem:[%s595_s22 + $0x48] sm:$0xff]  ;;  %v256_v39 = vld [vmem:[%s601_s25 + $0x30] sm:$0xff]  ;;  %v257_v40 = vld [vmem:[%s601_s25 + $0x38] sm:$0xff] }
  0x14   : > { %v327_v30 = vadd.f32 %v606_v1, %v291_v21  ;;  %v293_v32 = vmul.f32 %v587_v0, %v225_v23  ;;  %v357_v37 = vadd.f32 %v325_v26, %v253_v15  ;;  %v228_v41 = vld [vmem:[%s595_s22 + $0x50] sm:$0xff]  ;;  %v328_v44 = vadd.f32 %v606_v1, %v292_v31  ;;  %v229_v46 = vld [vmem:[%s595_s22 + $0x58] sm:$0xff]  ;;  %v230_v47 = vld [vmem:[%s595_s22 + $0x60] sm:$0xff] }
  0x15   : > { %v386_v35 = vmax.f32 %v354_v24, 0.0  ;;  %v387_v36 = vmax.f32 %v355_v25, 0.0  ;;  %v358_v38 = vadd.f32 %v326_v27, %v254_v20  ;;  %v388_v42 = vmax.f32 %v356_v29, 0.0  ;;  %v231_v52 = vld [vmem:[%s595_s22 + $0x68] sm:$0xff]  ;;  %v258_v56 = vld [vmem:[%s601_s25 + $0x40] sm:$0xff]  ;;  %v260_v61 = vld [vmem:[%s601_s25 + $0x50] sm:$0xff] }
  0x16   : > { %v359_v43 = vadd.f32 %v327_v30, %v255_v28  ;;  %v329_v45 = vadd.f32 %v606_v1, %v293_v32  ;;  %v389_v48 = vmax.f32 %v357_v37, 0.0  ;;  %v294_v50 = vmul.f32 %v587_v0, %v226_v33  ;;  %v259_v57 = vld [vmem:[%s601_s25 + $0x48] sm:$0xff]  ;;  %v232_v2 = vld [vmem:[%s595_s22 + $0x70] sm:$0xff]  ;;  %v233_v3 = vld [vmem:[%s595_s22 + $0x78] sm:$0xff] }
  0x17   : > { %418 = vst [vmem:[%s637_s30] sm:$0xff] %v386_v35  ;;  %v390_v49 = vmax.f32 %v358_v38, 0.0  ;;  %v295_v51 = vmul.f32 %v587_v0, %v227_v34  ;;  %v360_v54 = vadd.f32 %v328_v44, %v256_v39  ;;  %v296_v58 = vmul.f32 %v587_v0, %v228_v41  ;;  %v261_v7 = vld [vmem:[%s601_s25 + $0x58] sm:$0xff]  ;;  %v262_v8 = vld [vmem:[%s601_s25 + $0x60] sm:$0xff]  ;;  %v263_v14 = vld [vmem:[%s601_s25 + $0x68] sm:$0xff] }
  0x18   : > { %419 = vst [vmem:[%s637_s30 + $0x8] sm:$0xff] %v387_v36  ;;  %v391_v53 = vmax.f32 %v359_v43, 0.0  ;;  %v361_v55 = vadd.f32 %v329_v45, %v257_v40  ;;  %v330_v59 = vadd.f32 %v606_v1, %v294_v50  ;;  %v297_v62 = vmul.f32 %v587_v0, %v229_v46  ;;  %v234_v19 = vld [vmem:[%s595_s22 + $0x80] sm:$0xff]  ;;  %v235_v20 = vld [vmem:[%s595_s22 + $0x88] sm:$0xff]  ;;  %v264_v25 = vld [vmem:[%s601_s25 + $0x70] sm:$0xff] }
  0x19   : > { %420 = vst [vmem:[%s637_s30 + $0x10] sm:$0xff] %v388_v42  ;;  %v331_v60 = vadd.f32 %v606_v1, %v295_v51  ;;  %v298_v63 = vmul.f32 %v587_v0, %v230_v47  ;;  %v392_v4 = vmax.f32 %v360_v54, 0.0  ;;  %v332_v6 = vadd.f32 %v606_v1, %v296_v58  ;;  %v265_v26 = vld [vmem:[%s601_s25 + $0x78] sm:$0xff]  ;;  %v236_v27 = vld [vmem:[%s595_s22 + $0x90] sm:$0xff]  ;;  %v238_v33 = vld [vmem:[%s595_s22 + $0xa0] sm:$0xff] }
  0x1a   : > { %421 = vst [vmem:[%s637_s30 + $0x18] sm:$0xff] %v389_v48  ;;  %v393_v5 = vmax.f32 %v361_v55, 0.0  ;;  %v299_v9 = vmul.f32 %v587_v0, %v231_v52  ;;  %v362_v10 = vadd.f32 %v330_v59, %v258_v56  ;;  %v333_v12 = vadd.f32 %v606_v1, %v297_v62  ;;  %v237_v32 = vld [vmem:[%s595_s22 + $0x98] sm:$0xff]  ;;  %v239_v38 = vld [vmem:[%s595_s22 + $0xa8] sm:$0xff]  ;;  %v266_v42 = vld [vmem:[%s601_s25 + $0x80] sm:$0xff] }
  0x1b   : > { %422 = vst [vmem:[%s637_s30 + $0x20] sm:$0xff] %v390_v49  ;;  %v363_v11 = vadd.f32 %v331_v60, %v259_v57  ;;  %v334_v13 = vadd.f32 %v606_v1, %v298_v63  ;;  %v364_v15 = vadd.f32 %v332_v6, %v260_v61  ;;  %v300_v17 = vmul.f32 %v587_v0, %v232_v2  ;;  %v267_v43 = vld [vmem:[%s601_s25 + $0x88] sm:$0xff]  ;;  %v268_v47 = vld [vmem:[%s601_s25 + $0x90] sm:$0xff]  ;;  %v241_v51 = vld [vmem:[%s595_s22 + $0xb8] sm:$0xff] }
  0x1c   : > { %423 = vst [vmem:[%s637_s30 + $0x28] sm:$0xff] %v391_v53  ;;  %v335_v16 = vadd.f32 %v606_v1, %v299_v9  ;;  %v301_v18 = vmul.f32 %v587_v0, %v233_v3  ;;  %v394_v21 = vmax.f32 %v362_v10, 0.0  ;;  %v365_v23 = vadd.f32 %v333_v12, %v261_v7  ;;  %v240_v50 = vld [vmem:[%s595_s22 + $0xb0] sm:$0xff]  ;;  %v269_v55 = vld [vmem:[%s601_s25 + $0x98] sm:$0xff]  ;;  %v270_v56 = vld [vmem:[%s601_s25 + $0xa0] sm:$0xff] }
  0x1d   : > { %424 = vst [vmem:[%s637_s30 + $0x30] sm:$0xff] %v392_v4  ;;  %v395_v22 = vmax.f32 %v363_v11, 0.0  ;;  %v366_v24 = vadd.f32 %v334_v13, %v262_v8  ;;  %v396_v28 = vmax.f32 %v364_v15, 0.0  ;;  %v336_v30 = vadd.f32 %v606_v1, %v300_v17  ;;  %v271_v62 = vld [vmem:[%s601_s25 + $0xa8] sm:$0xff]  ;;  %v272_v11 = vld [vmem:[%s601_s25 + $0xb0] sm:$0xff]  ;;  %v273_v12 = vld [vmem:[%s601_s25 + $0xb8] sm:$0xff] }
  0x1e   : > { %425 = vst [vmem:[%s637_s30 + $0x38] sm:$0xff] %v393_v5  ;;  %v367_v29 = vadd.f32 %v335_v16, %v263_v14  ;;  %v337_v31 = vadd.f32 %v606_v1, %v301_v18  ;;  %v397_v34 = vmax.f32 %v365_v23, 0.0  ;;  %v302_v36 = vmul.f32 %v587_v0, %v234_v19  ;;  %v242_v5 = vld [vmem:[%s595_s22 + $0xc0] sm:$0xff]  ;;  %v243_v6 = vld [vmem:[%s595_s22 + $0xc8] sm:$0xff]  ;;  %v244_v13 = vld [vmem:[%s595_s22 + $0xd0] sm:$0xff] }
  0x1f   : > { %426 = vst [vmem:[%s637_s30 + $0x40] sm:$0xff] %v394_v21  ;;  %v398_v35 = vmax.f32 %v366_v24, 0.0  ;;  %v303_v37 = vmul.f32 %v587_v0, %v235_v20  ;;  %v368_v40 = vadd.f32 %v336_v30, %v264_v25  ;;  %v304_v44 = vmul.f32 %v587_v0, %v236_v27  ;;  %v245_v18 = vld [vmem:[%s595_s22 + $0xd8] sm:$0xff]  ;;  %v246_v19 = vld [vmem:[%s595_s22 + $0xe0] sm:$0xff]  ;;  %v247_v24 = vld [vmem:[%s595_s22 + $0xe8] sm:$0xff] }
  0x20   : > { %427 = vst [vmem:[%s637_s30 + $0x48] sm:$0xff] %v395_v22  ;;  %v399_v39 = vmax.f32 %v367_v29, 0.0  ;;  %v369_v41 = vadd.f32 %v337_v31, %v265_v26  ;;  %v338_v45 = vadd.f32 %v606_v1, %v302_v36  ;;  %v305_v48 = vmul.f32 %v587_v0, %v237_v32  ;;  %v275_v29 = vld [vmem:[%s601_s25 + $0xc8] sm:$0xff]  ;;  %v248_v36 = vld [vmem:[%s595_s22 + $0xf0] sm:$0xff] }
  0x21   : > { %428 = vst [vmem:[%s637_s30 + $0x50] sm:$0xff] %v396_v28  ;;  %v339_v46 = vadd.f32 %v606_v1, %v303_v37  ;;  %v306_v49 = vmul.f32 %v587_v0, %v238_v33  ;;  %v400_v52 = vmax.f32 %v368_v40, 0.0  ;;  %v340_v54 = vadd.f32 %v606_v1, %v304_v44  ;;  %v274_v28 = vld [vmem:[%s601_s25 + $0xc0] sm:$0xff]  ;;  %v276_v33 = vld [vmem:[%s601_s25 + $0xd0] sm:$0xff]  ;;  %v249_v37 = vld [vmem:[%s595_s22 + $0xf8] sm:$0xff] }
  0x22   : > { %429 = vst [vmem:[%s637_s30 + $0x58] sm:$0xff] %v397_v34  ;;  %v401_v53 = vmax.f32 %v369_v41, 0.0  ;;  %v307_v57 = vmul.f32 %v587_v0, %v239_v38  ;;  %v370_v58 = vadd.f32 %v338_v45, %v266_v42  ;;  %v341_v60 = vadd.f32 %v606_v1, %v305_v48  ;;  %v277_v41 = vld [vmem:[%s601_s25 + $0xd8] sm:$0xff]  ;;  %v278_v42 = vld [vmem:[%s601_s25 + $0xe0] sm:$0xff]  ;;  %v279_v48 = vld [vmem:[%s601_s25 + $0xe8] sm:$0xff] }
  0x23   : > { %430 = vst [vmem:[%s637_s30 + $0x60] sm:$0xff] %v398_v35  ;;  %v371_v59 = vadd.f32 %v339_v46, %v267_v43  ;;  %v342_v61 = vadd.f32 %v606_v1, %v306_v49  ;;  %v372_v63 = vadd.f32 %v340_v54, %v268_v47  ;;  %v308_v3 = vmul.f32 %v587_v0, %v240_v50 }
  0x24   : > { %431 = vst [vmem:[%s637_s30 + $0x68] sm:$0xff] %v399_v39  ;;  %v343_v2 = vadd.f32 %v606_v1, %v307_v57  ;;  %v309_v4 = vmul.f32 %v587_v0, %v241_v51  ;;  %v402_v7 = vmax.f32 %v370_v58, 0.0  ;;  %v373_v9 = vadd.f32 %v341_v60, %v269_v55  ;;  %v280_v57 = vld [vmem:[%s601_s25 + $0xf0] sm:$0xff]  ;;  %v281_v58 = vld [vmem:[%s601_s25 + $0xf8] sm:$0xff] }
  0x25   : > { %432 = vst [vmem:[%s637_s30 + $0x70] sm:$0xff] %v400_v52  ;;  %v403_v8 = vmax.f32 %v371_v59, 0.0  ;;  %v374_v10 = vadd.f32 %v342_v61, %v270_v56  ;;  %v404_v14 = vmax.f32 %v372_v63, 0.0  ;;  %v344_v16 = vadd.f32 %v606_v1, %v308_v3 }
  0x26   : > { %433 = vst [vmem:[%s637_s30 + $0x78] sm:$0xff] %v401_v53  ;;  %v375_v15 = vadd.f32 %v343_v2, %v271_v62  ;;  %v345_v17 = vadd.f32 %v606_v1, %v309_v4  ;;  %v405_v20 = vmax.f32 %v373_v9, 0.0  ;;  %v310_v22 = vmul.f32 %v587_v0, %v242_v5 }
  0x27   : > { %434 = vst [vmem:[%s637_s30 + $0x80] sm:$0xff] %v402_v7  ;;  %v406_v21 = vmax.f32 %v374_v10, 0.0  ;;  %v311_v23 = vmul.f32 %v587_v0, %v243_v6  ;;  %v376_v26 = vadd.f32 %v344_v16, %v272_v11  ;;  %v312_v30 = vmul.f32 %v587_v0, %v244_v13 }
  0x28   : > { %435 = vst [vmem:[%s637_s30 + $0x88] sm:$0xff] %v403_v8  ;;  %v407_v25 = vmax.f32 %v375_v15, 0.0  ;;  %v377_v27 = vadd.f32 %v345_v17, %v273_v12  ;;  %v346_v31 = vadd.f32 %v606_v1, %v310_v22  ;;  %v313_v34 = vmul.f32 %v587_v0, %v245_v18 }
  0x29   : > { %436 = vst [vmem:[%s637_s30 + $0x90] sm:$0xff] %v404_v14  ;;  %v347_v32 = vadd.f32 %v606_v1, %v311_v23  ;;  %v314_v35 = vmul.f32 %v587_v0, %v246_v19  ;;  %v408_v38 = vmax.f32 %v376_v26, 0.0  ;;  %v348_v40 = vadd.f32 %v606_v1, %v312_v30 }
  0x2a   : > { %437 = vst [vmem:[%s637_s30 + $0x98] sm:$0xff] %v405_v20  ;;  %v409_v39 = vmax.f32 %v377_v27, 0.0  ;;  %v315_v43 = vmul.f32 %v587_v0, %v247_v24  ;;  %v378_v44 = vadd.f32 %v346_v31, %v274_v28  ;;  %v349_v46 = vadd.f32 %v606_v1, %v313_v34 }
  0x2b   : > { %438 = vst [vmem:[%s637_s30 + $0xa0] sm:$0xff] %v406_v21  ;;  %v379_v45 = vadd.f32 %v347_v32, %v275_v29  ;;  %v350_v47 = vadd.f32 %v606_v1, %v314_v35  ;;  %v380_v49 = vadd.f32 %v348_v40, %v276_v33  ;;  %v316_v51 = vmul.f32 %v587_v0, %v248_v36 }
  0x2c   : > { %439 = vst [vmem:[%s637_s30 + $0xa8] sm:$0xff] %v407_v25  ;;  %v351_v50 = vadd.f32 %v606_v1, %v315_v43  ;;  %v317_v52 = vmul.f32 %v587_v0, %v249_v37  ;;  %v410_v53 = vmax.f32 %v378_v44, 0.0  ;;  %v381_v55 = vadd.f32 %v349_v46, %v277_v41 }
  0x2d   : > { %440 = vst [vmem:[%s637_s30 + $0xb0] sm:$0xff] %v408_v38  ;;  %v411_v54 = vmax.f32 %v379_v45, 0.0  ;;  %v382_v56 = vadd.f32 %v350_v47, %v278_v42  ;;  %v412_v59 = vmax.f32 %v380_v49, 0.0  ;;  %v352_v61 = vadd.f32 %v606_v1, %v316_v51 }
  0x2e   : > { %441 = vst [vmem:[%s637_s30 + $0xb8] sm:$0xff] %v409_v39  ;;  %v383_v60 = vadd.f32 %v351_v50, %v279_v48  ;;  %v353_v0 = vadd.f32 %v606_v1, %v317_v52  ;;  %v413_v62 = vmax.f32 %v381_v55, 0.0 }
  0x2f   : > { %442 = vst [vmem:[%s637_s30 + $0xc0] sm:$0xff] %v410_v53  ;;  %v414_v63 = vmax.f32 %v382_v56, 0.0  ;;  %v384_v3 = vadd.f32 %v352_v61, %v280_v57 }
  0x30   : > { %443 = vst [vmem:[%s637_s30 + $0xc8] sm:$0xff] %v411_v54  ;;  %v415_v2 = vmax.f32 %v383_v60, 0.0  ;;  %v385_v4 = vadd.f32 %v353_v0, %v281_v58 }
  0x31   : > { %444 = vst [vmem:[%s637_s30 + $0xd0] sm:$0xff] %v412_v59  ;;  %v416_v5 = vmax.f32 %v384_v3, 0.0 }
  0x32   : > { %445 = vst [vmem:[%s637_s30 + $0xd8] sm:$0xff] %v413_v62  ;;  %v417_v6 = vmax.f32 %v385_v4, 0.0 }
  0x33   : > { %446 = vst [vmem:[%s637_s30 + $0xe0] sm:$0xff] %v414_v63 }
  0x34   : > { %447 = vst [vmem:[%s637_s30 + $0xe8] sm:$0xff] %v415_v2 }
  0x35   : > { %448 = vst [vmem:[%s637_s30 + $0xf0] sm:$0xff] %v416_v5 }
  0x36   : > { %449 = vst [vmem:[%s637_s30 + $0xf8] sm:$0xff] %v417_v6 }
  0x37 PF: > { %s14_s15 = sadd.s32 1, %s549_s15  }
  0x38   : > { %p11_p4 = scmp.ge.s32.totalorder %s14_s15, 4  }
  0x3a   :  { %13 = sbr.rel (!%p11_p4) target bundleno = 1 (0x1), region = 69 }

// kernel: residual_block_forward.5
= control target key start
LH: loop header
LB: loop body
LE: loop exit
PB: predicated region body
PF: predicated region fallthrough
CT: control target
= control target key end

     0   :  { %s454_s12 = smov 0   ;;  %s621_s0 = inlined_call_operand.vmem [shape: f32[2,256,128], index: 0, kind: input, shape index: {}]   ;;  %s622_s1 = inlined_call_operand.vmem [shape: f32[1,128], index: 1, kind: input, shape index: {}]   ;;  %s623_s2 = inlined_call_operand.vmem [shape: f32[1,128], index: 2, kind: input, shape index: {}]   ;;  %s624_s3 = inlined_call_operand.vmem [shape: f32[2,320,128], index: 3, kind: output, shape index: {}]  }
   0x1 LB: > { %s402_s13 = sadd.s32 4294967295, %s431_s12   ;;  %p406_p0 = scmp.ge.s32.totalorder %s431_s12, 1  ;;  %s431_s12 = sphi %s454_s12, %s13_s12  }
   0x2   : > { %p137_p1 = scmp.lt.s32.totalorder %s431_s12, 3 }
   0x4   : > { %p138_p2 = pnand %p406_p0, %p137_p1 }
   0x5   : > { %p161_p3 = scmp.lt.s32.totalorder (!%p138_p2), %s402_s13, 1 }
   0x6   : > { %141 = sbr.rel (%p138_p2) target bundleno = 55 (0x37), region = 32 }
   0xb   : > { %s626_s13 = smov (!%p161_p3, %s402_s13), 1  ;;  %v465_v0 = vld [vmem:[%s622_s1] ss:$0 sm:$0xff]  ;;  %v433_v5 = vmov 0.0  }
   0xc   : > { %s413_s16 = smul.u32 320, %s626_s13  ;;  %s412_s17 = sshll.u32 %s626_s13, 8  ;;  %v475_v1 = vld [vmem:[%s623_s2] ss:$0 sm:$0xff] }
   0xd   : > { %s470_s20 = scalar_lea.vmem %s621_s0, %s412_s17 }
   0xe   : > { %s480_s25 = scalar_lea.vmem %s624_s3, %s413_s16  ;;  %v171_v2 = vld [vmem:[%s470_s20] sm:$0xff]  ;;  %v172_v3 = vld [vmem:[%s470_s20 + $0x8] sm:$0xff]  ;;  %v173_v4 = vld [vmem:[%s470_s20 + $0x10] sm:$0xff] }
   0xf   : > { %307 = vst [vmem:[%s480_s25] sm:$0xff] %v433_v5  ;;  %v207_v6 = vmul.f32 %v465_v0, %v171_v2  ;;  %v208_v7 = vmul.f32 %v465_v0, %v172_v3  ;;  %v209_v8 = vmul.f32 %v465_v0, %v173_v4  ;;  %v174_v9 = vld [vmem:[%s470_s20 + $0x18] sm:$0xff]  ;;  %v175_v10 = vld [vmem:[%s470_s20 + $0x20] sm:$0xff]  ;;  %v176_v11 = vld [vmem:[%s470_s20 + $0x28] sm:$0xff] }
  0x10   : > { %308 = vst [vmem:[%s480_s25 + $0x8] sm:$0xff] %v433_v5  ;;  %v210_v12 = vmul.f32 %v465_v0, %v174_v9  ;;  %v211_v13 = vmul.f32 %v465_v0, %v175_v10  ;;  %v212_v14 = vmul.f32 %v465_v0, %v176_v11  ;;  %v177_v15 = vld [vmem:[%s470_s20 + $0x30] sm:$0xff]  ;;  %v178_v16 = vld [vmem:[%s470_s20 + $0x38] sm:$0xff]  ;;  %v179_v23 = vld [vmem:[%s470_s20 + $0x40] sm:$0xff] }
  0x11   : > { %309 = vst [vmem:[%s480_s25 + $0x10] sm:$0xff] %v433_v5  ;;  %v243_v17 = vadd.f32 %v475_v1, %v207_v6  ;;  %v244_v18 = vadd.f32 %v475_v1, %v208_v7  ;;  %v245_v19 = vadd.f32 %v475_v1, %v209_v8  ;;  %v213_v20 = vmul.f32 %v465_v0, %v177_v15  ;;  %v180_v24 = vld [vmem:[%s470_s20 + $0x48] sm:$0xff]  ;;  %v181_v25 = vld [vmem:[%s470_s20 + $0x50] sm:$0xff]  ;;  %v182_v28 = vld [vmem:[%s470_s20 + $0x58] sm:$0xff] }
  0x12   : > { %310 = vst [vmem:[%s480_s25 + $0x18] sm:$0xff] %v433_v5  ;;  %v246_v21 = vadd.f32 %v475_v1, %v210_v12  ;;  %v214_v22 = vmul.f32 %v465_v0, %v178_v16  ;;  %v247_v27 = vadd.f32 %v475_v1, %v211_v13  ;;  %v248_v31 = vadd.f32 %v475_v1, %v212_v14  ;;  %v183_v32 = vld [vmem:[%s470_s20 + $0x60] sm:$0xff]  ;;  %v184_v37 = vld [vmem:[%s470_s20 + $0x68] sm:$0xff]  ;;  %v185_v41 = vld [vmem:[%s470_s20 + $0x70] sm:$0xff] }
  0x13   : > { %311 = vst [vmem:[%s480_s25 + $0x120] sm:$0xff] %v433_v5  ;;  %v275_v26 = vmax.f32 %v243_v17, 0.0  ;;  %v276_v29 = vmax.f32 %v244_v18, 0.0  ;;  %v277_v30 = vmax.f32 %v245_v19, 0.0  ;;  %v249_v33 = vadd.f32 %v475_v1, %v213_v20  ;;  %v186_v45 = vld [vmem:[%s470_s20 + $0x78] sm:$0xff]  ;;  %v187_v49 = vld [vmem:[%s470_s20 + $0x80] sm:$0xff] }
  0x14   : > { %312 = vst [vmem:[%s480_s25 + $0x128] sm:$0xff] %v433_v5  ;;  %v215_v34 = vmul.f32 %v465_v0, %v179_v23  ;;  %v216_v35 = vmul.f32 %v465_v0, %v180_v24  ;;  %v217_v36 = vmul.f32 %v465_v0, %v181_v25  ;;  %v278_v38 = vmax.f32 %v246_v21, 0.0  ;;  %v188_v53 = vld [vmem:[%s470_s20 + $0x88] sm:$0xff]  ;;  %v189_v57 = vld [vmem:[%s470_s20 + $0x90] sm:$0xff]  ;;  %v190_v61 = vld [vmem:[%s470_s20 + $0x98] sm:$0xff] }
  0x15   : > { %313 = vst [vmem:[%s480_s25 + $0x130] sm:$0xff] %v433_v5  ;;  %v250_v39 = vadd.f32 %v475_v1, %v214_v22  ;;  %v218_v40 = vmul.f32 %v465_v0, %v182_v28  ;;  %v279_v42 = vmax.f32 %v247_v27, 0.0  ;;  %v219_v44 = vmul.f32 %v465_v0, %v183_v32  ;;  %v191_v3 = vld [vmem:[%s470_s20 + $0xa0] sm:$0xff]  ;;  %v192_v7 = vld [vmem:[%s470_s20 + $0xa8] sm:$0xff]  ;;  %v193_v11 = vld [vmem:[%s470_s20 + $0xb0] sm:$0xff] }
  0x16   : > { %314 = vst [vmem:[%s480_s25 + $0x138] sm:$0xff] %v433_v5  ;;  %v251_v43 = vadd.f32 %v475_v1, %v215_v34  ;;  %v280_v46 = vmax.f32 %v248_v31, 0.0  ;;  %v252_v47 = vadd.f32 %v475_v1, %v216_v35  ;;  %v220_v48 = vmul.f32 %v465_v0, %v184_v37  ;;  %v194_v15 = vld [vmem:[%s470_s20 + $0xb8] sm:$0xff]  ;;  %v195_v19 = vld [vmem:[%s470_s20 + $0xc0] sm:$0xff]  ;;  %v196_v23 = vld [vmem:[%s470_s20 + $0xc8] sm:$0xff] }
  0x17   : > { %315 = vst [vmem:[%s480_s25 + $0x20] sm:$0xff] %v275_v26  ;;  %v281_v50 = vmax.f32 %v249_v33, 0.0  ;;  %v253_v51 = vadd.f32 %v475_v1, %v217_v36  ;;  %v221_v52 = vmul.f32 %v465_v0, %v185_v41  ;;  %v282_v54 = vmax.f32 %v250_v39, 0.0  ;;  %v197_v27 = vld [vmem:[%s470_s20 + $0xd0] sm:$0xff]  ;;  %v198_v31 = vld [vmem:[%s470_s20 + $0xd8] sm:$0xff]  ;;  %v199_v35 = vld [vmem:[%s470_s20 + $0xe0] sm:$0xff] }
  0x18   : > { %316 = vst [vmem:[%s480_s25 + $0x28] sm:$0xff] %v276_v29  ;;  %v254_v55 = vadd.f32 %v475_v1, %v218_v40  ;;  %v222_v56 = vmul.f32 %v465_v0, %v186_v45  ;;  %v283_v58 = vmax.f32 %v251_v43, 0.0  ;;  %v255_v59 = vadd.f32 %v475_v1, %v219_v44  ;;  %v200_v39 = vld [vmem:[%s470_s20 + $0xe8] sm:$0xff]  ;;  %v201_v43 = vld [vmem:[%s470_s20 + $0xf0] sm:$0xff] }
  0x19   : > { %317 = vst [vmem:[%s480_s25 + $0x30] sm:$0xff] %v277_v30  ;;  %v223_v60 = vmul.f32 %v465_v0, %v187_v49  ;;  %v284_v62 = vmax.f32 %v252_v47, 0.0  ;;  %v256_v63 = vadd.f32 %v475_v1, %v220_v48  ;;  %v224_v2 = vmul.f32 %v465_v0, %v188_v53  ;;  %v202_v47 = vld [vmem:[%s470_s20 + $0xf8] sm:$0xff] }
  0x1a   : > { %318 = vst [vmem:[%s480_s25 + $0x38] sm:$0xff] %v278_v38  ;;  %v285_v4 = vmax.f32 %v253_v51, 0.0  ;;  %v257_v5 = vadd.f32 %v475_v1, %v221_v52  ;;  %v225_v6 = vmul.f32 %v465_v0, %v189_v57  ;;  %v286_v8 = vmax.f32 %v254_v55, 0.0 }
  0x1b   : > { %319 = vst [vmem:[%s480_s25 + $0x40] sm:$0xff] %v279_v42  ;;  %v258_v9 = vadd.f32 %v475_v1, %v222_v56  ;;  %v226_v10 = vmul.f32 %v465_v0, %v190_v61  ;;  %v287_v12 = vmax.f32 %v255_v59, 0.0  ;;  %v259_v13 = vadd.f32 %v475_v1, %v223_v60 }
  0x1c   : > { %320 = vst [vmem:[%s480_s25 + $0x48] sm:$0xff] %v280_v46  ;;  %v227_v14 = vmul.f32 %v465_v0, %v191_v3  ;;  %v288_v16 = vmax.f32 %v256_v63, 0.0  ;;  %v260_v17 = vadd.f32 %v475_v1, %v224_v2  ;;  %v228_v18 = vmul.f32 %v465_v0, %v192_v7 }
  0x1d   : > { %321 = vst [vmem:[%s480_s25 + $0x50] sm:$0xff] %v281_v50  ;;  %v289_v20 = vmax.f32 %v257_v5, 0.0  ;;  %v261_v21 = vadd.f32 %v475_v1, %v225_v6  ;;  %v229_v22 = vmul.f32 %v465_v0, %v193_v11  ;;  %v290_v24 = vmax.f32 %v258_v9, 0.0 }
  0x1e   : > { %322 = vst [vmem:[%s480_s25 + $0x58] sm:$0xff] %v282_v54  ;;  %v262_v25 = vadd.f32 %v475_v1, %v226_v10  ;;  %v230_v26 = vmul.f32 %v465_v0, %v194_v15  ;;  %v291_v28 = vmax.f32 %v259_v13, 0.0  ;;  %v263_v29 = vadd.f32 %v475_v1, %v227_v14 }
  0x1f   : > { %323 = vst [vmem:[%s480_s25 + $0x60] sm:$0xff] %v283_v58  ;;  %v231_v30 = vmul.f32 %v465_v0, %v195_v19  ;;  %v292_v32 = vmax.f32 %v260_v17, 0.0  ;;  %v264_v33 = vadd.f32 %v475_v1, %v228_v18  ;;  %v232_v34 = vmul.f32 %v465_v0, %v196_v23 }
  0x20   : > { %324 = vst [vmem:[%s480_s25 + $0x68] sm:$0xff] %v284_v62  ;;  %v293_v36 = vmax.f32 %v261_v21, 0.0  ;;  %v265_v37 = vadd.f32 %v475_v1, %v229_v22  ;;  %v233_v38 = vmul.f32 %v465_v0, %v197_v27  ;;  %v294_v40 = vmax.f32 %v262_v25, 0.0 }
  0x21   : > { %325 = vst [vmem:[%s480_s25 + $0x70] sm:$0xff] %v285_v4  ;;  %v266_v41 = vadd.f32 %v475_v1, %v230_v26  ;;  %v234_v42 = vmul.f32 %v465_v0, %v198_v31  ;;  %v295_v44 = vmax.f32 %v263_v29, 0.0  ;;  %v267_v45 = vadd.f32 %v475_v1, %v231_v30 }
  0x22   : > { %326 = vst [vmem:[%s480_s25 + $0x78] sm:$0xff] %v286_v8  ;;  %v235_v46 = vmul.f32 %v465_v0, %v199_v35  ;;  %v296_v48 = vmax.f32 %v264_v33, 0.0  ;;  %v268_v49 = vadd.f32 %v475_v1, %v232_v34  ;;  %v236_v50 = vmul.f32 %v465_v0, %v200_v39 }
  0x23   : > { %327 = vst [vmem:[%s480_s25 + $0x80] sm:$0xff] %v287_v12  ;;  %v297_v51 = vmax.f32 %v265_v37, 0.0  ;;  %v269_v52 = vadd.f32 %v475_v1, %v233_v38  ;;  %v237_v53 = vmul.f32 %v465_v0, %v201_v43  ;;  %v298_v54 = vmax.f32 %v266_v41, 0.0 }
  0x24   : > { %328 = vst [vmem:[%s480_s25 + $0x88] sm:$0xff] %v288_v16  ;;  %v270_v55 = vadd.f32 %v475_v1, %v234_v42  ;;  %v238_v56 = vmul.f32 %v465_v0, %v202_v47  ;;  %v299_v57 = vmax.f32 %v267_v45, 0.0  ;;  %v271_v58 = vadd.f32 %v475_v1, %v235_v46 }
  0x25   : > { %329 = vst [vmem:[%s480_s25 + $0x90] sm:$0xff] %v289_v20  ;;  %v300_v59 = vmax.f32 %v268_v49, 0.0  ;;  %v272_v60 = vadd.f32 %v475_v1, %v236_v50  ;;  %v301_v61 = vmax.f32 %v269_v52, 0.0  ;;  %v273_v62 = vadd.f32 %v475_v1, %v237_v53 }
  0x26   : > { %330 = vst [vmem:[%s480_s25 + $0x98] sm:$0xff] %v290_v24  ;;  %v302_v0 = vmax.f32 %v270_v55, 0.0  ;;  %v274_v63 = vadd.f32 %v475_v1, %v238_v56  ;;  %v303_v2 = vmax.f32 %v271_v58, 0.0 }
  0x27   : > { %331 = vst [vmem:[%s480_s25 + $0xa0] sm:$0xff] %v291_v28  ;;  %v304_v3 = vmax.f32 %v272_v60, 0.0  ;;  %v305_v4 = vmax.f32 %v273_v62, 0.0 }
  0x28   : > { %332 = vst [vmem:[%s480_s25 + $0xa8] sm:$0xff] %v292_v32  ;;  %v306_v5 = vmax.f32 %v274_v63, 0.0 }
  0x29   : > { %333 = vst [vmem:[%s480_s25 + $0xb0] sm:$0xff] %v293_v36 }
  0x2a   : > { %334 = vst [vmem:[%s480_s25 + $0xb8] sm:$0xff] %v294_v40 }
  0x2b   : > { %335 = vst [vmem:[%s480_s25 + $0xc0] sm:$0xff] %v295_v44 }
  0x2c   : > { %336 = vst [vmem:[%s480_s25 + $0xc8] sm:$0xff] %v296_v48 }
  0x2d   : > { %337 = vst [vmem:[%s480_s25 + $0xd0] sm:$0xff] %v297_v51 }
  0x2e   : > { %338 = vst [vmem:[%s480_s25 + $0xd8] sm:$0xff] %v298_v54 }
  0x2f   : > { %339 = vst [vmem:[%s480_s25 + $0xe0] sm:$0xff] %v299_v57 }
  0x30   : > { %340 = vst [vmem:[%s480_s25 + $0xe8] sm:$0xff] %v300_v59 }
  0x31   : > { %341 = vst [vmem:[%s480_s25 + $0xf0] sm:$0xff] %v301_v61 }
  0x32   : > { %342 = vst [vmem:[%s480_s25 + $0xf8] sm:$0xff] %v302_v0 }
  0x33   : > { %343 = vst [vmem:[%s480_s25 + $0x100] sm:$0xff] %v303_v2 }
  0x34   : > { %344 = vst [vmem:[%s480_s25 + $0x108] sm:$0xff] %v304_v3 }
  0x35   : > { %345 = vst [vmem:[%s480_s25 + $0x110] sm:$0xff] %v305_v4 }
  0x36   : > { %346 = vst [vmem:[%s480_s25 + $0x118] sm:$0xff] %v306_v5 }
  0x37 PF: > { %s13_s12 = sadd.s32 1, %s431_s12  }
  0x38   : > { %p10_p4 = scmp.ge.s32.totalorder %s13_s12, 4  }
  0x3a   :  { %12 = sbr.rel (!%p10_p4) target bundleno = 1 (0x1), region = 62 }

// kernel: residual_block_forward.4
= control target key start
LH: loop header
LB: loop body
LE: loop exit
PB: predicated region body
PF: predicated region fallthrough
CT: control target
= control target key end

     0   :  { %s3208_s18 = smov 0   ;;  %s4586_s0 = inlined_call_operand.vmem [shape: f32[2,320,128], index: 0, kind: input, shape index: {}]   ;;  %s4587_s1 = inlined_call_operand.vmem [shape: f32[9,128,128], index: 1, kind: input, shape index: {}]   ;;  %s4588_s2 = inlined_call_operand.vmem [shape: f32[1,128], index: 2, kind: input, shape index: {}]   ;;  %s4589_s3 = inlined_call_operand.vmem [shape: f32[2,256,128], index: 3, kind: output, shape index: {0}]   ;;  %s4590_s4 = inlined_call_operand.vmem [shape: f32[2,1,128], index: 4, kind: output, shape index: {1}]   ;;  %s4591_s5 = inlined_call_operand.vmem [shape: f32[2,1,128], index: 5, kind: output, shape index: {2}]  }
   0x1 LB: > { %s2877_s19 = sadd.s32 4294967295, %s3176_s18   ;;  %p2881_p0 = scmp.ge.s32.totalorder %s3176_s18, 1  ;;  %s3176_s18 = sphi %s3208_s18, %s16_s18  }
   0x2   : > { %p192_p1 = scmp.lt.s32.totalorder %s3176_s18, 3 }
   0x4   : > { %p193_p2 = pnand %p2881_p0, %p192_p1 }
   0x6   : > { %196 = sbr.rel (%p193_p2) target bundleno = 768 (0x300), region = 32 }
   0xb   : > { %v2900_v0 = vld [vmem:[%s4587_s1 + $0xf8] sm:$0xff]  ;;  %v2899_v1 = vld [vmem:[%s4587_s1 + $0xf0] sm:$0xff]  ;;  %v2898_v2 = vld [vmem:[%s4587_s1 + $0xe8] sm:$0xff]  ;;  %p226_p3 = scmp.lt.s32.totalorder %s2877_s19, 1 }
   0xc   : > { %3112 = vmatpush.msra.mxu1 %v2900_v0  ;;  %3113 = vmatpush.msra.mxu2 %v2900_v0  ;;  %v2897_v3 = vld [vmem:[%s4587_s1 + $0xe0] sm:$0xff]  ;;  %v2896_v4 = vld [vmem:[%s4587_s1 + $0xd8] sm:$0xff]  ;;  %v2895_v5 = vld [vmem:[%s4587_s1 + $0xd0] sm:$0xff] }
   0xd   : > { %3114 = vmatpush.msra.mxu3 %v2900_v0  ;;  %852 = vmatpush.msra.mxu0 %v2900_v0  ;;  %v2894_v6 = vld [vmem:[%s4587_s1 + $0xc8] sm:$0xff]  ;;  %v2893_v7 = vld [vmem:[%s4587_s1 + $0xc0] sm:$0xff]  ;;  %v2892_v8 = vld [vmem:[%s4587_s1 + $0xb8] sm:$0xff]  ;;  %s4747_s19 = smov (!%p226_p3, %s2877_s19), 1 }
   0xe   : > { %3115 = vmatpush.msra.mxu1 %v2899_v1  ;;  %3116 = vmatpush.msra.mxu2 %v2899_v1  ;;  %v2891_v9 = vld [vmem:[%s4587_s1 + $0xb0] sm:$0xff]  ;;  %v2890_v10 = vld [vmem:[%s4587_s1 + $0xa8] sm:$0xff]  ;;  %v2889_v11 = vld [vmem:[%s4587_s1 + $0xa0] sm:$0xff]  ;;  %s3160_s23 = smul.u32 320, %s4747_s19  ;;  %s3111_s24 = sshll.u32 %s4747_s19, 8 }
   0xf   : > { %3117 = vmatpush.msra.mxu3 %v2899_v1  ;;  %853 = vmatpush.msra.mxu0 %v2899_v1  ;;  %v2888_v12 = vld [vmem:[%s4587_s1 + $0x98] sm:$0xff]  ;;  %v2887_v13 = vld [vmem:[%s4587_s1 + $0x90] sm:$0xff]  ;;  %v2886_v14 = vld [vmem:[%s4587_s1 + $0x88] sm:$0xff]  ;;  %s4391_s29 = scalar_lea.vmem %s4589_s3, %s3111_s24  ;;  %s238_s7 = scalar_lea.vmem %s4590_s4, %s4747_s19 }
  0x10   : > { %3118 = vmatpush.msra.mxu1 %v2898_v2  ;;  %3119 = vmatpush.msra.mxu2 %v2898_v2  ;;  %s3271_s30 = scalar_lea.vmem %s4586_s0, %s3160_s23  ;;  %v2885_v15 = vld [vmem:[%s4587_s1 + $0x80] sm:$0xff]  ;;  %v2932_v18 = vld [vmem:[%s4587_s1 + $0x178] sm:$0xff]  ;;  %v2931_v22 = vld [vmem:[%s4587_s1 + $0x170] sm:$0xff]  ;;  %s241_s10 = scalar_lea.vmem %s4591_s5, %s4747_s19 }
  0x11   : > { %3120 = vmatpush.msra.mxu3 %v2898_v2  ;;  %854 = vmatpush.msra.mxu0 %v2898_v2  ;;  %v3277_v16 = vld [vmem:[%s3271_s30 + $0x50] sm:$0xff]  ;;  %v802_v20 = vld [vmem:[%s4587_s1 + $0x78] sm:$0xff]  ;;  %v2930_v25 = vld [vmem:[%s4587_s1 + $0x168] sm:$0xff] }
  0x12   : > { %3121 = vmatpush.msra.mxu1 %v2897_v3  ;;  %3122 = vmatpush.msra.mxu2 %v2897_v3  ;;  %v3280_v17 = vld [vmem:[%s3271_s30 + $0x90] sm:$0xff]  ;;  %v2964_v21 = vld [vmem:[%s4587_s1 + $0x1f8] sm:$0xff]  ;;  %v800_v27 = vld [vmem:[%s4587_s1 + $0x68] sm:$0xff] }
  0x13   : > { %3123 = vmatpush.msra.mxu3 %v2897_v3  ;;  %855 = vmatpush.msra.mxu0 %v2897_v3  ;;  %v827_v19 = vld [vmem:[%s3271_s30 + $0xd0] sm:$0xff]  ;;  %v2962_v28 = vld [vmem:[%s4587_s1 + $0x1e8] sm:$0xff]  ;;  %v2996_v29 = vld [vmem:[%s4587_s1 + $0x278] sm:$0xff] }
  0x14   : > { %3124 = vmatpush.msra.mxu1 %v2896_v4  ;;  %3125 = vmatpush.msra.mxu2 %v2896_v4  ;;  %v801_v23 = vld [vmem:[%s4587_s1 + $0x70] sm:$0xff]  ;;  %v3317_v30 = vld [vmem:[%s3271_s30 + $0x58] sm:$0xff]  ;;  %v2929_v32 = vld [vmem:[%s4587_s1 + $0x160] sm:$0xff] }
  0x15   : > { %3126 = vmatpush.msra.mxu3 %v2896_v4  ;;  %856 = vmatpush.msra.mxu0 %v2896_v4  ;;  %v2963_v24 = vld [vmem:[%s4587_s1 + $0x1f0] sm:$0xff]  ;;  %v3320_v31 = vld [vmem:[%s3271_s30 + $0x98] sm:$0xff]  ;;  %v2961_v33 = vld [vmem:[%s4587_s1 + $0x1e0] sm:$0xff] }
  0x16   : > { %3127 = vmatpush.msra.mxu1 %v2895_v5  ;;  %3128 = vmatpush.msra.mxu2 %v2895_v5  ;;  %v803_v26 = vld [vmem:[%s3271_s30 + $0x10] sm:$0xff]  ;;  %v828_v34 = vld [vmem:[%s3271_s30 + $0xd8] sm:$0xff]  ;;  %v799_v36 = vld [vmem:[%s4587_s1 + $0x60] sm:$0xff] }
  0x17   : > { %3129 = vmatpush.msra.mxu3 %v2895_v5  ;;  %857 = vmatpush.msra.mxu0 %v2895_v5  ;;  %v2995_v35 = vld [vmem:[%s4587_s1 + $0x270] sm:$0xff]  ;;  %v2928_v37 = vld [vmem:[%s4587_s1 + $0x158] sm:$0xff]  ;;  %v2994_v39 = vld [vmem:[%s4587_s1 + $0x268] sm:$0xff] }
  0x18   : > { %3130 = vmatpush.msra.mxu1 %v2894_v6  ;;  %3131 = vmatpush.msra.mxu2 %v2894_v6  ;;  %v2960_v38 = vld [vmem:[%s4587_s1 + $0x1d8] sm:$0xff]  ;;  %v2927_v41 = vld [vmem:[%s4587_s1 + $0x150] sm:$0xff]  ;;  %v2993_v44 = vld [vmem:[%s4587_s1 + $0x260] sm:$0xff] }
  0x19   : > { %3132 = vmatpush.msra.mxu3 %v2894_v6  ;;  %858 = vmatpush.msra.mxu0 %v2894_v6  ;;  %v798_v40 = vld [vmem:[%s4587_s1 + $0x58] sm:$0xff]  ;;  %v2959_v43 = vld [vmem:[%s4587_s1 + $0x1d0] sm:$0xff]  ;;  %v3363_v46 = vld [vmem:[%s3271_s30 + $0x60] sm:$0xff] }
  0x1a   : > { %3133 = vmatpush.msra.mxu1 %v2893_v7  ;;  %3134 = vmatpush.msra.mxu2 %v2893_v7  ;;  %v804_v42 = vld [vmem:[%s3271_s30 + $0x18] sm:$0xff]  ;;  %v797_v45 = vld [vmem:[%s4587_s1 + $0x50] sm:$0xff]  ;;  %v3366_v47 = vld [vmem:[%s3271_s30 + $0xa0] sm:$0xff] }
  0x1b   : > { %3135 = vmatpush.msra.mxu3 %v2893_v7  ;;  %859 = vmatpush.msra.mxu0 %v2893_v7  ;;  %v2926_v48 = vld [vmem:[%s4587_s1 + $0x148] sm:$0xff]  ;;  %v829_v50 = vld [vmem:[%s3271_s30 + $0xe0] sm:$0xff]  ;;  %v2992_v51 = vld [vmem:[%s4587_s1 + $0x258] sm:$0xff] }
  0x1c   : > { %3136 = vmatpush.msra.mxu1 %v2892_v8  ;;  %3137 = vmatpush.msra.mxu2 %v2892_v8  ;;  %v2958_v49 = vld [vmem:[%s4587_s1 + $0x1c8] sm:$0xff]  ;;  %v2925_v53 = vld [vmem:[%s4587_s1 + $0x140] sm:$0xff]  ;;  %v2991_v55 = vld [vmem:[%s4587_s1 + $0x250] sm:$0xff] }
  0x1d   : > { %3138 = vmatpush.msra.mxu3 %v2892_v8  ;;  %860 = vmatpush.msra.mxu0 %v2892_v8  ;;  %v796_v52 = vld [vmem:[%s4587_s1 + $0x48] sm:$0xff]  ;;  %v2957_v54 = vld [vmem:[%s4587_s1 + $0x1c0] sm:$0xff]  ;;  %v2924_v57 = vld [vmem:[%s4587_s1 + $0x138] sm:$0xff] }
  0x1e   : > { %3139 = vmatpush.msra.mxu1 %v2891_v9  ;;  %3140 = vmatpush.msra.mxu2 %v2891_v9  ;;  %v795_v56 = vld [vmem:[%s4587_s1 + $0x40] sm:$0xff]  ;;  %v2956_v59 = vld [vmem:[%s4587_s1 + $0x1b8] sm:$0xff]  ;;  %v2990_v60 = vld [vmem:[%s4587_s1 + $0x248] sm:$0xff] }
  0x1f   : > { %3141 = vmatpush.msra.mxu3 %v2891_v9  ;;  %861 = vmatpush.msra.mxu0 %v2891_v9  ;;  %v3399_v58 = vld [vmem:[%s3271_s30 + $0x20] sm:$0xff]  ;;  %v794_v61 = vld [vmem:[%s4587_s1 + $0x38] sm:$0xff]  ;;  %v3411_v62 = vld [vmem:[%s3271_s30 + $0x68] sm:$0xff] }
  0x20   : > { %3142 = vmatpush.msra.mxu1 %v2890_v10  ;;  %3143 = vmatpush.msra.mxu2 %v2890_v10  ;;  %v3414_v63 = vld [vmem:[%s3271_s30 + $0xa8] sm:$0xff]  ;;  %v2923_v0 = vld [vmem:[%s4587_s1 + $0x130] sm:$0xff]  ;;  %v2989_v3 = vld [vmem:[%s4587_s1 + $0x240] sm:$0xff] }
  0x21   : > { %3144 = vmatpush.msra.mxu3 %v2890_v10  ;;  %862 = vmatpush.msra.mxu0 %v2890_v10  ;;  %v2955_v1 = vld [vmem:[%s4587_s1 + $0x1b0] sm:$0xff]  ;;  %v830_v2 = vld [vmem:[%s3271_s30 + $0xe8] sm:$0xff]  ;;  %v2988_v7 = vld [vmem:[%s4587_s1 + $0x238] sm:$0xff] }
  0x22   : > { %3145 = vmatpush.msra.mxu1 %v2889_v11  ;;  %3146 = vmatpush.msra.mxu2 %v2889_v11  ;;  %v793_v4 = vld [vmem:[%s4587_s1 + $0x30] sm:$0xff]  ;;  %v2922_v5 = vld [vmem:[%s4587_s1 + $0x128] sm:$0xff]  ;;  %v2921_v9 = vld [vmem:[%s4587_s1 + $0x120] sm:$0xff] }
  0x23   : > { %3147 = vmatpush.msra.mxu3 %v2889_v11  ;;  %863 = vmatpush.msra.mxu0 %v2889_v11  ;;  %v2954_v6 = vld [vmem:[%s4587_s1 + $0x1a8] sm:$0xff]  ;;  %v2953_v11 = vld [vmem:[%s4587_s1 + $0x1a0] sm:$0xff] }
  0x24   : > { %3148 = vmatpush.msra.mxu1 %v2888_v12  ;;  %3149 = vmatpush.msra.mxu2 %v2888_v12  ;;  %v792_v8 = vld [vmem:[%s4587_s1 + $0x28] sm:$0xff] }
  0x25   : > { %3150 = vmatpush.msra.mxu3 %v2888_v12  ;;  %864 = vmatpush.msra.mxu0 %v2888_v12  ;;  %v3448_v10 = vld [vmem:[%s3271_s30 + $0x28] sm:$0xff]  ;;  %v2987_v12 = vld [vmem:[%s4587_s1 + $0x230] sm:$0xff] }
  0x26   : > { %3151 = vmatpush.msra.mxu1 %v2887_v13  ;;  %3152 = vmatpush.msra.mxu2 %v2887_v13 }
  0x27   : > { %3153 = vmatpush.msra.mxu3 %v2887_v13  ;;  %865 = vmatpush.msra.mxu0 %v2887_v13  ;;  %v791_v13 = vld [vmem:[%s4587_s1 + $0x20] sm:$0xff] }
  0x28   : > { %3154 = vmatpush.msra.mxu1 %v2886_v14  ;;  %3155 = vmatpush.msra.mxu2 %v2886_v14 }
  0x29   : > { %3156 = vmatpush.msra.mxu3 %v2886_v14  ;;  %866 = vmatpush.msra.mxu0 %v2886_v14  ;;  %v3460_v14 = vld [vmem:[%s3271_s30 + $0x70] sm:$0xff] }
  0x2a   : > { %3157 = vmatpush.msra.mxu1 %v2885_v15  ;;  %3158 = vmatpush.msra.mxu2 %v2885_v15 }
  0x2b   : > { %892 = vmatmul.f32.vlgmr.msra.gmra.mxu1 %v3277_v16  ;;  %916 = vmatmul.f32.vlgmr.msra.gmra.mxu2 %v3280_v17 }
  0x2c   : > { %1159 = vmatpush.msrb.mxu2 %v2932_v18  ;;  %3159 = vmatpush.msra.mxu3 %v2885_v15  ;;  %v2920_v18 = vld [vmem:[%s4587_s1 + $0x118] sm:$0xff] }
  0x2d   : > { %940 = vmatmul.f32.vlgmr.msra.gmra.mxu3 %v827_v19  ;;  %965 = vmatpush.msrb.mxu1 %v802_v20  ;;  %v2952_v19 = vld [vmem:[%s4587_s1 + $0x198] sm:$0xff]  ;;  %v831_v20 = vld [vmem:[%s3271_s30 + $0xf0] sm:$0xff] }
  0x2e   : > { %1385 = vmatpush.msrb.mxu3 %v2964_v21  ;;  %1160 = vmatpush.msrb.mxu2 %v2931_v22  ;;  %v2986_v21 = vld [vmem:[%s4587_s1 + $0x228] sm:$0xff]  ;;  %v790_v22 = vld [vmem:[%s4587_s1 + $0x18] sm:$0xff] }
  0x2f   : > { %966 = vmatpush.msrb.mxu1 %v801_v23  ;;  %867 = vmatpush.msra.mxu0 %v2885_v15  ;;  %v3463_v15 = vld [vmem:[%s3271_s30 + $0xb0] sm:$0xff] }
  0x30   : > { %1386 = vmatpush.msrb.mxu3 %v2963_v24  ;;  %1161 = vmatpush.msrb.mxu2 %v2930_v25  ;;  %v2919_v23 = vld [vmem:[%s4587_s1 + $0x110] sm:$0xff]  ;;  %v2985_v25 = vld [vmem:[%s4587_s1 + $0x220] sm:$0xff] }
  0x31   : > { %868 = vmatmul.f32.vlgmr.msra.gmra.mxu0 %v803_v26  ;;  %967 = vmatpush.msrb.mxu1 %v800_v27  ;;  %v2951_v24 = vld [vmem:[%s4587_s1 + $0x190] sm:$0xff]  ;;  %v2918_v27 = vld [vmem:[%s4587_s1 + $0x108] sm:$0xff] }
  0x32   : > { %1387 = vmatpush.msrb.mxu3 %v2962_v28  ;;  %1579 = vmatpush.msrb.mxu0 %v2996_v29  ;;  %v789_v26 = vld [vmem:[%s4587_s1 + $0x10] sm:$0xff]  ;;  %v2950_v29 = vld [vmem:[%s4587_s1 + $0x188] sm:$0xff] }
  0x33   : > { %895 = vmatmul.f32.gmra.mxu1 %v3317_v30  ;;  %919 = vmatmul.f32.gmra.mxu2 %v3320_v31  ;;  %v3497_v28 = vld [vmem:[%s3271_s30 + $0x30] sm:$0xff] }
  0x34   : > { %1162 = vmatpush.msrb.mxu2 %v2929_v32  ;;  %1388 = vmatpush.msrb.mxu3 %v2961_v33  ;;  %v2984_v32 = vld [vmem:[%s4587_s1 + $0x218] sm:$0xff]  ;;  %v788_v33 = vld [vmem:[%s4587_s1 + $0x8] sm:$0xff] }
  0x35   : > { %943 = vmatmul.f32.gmra.mxu3 %v828_v34  ;;  %1580 = vmatpush.msrb.mxu0 %v2995_v35  ;;  %v3509_v34 = vld [vmem:[%s3271_s30 + $0x78] sm:$0xff] }
  0x36   : > { %968 = vmatpush.msrb.mxu1 %v799_v36  ;;  %1163 = vmatpush.msrb.mxu2 %v2928_v37  ;;  %v3512_v35 = vld [vmem:[%s3271_s30 + $0xb8] sm:$0xff]  ;;  %v2917_v36 = vld [vmem:[%s4587_s1 + $0x100] sm:$0xff] }
  0x37   : > { %1389 = vmatpush.msrb.mxu3 %v2960_v38  ;;  %1581 = vmatpush.msrb.mxu0 %v2994_v39  ;;  %v2949_v37 = vld [vmem:[%s4587_s1 + $0x180] sm:$0xff]  ;;  %v832_v38 = vld [vmem:[%s3271_s30 + $0xf8] sm:$0xff]  ;;  %v2983_v39 = vld [vmem:[%s4587_s1 + $0x210] sm:$0xff] }
  0x38   : > { %969 = vmatpush.msrb.mxu1 %v798_v40  ;;  %1164 = vmatpush.msrb.mxu2 %v2927_v41  ;;  %v787_v40 = vld [vmem:[%s4587_s1] sm:$0xff]  ;;  %v3044_v41 = vld [vmem:[%s4587_s1 + $0x378] sm:$0xff] }
  0x39   : > { %871 = vmatmul.f32.gmra.mxu0 %v804_v42  ;;  %1390 = vmatpush.msrb.mxu3 %v2959_v43  ;;  %v2982_v42 = vld [vmem:[%s4587_s1 + $0x208] sm:$0xff]  ;;  %v3076_v43 = vld [vmem:[%s4587_s1 + $0x3f8] sm:$0xff] }
  0x3a   : > { %1582 = vmatpush.msrb.mxu0 %v2993_v44  ;;  %970 = vmatpush.msrb.mxu1 %v797_v45  ;;  %v3012_v44 = vld [vmem:[%s4587_s1 + $0x2f8] sm:$0xff] }
  0x3b   : > { %898 = vmatmul.f32.gmra.mxu1 %v3363_v46  ;;  %922 = vmatmul.f32.gmra.mxu2 %v3366_v47  ;;  %v3543_v45 = vld [vmem:[%s3271_s30 + $0x38] sm:$0xff] }
  0x3c   : > { %1165 = vmatpush.msrb.mxu2 %v2926_v48  ;;  %1391 = vmatpush.msrb.mxu3 %v2958_v49  ;;  %v2981_v48 = vld [vmem:[%s4587_s1 + $0x200] sm:$0xff] }
  0x3d   : > { %946 = vmatmul.f32.gmra.mxu3 %v829_v50  ;;  %1583 = vmatpush.msrb.mxu0 %v2992_v51  ;;  %v3549_v49 = vld [vmem:[%s3271_s30 + $0x80] sm:$0xff]  ;;  %v3092_v51 = vld [vmem:[%s4587_s1 + $0x478] sm:$0xff] }
  0x3e   : > { %971 = vmatpush.msrb.mxu1 %v796_v52  ;;  %1166 = vmatpush.msrb.mxu2 %v2925_v53  ;;  %v3552_v50 = vld [vmem:[%s3271_s30 + $0xc0] sm:$0xff]  ;;  %v3043_v53 = vld [vmem:[%s4587_s1 + $0x370] sm:$0xff] }
  0x3f   : > { %1392 = vmatpush.msrb.mxu3 %v2957_v54  ;;  %1584 = vmatpush.msrb.mxu0 %v2991_v55  ;;  %v833_v52 = vld [vmem:[%s3271_s30 + $0x100] sm:$0xff]  ;;  %v242_v54 = vlaneseq  ;;  %v3075_v55 = vld [vmem:[%s4587_s1 + $0x3f0] sm:$0xff] }
  0x40   : > { %972 = vmatpush.msrb.mxu1 %v795_v56  ;;  %1167 = vmatpush.msrb.mxu2 %v2924_v57  ;;  %v3011_v56 = vld [vmem:[%s4587_s1 + $0x2f0] sm:$0xff]  ;;  %v3571_v57 = vld [vmem:[%s3271_s30 + $0x40] sm:$0xff] }
  0x41   : > { %874 = vmatmul.f32.gmra.mxu0 %v3399_v58  ;;  %1393 = vmatpush.msrb.mxu3 %v2956_v59  ;;  %v3574_v59 = vld [vmem:[%s3271_s30 + $0x88] sm:$0xff] }
  0x42   : > { %1585 = vmatpush.msrb.mxu0 %v2990_v60  ;;  %973 = vmatpush.msrb.mxu1 %v794_v61  ;;  %v3577_v60 = vld [vmem:[%s3271_s30 + $0xc8] sm:$0xff]  ;;  %v3579_v61 = vshrl.u32 %v242_v54, 7  ;;  %v1083_v54 = vld [vmem:[%s3271_s30 + $0x39] sm:$0xff] }
  0x43   : > { %901 = vmatmul.f32.gmra.mxu1 %v3411_v62  ;;  %925 = vmatmul.f32.gmra.mxu2 %v3414_v63 }
  0x44   : > { %1168 = vmatpush.msrb.mxu2 %v2923_v0  ;;  %1394 = vmatpush.msrb.mxu3 %v2955_v1  ;;  %v834_v0 = vld [vmem:[%s3271_s30 + $0x108] sm:$0xff]  ;;  %v279_v1 = vand.u32 15, %v3579_v61 }
  0x45   : > { %949 = vmatmul.f32.gmra.mxu3 %v830_v2  ;;  %1586 = vmatpush.msrb.mxu0 %v2989_v3  ;;  %v3091_v2 = vld [vmem:[%s4587_s1 + $0x470] sm:$0xff]  ;;  %v3590_v3 = vld [vmem:[%s3271_s30 + $0x48] sm:$0xff] }
  0x46   : > { %974 = vmatpush.msrb.mxu1 %v793_v4  ;;  %1169 = vmatpush.msrb.mxu2 %v2922_v5  ;;  %vm3592_vm0 = vcmp.ne.s32.totalorder %v279_v1, 0  ;;  %v723_v5 = vld [vmem:[%s3271_s30 + $0xf] sm:$0xff]  ;;  %v3088_v1 = vld [vmem:[%s4587_s1 + $0x458] sm:$0xff] }
  0x47   : > { %1395 = vmatpush.msrb.mxu3 %v2954_v6  ;;  %1587 = vmatpush.msrb.mxu0 %v2988_v7  ;;  %v1078_v6 = vld [vmem:[%s3271_s30 + $0x11] sm:$0xff]  ;;  %v244_v7 = vadd.s32 8, %v3579_v61 }
  0x48   : > { %975 = vmatpush.msrb.mxu1 %v792_v8  ;;  %1170 = vmatpush.msrb.mxu2 %v2921_v9  ;;  %v1304_v8 = vld [vmem:[%s3271_s30 + $0x1f] sm:$0xff]  ;;  %v3042_v9 = vld [vmem:[%s4587_s1 + $0x368] sm:$0xff] }
  0x49   : > { %877 = vmatmul.f32.gmra.mxu0 %v3448_v10  ;;  %1396 = vmatpush.msrb.mxu3 %v2953_v11  ;;  %v286_v11 = vand.u32 15, %v244_v7  ;;  %v3039_v7 = vld [vmem:[%s4587_s1 + $0x350] sm:$0xff] }
  0x4a   : > { %1588 = vmatpush.msrb.mxu0 %v2987_v12  ;;  %976 = vmatpush.msrb.mxu1 %v791_v13  ;;  %v3074_v12 = vld [vmem:[%s4587_s1 + $0x3e8] sm:$0xff] }
  0x4b   : > { %904 = vmatmul.f32.gmra.mxu1 %v3460_v14  ;;  %928 = vmatmul.f32.gmra.mxu2 %v3463_v15  ;;  %v3010_v13 = vld [vmem:[%s4587_s1 + $0x2e8] sm:$0xff]  ;;  %vm3615_vm1 = vcmp.ne.s32.totalorder %v286_v11, 15  ;;  %v1959_v11 = vld [vmem:[%s3271_s30 + $0x77] sm:$0xff] }
  0x4c   : > { %1171 = vmatpush.msrb.mxu2 %v2920_v18  ;;  %1397 = vmatpush.msrb.mxu3 %v2952_v19  ;;  %v724_v18 = vld [vmem:[%s3271_s30 + $0x17] sm:$0xff]  ;;  %v1953_v19 = vld [vmem:[%s3271_s30 + $0x47] sm:$0xff] }
  0x4d   : > { %952 = vmatmul.f32.gmra.mxu3 %v831_v20  ;;  %1589 = vmatpush.msrb.mxu0 %v2986_v21  ;;  %v1079_v20 = vld [vmem:[%s3271_s30 + $0x19] sm:$0xff]  ;;  %v245_v21 = vadd.s32 16, %v3579_v61 }
  0x4e   : > { %977 = vmatpush.msrb.mxu1 %v790_v22  ;;  %1172 = vmatpush.msrb.mxu2 %v2919_v23  ;;  %v1305_v22 = vld [vmem:[%s3271_s30 + $0x27] sm:$0xff] }
  0x4f   : > { %1398 = vmatpush.msrb.mxu3 %v2951_v24  ;;  %1590 = vmatpush.msrb.mxu0 %v2985_v25  ;;  %v293_v23 = vand.u32 15, %v245_v21  ;;  %v3090_v24 = vld [vmem:[%s4587_s1 + $0x468] sm:$0xff]  ;;  %v3087_v21 = vld [vmem:[%s4587_s1 + $0x450] sm:$0xff] }
  0x50   : > { %978 = vmatpush.msrb.mxu1 %v789_v26  ;;  %1173 = vmatpush.msrb.mxu2 %v2918_v27  ;;  %v1080_v26 = vld [vmem:[%s3271_s30 + $0x21] sm:$0xff]  ;;  %v1306_v27 = vld [vmem:[%s3271_s30 + $0x2f] sm:$0xff] }
  0x51   : > { %880 = vmatmul.f32.gmra.mxu0 %v3497_v28  ;;  %1399 = vmatpush.msrb.mxu3 %v2950_v29  ;;  %vm3628_vm2 = vcmp.ne.s32.totalorder %v293_v23, 0  ;;  %v3041_v29 = vld [vmem:[%s4587_s1 + $0x360] sm:$0xff] }
  0x52   : > { %1591 = vmatpush.msrb.mxu0 %v2984_v32  ;;  %979 = vmatpush.msrb.mxu1 %v788_v33  ;;  %v3073_v33 = vld [vmem:[%s4587_s1 + $0x3e0] sm:$0xff] }
  0x53   : > { %907 = vmatmul.f32.gmra.mxu1 %v3509_v34  ;;  %931 = vmatmul.f32.gmra.mxu2 %v3512_v35 }
  0x54   : > { %1174 = vmatpush.msrb.mxu2 %v2917_v36  ;;  %1400 = vmatpush.msrb.mxu3 %v2949_v37  ;;  %v1081_v37 = vld [vmem:[%s3271_s30 + $0x29] sm:$0xff]  ;;  %v1955_v36 = vld [vmem:[%s3271_s30 + $0x57] sm:$0xff] }
  0x55   : > { %955 = vmatmul.f32.gmra.mxu3 %v832_v38  ;;  %1592 = vmatpush.msrb.mxu0 %v2983_v39  ;;  %v247_v38 = vadd.s32 32, %v3579_v61  ;;  %v1307_v39 = vld [vmem:[%s3271_s30 + $0x37] sm:$0xff] }
  0x56   : > { %980 = vmatpush.msrb.mxu1 %v787_v40  ;;  %2031 = vmatpush.msra.mxu2 %v3044_v41  ;;  %v3089_v41 = vld [vmem:[%s4587_s1 + $0x460] sm:$0xff] }
  0x57   : > { %1593 = vmatpush.msrb.mxu0 %v2982_v42  ;;  %2225 = vmatpush.msra.mxu3 %v3076_v43  ;;  %v307_v40 = vand.u32 15, %v247_v38  ;;  %v1082_v43 = vld [vmem:[%s3271_s30 + $0x31] sm:$0xff]  ;;  %v1961_v38 = vld [vmem:[%s3271_s30 + $0x87] sm:$0xff] }
  0x58   : > { %1805 = vmatpush.msra.mxu1 %v3012_v44  ;;  %2032 = vmatpush.msra.mxu2 %v3043_v53  ;;  %v1308_v44 = vld [vmem:[%s3271_s30 + $0x3f] sm:$0xff]  ;;  %v1957_v53 = vld [vmem:[%s3271_s30 + $0x67] sm:$0xff] }
  0x59   : > { %883 = vmatmul.f32.gmra.mxu0 %v3543_v45  ;;  %2226 = vmatpush.msra.mxu3 %v3075_v55  ;;  %vm3662_vm4 = vcmp.ne.s32.totalorder %v307_v40, 0  ;;  %v249_v55 = vadd.s32 48, %v3579_v61  ;;  %v253_v40 = vadd.s32 80, %v3579_v61 }
  0x5a   : > { %1594 = vmatpush.msrb.mxu0 %v2981_v48  ;;  %1806 = vmatpush.msra.mxu1 %v3011_v56  ;;  %v3040_v48 = vld [vmem:[%s4587_s1 + $0x358] sm:$0xff]  ;;  %v1309_v56 = vld [vmem:[%s3271_s30 + $0x47] sm:$0xff] }
  0x5b   : > { %910 = vmatmul.f32.gmra.mxu1 %v3549_v49  ;;  %934 = vmatmul.f32.gmra.mxu2 %v3552_v50 }
  0x5c   : > { %2451 = vmatpush.msra.mxu0 %v3092_v51  ;;  %2033 = vmatpush.msra.mxu2 %v3042_v9  ;;  %v3071_v9 = vld [vmem:[%s4587_s1 + $0x3d0] sm:$0xff] }
  0x5d   : > { %958 = vmatmul.f32.gmra.mxu3 %v833_v52  ;;  %1807 = vmatpush.msra.mxu1 %v3010_v13  ;;  %v3072_v52 = vld [vmem:[%s4587_s1 + $0x3d8] sm:$0xff]  ;;  %v251_v13 = vadd.s32 64, %v3579_v61 }
  0x5e   : > { %2452 = vmatpush.msra.mxu0 %v3091_v2  ;;  %2227 = vmatpush.msra.mxu3 %v3074_v12  ;;  %v1085_v12 = vld [vmem:[%s3271_s30 + $0x49] sm:$0xff] }
  0x5f   : > { %2034 = vmatpush.msra.mxu2 %v3041_v29 }
  0x60   : > { %2453 = vmatpush.msra.mxu0 %v3090_v24  ;;  %2228 = vmatpush.msra.mxu3 %v3073_v33  ;;  %v1086_v24 = vld [vmem:[%s3271_s30 + $0x51] sm:$0xff]  ;;  %v3006_v33 = vld [vmem:[%s4587_s1 + $0x2c8] sm:$0xff] }
  0x61   : > { %886 = vmatmul.f32.gmra.mxu0 %v3571_v57  ;;  %2035 = vmatpush.msra.mxu2 %v3040_v48 }
  0x62   : > { %2454 = vmatpush.msra.mxu0 %v3089_v41  ;;  %2229 = vmatpush.msra.mxu3 %v3072_v52  ;;  %v1313_v41 = vld [vmem:[%s3271_s30 + $0x67] sm:$0xff] }
  0x63   : > { %913 = vmatmul.f32.gmra.mxu1 %v3574_v59  ;;  %937 = vmatmul.f32.gmra.mxu2 %v3577_v60 }
  0x64   : > { %2455 = vmatpush.msra.mxu0 %v3088_v1  ;;  %2036 = vmatpush.msra.mxu2 %v3039_v7 }
  0x65   : > { %961 = vmatmul.f32.gmra.mxu3 %v834_v0  ;;  %v321_v0 = vand.u32 15, %v249_v55  ;;  %v1314_v55 = vld [vmem:[%s3271_s30 + $0x6f] sm:$0xff] }
  0x66   : > { %2230 = vmatpush.msra.mxu3 %v3071_v9  ;;  %2456 = vmatpush.msra.mxu0 %v3087_v21  ;;  %v1089_v9 = vld [vmem:[%s3271_s30 + $0x69] sm:$0xff] }
  0x67   : > { %vm3696_vm6 = vcmp.ne.s32.totalorder %v321_v0, 0 }
  0x69   : > { %889 = vmatmul.f32.gmra.mxu0 %v3590_v3 }
  0x6b   : > { %2901 = vmatmul.msk.f32.vlgmr.msrb.gmra.mxu1 %vm3592_vm0, %v723_v5  ;;  %1175 = vmatmul.f32.vlgmr.msrb.gmra.mxu2 %v1078_v6  ;;  %v1084_v5 = vld [vmem:[%s3271_s30 + $0x41] sm:$0xff]  ;;  %v1310_v6 = vld [vmem:[%s3271_s30 + $0x4f] sm:$0xff] }
  0x6d   : > { %2965 = vmatmul.msk.f32.vlgmr.msrb.gmra.mxu3 %vm3592_vm0, %v1304_v8 }
  0x71   : > { %1595 = vmatmul.f32.vlgmr.msrb.gmra.mxu0 %v3399_v58  ;;  %v246_v58 = vadd.s32 24, %v3579_v61 }
  0x73   : > { %984 = vmatmul.f32.gmra.mxu1 %v724_v18  ;;  %2933 = vmatmul.msk.f32.gmra.mxu2 %vm3615_vm1, %v1079_v20  ;;  %v300_v32 = vand.u32 15, %v246_v58  ;;  %v1311_v18 = vld [vmem:[%s3271_s30 + $0x57] sm:$0xff]  ;;  %v335_v20 = vand.u32 15, %v251_v13  ;;  %v3038_v58 = vld [vmem:[%s4587_s1 + $0x348] sm:$0xff] }
  0x74   : > { %2037 = vmatpush.msra.mxu2 %v3038_v58  ;;  %v256_v58 = vadd.s32 104, %v3579_v61 }
  0x75   : > { %1404 = vmatmul.f32.gmra.mxu3 %v1305_v22  ;;  %vm3649_vm3 = vcmp.ne.s32.totalorder %v300_v32, 15  ;;  %vm3732_vm8 = vcmp.ne.s32.totalorder %v335_v20, 0 }
  0x79   : > { %1598 = vmatmul.f32.gmra.mxu0 %v3448_v10  ;;  %v3009_v10 = vld [vmem:[%s4587_s1 + $0x2e0] sm:$0xff] }
  0x7a   : > { %1808 = vmatpush.msra.mxu1 %v3009_v10 }
  0x7b   : > { %2902 = vmatmul.msk.f32.gmra.mxu1 %vm3628_vm2, %v1304_v8  ;;  %1181 = vmatmul.f32.gmra.mxu2 %v1080_v26  ;;  %v1312_v26 = vld [vmem:[%s3271_s30 + $0x5f] sm:$0xff] }
  0x7d   : > { %2966 = vmatmul.msk.f32.gmra.mxu3 %vm3628_vm2, %v1306_v27 }
  0x81   : > { %1601 = vmatmul.f32.gmra.mxu0 %v3497_v28  ;;  %v248_v28 = vadd.s32 40, %v3579_v61 }
  0x83   : > { %990 = vmatmul.f32.gmra.mxu1 %v1305_v22  ;;  %2934 = vmatmul.msk.f32.gmra.mxu2 %vm3649_vm3, %v1081_v37  ;;  %v314_v51 = vand.u32 15, %v248_v28  ;;  %v3086_v28 = vld [vmem:[%s4587_s1 + $0x448] sm:$0xff] }
  0x84   : > { %2457 = vmatpush.msra.mxu0 %v3086_v28 }
  0x85   : > { %1410 = vmatmul.f32.gmra.mxu3 %v1307_v39  ;;  %vm3683_vm5 = vcmp.ne.s32.totalorder %v314_v51, 15 }
  0x89   : > { %1604 = vmatmul.f32.gmra.mxu0 %v3543_v45  ;;  %v3008_v45 = vld [vmem:[%s4587_s1 + $0x2d8] sm:$0xff] }
  0x8a   : > { %1809 = vmatpush.msra.mxu1 %v3008_v45  ;;  %v1088_v45 = vld [vmem:[%s3271_s30 + $0x61] sm:$0xff] }
  0x8b   : > { %2903 = vmatmul.msk.f32.gmra.mxu1 %vm3662_vm4, %v1306_v27  ;;  %1187 = vmatmul.f32.gmra.mxu2 %v1082_v43  ;;  %v349_v43 = vand.u32 15, %v253_v40 }
  0x8d   : > { %2967 = vmatmul.msk.f32.gmra.mxu3 %vm3662_vm4, %v1308_v44  ;;  %vm3782_vm10 = vcmp.ne.s32.totalorder %v349_v43, 0 }
  0x91   : > { %1607 = vmatmul.f32.gmra.mxu0 %v3571_v57  ;;  %v250_v57 = vadd.s32 56, %v3579_v61 }
  0x93   : > { %996 = vmatmul.f32.gmra.mxu1 %v1307_v39  ;;  %2935 = vmatmul.msk.f32.gmra.mxu2 %vm3683_vm5, %v1083_v54  ;;  %v328_v8 = vand.u32 15, %v250_v57  ;;  %v1087_v39 = vld [vmem:[%s3271_s30 + $0x59] sm:$0xff]  ;;  %v254_v54 = vadd.s32 88, %v3579_v61 }
  0x94   : > { %v3005_v57 = vld [vmem:[%s4587_s1 + $0x2c0] sm:$0xff] }
  0x95   : > { %1416 = vmatmul.f32.gmra.mxu3 %v1309_v56  ;;  %vm3717_vm7 = vcmp.ne.s32.totalorder %v328_v8, 15  ;;  %v356_v0 = vand.u32 15, %v254_v54  ;;  %v1091_v54 = vld [vmem:[%s3271_s30 + $0x79] sm:$0xff] }
  0x96   : > { %v1963_v8 = vld [vmem:[%s3271_s30 + $0x97] sm:$0xff] }
  0x97   : > { %vm3811_vm11 = vcmp.ne.s32.totalorder %v356_v0, 15 }
  0x99   : > { %1610 = vmatmul.f32.gmra.mxu0 %v3590_v3  ;;  %v3007_v3 = vld [vmem:[%s4587_s1 + $0x2d0] sm:$0xff] }
  0x9a   : > { %1810 = vmatpush.msra.mxu1 %v3007_v3  ;;  %v255_v3 = vadd.s32 96, %v3579_v61 }
  0x9b   : > { %2904 = vmatmul.msk.f32.gmra.mxu1 %vm3696_vm6, %v1308_v44  ;;  %1193 = vmatmul.f32.gmra.mxu2 %v1084_v5 }
  0x9c   : > { %1811 = vmatpush.msra.mxu1 %v3006_v33  ;;  %v363_v13 = vand.u32 15, %v255_v3  ;;  %v370_v33 = vand.u32 15, %v256_v58  ;;  %v3035_v58 = vld [vmem:[%s4587_s1 + $0x330] sm:$0xff] }
  0x9d   : > { %2968 = vmatmul.msk.f32.gmra.mxu3 %vm3696_vm6, %v1310_v6 }
  0x9e   : > { %1812 = vmatpush.msra.mxu1 %v3005_v57  ;;  %vm3832_vm12 = vcmp.ne.s32.totalorder %v363_v13, 0  ;;  %vm3861_vm13 = vcmp.ne.s32.totalorder %v370_v33, 15  ;;  %v1092_v13 = vld [vmem:[%s3271_s30 + $0x81] sm:$0xff] }
  0xa1   : > { %1613 = vmatmul.f32.gmra.mxu0 %v3277_v16  ;;  %v252_v16 = vadd.s32 72, %v3579_v61 }
  0xa3   : > { %1002 = vmatmul.f32.gmra.mxu1 %v1309_v56  ;;  %2936 = vmatmul.msk.f32.gmra.mxu2 %vm3717_vm7, %v1085_v12  ;;  %v342_v27 = vand.u32 15, %v252_v16  ;;  %v3037_v56 = vld [vmem:[%s4587_s1 + $0x340] sm:$0xff]  ;;  %v1315_v12 = vld [vmem:[%s3271_s30 + $0x77] sm:$0xff] }
  0xa4   : > { %2038 = vmatpush.msra.mxu2 %v3037_v56  ;;  %v1317_v56 = vld [vmem:[%s3271_s30 + $0x87] sm:$0xff] }
  0xa5   : > { %1422 = vmatmul.f32.gmra.mxu3 %v1311_v18  ;;  %vm3761_vm9 = vcmp.ne.s32.totalorder %v342_v27, 15  ;;  %v1316_v27 = vld [vmem:[%s3271_s30 + $0x7f] sm:$0xff] }
  0xa8   : > { %v3730_v22 = vpop.f32.mrf.mxu1 }
  0xa9   : > { %1616 = vmatmul.f32.gmra.mxu0 %v3317_v30  ;;  %v3070_v30 = vld [vmem:[%s4587_s1 + $0x3c8] sm:$0xff] }
  0xaa   : > { %2231 = vmatpush.msra.mxu3 %v3070_v30  ;;  %v3036_v30 = vld [vmem:[%s4587_s1 + $0x338] sm:$0xff] }
  0xab   : > { %2905 = vmatmul.msk.f32.gmra.mxu1 %vm3732_vm8, %v1310_v6  ;;  %1199 = vmatmul.f32.gmra.mxu2 %v1086_v24 }
  0xac   : > { %2039 = vmatpush.msra.mxu2 %v3036_v30 }
  0xad   : > { %2969 = vmatmul.msk.f32.gmra.mxu3 %vm3732_vm8, %v1312_v26 }
  0xae   : > { %v3750_v29 = vpop.f32.mrf.mxu2  ;;  %v3752_v32 = vpop.f32.mrf.mxu0  ;;  %2040 = vmatpush.msra.mxu2 %v3035_v58  ;;  %v3083_v58 = vld [vmem:[%s4587_s1 + $0x430] sm:$0xff] }
  0xb0   : > { %v3757_v10 = vpop.f32.mrf.mxu1  ;;  %v3759_v37 = vpop.f32.mrf.mxu3 }
  0xb1   : > { %1619 = vmatmul.f32.gmra.mxu0 %v3363_v46 }
  0xb3   : > { %1008 = vmatmul.f32.gmra.mxu1 %v1311_v18  ;;  %2937 = vmatmul.msk.f32.gmra.mxu2 %vm3761_vm9, %v1087_v39  ;;  %v3085_v18 = vld [vmem:[%s4587_s1 + $0x440] sm:$0xff] }
  0xb4   : > { %2458 = vmatpush.msra.mxu0 %v3085_v18  ;;  %v258_v18 = vadd.s32 120, %v3579_v61 }
  0xb5   : > { %1428 = vmatmul.f32.gmra.mxu3 %v1313_v41 }
  0xb6   : > { %v3774_v44 = vpop.f32.mrf.mxu2  ;;  %v3776_v48 = vpop.f32.mrf.mxu0  ;;  %v384_v30 = vand.u32 15, %v258_v18 }
  0xb8   : > { %v3778_v51 = vpop.f32.mrf.mxu1  ;;  %v3780_v46 = vpop.f32.mrf.mxu3  ;;  %vm3911_vm15 = vcmp.ne.s32.totalorder %v384_v30, 15 }
  0xb9   : > { %1622 = vmatmul.f32.gmra.mxu0 %v3411_v62  ;;  %v3069_v62 = vld [vmem:[%s4587_s1 + $0x3c0] sm:$0xff] }
  0xba   : > { %2232 = vmatpush.msra.mxu3 %v3069_v62  ;;  %v3084_v62 = vld [vmem:[%s4587_s1 + $0x438] sm:$0xff] }
  0xbb   : > { %2906 = vmatmul.msk.f32.gmra.mxu1 %vm3782_vm10, %v1312_v26  ;;  %1205 = vmatmul.f32.gmra.mxu2 %v1088_v45  ;;  %v1090_v26 = vld [vmem:[%s3271_s30 + $0x71] sm:$0xff]  ;;  %v4658_v45 = vmov 0 }
  0xbc   : > { %v4659_v45 = vsel %vm3861_vm13, 4294967295, %v4658_v45  ;;  %2459 = vmatpush.msra.mxu0 %v3084_v62  ;;  %v259_v62 = vadd.s32 128, %v3579_v61 }
  0xbd   : > { %2970 = vmatmul.msk.f32.gmra.mxu3 %vm3782_vm10, %v1314_v55  ;;  %4660 = vst [vmem:[#allocation2_spill] sm:$0xff] %v4659_v45 }
  0xbe   : > { %v3800_v1 = vpop.f32.mrf.mxu2  ;;  %v3802_v5 = vpop.f32.mrf.mxu0  ;;  %v391_v18 = vand.u32 15, %v259_v62  ;;  %2460 = vmatpush.msra.mxu0 %v3083_v58  ;;  %v1320_v62 = vld [vmem:[%s3271_s30 + $0x9f] sm:$0xff]  ;;  %v3034_v58 = vld [vmem:[%s4587_s1 + $0x328] sm:$0xff] }
  0xbf   : > { %2041 = vmatpush.msra.mxu2 %v3034_v58 }
  0xc0   : > { %v3807_v6 = vpop.f32.mrf.mxu1  ;;  %v3809_v7 = vpop.f32.mrf.mxu3 }
  0xc1   : > { %1625 = vmatmul.f32.gmra.mxu0 %v3460_v14 }
  0xc3   : > { %1014 = vmatmul.f32.gmra.mxu1 %v1313_v41  ;;  %2938 = vmatmul.msk.f32.gmra.mxu2 %vm3811_vm11, %v1089_v9  ;;  %v3004_v41 = vld [vmem:[%s4587_s1 + $0x2b8] sm:$0xff] }
  0xc4   : > { %1813 = vmatpush.msra.mxu1 %v3004_v41 }
  0xc5   : > { %1434 = vmatmul.f32.gmra.mxu3 %v1315_v12 }
  0xc6   : > { %v3824_v20 = vpop.f32.mrf.mxu2  ;;  %v3826_v21 = vpop.f32.mrf.mxu0 }
  0xc8   : > { %v3828_v24 = vpop.f32.mrf.mxu1  ;;  %v3830_v14 = vpop.f32.mrf.mxu3 }
  0xc9   : > { %1628 = vmatmul.f32.gmra.mxu0 %v3509_v34  ;;  %v3068_v34 = vld [vmem:[%s4587_s1 + $0x3b8] sm:$0xff] }
  0xca   : > { %2233 = vmatpush.msra.mxu3 %v3068_v34 }
  0xcb   : > { %2907 = vmatmul.msk.f32.gmra.mxu1 %vm3832_vm12, %v1314_v55  ;;  %1211 = vmatmul.f32.gmra.mxu2 %v1090_v26  ;;  %v257_v55 = vadd.s32 112, %v3579_v61  ;;  %v1318_v26 = vld [vmem:[%s3271_s30 + $0x8f] sm:$0xff] }
  0xcd   : > { %2971 = vmatmul.msk.f32.gmra.mxu3 %vm3832_vm12, %v1316_v27  ;;  %v377_v0 = vand.u32 15, %v257_v55  ;;  %v4666_v55 = vmov 0 }
  0xce   : > { %v3850_v39 = vpop.f32.mrf.mxu2  ;;  %v3852_v40 = vpop.f32.mrf.mxu0  ;;  %v4667_v55 = vsel %vm3911_vm15, 4294967295, %v4666_v55 }
  0xcf   : > { %vm3882_vm14 = vcmp.ne.s32.totalorder %v377_v0, 0  ;;  %4668 = vst [vmem:[#allocation6_spill] sm:$0xff] %v4667_v55  ;;  %v1093_v0 = vld [vmem:[%s3271_s30 + $0x89] sm:$0xff] }
  0xd0   : > { %v3857_v43 = vpop.f32.mrf.mxu1  ;;  %v3859_v28 = vpop.f32.mrf.mxu3 }
  0xd1   : > { %1631 = vmatmul.f32.gmra.mxu0 %v3549_v49 }
  0xd3   : > { %1020 = vmatmul.f32.gmra.mxu1 %v1315_v12  ;;  %2939 = vmatmul.msk.f32.gmra.mxu2 %vm3861_vm13, %v1091_v54  ;;  %v4662_v12 = vmov 0 }
  0xd4   : > { %v4663_v12 = vsel %vm3882_vm14, 4294967295, %v4662_v12 }
  0xd5   : > { %1440 = vmatmul.f32.gmra.mxu3 %v1317_v56  ;;  %4664 = vst [vmem:[#allocation4_spill] sm:$0xff] %v4663_v12  ;;  %v3002_v12 = vld [vmem:[%s4587_s1 + $0x2a8] sm:$0xff] }
  0xd6   : > { %v3874_v57 = vpop.f32.mrf.mxu2  ;;  %v3876_v9 = vpop.f32.mrf.mxu0 }
  0xd8   : > { %v3878_v3 = vpop.f32.mrf.mxu1  ;;  %v3880_v49 = vpop.f32.mrf.mxu3 }
  0xd9   : > { %4661 = vst [vmem:[#allocation3_spill] sm:$0xff] %v3880_v49  ;;  %1634 = vmatmul.f32.gmra.mxu0 %v3574_v59  ;;  %v3067_v59 = vld [vmem:[%s4587_s1 + $0x3b0] sm:$0xff] }
  0xda   : > { %2234 = vmatpush.msra.mxu3 %v3067_v59 }
  0xdb   : > { %2908 = vmatmul.msk.f32.gmra.mxu1 %vm3882_vm14, %v1316_v27  ;;  %1217 = vmatmul.f32.gmra.mxu2 %v1092_v13  ;;  %v3003_v27 = vld [vmem:[%s4587_s1 + $0x2b0] sm:$0xff] }
  0xdc   : > { %1814 = vmatpush.msra.mxu1 %v3003_v27  ;;  %v1319_v13 = vld [vmem:[%s3271_s30 + $0x97] sm:$0xff] }
  0xdd   : > { %2972 = vmatmul.msk.f32.gmra.mxu3 %vm3882_vm14, %v1318_v26  ;;  %vm3930_vm14 = vcmp.ne.s32.totalorder %v391_v18, 0 }
  0xde   : > { %v3900_v33 = vpop.f32.mrf.mxu2  ;;  %v3902_v34 = vpop.f32.mrf.mxu0  ;;  %1815 = vmatpush.msra.mxu1 %v3002_v12  ;;  %v3082_v12 = vld [vmem:[%s4587_s1 + $0x428] sm:$0xff] }
  0xdf   : > { %2461 = vmatpush.msra.mxu0 %v3082_v12 }
  0xe0   : > { %v3907_v41 = vpop.f32.mrf.mxu1  ;;  %v3909_v54 = vpop.f32.mrf.mxu3 }
  0xe1   : > { %4665 = vst [vmem:[#allocation5_spill] sm:$0xff] %v3909_v54  ;;  %1637 = vmatmul.f32.gmra.mxu0 %v3280_v17  ;;  %v4670_v54 = vmov 0 }
  0xe2   : > { %v4671_v54 = vsel %vm3930_vm14, 4294967295, %v4670_v54 }
  0xe3   : > { %1026 = vmatmul.f32.gmra.mxu1 %v1317_v56  ;;  %2940 = vmatmul.msk.f32.gmra.mxu2 %vm3911_vm15, %v1093_v0  ;;  %4672 = vst [vmem:[#allocation8_spill] sm:$0xff] %v4671_v54  ;;  %v1094_v56 = vld [vmem:[%s3271_s30 + $0x91] sm:$0xff]  ;;  %v260_v0 = vadd.s32 136, %v3579_v61  ;;  %v261_v54 = vadd.s32 144, %v3579_v61 }
  0xe5   : > { %1446 = vmatmul.f32.gmra.mxu3 %v1319_v13 }
  0xe6   : > { %v3924_v30 = vpop.f32.mrf.mxu2  ;;  %v3926_v59 = vpop.f32.mrf.mxu0 }
  0xe8   : > { %v3928_v27 = vpop.f32.mrf.mxu3  ;;  %v982_v17 = vpop.f32.mrf.mxu1 }
  0xe9   : > { %4669 = vst [vmem:[#allocation7_spill] sm:$0xff] %v3928_v27  ;;  %1640 = vmatmul.f32.gmra.mxu0 %v3320_v31  ;;  %v398_v27 = vand.u32 15, %v260_v0  ;;  %v983_v18 = vadd.f32 %v982_v17, %v3752_v32  ;;  %v3066_v31 = vld [vmem:[%s4587_s1 + $0x3a8] sm:$0xff]  ;;  %v4673_v32 = vmov 0  ;;  %v1095_v17 = vld [vmem:[%s3271_s30 + $0x99] sm:$0xff] }
  0xea   : > { %2235 = vmatpush.msra.mxu3 %v3066_v31  ;;  %v1321_v31 = vld [vmem:[%s3271_s30 + $0xa7] sm:$0xff] }
  0xeb   : > { %2909 = vmatmul.msk.f32.gmra.mxu1 %vm3930_vm14, %v1318_v26  ;;  %1223 = vmatmul.f32.gmra.mxu2 %v1094_v56  ;;  %vm3952_vm15 = vcmp.ne.s32.totalorder %v398_v27, 15  ;;  %v405_v27 = vand.u32 15, %v261_v54  ;;  %v262_v54 = vadd.s32 152, %v3579_v61 }
  0xec   : > { %v4674_v32 = vsel %vm3952_vm15, 4294967295, %v4673_v32 }
  0xed   : > { %2973 = vmatmul.msk.f32.gmra.mxu3 %vm3930_vm14, %v1320_v62  ;;  %vm3968_vm14 = vcmp.ne.s32.totalorder %v405_v27, 0  ;;  %v3033_v27 = vld [vmem:[%s4587_s1 + $0x320] sm:$0xff] }
  0xee   : > { %v1176_v55 = vpop.f32.mrf.mxu2  ;;  %v1596_v26 = vpop.f32.mrf.mxu0  ;;  %2042 = vmatpush.msra.mxu2 %v3033_v27  ;;  %v1323_v27 = vld [vmem:[%s3271_s30 + $0xb7] sm:$0xff] }
  0xef   : > { %v1272_v56 = vadd.f32 %v1176_v55, %v983_v18 }
  0xf0   : > { %v985_v0 = vpop.f32.mrf.mxu1  ;;  %v1402_v58 = vpop.f32.mrf.mxu3 }
  0xf1   : > { %v1498_v49 = vadd.f32 %v1402_v58, %v1272_v56  ;;  %1643 = vmatmul.f32.gmra.mxu0 %v3366_v47  ;;  %v986_v18 = vadd.f32 %v985_v0, %v3776_v48  ;;  %v1322_v48 = vld [vmem:[%s3271_s30 + $0xaf] sm:$0xff] }
  0xf3   : > { %v3960_v55 = vadd.f32 %v1596_v26, %v1498_v49  ;;  %1032 = vmatmul.f32.gmra.mxu1 %v1319_v13  ;;  %2941 = vmatmul.msk.f32.gmra.mxu2 %vm3952_vm15, %v1095_v17  ;;  %v4675_v13 = vmov 0  ;;  %v1096_v26 = vld [vmem:[%s3271_s30 + $0xa1] sm:$0xff] }
  0xf4   : > { %v4676_v13 = vsel %vm3968_vm14, 4294967295, %v4675_v13 }
  0xf5   : > { %1452 = vmatmul.f32.gmra.mxu3 %v1321_v31 }
  0xf6   : > { %v1179_v56 = vpop.f32.mrf.mxu2  ;;  %v1599_v58 = vpop.f32.mrf.mxu0 }
  0xf7   : > { %v1273_v47 = vadd.f32 %v1179_v56, %v986_v18  ;;  %v412_v18 = vand.u32 15, %v262_v54  ;;  %v263_v54 = vadd.s32 160, %v3579_v61 }
  0xf8   : > { %v988_v45 = vpop.f32.mrf.mxu1  ;;  %v1405_v49 = vpop.f32.mrf.mxu3 }
  0xf9   : > { %v1499_v17 = vadd.f32 %v1405_v49, %v1273_v47  ;;  %1646 = vmatmul.f32.gmra.mxu0 %v3414_v63  ;;  %v989_v12 = vadd.f32 %v988_v45, %v3802_v5  ;;  %v3065_v63 = vld [vmem:[%s4587_s1 + $0x3a0] sm:$0xff]  ;;  %vm3992_vm15 = vcmp.ne.s32.totalorder %v412_v18, 15  ;;  %v4677_v5 = vmov 0  ;;  %v1097_v45 = vld [vmem:[%s3271_s30 + $0xa9] sm:$0xff] }
  0xfa   : > { %2236 = vmatpush.msra.mxu3 %v3065_v63  ;;  %v3001_v47 = vld [vmem:[%s4587_s1 + $0x2a0] sm:$0xff]  ;;  %v4678_v5 = vsel %vm3992_vm15, 4294967295, %v4677_v5  ;;  %v419_v18 = vand.u32 15, %v263_v54  ;;  %v264_v54 = vadd.s32 168, %v3579_v61 }
  0xfb   : > { %v3976_v0 = vadd.f32 %v1599_v58, %v1499_v17  ;;  %2910 = vmatmul.msk.f32.gmra.mxu1 %vm3968_vm14, %v1320_v62  ;;  %1229 = vmatmul.f32.gmra.mxu2 %v1096_v26 }
  0xfc   : > { %1816 = vmatpush.msra.mxu1 %v3001_v47 }
  0xfd   : > { %2974 = vmatmul.msk.f32.gmra.mxu3 %vm3968_vm14, %v1322_v48  ;;  %vm4008_vm14 = vcmp.ne.s32.totalorder %v419_v18, 0  ;;  %v3032_v18 = vld [vmem:[%s4587_s1 + $0x318] sm:$0xff] }
  0xfe   : > { %v1182_v56 = vpop.f32.mrf.mxu2  ;;  %v1602_v62 = vpop.f32.mrf.mxu0  ;;  %2043 = vmatpush.msra.mxu2 %v3032_v18  ;;  %v1325_v18 = vld [vmem:[%s3271_s30 + $0xc7] sm:$0xff] }
  0xff   : > { %v1274_v58 = vadd.f32 %v1182_v56, %v989_v12  ;;  %v3081_v56 = vld [vmem:[%s4587_s1 + $0x420] sm:$0xff] }
 0x100   : > { %v991_v49 = vpop.f32.mrf.mxu1  ;;  %v1408_v26 = vpop.f32.mrf.mxu3  ;;  %2462 = vmatpush.msra.mxu0 %v3081_v56 }
 0x101   : > { %v1500_v17 = vadd.f32 %v1408_v26, %v1274_v58  ;;  %1649 = vmatmul.f32.gmra.mxu0 %v3463_v15  ;;  %v992_v63 = vadd.f32 %v991_v49, %v3826_v21  ;;  %v1324_v21 = vld [vmem:[%s3271_s30 + $0xbf] sm:$0xff] }
 0x103   : > { %v4000_v12 = vadd.f32 %v1602_v62, %v1500_v17  ;;  %1038 = vmatmul.f32.gmra.mxu1 %v1321_v31  ;;  %2942 = vmatmul.msk.f32.gmra.mxu2 %vm3992_vm15, %v1097_v45  ;;  %v4679_v31 = vmov 0  ;;  %v1098_v45 = vld [vmem:[%s3271_s30 + $0xb1] sm:$0xff] }
 0x104   : > { %v4680_v31 = vsel %vm4008_vm14, 4294967295, %v4679_v31 }
 0x105   : > { %1458 = vmatmul.f32.gmra.mxu3 %v1323_v27 }
 0x106   : > { %v1185_v58 = vpop.f32.mrf.mxu2  ;;  %v1605_v47 = vpop.f32.mrf.mxu0 }
 0x107   : > { %v1275_v15 = vadd.f32 %v1185_v58, %v992_v63  ;;  %v426_v63 = vand.u32 15, %v264_v54  ;;  %v265_v54 = vadd.s32 176, %v3579_v61 }
 0x108   : > { %v994_v26 = vpop.f32.mrf.mxu1  ;;  %v1411_v62 = vpop.f32.mrf.mxu3 }
 0x109   : > { %v1501_v17 = vadd.f32 %v1411_v62, %v1275_v15  ;;  %1652 = vmatmul.f32.gmra.mxu0 %v3512_v35  ;;  %v995_v56 = vadd.f32 %v994_v26, %v3852_v40  ;;  %v3064_v35 = vld [vmem:[%s4587_s1 + $0x398] sm:$0xff]  ;;  %vm4032_vm15 = vcmp.ne.s32.totalorder %v426_v63, 15  ;;  %v4681_v40 = vmov 0 }
 0x10a   : > { %2237 = vmatpush.msra.mxu3 %v3064_v35  ;;  %v3000_v15 = vld [vmem:[%s4587_s1 + $0x298] sm:$0xff]  ;;  %v4682_v40 = vsel %vm4032_vm15, 4294967295, %v4681_v40  ;;  %v433_v63 = vand.u32 15, %v265_v54  ;;  %v266_v54 = vadd.s32 184, %v3579_v61 }
 0x10b   : > { %v4016_v49 = vadd.f32 %v1605_v47, %v1501_v17  ;;  %2911 = vmatmul.msk.f32.gmra.mxu1 %vm4008_vm14, %v1322_v48  ;;  %1235 = vmatmul.f32.gmra.mxu2 %v1098_v45  ;;  %v1099_v26 = vld [vmem:[%s3271_s30 + $0xb9] sm:$0xff] }
 0x10c   : > { %1817 = vmatpush.msra.mxu1 %v3000_v15 }
 0x10d   : > { %2975 = vmatmul.msk.f32.gmra.mxu3 %vm4008_vm14, %v1324_v21  ;;  %vm4048_vm14 = vcmp.ne.s32.totalorder %v433_v63, 0  ;;  %v3031_v63 = vld [vmem:[%s4587_s1 + $0x310] sm:$0xff] }
 0x10e   : > { %v1188_v58 = vpop.f32.mrf.mxu2  ;;  %v1608_v48 = vpop.f32.mrf.mxu0  ;;  %2044 = vmatpush.msra.mxu2 %v3031_v63 }
 0x10f   : > { %v1276_v47 = vadd.f32 %v1188_v58, %v995_v56  ;;  %v3080_v58 = vld [vmem:[%s4587_s1 + $0x418] sm:$0xff] }
 0x110   : > { %v997_v62 = vpop.f32.mrf.mxu1  ;;  %v1414_v45 = vpop.f32.mrf.mxu3  ;;  %2463 = vmatpush.msra.mxu0 %v3080_v58 }
 0x111   : > { %v1502_v17 = vadd.f32 %v1414_v45, %v1276_v47  ;;  %1655 = vmatmul.f32.gmra.mxu0 %v3552_v50  ;;  %v998_v35 = vadd.f32 %v997_v62, %v3876_v9  ;;  %v1326_v62 = vld [vmem:[%s3271_s30 + $0xcf] sm:$0xff] }
 0x113   : > { %v4040_v56 = vadd.f32 %v1608_v48, %v1502_v17  ;;  %1044 = vmatmul.f32.gmra.mxu1 %v1323_v27  ;;  %2943 = vmatmul.msk.f32.gmra.mxu2 %vm4032_vm15, %v1099_v26  ;;  %v4683_v27 = vmov 0  ;;  %v1100_v26 = vld [vmem:[%s3271_s30 + $0xc1] sm:$0xff] }
 0x114   : > { %v4684_v27 = vsel %vm4048_vm14, 4294967295, %v4683_v27 }
 0x115   : > { %1464 = vmatmul.f32.gmra.mxu3 %v1325_v18  ;;  %4685 = vst [vmem:[#allocation9_spill] sm:$0xff] %v4684_v27  ;;  %v1327_v27 = vld [vmem:[%s3271_s30 + $0xd7] sm:$0xff] }
 0x116   : > { %v1191_v47 = vpop.f32.mrf.mxu2  ;;  %v1611_v15 = vpop.f32.mrf.mxu0 }
 0x117   : > { %v1277_v50 = vadd.f32 %v1191_v47, %v998_v35  ;;  %v440_v35 = vand.u32 15, %v266_v54 }
 0x118   : > { %v1000_v45 = vpop.f32.mrf.mxu1  ;;  %v1417_v48 = vpop.f32.mrf.mxu3 }
 0x119   : > { %v1503_v9 = vadd.f32 %v1417_v48, %v1277_v50  ;;  %1658 = vmatmul.f32.gmra.mxu0 %v3577_v60  ;;  %v1001_v58 = vadd.f32 %v1000_v45, %v3902_v34  ;;  %v3063_v60 = vld [vmem:[%s4587_s1 + $0x390] sm:$0xff]  ;;  %vm4073_vm15 = vcmp.ne.s32.totalorder %v440_v35, 15  ;;  %v4686_v34 = vmov 0 }
 0x11a   : > { %2238 = vmatpush.msra.mxu3 %v3063_v60  ;;  %v2999_v48 = vld [vmem:[%s4587_s1 + $0x290] sm:$0xff]  ;;  %v4687_v34 = vsel %vm4073_vm15, 4294967295, %v4686_v34 }
 0x11b   : > { %v4056_v17 = vadd.f32 %v1611_v15, %v1503_v9  ;;  %2912 = vmatmul.msk.f32.gmra.mxu1 %vm4048_vm14, %v1324_v21  ;;  %1241 = vmatmul.f32.gmra.mxu2 %v1100_v26  ;;  %v1552_v15 = vld [vmem:[%s3271_s30 + $0xd0] sm:$0xff]  ;;  %4688 = vst [vmem:[#allocation10_spill] sm:$0xff] %v4687_v34  ;;  %v267_v9 = vadd.s32 192, %v3579_v61 }
 0x11c   : > { %v1101_v45 = vld [vmem:[%s3271_s30 + $0xc9] sm:$0xff]  ;;  %1818 = vmatpush.msra.mxu1 %v2999_v48 }
 0x11d   : > { %2976 = vmatmul.msk.f32.gmra.mxu3 %vm4048_vm14, %v1326_v62  ;;  %v447_v60 = vand.u32 15, %v267_v9  ;;  %v1328_v9 = vld [vmem:[%s3271_s30 + $0xdf] sm:$0xff] }
 0x11e   : > { %v1194_v47 = vpop.f32.mrf.mxu2  ;;  %v1614_v21 = vpop.f32.mrf.mxu0 }
 0x11f   : > { %v1278_v50 = vadd.f32 %v1194_v47, %v1001_v58  ;;  %v3079_v47 = vld [vmem:[%s4587_s1 + $0x410] sm:$0xff]  ;;  %vm4089_vm14 = vcmp.ne.s32.totalorder %v447_v60, 0  ;;  %v3030_v60 = vld [vmem:[%s4587_s1 + $0x308] sm:$0xff] }
 0x120   : > { %v1003_v26 = vpop.f32.mrf.mxu1  ;;  %v1420_v54 = vpop.f32.mrf.mxu3  ;;  %2464 = vmatpush.msra.mxu0 %v3079_v47  ;;  %2045 = vmatpush.msra.mxu2 %v3030_v60 }
 0x121   : > { %v1504_v63 = vadd.f32 %v1420_v54, %v1278_v50  ;;  %1661 = vmatmul.f32.gmra.mxu0 %v1552_v15  ;;  %v1004_v35 = vadd.f32 %v1003_v26, %v3926_v59  ;;  %v1553_v15 = vld [vmem:[%s3271_s30 + $0xd8] sm:$0xff]  ;;  %v268_v59 = vadd.s32 200, %v3579_v61 }
 0x123   : > { %v4080_v58 = vadd.f32 %v1614_v21, %v1504_v63  ;;  %1050 = vmatmul.f32.gmra.mxu1 %v1325_v18  ;;  %2944 = vmatmul.msk.f32.gmra.mxu2 %vm4073_vm15, %v1101_v45  ;;  %v4689_v18 = vmov 0  ;;  %v1102_v45 = vld [vmem:[%s3271_s30 + $0xd1] sm:$0xff] }
 0x124   : > { %v4690_v18 = vsel %vm4089_vm14, 4294967295, %v4689_v18 }
 0x125   : > { %1470 = vmatmul.f32.gmra.mxu3 %v1327_v27  ;;  %4691 = vst [vmem:[#allocation11_spill] sm:$0xff] %v4690_v18  ;;  %v1329_v18 = vld [vmem:[%s3271_s30 + $0xe7] sm:$0xff] }
 0x126   : > { %v1197_v48 = vpop.f32.mrf.mxu2  ;;  %v1617_v50 = vpop.f32.mrf.mxu0 }
 0x127   : > { %v1279_v54 = vadd.f32 %v1197_v48, %v1004_v35  ;;  %v454_v35 = vand.u32 15, %v268_v59  ;;  %v3062_v48 = vld [vmem:[%s4587_s1 + $0x388] sm:$0xff] }
 0x128   : > { %v1006_v21 = vpop.f32.mrf.mxu1  ;;  %v1423_v63 = vpop.f32.mrf.mxu3  ;;  %2239 = vmatpush.msra.mxu3 %v3062_v48 }
 0x129   : > { %v1505_v26 = vadd.f32 %v1423_v63, %v1279_v54  ;;  %1664 = vmatmul.f32.gmra.mxu0 %v1553_v15  ;;  %v1007_v47 = vadd.f32 %v1006_v21, %v3730_v22  ;;  %v1554_v15 = vld [vmem:[%s3271_s30 + $0xe0] sm:$0xff]  ;;  %v2998_v63 = vld [vmem:[%s4587_s1 + $0x288] sm:$0xff]  ;;  %vm4113_vm15 = vcmp.ne.s32.totalorder %v454_v35, 15  ;;  %v4692_v22 = vmov 0 }
 0x12a   : > { %v4693_v22 = vsel %vm4113_vm15, 4294967295, %v4692_v22  ;;  %v1103_v21 = vld [vmem:[%s3271_s30 + $0xd9] sm:$0xff]  ;;  %1819 = vmatpush.msra.mxu1 %v2998_v63 }
 0x12b   : > { %v4096_v34 = vadd.f32 %v1617_v50, %v1505_v26  ;;  %2913 = vmatmul.msk.f32.gmra.mxu1 %vm4089_vm14, %v1326_v62  ;;  %1247 = vmatmul.f32.gmra.mxu2 %v1102_v45  ;;  %4694 = vst [vmem:[#allocation12_spill] sm:$0xff] %v4693_v22  ;;  %v269_v26 = vadd.s32 208, %v3579_v61 }
 0x12d   : > { %2977 = vmatmul.msk.f32.gmra.mxu3 %vm4089_vm14, %v1328_v9  ;;  %v461_v48 = vand.u32 15, %v269_v26  ;;  %v1330_v26 = vld [vmem:[%s3271_s30 + $0xef] sm:$0xff] }
 0x12e   : > { %v1200_v50 = vpop.f32.mrf.mxu2  ;;  %v1620_v62 = vpop.f32.mrf.mxu0 }
 0x12f   : > { %v1280_v54 = vadd.f32 %v1200_v50, %v1007_v47  ;;  %v3078_v50 = vld [vmem:[%s4587_s1 + $0x408] sm:$0xff]  ;;  %vm4129_vm14 = vcmp.ne.s32.totalorder %v461_v48, 0  ;;  %v3029_v48 = vld [vmem:[%s4587_s1 + $0x300] sm:$0xff] }
 0x130   : > { %v1009_v45 = vpop.f32.mrf.mxu1  ;;  %v1426_v59 = vpop.f32.mrf.mxu3  ;;  %2465 = vmatpush.msra.mxu0 %v3078_v50  ;;  %2046 = vmatpush.msra.mxu2 %v3029_v48 }
 0x131   : > { %v1506_v60 = vadd.f32 %v1426_v59, %v1280_v54  ;;  %1667 = vmatmul.f32.gmra.mxu0 %v1554_v15  ;;  %v1010_v35 = vadd.f32 %v1009_v45, %v3757_v10  ;;  %v1555_v15 = vld [vmem:[%s3271_s30 + $0xe8] sm:$0xff]  ;;  %v270_v10 = vadd.s32 216, %v3579_v61 }
 0x133   : > { %v4120_v47 = vadd.f32 %v1620_v62, %v1506_v60  ;;  %1056 = vmatmul.f32.gmra.mxu1 %v1327_v27  ;;  %2945 = vmatmul.msk.f32.gmra.mxu2 %vm4113_vm15, %v1103_v21  ;;  %v4695_v27 = vmov 0  ;;  %v1104_v21 = vld [vmem:[%s3271_s30 + $0xe1] sm:$0xff] }
 0x134   : > { %v4696_v27 = vsel %vm4129_vm14, 4294967295, %v4695_v27 }
 0x135   : > { %1476 = vmatmul.f32.gmra.mxu3 %v1329_v18  ;;  %4697 = vst [vmem:[#allocation13_spill] sm:$0xff] %v4696_v27  ;;  %v1331_v27 = vld [vmem:[%s3271_s30 + $0xf7] sm:$0xff] }
 0x136   : > { %v1203_v63 = vpop.f32.mrf.mxu2  ;;  %v1623_v54 = vpop.f32.mrf.mxu0 }
 0x137   : > { %v1281_v59 = vadd.f32 %v1203_v63, %v1010_v35  ;;  %v468_v35 = vand.u32 15, %v270_v10  ;;  %v3061_v63 = vld [vmem:[%s4587_s1 + $0x380] sm:$0xff] }
 0x138   : > { %v1012_v62 = vpop.f32.mrf.mxu1  ;;  %v1429_v60 = vpop.f32.mrf.mxu3  ;;  %2240 = vmatpush.msra.mxu3 %v3061_v63 }
 0x139   : > { %v1507_v45 = vadd.f32 %v1429_v60, %v1281_v59  ;;  %1670 = vmatmul.f32.gmra.mxu0 %v1555_v15  ;;  %v1013_v50 = vadd.f32 %v1012_v62, %v3778_v51  ;;  %v1556_v15 = vld [vmem:[%s3271_s30 + $0xf0] sm:$0xff]  ;;  %v2997_v60 = vld [vmem:[%s4587_s1 + $0x280] sm:$0xff]  ;;  %vm4153_vm15 = vcmp.ne.s32.totalorder %v468_v35, 15  ;;  %v4699_v51 = vmov 0 }
 0x13a   : > { %v4700_v51 = vsel %vm4153_vm15, 4294967295, %v4699_v51  ;;  %v1105_v62 = vld [vmem:[%s3271_s30 + $0xe9] sm:$0xff]  ;;  %1820 = vmatpush.msra.mxu1 %v2997_v60 }
 0x13b   : > { %v4136_v22 = vadd.f32 %v1623_v54, %v1507_v45  ;;  %2914 = vmatmul.msk.f32.gmra.mxu1 %vm4129_vm14, %v1328_v9  ;;  %1253 = vmatmul.f32.gmra.mxu2 %v1104_v21  ;;  %4701 = vst [vmem:[#allocation15_spill] sm:$0xff] %v4700_v51  ;;  %v271_v45 = vadd.s32 224, %v3579_v61 }
 0x13d   : > { %4698 = vst [vmem:[#allocation14_spill] sm:$0xff] %v4136_v22  ;;  %2978 = vmatmul.msk.f32.gmra.mxu3 %vm4129_vm14, %v1330_v26  ;;  %v475_v63 = vand.u32 15, %v271_v45  ;;  %v1332_v45 = vld [vmem:[%s3271_s30 + $0xff] sm:$0xff] }
 0x13e   : > { %v1206_v54 = vpop.f32.mrf.mxu2  ;;  %v1626_v9 = vpop.f32.mrf.mxu0 }
 0x13f   : > { %v1282_v59 = vadd.f32 %v1206_v54, %v1013_v50  ;;  %v3077_v54 = vld [vmem:[%s4587_s1 + $0x400] sm:$0xff]  ;;  %vm4169_vm14 = vcmp.ne.s32.totalorder %v475_v63, 0 }
 0x140   : > { %v1015_v21 = vpop.f32.mrf.mxu1  ;;  %v1432_v10 = vpop.f32.mrf.mxu3  ;;  %2466 = vmatpush.msra.mxu0 %v3077_v54 }
 0x141   : > { %v1508_v48 = vadd.f32 %v1432_v10, %v1282_v59  ;;  %1673 = vmatmul.f32.gmra.mxu0 %v1556_v15  ;;  %v1016_v35 = vadd.f32 %v1015_v21, %v3807_v6  ;;  %v1557_v15 = vld [vmem:[%s3271_s30 + $0xf8] sm:$0xff]  ;;  %v272_v6 = vadd.s32 232, %v3579_v61 }
 0x143   : > { %v4160_v50 = vadd.f32 %v1626_v9, %v1508_v48  ;;  %1062 = vmatmul.f32.gmra.mxu1 %v1329_v18  ;;  %2946 = vmatmul.msk.f32.gmra.mxu2 %vm4153_vm15, %v1105_v62  ;;  %v4703_v48 = vmov 0  ;;  %v1106_v62 = vld [vmem:[%s3271_s30 + $0xf1] sm:$0xff] }
 0x144   : > { %v4704_v48 = vsel %vm4169_vm14, 4294967295, %v4703_v48 }
 0x145   : > { %4702 = vst [vmem:[#allocation16_spill] sm:$0xff] %v4160_v50  ;;  %1482 = vmatmul.f32.gmra.mxu3 %v1331_v27  ;;  %v1558_v50 = vld [vmem:[%s3271_s30 + $0x100] sm:$0xff] }
 0x146   : > { %v1209_v60 = vpop.f32.mrf.mxu2  ;;  %v1629_v59 = vpop.f32.mrf.mxu0  ;;  %4705 = vst [vmem:[#allocation17_spill] sm:$0xff] %v4704_v48  ;;  %v1559_v48 = vld [vmem:[%s3271_s30 + $0x108] sm:$0xff] }
 0x147   : > { %v1283_v10 = vadd.f32 %v1209_v60, %v1016_v35  ;;  %v482_v35 = vand.u32 15, %v272_v6 }
 0x148   : > { %v1018_v9 = vpop.f32.mrf.mxu1  ;;  %v1435_v18 = vpop.f32.mrf.mxu3 }
 0x149   : > { %v1509_v21 = vadd.f32 %v1435_v18, %v1283_v10  ;;  %1676 = vmatmul.f32.gmra.mxu0 %v1557_v15  ;;  %v1019_v63 = vadd.f32 %v1018_v9, %v3828_v24  ;;  %vm4184_vm15 = vcmp.ne.s32.totalorder %v482_v35, 15  ;;  %v1333_v24 = vld [vmem:[%s3271_s30 + $0x107] sm:$0xff] }
 0x14b   : > { %v4176_v51 = vadd.f32 %v1629_v59, %v1509_v21  ;;  %2915 = vmatmul.msk.f32.gmra.mxu1 %vm4169_vm14, %v1330_v26  ;;  %1259 = vmatmul.f32.gmra.mxu2 %v1106_v62  ;;  %v4707_v59 = vmov 0  ;;  %v1107_v26 = vld [vmem:[%s3271_s30 + $0xf9] sm:$0xff]  ;;  %v273_v62 = vadd.s32 240, %v3579_v61 }
 0x14c   : > { %v4708_v59 = vsel %vm4184_vm15, 4294967295, %v4707_v59 }
 0x14d   : > { %4706 = vst [vmem:[#allocation18_spill] sm:$0xff] %v4176_v51  ;;  %2979 = vmatmul.msk.f32.gmra.mxu3 %vm4169_vm14, %v1332_v45  ;;  %v489_v21 = vand.u32 15, %v273_v62 }
 0x14e   : > { %v1212_v54 = vpop.f32.mrf.mxu2  ;;  %v1632_v60 = vpop.f32.mrf.mxu0 }
 0x14f   : > { %v1284_v10 = vadd.f32 %v1212_v54, %v1019_v63  ;;  %vm4197_vm14 = vcmp.ne.s32.totalorder %v489_v21, 0 }
 0x150   : > { %v1021_v18 = vpop.f32.mrf.mxu1  ;;  %v1438_v15 = vpop.f32.mrf.mxu3 }
 0x151   : > { %v1510_v6 = vadd.f32 %v1438_v15, %v1284_v10  ;;  %1679 = vmatmul.f32.gmra.mxu0 %v1558_v50  ;;  %v1022_v35 = vadd.f32 %v1021_v18, %v3857_v43 }
 0x153   : > { %v4191_v9 = vadd.f32 %v1632_v60, %v1510_v6  ;;  %1068 = vmatmul.f32.gmra.mxu1 %v1331_v27  ;;  %2947 = vmatmul.msk.f32.gmra.mxu2 %vm4184_vm15, %v1107_v26  ;;  %v1108_v27 = vld [vmem:[%s3271_s30 + $0x101] sm:$0xff]  ;;  %v274_v60 = vadd.s32 248, %v3579_v61  ;;  %v1334_v26 = vld [vmem:[%s3271_s30 + $0x10f] sm:$0xff] }
 0x154   : > { %v1560_v61 = vld [vmem:[%s3271_s30 + $0x110] sm:$0xff] }
 0x155   : > { %1488 = vmatmul.f32.gmra.mxu3 %v1333_v24  ;;  %v496_v18 = vand.u32 15, %v274_v60 }
 0x156   : > { %v1215_v63 = vpop.f32.mrf.mxu2  ;;  %v1635_v54 = vpop.f32.mrf.mxu0 }
 0x157   : > { %v1285_v51 = vadd.f32 %v1215_v63, %v1022_v35  ;;  %vm4212_vm15 = vcmp.ne.s32.totalorder %v496_v18, 15 }
 0x158   : > { %v1024_v22 = vpop.f32.mrf.mxu1  ;;  %v1441_v10 = vpop.f32.mrf.mxu3 }
 0x159   : > { %v1511_v15 = vadd.f32 %v1441_v10, %v1285_v51  ;;  %1682 = vmatmul.f32.gmra.mxu0 %v1559_v48  ;;  %v1025_v62 = vadd.f32 %v1024_v22, %v3878_v3  ;;  %v1335_v3 = vld [vmem:[%s3271_s30 + $0x117] sm:$0xff] }
 0x15b   : > { %v4204_v43 = vadd.f32 %v1635_v54, %v1511_v15  ;;  %2916 = vmatmul.msk.f32.gmra.mxu1 %vm4197_vm14, %v1332_v45  ;;  %1265 = vmatmul.f32.gmra.mxu2 %v1108_v27  ;;  %v1109_v45 = vld [vmem:[%s3271_s30 + $0x109] sm:$0xff]  ;;  %v1561_v15 = vld [vmem:[%s3271_s30 + $0x118] sm:$0xff] }
 0x15d   : > { %2980 = vmatmul.msk.f32.gmra.mxu3 %vm4197_vm14, %v1334_v26 }
 0x15e   : > { %v1218_v6 = vpop.f32.mrf.mxu2  ;;  %v1638_v21 = vpop.f32.mrf.mxu0 }
 0x15f   : > { %v1286_v51 = vadd.f32 %v1218_v6, %v1025_v62  ;;  %v1724_v6 = vld [vmem:[%s3271_s30 + $0x21] sm:$0xff] }
 0x160   : > { %v1027_v48 = vpop.f32.mrf.mxu1  ;;  %v1444_v35 = vpop.f32.mrf.mxu3 }
 0x161   : > { %v1512_v54 = vadd.f32 %v1444_v35, %v1286_v51  ;;  %1685 = vmatmul.f32.gmra.mxu0 %v1560_v61  ;;  %v1028_v10 = vadd.f32 %v1027_v48, %v3907_v41  ;;  %v1950_v61 = vld [vmem:[%s3271_s30 + $0x2f] sm:$0xff] }
 0x163   : > { %v4218_v22 = vadd.f32 %v1638_v21, %v1512_v54  ;;  %1074 = vmatmul.f32.gmra.mxu1 %v1333_v24  ;;  %2948 = vmatmul.msk.f32.gmra.mxu2 %vm4212_vm15, %v1109_v45  ;;  %v2176_v24 = vld [vmem:[%s3271_s30 + $0x30] sm:$0xff] }
 0x164   : > { %v2370_v45 = vld [vmem:[%s3271_s30 + $0x31] sm:$0xff] }
 0x165   : > { %1494 = vmatmul.f32.gmra.mxu3 %v1335_v3 }
 0x166   : > { %v1221_v27 = vpop.f32.mrf.mxu2  ;;  %v1641_v60 = vpop.f32.mrf.mxu0 }
 0x167   : > { %v1287_v26 = vadd.f32 %v1221_v27, %v1028_v10  ;;  %v1725_v27 = vld [vmem:[%s3271_s30 + $0x29] sm:$0xff] }
 0x168   : > { %v1030_v18 = vpop.f32.mrf.mxu1  ;;  %v1447_v62 = vpop.f32.mrf.mxu3 }
 0x169   : > { %v1513_v21 = vadd.f32 %v1447_v62, %v1287_v26  ;;  %1688 = vmatmul.f32.gmra.mxu0 %v1561_v15  ;;  %v1031_v41 = vadd.f32 %v1030_v18, %v3750_v29  ;;  %v1951_v15 = vld [vmem:[%s3271_s30 + $0x37] sm:$0xff] }
 0x16b   : > { %v4227_v51 = vadd.f32 %v1641_v60, %v1513_v21  ;;  %1821 = vmatmul.f32.vlgmr.msra.gmra.mxu1 %v1724_v6  ;;  %3045 = vmatmul.msk.f32.vlgmr.msra.gmra.mxu2 %vm3592_vm0, %v1950_v61  ;;  %v2177_v60 = vld [vmem:[%s3271_s30 + $0x38] sm:$0xff] }
 0x16c   : > { %v2371_v6 = vld [vmem:[%s3271_s30 + $0x39] sm:$0xff] }
 0x16d   : > { %2241 = vmatmul.f32.vlgmr.msra.gmra.mxu3 %v2176_v24 }
 0x16e   : > { %v1224_v48 = vpop.f32.mrf.mxu2  ;;  %v1644_v35 = vpop.f32.mrf.mxu0 }
 0x16f   : > { %v1288_v54 = vadd.f32 %v1224_v48, %v1031_v41  ;;  %v1952_v41 = vld [vmem:[%s3271_s30 + $0x3f] sm:$0xff] }
 0x170   : > { %v1033_v3 = vpop.f32.mrf.mxu1  ;;  %v1450_v10 = vpop.f32.mrf.mxu3 }
 0x171   : > { %v1514_v26 = vadd.f32 %v1450_v10, %v1288_v54  ;;  %2467 = vmatmul.f32.vlgmr.msra.gmra.mxu0 %v2370_v45  ;;  %v1034_v4 = vadd.f32 %v1033_v3, %v3774_v44 }
 0x173   : > { %v4236_v62 = vadd.f32 %v1644_v35, %v1514_v26  ;;  %3013 = vmatmul.msk.f32.gmra.mxu1 %vm3615_vm1, %v1725_v27  ;;  %2050 = vmatmul.f32.gmra.mxu2 %v1951_v15  ;;  %v2178_v35 = vld [vmem:[%s3271_s30 + $0x40] sm:$0xff] }
 0x174   : > { %v2372_v27 = vld [vmem:[%s3271_s30 + $0x41] sm:$0xff] }
 0x175   : > { %2244 = vmatmul.f32.gmra.mxu3 %v2177_v60 }
 0x176   : > { %v1227_v29 = vpop.f32.mrf.mxu2  ;;  %v1647_v18 = vpop.f32.mrf.mxu0 }
 0x177   : > { %v1289_v61 = vadd.f32 %v1227_v29, %v1034_v4  ;;  %v2179_v29 = vld [vmem:[%s3271_s30 + $0x48] sm:$0xff] }
 0x178   : > { %v1036_v21 = vpop.f32.mrf.mxu1  ;;  %v1453_v24 = vpop.f32.mrf.mxu3 }
 0x179   : > { %v1515_v48 = vadd.f32 %v1453_v24, %v1289_v61  ;;  %3093 = vmatmul.msk.f32.gmra.mxu0 %vm3615_vm1, %v2371_v6  ;;  %v1037_v44 = vadd.f32 %v1036_v21, %v3800_v1  ;;  %v2373_v61 = vld [vmem:[%s3271_s30 + $0x49] sm:$0xff] }
 0x17b   : > { %v4246_v54 = vadd.f32 %v1647_v18, %v1515_v48  ;;  %1827 = vmatmul.f32.gmra.mxu1 %v2370_v45  ;;  %3046 = vmatmul.msk.f32.gmra.mxu2 %vm3628_vm2, %v1952_v41  ;;  %v1954_v48 = vld [vmem:[%s3271_s30 + $0x4f] sm:$0xff] }
 0x17d   : > { %2247 = vmatmul.f32.gmra.mxu3 %v2178_v35 }
 0x17e   : > { %v1230_v3 = vpop.f32.mrf.mxu2  ;;  %v1650_v10 = vpop.f32.mrf.mxu0 }
 0x17f   : > { %v1290_v15 = vadd.f32 %v1230_v3, %v1037_v44  ;;  %v2180_v44 = vld [vmem:[%s3271_s30 + $0x50] sm:$0xff] }
 0x180   : > { %v1039_v26 = vpop.f32.mrf.mxu1  ;;  %v1456_v60 = vpop.f32.mrf.mxu3 }
 0x181   : > { %v1516_v4 = vadd.f32 %v1456_v60, %v1290_v15  ;;  %2473 = vmatmul.f32.gmra.mxu0 %v2372_v27  ;;  %v1040_v25 = vadd.f32 %v1039_v26, %v3824_v20  ;;  %v2374_v15 = vld [vmem:[%s3271_s30 + $0x51] sm:$0xff] }
 0x183   : > { %v4254_v45 = vadd.f32 %v1650_v10, %v1516_v4  ;;  %3014 = vmatmul.msk.f32.gmra.mxu1 %vm3649_vm3, %v2371_v6  ;;  %2056 = vmatmul.f32.gmra.mxu2 %v1953_v19 }
 0x185   : > { %2250 = vmatmul.f32.gmra.mxu3 %v2179_v29  ;;  %v2181_v29 = vld [vmem:[%s3271_s30 + $0x58] sm:$0xff] }
 0x186   : > { %v1233_v1 = vpop.f32.mrf.mxu2  ;;  %v1653_v18 = vpop.f32.mrf.mxu0 }
 0x187   : > { %v1291_v21 = vadd.f32 %v1233_v1, %v1040_v25  ;;  %v2375_v1 = vld [vmem:[%s3271_s30 + $0x59] sm:$0xff] }
 0x188   : > { %v1042_v24 = vpop.f32.mrf.mxu1  ;;  %v1459_v41 = vpop.f32.mrf.mxu3 }
 0x189   : > { %v1517_v35 = vadd.f32 %v1459_v41, %v1291_v21  ;;  %3094 = vmatmul.msk.f32.gmra.mxu0 %vm3649_vm3, %v2373_v61  ;;  %v1043_v20 = vadd.f32 %v1042_v24, %v3850_v39  ;;  %v1956_v41 = vld [vmem:[%s3271_s30 + $0x5f] sm:$0xff]  ;;  %vm4723_vm3 = vnez %v4674_v32 }
 0x18b   : > { %v4264_v6 = vadd.f32 %v1653_v18, %v1517_v35  ;;  %1833 = vmatmul.f32.gmra.mxu1 %v2372_v27  ;;  %3047 = vmatmul.msk.f32.gmra.mxu2 %vm3662_vm4, %v1954_v48  ;;  %v2182_v35 = vld [vmem:[%s3271_s30 + $0x60] sm:$0xff]  ;;  %vm4724_vm4 = vnez %v4676_v13 }
 0x18d   : > { %2253 = vmatmul.f32.gmra.mxu3 %v2180_v44 }
 0x18e   : > { %v1236_v3 = vpop.f32.mrf.mxu2  ;;  %v1656_v10 = vpop.f32.mrf.mxu0 }
 0x18f   : > { %v1292_v26 = vadd.f32 %v1236_v3, %v1043_v20  ;;  %v2376_v3 = vld [vmem:[%s3271_s30 + $0x61] sm:$0xff] }
 0x190   : > { %v1045_v60 = vpop.f32.mrf.mxu1  ;;  %v1462_v19 = vpop.f32.mrf.mxu3 }
 0x191   : > { %v1518_v4 = vadd.f32 %v1462_v19, %v1292_v26  ;;  %2479 = vmatmul.f32.gmra.mxu0 %v2374_v15  ;;  %v1046_v42 = vadd.f32 %v1045_v60, %v3874_v57 }
 0x193   : > { %v4272_v27 = vadd.f32 %v1656_v10, %v1518_v4  ;;  %3015 = vmatmul.msk.f32.gmra.mxu1 %vm3683_vm5, %v2373_v61  ;;  %2062 = vmatmul.f32.gmra.mxu2 %v1955_v36  ;;  %v2183_v36 = vld [vmem:[%s3271_s30 + $0x68] sm:$0xff] }
 0x195   : > { %2256 = vmatmul.f32.gmra.mxu3 %v2181_v29  ;;  %v2377_v29 = vld [vmem:[%s3271_s30 + $0x69] sm:$0xff] }
 0x196   : > { %v1239_v39 = vpop.f32.mrf.mxu2  ;;  %v1659_v25 = vpop.f32.mrf.mxu0 }
 0x197   : > { %v1293_v18 = vadd.f32 %v1239_v39, %v1046_v42 }
 0x198   : > { %v1048_v21 = vpop.f32.mrf.mxu1  ;;  %v1465_v24 = vpop.f32.mrf.mxu3 }
 0x199   : > { %v1519_v48 = vadd.f32 %v1465_v24, %v1293_v18  ;;  %3095 = vmatmul.msk.f32.gmra.mxu0 %vm3683_vm5, %v2375_v1  ;;  %v1049_v57 = vadd.f32 %v1048_v21, %v3900_v33  ;;  %v1958_v18 = vld [vmem:[%s3271_s30 + $0x6f] sm:$0xff]  ;;  %vm4725_vm5 = vnez %v4678_v5 }
 0x19a   : > { %v2184_v24 = vld [vmem:[%s3271_s30 + $0x70] sm:$0xff] }
 0x19b   : > { %v4282_v61 = vadd.f32 %v1659_v25, %v1519_v48  ;;  %1839 = vmatmul.f32.gmra.mxu1 %v2374_v15  ;;  %3048 = vmatmul.msk.f32.gmra.mxu2 %vm3696_vm6, %v1956_v41  ;;  %vm4726_vm6 = vnez %v4680_v31 }
 0x19d   : > { %2259 = vmatmul.f32.gmra.mxu3 %v2182_v35  ;;  %v2378_v35 = vld [vmem:[%s3271_s30 + $0x71] sm:$0xff] }
 0x19e   : > { %v1242_v44 = vpop.f32.mrf.mxu2  ;;  %v1662_v20 = vpop.f32.mrf.mxu0 }
 0x19f   : > { %v1294_v10 = vadd.f32 %v1242_v44, %v1049_v57 }
 0x1a0   : > { %v1051_v26 = vpop.f32.mrf.mxu1  ;;  %v1468_v60 = vpop.f32.mrf.mxu3 }
 0x1a1   : > { %v1520_v19 = vadd.f32 %v1468_v60, %v1294_v10  ;;  %2485 = vmatmul.f32.gmra.mxu0 %v2376_v3  ;;  %v1052_v2 = vadd.f32 %v1051_v26, %v3924_v30  ;;  %v2185_v26 = vld [vmem:[%s3271_s30 + $0x78] sm:$0xff] }
 0x1a3   : > { %v4290_v15 = vadd.f32 %v1662_v20, %v1520_v19  ;;  %3016 = vmatmul.msk.f32.gmra.mxu1 %vm3717_vm7, %v2375_v1  ;;  %2068 = vmatmul.f32.gmra.mxu2 %v1957_v53  ;;  %v2379_v53 = vld [vmem:[%s3271_s30 + $0x79] sm:$0xff] }
 0x1a5   : > { %2262 = vmatmul.f32.gmra.mxu3 %v2183_v36 }
 0x1a6   : > { %v1245_v33 = vpop.f32.mrf.mxu2  ;;  %v1665_v4 = vpop.f32.mrf.mxu0 }
 0x1a7   : > { %v1295_v42 = vadd.f32 %v1245_v33, %v1052_v2  ;;  %v1960_v33 = vld [vmem:[%s3271_s30 + $0x7f] sm:$0xff] }
 0x1a8   : > { %v1054_v39 = vpop.f32.mrf.mxu1  ;;  %v1471_v25 = vpop.f32.mrf.mxu3 }
 0x1a9   : > { %v1521_v21 = vadd.f32 %v1471_v25, %v1295_v42  ;;  %3096 = vmatmul.msk.f32.gmra.mxu0 %vm3717_vm7, %v2377_v29  ;;  %v1055_v30 = vadd.f32 %v1054_v39, %v3759_v37  ;;  %v2186_v42 = vld [vmem:[%s3271_s30 + $0x80] sm:$0xff]  ;;  %vm4727_vm7 = vnez %v4682_v40 }
 0x1ab   : > { %v4300_v1 = vadd.f32 %v1665_v4, %v1521_v21  ;;  %1845 = vmatmul.f32.gmra.mxu1 %v2376_v3  ;;  %3049 = vmatmul.msk.f32.gmra.mxu2 %vm3732_vm8, %v1958_v18  ;;  %v2380_v18 = vld [vmem:[%s3271_s30 + $0x81] sm:$0xff] }
 0x1ad   : > { %2265 = vmatmul.f32.gmra.mxu3 %v2184_v24 }
 0x1ae   : > { %v1248_v41 = vpop.f32.mrf.mxu2  ;;  %v1668_v48 = vpop.f32.mrf.mxu0 }
 0x1af   : > { %v1296_v57 = vadd.f32 %v1248_v41, %v1055_v30 }
 0x1b0   : > { %v1057_v44 = vpop.f32.mrf.mxu1  ;;  %v1474_v20 = vpop.f32.mrf.mxu3 }
 0x1b1   : > { %v1522_v10 = vadd.f32 %v1474_v20, %v1296_v57  ;;  %2491 = vmatmul.f32.gmra.mxu0 %v2378_v35  ;;  %v1058_v23 = vadd.f32 %v1057_v44, %v3780_v46  ;;  %v2381_v44 = vld [vmem:[%s3271_s30 + $0x89] sm:$0xff] }
 0x1b3   : > { %v4308_v3 = vadd.f32 %v1668_v48, %v1522_v10  ;;  %3017 = vmatmul.msk.f32.gmra.mxu1 %vm3761_vm9, %v2377_v29  ;;  %2074 = vmatmul.f32.gmra.mxu2 %v1959_v11  ;;  %v2187_v48 = vld [vmem:[%s3271_s30 + $0x88] sm:$0xff] }
 0x1b5   : > { %2268 = vmatmul.f32.gmra.mxu3 %v2185_v26  ;;  %v1962_v26 = vld [vmem:[%s3271_s30 + $0x8f] sm:$0xff] }
 0x1b6   : > { %v1251_v37 = vpop.f32.mrf.mxu2  ;;  %v1671_v60 = vpop.f32.mrf.mxu0 }
 0x1b7   : > { %v1297_v19 = vadd.f32 %v1251_v37, %v1058_v23  ;;  %v2188_v37 = vld [vmem:[%s3271_s30 + $0x90] sm:$0xff] }
 0x1b8   : > { %v1060_v36 = vpop.f32.mrf.mxu1  ;;  %v1477_v2 = vpop.f32.mrf.mxu3 }
 0x1b9   : > { %v1523_v4 = vadd.f32 %v1477_v2, %v1297_v19  ;;  %3097 = vmatmul.msk.f32.gmra.mxu0 %vm3761_vm9, %v2379_v53  ;;  %v1061_v46 = vadd.f32 %v1060_v36, %v3809_v7  ;;  %v2382_v36 = vld [vmem:[%s3271_s30 + $0x91] sm:$0xff] }
 0x1bb   : > { %v4318_v29 = vadd.f32 %v1671_v60, %v1523_v4  ;;  %1851 = vmatmul.f32.gmra.mxu1 %v2378_v35  ;;  %3050 = vmatmul.msk.f32.gmra.mxu2 %vm3782_vm10, %v1960_v33 }
 0x1bd   : > { %2271 = vmatmul.f32.gmra.mxu3 %v2186_v42 }
 0x1be   : > { %v1254_v39 = vpop.f32.mrf.mxu2  ;;  %v1674_v25 = vpop.f32.mrf.mxu0 }
 0x1bf   : > { %v1298_v21 = vadd.f32 %v1254_v39, %v1061_v46  ;;  %v2189_v46 = vld [vmem:[%s3271_s30 + $0x98] sm:$0xff] }
 0x1c0   : > { %v1063_v24 = vpop.f32.mrf.mxu1  ;;  %v1480_v30 = vpop.f32.mrf.mxu3 }
 0x1c1   : > { %v1524_v41 = vadd.f32 %v1480_v30, %v1298_v21  ;;  %2497 = vmatmul.f32.gmra.mxu0 %v2380_v18  ;;  %v1064_v52 = vadd.f32 %v1063_v24, %v3830_v14  ;;  %v2383_v24 = vld [vmem:[%s3271_s30 + $0x99] sm:$0xff] }
 0x1c3   : > { %v4326_v35 = vadd.f32 %v1674_v25, %v1524_v41  ;;  %3018 = vmatmul.msk.f32.gmra.mxu1 %vm3811_vm11, %v2379_v53  ;;  %2080 = vmatmul.f32.gmra.mxu2 %v1961_v38 }
 0x1c5   : > { %2274 = vmatmul.f32.gmra.mxu3 %v2187_v48  ;;  %v1964_v48 = vld [vmem:[%s3271_s30 + $0x9f] sm:$0xff] }
 0x1c6   : > { %v1257_v7 = vpop.f32.mrf.mxu2  ;;  %v1677_v57 = vpop.f32.mrf.mxu0 }
 0x1c7   : > { %v1299_v20 = vadd.f32 %v1257_v7, %v1064_v52  ;;  %v2190_v7 = vld [vmem:[%s3271_s30 + $0xa0] sm:$0xff] }
 0x1c8   : > { %v1066_v11 = vpop.f32.mrf.mxu1  ;;  %v1483_v10 = vpop.f32.mrf.mxu3 }
 0x1c9   : > { %v1525_v23 = vadd.f32 %v1483_v10, %v1299_v20  ;;  %3098 = vmatmul.msk.f32.gmra.mxu0 %vm3811_vm11, %v2381_v44  ;;  %v1067_v14 = vadd.f32 %v1066_v11, %v3859_v28  ;;  %v4714_v28 = vld [vmem:[#allocation3_spill] sm:$0xff]  ;;  %v4717_v20 = vld [vmem:[#allocation5_spill] sm:$0xff] }
 0x1cb   : > { %v4336_v60 = vadd.f32 %v1677_v57, %v1525_v23  ;;  %1857 = vmatmul.f32.gmra.mxu1 %v2380_v18  ;;  %3051 = vmatmul.msk.f32.gmra.mxu2 %vm3832_vm12, %v1962_v26  ;;  %v2384_v23 = vld [vmem:[%s3271_s30 + $0xa1] sm:$0xff] }
 0x1cd   : > { %2277 = vmatmul.f32.gmra.mxu3 %v2188_v37 }
 0x1ce   : > { %v1260_v53 = vpop.f32.mrf.mxu2  ;;  %v1680_v19 = vpop.f32.mrf.mxu0 }
 0x1cf   : > { %v1300_v2 = vadd.f32 %v1260_v53, %v1067_v14 }
 0x1d0   : > { %v1069_v33 = vpop.f32.mrf.mxu1  ;;  %v1486_v4 = vpop.f32.mrf.mxu3 }
 0x1d1   : > { %v1526_v42 = vadd.f32 %v1486_v4, %v1300_v2  ;;  %2503 = vmatmul.f32.gmra.mxu0 %v2382_v36  ;;  %v1070_v25 = vadd.f32 %v1069_v33, %v4714_v28  ;;  %v2191_v33 = vld [vmem:[%s3271_s30 + $0xa8] sm:$0xff]  ;;  %v4718_v4 = vld [vmem:[#allocation6_spill] sm:$0xff] }
 0x1d2   : > { %vm4719_vm1 = vnez %v4718_v4  ;;  %v2385_v28 = vld [vmem:[%s3271_s30 + $0xa9] sm:$0xff] }
 0x1d3   : > { %v4344_v39 = vadd.f32 %v1680_v19, %v1526_v42  ;;  %3019 = vmatmul.msk.f32.gmra.mxu1 %vm3861_vm13, %v2381_v44  ;;  %2086 = vmatmul.f32.gmra.mxu2 %v1963_v8  ;;  %v4715_v44 = vld [vmem:[#allocation4_spill] sm:$0xff]  ;;  %v1965_v19 = vld [vmem:[%s3271_s30 + $0xa7] sm:$0xff] }
 0x1d4   : > { %vm4716_vm0 = vnez %v4715_v44  ;;  %v4720_v8 = vld [vmem:[#allocation7_spill] sm:$0xff] }
 0x1d5   : > { %2280 = vmatmul.f32.gmra.mxu3 %v2189_v46 }
 0x1d6   : > { %v1263_v18 = vpop.f32.mrf.mxu2  ;;  %v1683_v21 = vpop.f32.mrf.mxu0 }
 0x1d7   : > { %v1301_v30 = vadd.f32 %v1263_v18, %v1070_v25 }
 0x1d8   : > { %v1072_v38 = vpop.f32.mrf.mxu1  ;;  %v1489_v41 = vpop.f32.mrf.mxu3 }
 0x1d9   : > { %v1527_v52 = vadd.f32 %v1489_v41, %v1301_v30  ;;  %3099 = vmatmul.msk.f32.gmra.mxu0 %vm3861_vm13, %v2383_v24  ;;  %v1073_v11 = vadd.f32 %v1072_v38, %v4717_v20  ;;  %v1966_v30 = vld [vmem:[%s3271_s30 + $0xaf] sm:$0xff] }
 0x1da   : > { %v2192_v41 = vld [vmem:[%s3271_s30 + $0xb0] sm:$0xff] }
 0x1db   : > { %v4354_v57 = vadd.f32 %v1683_v21, %v1527_v52  ;;  %1863 = vmatmul.f32.gmra.mxu1 %v2382_v36  ;;  %3052 = vmatmul.msk.f32.gmra.mxu2 %vm4716_vm0, %v1964_v48  ;;  %v4721_v48 = vld [vmem:[#allocation8_spill] sm:$0xff] }
 0x1dc   : > { %vm4722_vm2 = vnez %v4721_v48  ;;  %v2386_v20 = vld [vmem:[%s3271_s30 + $0xb1] sm:$0xff]  ;;  %v2388_v48 = vld [vmem:[%s3271_s30 + $0xc1] sm:$0xff] }
 0x1dd   : > { %2283 = vmatmul.f32.gmra.mxu3 %v2190_v7 }
 0x1de   : > { %v1266_v10 = vpop.f32.mrf.mxu2  ;;  %v1686_v26 = vpop.f32.mrf.mxu0 }
 0x1df   : > { %v1302_v37 = vadd.f32 %v1266_v10, %v1073_v11 }
 0x1e0   : > { %v1075_v14 = vpop.f32.mrf.mxu1  ;;  %v1492_v53 = vpop.f32.mrf.mxu3 }
 0x1e1   : > { %v1528_v2 = vadd.f32 %v1492_v53, %v1302_v37  ;;  %2509 = vmatmul.f32.gmra.mxu0 %v2384_v23  ;;  %v1076_v42 = vadd.f32 %v1075_v14, %v4720_v8  ;;  %v1967_v37 = vld [vmem:[%s3271_s30 + $0xb7] sm:$0xff] }
 0x1e2   : > { %v2193_v53 = vld [vmem:[%s3271_s30 + $0xb8] sm:$0xff] }
 0x1e3   : > { %v4362_v36 = vadd.f32 %v1686_v26, %v1528_v2  ;;  %3020 = vmatmul.msk.f32.gmra.mxu1 %vm4719_vm1, %v2383_v24  ;;  %2092 = vmatmul.f32.gmra.mxu2 %v1965_v19  ;;  %v2387_v8 = vld [vmem:[%s3271_s30 + $0xb9] sm:$0xff] }
 0x1e5   : > { %2286 = vmatmul.f32.gmra.mxu3 %v2191_v33 }
 0x1e6   : > { %v1269_v46 = vpop.f32.mrf.mxu2  ;;  %v1689_v16 = vpop.f32.mrf.mxu0 }
 0x1e7   : > { %v1303_v25 = vadd.f32 %v1269_v46, %v1076_v42 }
 0x1e8   : > { %v1495_v18 = vpop.f32.mrf.mxu3  ;;  %v1822_v21 = vpop.f32.mrf.mxu1 }
 0x1e9   : > { %v1529_v38 = vadd.f32 %v1495_v18, %v1303_v25  ;;  %3100 = vmatmul.msk.f32.gmra.mxu0 %vm4719_vm1, %v2385_v28  ;;  %v1918_v52 = vadd.f32 %v1822_v21, %v3960_v55  ;;  %v2194_v18 = vld [vmem:[%s3271_s30 + $0xc0] sm:$0xff]  ;;  %vm4745_vm1 = vnez %v4708_v59 }
 0x1eb   : > { %v4372_v24 = vadd.f32 %v1689_v16, %v1529_v38  ;;  %1869 = vmatmul.f32.gmra.mxu1 %v2384_v23  ;;  %3053 = vmatmul.msk.f32.gmra.mxu2 %vm4722_vm2, %v1966_v30  ;;  %v4383_v23 = vld [vmem:[%s4588_s2] ss:$0 sm:$0xff] }
 0x1ed   : > { %2289 = vmatmul.f32.gmra.mxu3 %v2192_v41 }
 0x1ee   : > { %v2048_v7 = vpop.f32.mrf.mxu2  ;;  %v2468_v44 = vpop.f32.mrf.mxu0 }
 0x1ef   : > { %v2144_v11 = vadd.f32 %v2048_v7, %v1918_v52 }
 0x1f0   : > { %v1825_v10 = vpop.f32.mrf.mxu1  ;;  %v2242_v26 = vpop.f32.mrf.mxu3 }
 0x1f1   : > { %v2338_v14 = vadd.f32 %v2242_v26, %v2144_v11  ;;  %2515 = vmatmul.f32.gmra.mxu0 %v2386_v20  ;;  %v1919_v19 = vadd.f32 %v1825_v10, %v3976_v0  ;;  %v1969_v10 = vld [vmem:[%s3271_s30 + $0xc7] sm:$0xff] }
 0x1f3   : > { %v2564_v55 = vadd.f32 %v2468_v44, %v2338_v14  ;;  %3021 = vmatmul.msk.f32.gmra.mxu1 %vm4723_vm3, %v2385_v28  ;;  %2098 = vmatmul.f32.gmra.mxu2 %v1967_v37  ;;  %v1968_v28 = vld [vmem:[%s3271_s30 + $0xbf] sm:$0xff] }
 0x1f5   : > { %v2600_v2 = vadd.f32 %v4383_v23, %v2564_v55  ;;  %2292 = vmatmul.f32.gmra.mxu3 %v2193_v53 }
 0x1f6   : > { %v2051_v33 = vpop.f32.mrf.mxu2  ;;  %v2471_v4 = vpop.f32.mrf.mxu0 }
 0x1f7   : > { %2740 = vst [vmem:[%s4391_s29] sm:$0xff] %v2600_v2  ;;  %v2145_v42 = vadd.f32 %v2051_v33, %v1919_v19  ;;  %v2670_v52 = vmul.f32 %v2600_v2, %v2600_v2 }
 0x1f8   : > { %v1828_v46 = vpop.f32.mrf.mxu1  ;;  %v2245_v16 = vpop.f32.mrf.mxu3 }
 0x1f9   : > { %v2339_v25 = vadd.f32 %v2245_v16, %v2145_v42  ;;  %3101 = vmatmul.msk.f32.gmra.mxu0 %vm4723_vm3, %v2387_v8  ;;  %v1920_v0 = vadd.f32 %v1828_v46, %v4000_v12  ;;  %v2195_v12 = vld [vmem:[%s3271_s30 + $0xc8] sm:$0xff] }
 0x1fb   : > { %v2565_v21 = vadd.f32 %v2471_v4, %v2339_v25  ;;  %1875 = vmatmul.f32.gmra.mxu1 %v2386_v20  ;;  %3054 = vmatmul.msk.f32.gmra.mxu2 %vm4724_vm4, %v1968_v28  ;;  %v1970_v28 = vld [vmem:[%s3271_s30 + $0xcf] sm:$0xff] }
 0x1fd   : > { %v2601_v30 = vadd.f32 %v4383_v23, %v2565_v21  ;;  %2295 = vmatmul.f32.gmra.mxu3 %v2194_v18 }
 0x1fe   : > { %v2054_v38 = vpop.f32.mrf.mxu2  ;;  %v2474_v41 = vpop.f32.mrf.mxu0 }
 0x1ff   : > { %v2632_v7 = vadd.f32 %v2601_v30, %v2600_v2  ;;  %v2671_v32 = vmul.f32 %v2601_v30, %v2601_v30  ;;  %2741 = vst [vmem:[%s4391_s29 + $0x8] sm:$0xff] %v2601_v30  ;;  %v2146_v44 = vadd.f32 %v2054_v38, %v1920_v0  ;;  %v2389_v2 = vld [vmem:[%s3271_s30 + $0xc9] sm:$0xff] }
 0x200   : > { %v1831_v11 = vpop.f32.mrf.mxu1  ;;  %v2248_v20 = vpop.f32.mrf.mxu3 }
 0x201   : > { %v2702_v13 = vadd.f32 %v2671_v32, %v2670_v52  ;;  %v2340_v26 = vadd.f32 %v2248_v20, %v2146_v44  ;;  %2521 = vmatmul.f32.gmra.mxu0 %v2388_v48  ;;  %v1921_v14 = vadd.f32 %v1831_v11, %v4016_v49  ;;  %v2196_v49 = vld [vmem:[%s3271_s30 + $0xd0] sm:$0xff] }
 0x203   : > { %v2566_v37 = vadd.f32 %v2474_v41, %v2340_v26  ;;  %3022 = vmatmul.msk.f32.gmra.mxu1 %vm4725_vm5, %v2387_v8  ;;  %2104 = vmatmul.f32.gmra.mxu2 %v1969_v10  ;;  %v2390_v41 = vld [vmem:[%s3271_s30 + $0xd1] sm:$0xff] }
 0x205   : > { %v2602_v53 = vadd.f32 %v4383_v23, %v2566_v37  ;;  %2298 = vmatmul.f32.gmra.mxu3 %v2195_v12  ;;  %v2391_v37 = vld [vmem:[%s3271_s30 + $0xd9] sm:$0xff] }
 0x206   : > { %v2057_v55 = vpop.f32.mrf.mxu2  ;;  %v2477_v19 = vpop.f32.mrf.mxu0 }
 0x207   : > { %v2633_v33 = vadd.f32 %v2632_v7, %v2602_v53  ;;  %v2672_v4 = vmul.f32 %v2602_v53, %v2602_v53  ;;  %2742 = vst [vmem:[%s4391_s29 + $0x10] sm:$0xff] %v2602_v53  ;;  %v2147_v42 = vadd.f32 %v2057_v55, %v1921_v14 }
 0x208   : > { %v1834_v46 = vpop.f32.mrf.mxu1  ;;  %v2251_v16 = vpop.f32.mrf.mxu3 }
 0x209   : > { %v2703_v8 = vadd.f32 %v2702_v13, %v2672_v4  ;;  %v2341_v25 = vadd.f32 %v2251_v16, %v2147_v42  ;;  %3102 = vmatmul.msk.f32.gmra.mxu0 %vm4725_vm5, %v2389_v2  ;;  %v1922_v21 = vadd.f32 %v1834_v46, %v4040_v56  ;;  %v2197_v56 = vld [vmem:[%s3271_s30 + $0xd8] sm:$0xff] }
 0x20a   : > { %v1972_v4 = vld [vmem:[%s3271_s30 + $0xdf] sm:$0xff] }
 0x20b   : > { %v2567_v18 = vadd.f32 %v2477_v19, %v2341_v25  ;;  %1881 = vmatmul.f32.gmra.mxu1 %v2388_v48  ;;  %3055 = vmatmul.msk.f32.gmra.mxu2 %vm4726_vm6, %v1970_v28  ;;  %v1971_v48 = vld [vmem:[%s3271_s30 + $0xd7] sm:$0xff] }
 0x20c   : > { %v4728_v16 = vld [vmem:[#allocation9_spill] sm:$0xff] }
 0x20d   : > { %v2603_v0 = vadd.f32 %v4383_v23, %v2567_v18  ;;  %2301 = vmatmul.f32.gmra.mxu3 %v2196_v49  ;;  %vm4729_vm8 = vnez %v4728_v16  ;;  %v2392_v18 = vld [vmem:[%s3271_s30 + $0xe1] sm:$0xff] }
 0x20e   : > { %v2060_v30 = vpop.f32.mrf.mxu2  ;;  %v2480_v38 = vpop.f32.mrf.mxu0 }
 0x20f   : > { %v2634_v52 = vadd.f32 %v2633_v33, %v2603_v0  ;;  %v2673_v7 = vmul.f32 %v2603_v0, %v2603_v0  ;;  %2743 = vst [vmem:[%s4391_s29 + $0x18] sm:$0xff] %v2603_v0  ;;  %v2148_v5 = vadd.f32 %v2060_v30, %v1922_v21 }
 0x210   : > { %v1837_v32 = vpop.f32.mrf.mxu1  ;;  %v2254_v44 = vpop.f32.mrf.mxu3 }
 0x211   : > { %v2704_v31 = vadd.f32 %v2703_v8, %v2673_v7  ;;  %v2342_v11 = vadd.f32 %v2254_v44, %v2148_v5  ;;  %2527 = vmatmul.f32.gmra.mxu0 %v2390_v41  ;;  %v1923_v10 = vadd.f32 %v1837_v32, %v4056_v17  ;;  %v2198_v17 = vld [vmem:[%s3271_s30 + $0xe0] sm:$0xff] }
 0x212   : > { %v4730_v32 = vld [vmem:[#allocation10_spill] sm:$0xff] }
 0x213   : > { %v2568_v20 = vadd.f32 %v2480_v38, %v2342_v11  ;;  %3023 = vmatmul.msk.f32.gmra.mxu1 %vm4727_vm7, %v2389_v2  ;;  %2110 = vmatmul.f32.gmra.mxu2 %v1971_v48  ;;  %vm4731_vm9 = vnez %v4730_v32 }
 0x215   : > { %v2604_v13 = vadd.f32 %v4383_v23, %v2568_v20  ;;  %2304 = vmatmul.f32.gmra.mxu3 %v2197_v56  ;;  %v2393_v56 = vld [vmem:[%s3271_s30 + $0xe9] sm:$0xff] }
 0x216   : > { %v2063_v26 = vpop.f32.mrf.mxu2  ;;  %v2483_v12 = vpop.f32.mrf.mxu0 }
 0x217   : > { %v2635_v14 = vadd.f32 %v2634_v52, %v2604_v13  ;;  %v2674_v53 = vmul.f32 %v2604_v13, %v2604_v13  ;;  %2744 = vst [vmem:[%s4391_s29 + $0x20] sm:$0xff] %v2604_v13  ;;  %v2149_v55 = vadd.f32 %v2063_v26, %v1923_v10 }
 0x218   : > { %v1840_v19 = vpop.f32.mrf.mxu1  ;;  %v2257_v33 = vpop.f32.mrf.mxu3 }
 0x219   : > { %v2705_v2 = vadd.f32 %v2704_v31, %v2674_v53  ;;  %v2343_v42 = vadd.f32 %v2257_v33, %v2149_v55  ;;  %3103 = vmatmul.msk.f32.gmra.mxu0 %vm4727_vm7, %v2391_v37  ;;  %v1924_v28 = vadd.f32 %v1840_v19, %v4080_v58  ;;  %v2199_v58 = vld [vmem:[%s3271_s30 + $0xe8] sm:$0xff] }
 0x21a   : > { %v4732_v19 = vld [vmem:[#allocation11_spill] sm:$0xff] }
 0x21b   : > { %v2569_v46 = vadd.f32 %v2483_v12, %v2343_v42  ;;  %1887 = vmatmul.f32.gmra.mxu1 %v2390_v41  ;;  %3056 = vmatmul.msk.f32.gmra.mxu2 %vm4729_vm8, %v1972_v4  ;;  %v1973_v41 = vld [vmem:[%s3271_s30 + $0xe7] sm:$0xff]  ;;  %vm4733_vm10 = vnez %v4732_v19 }
 0x21d   : > { %v2605_v8 = vadd.f32 %v4383_v23, %v2569_v46  ;;  %2307 = vmatmul.f32.gmra.mxu3 %v2198_v17  ;;  %v2394_v17 = vld [vmem:[%s3271_s30 + $0xf1] sm:$0xff] }
 0x21e   : > { %v2066_v25 = vpop.f32.mrf.mxu2  ;;  %v2486_v49 = vpop.f32.mrf.mxu0 }
 0x21f   : > { %v2636_v21 = vadd.f32 %v2635_v14, %v2605_v8  ;;  %v2675_v0 = vmul.f32 %v2605_v8, %v2605_v8  ;;  %2745 = vst [vmem:[%s4391_s29 + $0x28] sm:$0xff] %v2605_v8  ;;  %v2150_v40 = vadd.f32 %v2066_v25, %v1924_v28  ;;  %v1974_v14 = vld [vmem:[%s3271_s30 + $0xef] sm:$0xff] }
 0x220   : > { %v1843_v30 = vpop.f32.mrf.mxu1  ;;  %v2260_v38 = vpop.f32.mrf.mxu3 }
 0x221   : > { %v2706_v52 = vadd.f32 %v2705_v2, %v2675_v0  ;;  %v2344_v7 = vadd.f32 %v2260_v38, %v2150_v40  ;;  %2533 = vmatmul.f32.gmra.mxu0 %v2392_v18  ;;  %v1925_v44 = vadd.f32 %v1843_v30, %v4096_v34  ;;  %v2200_v34 = vld [vmem:[%s3271_s30 + $0xf0] sm:$0xff]  ;;  %v4736_v30 = vld [vmem:[#allocation14_spill] sm:$0xff] }
 0x222   : > { %v4734_v40 = vld [vmem:[#allocation12_spill] sm:$0xff] }
 0x223   : > { %v2570_v5 = vadd.f32 %v2486_v49, %v2344_v7  ;;  %3024 = vmatmul.msk.f32.gmra.mxu1 %vm4731_vm9, %v2391_v37  ;;  %2116 = vmatmul.f32.gmra.mxu2 %v1973_v41  ;;  %v1975_v49 = vld [vmem:[%s3271_s30 + $0xf7] sm:$0xff]  ;;  %vm4735_vm11 = vnez %v4734_v40  ;;  %v2397_v40 = vld [vmem:[%s3271_s30 + $0x109] sm:$0xff] }
 0x225   : > { %v2606_v48 = vadd.f32 %v4383_v23, %v2570_v5  ;;  %2310 = vmatmul.f32.gmra.mxu3 %v2199_v58  ;;  %v2395_v58 = vld [vmem:[%s3271_s30 + $0xf9] sm:$0xff] }
 0x226   : > { %v2069_v31 = vpop.f32.mrf.mxu2  ;;  %v2489_v11 = vpop.f32.mrf.mxu0 }
 0x227   : > { %v2637_v20 = vadd.f32 %v2636_v21, %v2606_v48  ;;  %v2676_v10 = vmul.f32 %v2606_v48, %v2606_v48  ;;  %2746 = vst [vmem:[%s4391_s29 + $0x30] sm:$0xff] %v2606_v48  ;;  %v2151_v13 = vadd.f32 %v2069_v31, %v1925_v44 }
 0x228   : > { %v1846_v26 = vpop.f32.mrf.mxu1  ;;  %v2263_v12 = vpop.f32.mrf.mxu3 }
 0x229   : > { %v2707_v37 = vadd.f32 %v2706_v52, %v2676_v10  ;;  %v2345_v53 = vadd.f32 %v2263_v12, %v2151_v13  ;;  %3104 = vmatmul.msk.f32.gmra.mxu0 %vm4731_vm9, %v2393_v56  ;;  %v1926_v33 = vadd.f32 %v1846_v26, %v4120_v47  ;;  %v2201_v47 = vld [vmem:[%s3271_s30 + $0xf8] sm:$0xff]  ;;  %v2202_v10 = vld [vmem:[%s3271_s30 + $0x100] sm:$0xff]  ;;  %v4739_v12 = vld [vmem:[#allocation16_spill] sm:$0xff] }
 0x22a   : > { %v4737_v26 = vld [vmem:[#allocation13_spill] sm:$0xff] }
 0x22b   : > { %v2571_v55 = vadd.f32 %v2489_v11, %v2345_v53  ;;  %1893 = vmatmul.f32.gmra.mxu1 %v2392_v18  ;;  %3057 = vmatmul.msk.f32.gmra.mxu2 %vm4733_vm10, %v1974_v14  ;;  %v1976_v11 = vld [vmem:[%s3271_s30 + $0xff] sm:$0xff]  ;;  %vm4738_vm12 = vnez %v4737_v26 }
 0x22d   : > { %v2607_v4 = vadd.f32 %v4383_v23, %v2571_v55  ;;  %2313 = vmatmul.f32.gmra.mxu3 %v2200_v34  ;;  %v2396_v55 = vld [vmem:[%s3271_s30 + $0x101] sm:$0xff] }
 0x22e   : > { %v2072_v2 = vpop.f32.mrf.mxu2  ;;  %v2492_v42 = vpop.f32.mrf.mxu0 }
 0x22f   : > { %v2638_v46 = vadd.f32 %v2637_v20, %v2607_v4  ;;  %v2677_v16 = vmul.f32 %v2607_v4, %v2607_v4  ;;  %2747 = vst [vmem:[%s4391_s29 + $0x38] sm:$0xff] %v2607_v4  ;;  %v2152_v28 = vadd.f32 %v2072_v2, %v1926_v33 }
 0x230   : > { %v1849_v8 = vpop.f32.mrf.mxu1  ;;  %v2266_v25 = vpop.f32.mrf.mxu3 }
 0x231   : > { %v2708_v18 = vadd.f32 %v2707_v37, %v2677_v16  ;;  %v2346_v21 = vadd.f32 %v2266_v25, %v2152_v28  ;;  %2539 = vmatmul.f32.gmra.mxu0 %v2394_v17  ;;  %v1927_v38 = vadd.f32 %v1849_v8, %v4736_v30  ;;  %v2203_v28 = vld [vmem:[%s3271_s30 + $0x108] sm:$0xff] }
 0x232   : > { %v4740_v25 = vld [vmem:[#allocation15_spill] sm:$0xff] }
 0x233   : > { %v2572_v0 = vadd.f32 %v2492_v42, %v2346_v21  ;;  %3025 = vmatmul.msk.f32.gmra.mxu1 %vm4735_vm11, %v2393_v56  ;;  %2122 = vmatmul.f32.gmra.mxu2 %v1975_v49  ;;  %vm4741_vm13 = vnez %v4740_v25  ;;  %v4742_v49 = vld [vmem:[#allocation18_spill] sm:$0xff] }
 0x235   : > { %v2608_v41 = vadd.f32 %v4383_v23, %v2572_v0  ;;  %2316 = vmatmul.f32.gmra.mxu3 %v2201_v47 }
 0x236   : > { %v2075_v52 = vpop.f32.mrf.mxu2  ;;  %v2495_v7 = vpop.f32.mrf.mxu0 }
 0x237   : > { %v2639_v5 = vadd.f32 %v2638_v46, %v2608_v41  ;;  %v2678_v32 = vmul.f32 %v2608_v41, %v2608_v41  ;;  %2748 = vst [vmem:[%s4391_s29 + $0x40] sm:$0xff] %v2608_v41  ;;  %v2153_v44 = vadd.f32 %v2075_v52, %v1927_v38 }
 0x238   : > { %v1852_v48 = vpop.f32.mrf.mxu1  ;;  %v2269_v31 = vpop.f32.mrf.mxu3 }
 0x239   : > { %v2709_v56 = vadd.f32 %v2708_v18, %v2678_v32  ;;  %v2347_v20 = vadd.f32 %v2269_v31, %v2153_v44  ;;  %3105 = vmatmul.msk.f32.gmra.mxu0 %vm4735_vm11, %v2395_v58  ;;  %v1928_v14 = vadd.f32 %v1852_v48, %v4739_v12  ;;  %v2204_v44 = vld [vmem:[%s3271_s30 + $0x110] sm:$0xff]  ;;  %v4743_v31 = vld [vmem:[#allocation17_spill] sm:$0xff] }
 0x23a   : > { %vm4744_vm0 = vnez %v4743_v31 }
 0x23b   : > { %v2573_v13 = vadd.f32 %v2495_v7, %v2347_v20  ;;  %1899 = vmatmul.f32.gmra.mxu1 %v2394_v17  ;;  %3058 = vmatmul.msk.f32.gmra.mxu2 %vm4738_vm12, %v1976_v11  ;;  %v1977_v17 = vld [vmem:[%s3271_s30 + $0x107] sm:$0xff] }
 0x23d   : > { %v2609_v37 = vadd.f32 %v4383_v23, %v2573_v13  ;;  %2319 = vmatmul.f32.gmra.mxu3 %v2202_v10  ;;  %v2398_v13 = vld [vmem:[%s3271_s30 + $0x111] sm:$0xff] }
 0x23e   : > { %v2078_v53 = vpop.f32.mrf.mxu2  ;;  %v2498_v34 = vpop.f32.mrf.mxu0 }
 0x23f   : > { %v2640_v19 = vadd.f32 %v2639_v5, %v2609_v37  ;;  %v2679_v33 = vmul.f32 %v2609_v37, %v2609_v37  ;;  %2749 = vst [vmem:[%s4391_s29 + $0x48] sm:$0xff] %v2609_v37  ;;  %v2154_v4 = vadd.f32 %v2078_v53, %v1928_v14  ;;  %v1978_v5 = vld [vmem:[%s3271_s30 + $0x10f] sm:$0xff] }
 0x240   : > { %v1855_v2 = vpop.f32.mrf.mxu1  ;;  %v2272_v42 = vpop.f32.mrf.mxu3 }
 0x241   : > { %v2710_v46 = vadd.f32 %v2709_v56, %v2679_v33  ;;  %v2348_v16 = vadd.f32 %v2272_v42, %v2154_v4  ;;  %2545 = vmatmul.f32.gmra.mxu0 %v2396_v55  ;;  %v1929_v18 = vadd.f32 %v1855_v2, %v4742_v49 }
 0x243   : > { %v2574_v8 = vadd.f32 %v2498_v34, %v2348_v16  ;;  %3026 = vmatmul.msk.f32.gmra.mxu1 %vm4741_vm13, %v2395_v58  ;;  %2128 = vmatmul.f32.gmra.mxu2 %v1977_v17  ;;  %v1979_v34 = vld [vmem:[%s3271_s30 + $0x117] sm:$0xff] }
 0x245   : > { %v2610_v21 = vadd.f32 %v4383_v23, %v2574_v8  ;;  %2322 = vmatmul.f32.gmra.mxu3 %v2203_v28 }
 0x246   : > { %v2081_v47 = vpop.f32.mrf.mxu2  ;;  %v2501_v0 = vpop.f32.mrf.mxu0 }
 0x247   : > { %v2641_v30 = vadd.f32 %v2640_v19, %v2610_v21  ;;  %v2680_v38 = vmul.f32 %v2610_v21, %v2610_v21  ;;  %2750 = vst [vmem:[%s4391_s29 + $0x50] sm:$0xff] %v2610_v21  ;;  %v2155_v41 = vadd.f32 %v2081_v47, %v1929_v18  ;;  %v1980_v18 = vld [vmem:[%s3271_s30 + $0x11f] sm:$0xff] }
 0x248   : > { %v1858_v52 = vpop.f32.mrf.mxu1  ;;  %v2275_v7 = vpop.f32.mrf.mxu3 }
 0x249   : > { %v2711_v58 = vadd.f32 %v2710_v46, %v2680_v38  ;;  %v2349_v32 = vadd.f32 %v2275_v7, %v2155_v41  ;;  %3106 = vmatmul.msk.f32.gmra.mxu0 %vm4741_vm13, %v2397_v40  ;;  %v1930_v11 = vadd.f32 %v1858_v52, %v4191_v9  ;;  %v2205_v9 = vld [vmem:[%s3271_s30 + $0x118] sm:$0xff]  ;;  %v2400_v52 = vld [vmem:[%s3271_s30 + $0x121] sm:$0xff] }
 0x24a   : > { %v2399_v46 = vld [vmem:[%s3271_s30 + $0x119] sm:$0xff] }
 0x24b   : > { %v2575_v48 = vadd.f32 %v2501_v0, %v2349_v32  ;;  %1905 = vmatmul.f32.gmra.mxu1 %v2396_v55  ;;  %3059 = vmatmul.msk.f32.gmra.mxu2 %vm4744_vm0, %v1978_v5 }
 0x24d   : > { %v2611_v56 = vadd.f32 %v4383_v23, %v2575_v48  ;;  %2325 = vmatmul.f32.gmra.mxu3 %v2204_v44  ;;  %v1981_v44 = vld [vmem:[%s3271_s30 + $0x127] sm:$0xff] }
 0x24e   : > { %v2084_v20 = vpop.f32.mrf.mxu2  ;;  %v2504_v10 = vpop.f32.mrf.mxu0 }
 0x24f   : > { %v2642_v26 = vadd.f32 %v2641_v30, %v2611_v56  ;;  %v2681_v12 = vmul.f32 %v2611_v56, %v2611_v56  ;;  %2751 = vst [vmem:[%s4391_s29 + $0x58] sm:$0xff] %v2611_v56  ;;  %v2156_v14 = vadd.f32 %v2084_v20, %v1930_v11 }
 0x250   : > { %v1861_v37 = vpop.f32.mrf.mxu1  ;;  %v2278_v53 = vpop.f32.mrf.mxu3 }
 0x251   : > { %v2712_v55 = vadd.f32 %v2711_v58, %v2681_v12  ;;  %v2350_v19 = vadd.f32 %v2278_v53, %v2156_v14  ;;  %2551 = vmatmul.f32.gmra.mxu0 %v2398_v13  ;;  %v1931_v4 = vadd.f32 %v1861_v37, %v4204_v43  ;;  %v2206_v43 = vld [vmem:[%s3271_s30 + $0x120] sm:$0xff] }
 0x253   : > { %v2576_v33 = vadd.f32 %v2504_v10, %v2350_v19  ;;  %3027 = vmatmul.msk.f32.gmra.mxu1 %vm4745_vm1, %v2397_v40  ;;  %2134 = vmatmul.f32.gmra.mxu2 %v1979_v34 }
 0x255   : > { %v2612_v2 = vadd.f32 %v4383_v23, %v2576_v33  ;;  %2328 = vmatmul.f32.gmra.mxu3 %v2205_v9 }
 0x256   : > { %v2087_v42 = vpop.f32.mrf.mxu2  ;;  %v2507_v17 = vpop.f32.mrf.mxu0 }
 0x257   : > { %v2643_v16 = vadd.f32 %v2642_v26, %v2612_v2  ;;  %v2682_v28 = vmul.f32 %v2612_v2, %v2612_v2  ;;  %2752 = vst [vmem:[%s4391_s29 + $0x60] sm:$0xff] %v2612_v2  ;;  %v2157_v8 = vadd.f32 %v2087_v42, %v1931_v4 }
 0x258   : > { %v1864_v25 = vpop.f32.mrf.mxu1  ;;  %v2281_v49 = vpop.f32.mrf.mxu3 }
 0x259   : > { %v2713_v21 = vadd.f32 %v2712_v55, %v2682_v28  ;;  %v2351_v47 = vadd.f32 %v2281_v49, %v2157_v8  ;;  %3107 = vmatmul.msk.f32.gmra.mxu0 %vm4745_vm1, %v2399_v46  ;;  %v1932_v40 = vadd.f32 %v1864_v25, %v4218_v22  ;;  %v2207_v22 = vld [vmem:[%s3271_s30 + $0x128] sm:$0xff] }
 0x25b   : > { %v2577_v0 = vadd.f32 %v2507_v17, %v2351_v47  ;;  %1911 = vmatmul.f32.gmra.mxu1 %v2398_v13  ;;  %3060 = vmatmul.msk.f32.gmra.mxu2 %vm4197_vm14, %v1980_v18  ;;  %v2401_v13 = vld [vmem:[%s3271_s30 + $0x129] sm:$0xff] }
 0x25d   : > { %v2613_v30 = vadd.f32 %v4383_v23, %v2577_v0  ;;  %2331 = vmatmul.f32.gmra.mxu3 %v2206_v43 }
 0x25e   : > { %v2090_v38 = vpop.f32.mrf.mxu2  ;;  %v2510_v41 = vpop.f32.mrf.mxu0 }
 0x25f   : > { %v2644_v7 = vadd.f32 %v2643_v16, %v2613_v30  ;;  %v2683_v5 = vmul.f32 %v2613_v30, %v2613_v30  ;;  %2753 = vst [vmem:[%s4391_s29 + $0x68] sm:$0xff] %v2613_v30  ;;  %v2158_v59 = vadd.f32 %v2090_v38, %v1932_v40 }
 0x260   : > { %v1867_v58 = vpop.f32.mrf.mxu1  ;;  %v2284_v32 = vpop.f32.mrf.mxu3 }
 0x261   : > { %v2714_v50 = vadd.f32 %v2713_v21, %v2683_v5  ;;  %v2352_v48 = vadd.f32 %v2284_v32, %v2158_v59  ;;  %2557 = vmatmul.f32.gmra.mxu0 %v2400_v52  ;;  %v1933_v11 = vadd.f32 %v1867_v58, %v4227_v51 }
 0x263   : > { %v2578_v31 = vadd.f32 %v2510_v41, %v2352_v48  ;;  %3028 = vmatmul.msk.f32.gmra.mxu1 %vm4212_vm15, %v2399_v46  ;;  %2140 = vmatmul.f32.gmra.mxu2 %v1981_v44 }
 0x265   : > { %v2614_v56 = vadd.f32 %v4383_v23, %v2578_v31  ;;  %2334 = vmatmul.f32.gmra.mxu3 %v2207_v22 }
 0x266   : > { %v2093_v20 = vpop.f32.mrf.mxu2  ;;  %v2513_v10 = vpop.f32.mrf.mxu0 }
 0x267   : > { %v2645_v26 = vadd.f32 %v2644_v7, %v2614_v56  ;;  %v2684_v12 = vmul.f32 %v2614_v56, %v2614_v56  ;;  %2754 = vst [vmem:[%s4391_s29 + $0x70] sm:$0xff] %v2614_v56  ;;  %v2159_v14 = vadd.f32 %v2093_v20, %v1933_v11 }
 0x268   : > { %v1870_v37 = vpop.f32.mrf.mxu1  ;;  %v2287_v53 = vpop.f32.mrf.mxu3 }
 0x269   : > { %v2715_v34 = vadd.f32 %v2714_v50, %v2684_v12  ;;  %v2353_v55 = vadd.f32 %v2287_v53, %v2159_v14  ;;  %3108 = vmatmul.msk.f32.gmra.mxu0 %vm4212_vm15, %v2401_v13  ;;  %v1934_v51 = vadd.f32 %v1870_v37, %v4236_v62 }
 0x26b   : > { %v2579_v19 = vadd.f32 %v2513_v10, %v2353_v55 }
 0x26d   : > { %v2615_v9 = vadd.f32 %v4383_v23, %v2579_v19 }
 0x26e   : > { %v2096_v33 = vpop.f32.mrf.mxu2  ;;  %v2516_v4 = vpop.f32.mrf.mxu0 }
 0x26f   : > { %v2646_v2 = vadd.f32 %v2645_v26, %v2615_v9  ;;  %v2685_v42 = vmul.f32 %v2615_v9, %v2615_v9  ;;  %2755 = vst [vmem:[%s4391_s29 + $0x78] sm:$0xff] %v2615_v9  ;;  %v2160_v17 = vadd.f32 %v2096_v33, %v1934_v51 }
 0x270   : > { %v1873_v46 = vpop.f32.mrf.mxu1  ;;  %v2290_v16 = vpop.f32.mrf.mxu3 }
 0x271   : > { %v2716_v28 = vadd.f32 %v2715_v34, %v2685_v42  ;;  %v2354_v8 = vadd.f32 %v2290_v16, %v2160_v17  ;;  %v1935_v63 = vadd.f32 %v1873_v46, %v4246_v54 }
 0x273   : > { %v2580_v25 = vadd.f32 %v2516_v4, %v2354_v8 }
 0x275   : > { %v2616_v49 = vadd.f32 %v4383_v23, %v2580_v25 }
 0x276   : > { %v2099_v18 = vpop.f32.mrf.mxu2  ;;  %v2519_v62 = vpop.f32.mrf.mxu0 }
 0x277   : > { %v2647_v21 = vadd.f32 %v2646_v2, %v2616_v49  ;;  %v2686_v47 = vmul.f32 %v2616_v49, %v2616_v49  ;;  %2756 = vst [vmem:[%s4391_s29 + $0x80] sm:$0xff] %v2616_v49  ;;  %v2161_v43 = vadd.f32 %v2099_v18, %v1935_v63 }
 0x278   : > { %v1876_v0 = vpop.f32.mrf.mxu1  ;;  %v2293_v40 = vpop.f32.mrf.mxu3 }
 0x279   : > { %v2717_v30 = vadd.f32 %v2716_v28, %v2686_v47  ;;  %v2355_v38 = vadd.f32 %v2293_v40, %v2161_v43  ;;  %v1936_v52 = vadd.f32 %v1876_v0, %v4254_v45 }
 0x27b   : > { %v2581_v41 = vadd.f32 %v2519_v62, %v2355_v38 }
 0x27d   : > { %v2617_v7 = vadd.f32 %v4383_v23, %v2581_v41 }
 0x27e   : > { %v2102_v5 = vpop.f32.mrf.mxu2  ;;  %v2522_v54 = vpop.f32.mrf.mxu0 }
 0x27f   : > { %v2648_v59 = vadd.f32 %v2647_v21, %v2617_v7  ;;  %v2687_v58 = vmul.f32 %v2617_v7, %v2617_v7  ;;  %2757 = vst [vmem:[%s4391_s29 + $0x88] sm:$0xff] %v2617_v7  ;;  %v2162_v32 = vadd.f32 %v2102_v5, %v1936_v52 }
 0x280   : > { %v1879_v44 = vpop.f32.mrf.mxu1  ;;  %v2296_v50 = vpop.f32.mrf.mxu3 }
 0x281   : > { %v2718_v48 = vadd.f32 %v2717_v30, %v2687_v58  ;;  %v2356_v22 = vadd.f32 %v2296_v50, %v2162_v32  ;;  %v1937_v11 = vadd.f32 %v1879_v44, %v4264_v6 }
 0x283   : > { %v2582_v31 = vadd.f32 %v2522_v54, %v2356_v22 }
 0x285   : > { %v2618_v56 = vadd.f32 %v4383_v23, %v2582_v31 }
 0x286   : > { %v2105_v20 = vpop.f32.mrf.mxu2  ;;  %v2525_v45 = vpop.f32.mrf.mxu0 }
 0x287   : > { %v2649_v10 = vadd.f32 %v2648_v59, %v2618_v56  ;;  %v2688_v13 = vmul.f32 %v2618_v56, %v2618_v56  ;;  %2758 = vst [vmem:[%s4391_s29 + $0x90] sm:$0xff] %v2618_v56  ;;  %v2163_v26 = vadd.f32 %v2105_v20, %v1937_v11 }
 0x288   : > { %v1882_v12 = vpop.f32.mrf.mxu1  ;;  %v2299_v14 = vpop.f32.mrf.mxu3 }
 0x289   : > { %v2719_v37 = vadd.f32 %v2718_v48, %v2688_v13  ;;  %v2357_v53 = vadd.f32 %v2299_v14, %v2163_v26  ;;  %v1938_v55 = vadd.f32 %v1882_v12, %v4272_v27 }
 0x28b   : > { %v2583_v34 = vadd.f32 %v2525_v45, %v2357_v53 }
 0x28d   : > { %v2619_v19 = vadd.f32 %v4383_v23, %v2583_v34 }
 0x28e   : > { %v2108_v51 = vpop.f32.mrf.mxu2  ;;  %v2528_v6 = vpop.f32.mrf.mxu0 }
 0x28f   : > { %v2650_v9 = vadd.f32 %v2649_v10, %v2619_v19  ;;  %v2689_v33 = vmul.f32 %v2619_v19, %v2619_v19  ;;  %2759 = vst [vmem:[%s4391_s29 + $0x98] sm:$0xff] %v2619_v19  ;;  %v2164_v4 = vadd.f32 %v2108_v51, %v1938_v55 }
 0x290   : > { %v1885_v2 = vpop.f32.mrf.mxu1  ;;  %v2302_v42 = vpop.f32.mrf.mxu3 }
 0x291   : > { %v2720_v17 = vadd.f32 %v2719_v37, %v2689_v33  ;;  %v2358_v46 = vadd.f32 %v2302_v42, %v2164_v4  ;;  %v1939_v28 = vadd.f32 %v1885_v2, %v4282_v61 }
 0x293   : > { %v2584_v16 = vadd.f32 %v2528_v6, %v2358_v46 }
 0x295   : > { %v2620_v8 = vadd.f32 %v4383_v23, %v2584_v16 }
 0x296   : > { %v2111_v25 = vpop.f32.mrf.mxu2  ;;  %v2531_v27 = vpop.f32.mrf.mxu0 }
 0x297   : > { %v2651_v63 = vadd.f32 %v2650_v9, %v2620_v8  ;;  %v2690_v49 = vmul.f32 %v2620_v8, %v2620_v8  ;;  %2760 = vst [vmem:[%s4391_s29 + $0xa0] sm:$0xff] %v2620_v8  ;;  %v2165_v18 = vadd.f32 %v2111_v25, %v1939_v28 }
 0x298   : > { %v1888_v62 = vpop.f32.mrf.mxu1  ;;  %v2305_v21 = vpop.f32.mrf.mxu3 }
 0x299   : > { %v2721_v47 = vadd.f32 %v2720_v17, %v2690_v49  ;;  %v2359_v43 = vadd.f32 %v2305_v21, %v2165_v18  ;;  %v1940_v40 = vadd.f32 %v1888_v62, %v4290_v15 }
 0x29b   : > { %v2585_v0 = vadd.f32 %v2531_v27, %v2359_v43 }
 0x29d   : > { %v2621_v30 = vadd.f32 %v4383_v23, %v2585_v0 }
 0x29e   : > { %v2114_v38 = vpop.f32.mrf.mxu2  ;;  %v2534_v61 = vpop.f32.mrf.mxu0 }
 0x29f   : > { %v2652_v41 = vadd.f32 %v2651_v63, %v2621_v30  ;;  %v2691_v52 = vmul.f32 %v2621_v30, %v2621_v30  ;;  %2761 = vst [vmem:[%s4391_s29 + $0xa8] sm:$0xff] %v2621_v30  ;;  %v2166_v7 = vadd.f32 %v2114_v38, %v1940_v40 }
 0x2a0   : > { %v1891_v5 = vpop.f32.mrf.mxu1  ;;  %v2308_v54 = vpop.f32.mrf.mxu3 }
 0x2a1   : > { %v2722_v59 = vadd.f32 %v2721_v47, %v2691_v52  ;;  %v2360_v58 = vadd.f32 %v2308_v54, %v2166_v7  ;;  %v1941_v44 = vadd.f32 %v1891_v5, %v4300_v1 }
 0x2a3   : > { %v2586_v32 = vadd.f32 %v2534_v61, %v2360_v58 }
 0x2a5   : > { %v2622_v50 = vadd.f32 %v4383_v23, %v2586_v32 }
 0x2a6   : > { %v2117_v48 = vpop.f32.mrf.mxu2  ;;  %v2537_v15 = vpop.f32.mrf.mxu0 }
 0x2a7   : > { %v2653_v22 = vadd.f32 %v2652_v41, %v2622_v50  ;;  %v2692_v31 = vmul.f32 %v2622_v50, %v2622_v50  ;;  %2762 = vst [vmem:[%s4391_s29 + $0xb0] sm:$0xff] %v2622_v50  ;;  %v2167_v11 = vadd.f32 %v2117_v48, %v1941_v44 }
 0x2a8   : > { %v1894_v56 = vpop.f32.mrf.mxu1  ;;  %v2311_v20 = vpop.f32.mrf.mxu3 }
 0x2a9   : > { %v2723_v45 = vadd.f32 %v2722_v59, %v2692_v31  ;;  %v2361_v10 = vadd.f32 %v2311_v20, %v2167_v11  ;;  %v1942_v26 = vadd.f32 %v1894_v56, %v4308_v3 }
 0x2ab   : > { %v2587_v13 = vadd.f32 %v2537_v15, %v2361_v10 }
 0x2ad   : > { %v2623_v12 = vadd.f32 %v4383_v23, %v2587_v13 }
 0x2ae   : > { %v2120_v14 = vpop.f32.mrf.mxu2  ;;  %v2540_v1 = vpop.f32.mrf.mxu0 }
 0x2af   : > { %v2654_v37 = vadd.f32 %v2653_v22, %v2623_v12  ;;  %v2693_v53 = vmul.f32 %v2623_v12, %v2623_v12  ;;  %2763 = vst [vmem:[%s4391_s29 + $0xb8] sm:$0xff] %v2623_v12  ;;  %v2168_v34 = vadd.f32 %v2120_v14, %v1942_v26 }
 0x2b0   : > { %v1897_v55 = vpop.f32.mrf.mxu1  ;;  %v2314_v19 = vpop.f32.mrf.mxu3 }
 0x2b1   : > { %v2724_v51 = vadd.f32 %v2723_v45, %v2693_v53  ;;  %v2362_v6 = vadd.f32 %v2314_v19, %v2168_v34  ;;  %v1943_v33 = vadd.f32 %v1897_v55, %v4318_v29 }
 0x2b3   : > { %v2588_v9 = vadd.f32 %v2540_v1, %v2362_v6 }
 0x2b5   : > { %v2624_v4 = vadd.f32 %v4383_v23, %v2588_v9 }
 0x2b6   : > { %v2123_v2 = vpop.f32.mrf.mxu2  ;;  %v2543_v3 = vpop.f32.mrf.mxu0 }
 0x2b7   : > { %v2655_v42 = vadd.f32 %v2654_v37, %v2624_v4  ;;  %v2694_v17 = vmul.f32 %v2624_v4, %v2624_v4  ;;  %2764 = vst [vmem:[%s4391_s29 + $0xc0] sm:$0xff] %v2624_v4  ;;  %v2169_v46 = vadd.f32 %v2123_v2, %v1943_v33 }
 0x2b8   : > { %v1900_v16 = vpop.f32.mrf.mxu1  ;;  %v2317_v28 = vpop.f32.mrf.mxu3 }
 0x2b9   : > { %v2725_v8 = vadd.f32 %v2724_v51, %v2694_v17  ;;  %v2363_v25 = vadd.f32 %v2317_v28, %v2169_v46  ;;  %v1944_v63 = vadd.f32 %v1900_v16, %v4326_v35 }
 0x2bb   : > { %v2589_v27 = vadd.f32 %v2543_v3, %v2363_v25 }
 0x2bd   : > { %v2625_v49 = vadd.f32 %v4383_v23, %v2589_v27 }
 0x2be   : > { %v2126_v18 = vpop.f32.mrf.mxu2  ;;  %v2546_v29 = vpop.f32.mrf.mxu0 }
 0x2bf   : > { %v2656_v62 = vadd.f32 %v2655_v42, %v2625_v49  ;;  %v2695_v21 = vmul.f32 %v2625_v49, %v2625_v49  ;;  %2765 = vst [vmem:[%s4391_s29 + $0xc8] sm:$0xff] %v2625_v49  ;;  %v2170_v47 = vadd.f32 %v2126_v18, %v1944_v63 }
 0x2c0   : > { %v1903_v43 = vpop.f32.mrf.mxu1  ;;  %v2320_v0 = vpop.f32.mrf.mxu3 }
 0x2c1   : > { %v2726_v40 = vadd.f32 %v2725_v8, %v2695_v21  ;;  %v2364_v30 = vadd.f32 %v2320_v0, %v2170_v47  ;;  %v1945_v61 = vadd.f32 %v1903_v43, %v4336_v60 }
 0x2c3   : > { %v2590_v38 = vadd.f32 %v2546_v29, %v2364_v30 }
 0x2c5   : > { %v2626_v41 = vadd.f32 %v4383_v23, %v2590_v38 }
 0x2c6   : > { %v2129_v52 = vpop.f32.mrf.mxu2  ;;  %v2549_v35 = vpop.f32.mrf.mxu0 }
 0x2c7   : > { %v2657_v7 = vadd.f32 %v2656_v62, %v2626_v41  ;;  %v2696_v5 = vmul.f32 %v2626_v41, %v2626_v41  ;;  %2766 = vst [vmem:[%s4391_s29 + $0xd0] sm:$0xff] %v2626_v41  ;;  %v2171_v54 = vadd.f32 %v2129_v52, %v1945_v61 }
 0x2c8   : > { %v1906_v59 = vpop.f32.mrf.mxu1  ;;  %v2323_v58 = vpop.f32.mrf.mxu3 }
 0x2c9   : > { %v2727_v32 = vadd.f32 %v2726_v40, %v2696_v5  ;;  %v2365_v44 = vadd.f32 %v2323_v58, %v2171_v54  ;;  %v1946_v48 = vadd.f32 %v1906_v59, %v4344_v39 }
 0x2cb   : > { %v2591_v50 = vadd.f32 %v2549_v35, %v2365_v44 }
 0x2cd   : > { %v2627_v15 = vadd.f32 %v4383_v23, %v2591_v50 }
 0x2ce   : > { %v2132_v22 = vpop.f32.mrf.mxu2  ;;  %v2552_v60 = vpop.f32.mrf.mxu0 }
 0x2cf   : > { %v2658_v31 = vadd.f32 %v2657_v7, %v2627_v15  ;;  %v2697_v11 = vmul.f32 %v2627_v15, %v2627_v15  ;;  %2767 = vst [vmem:[%s4391_s29 + $0xd8] sm:$0xff] %v2627_v15  ;;  %v2172_v56 = vadd.f32 %v2132_v22, %v1946_v48 }
 0x2d0   : > { %v1909_v20 = vpop.f32.mrf.mxu1  ;;  %v2326_v45 = vpop.f32.mrf.mxu3 }
 0x2d1   : > { %v2728_v10 = vadd.f32 %v2727_v32, %v2697_v11  ;;  %v2366_v13 = vadd.f32 %v2326_v45, %v2172_v56  ;;  %v1947_v12 = vadd.f32 %v1909_v20, %v4354_v57 }
 0x2d3   : > { %v2592_v26 = vadd.f32 %v2552_v60, %v2366_v13 }
 0x2d5   : > { %v2628_v14 = vadd.f32 %v4383_v23, %v2592_v26 }
 0x2d6   : > { %v2135_v1 = vpop.f32.mrf.mxu2  ;;  %v2555_v39 = vpop.f32.mrf.mxu0 }
 0x2d7   : > { %v2659_v37 = vadd.f32 %v2658_v31, %v2628_v14  ;;  %v2698_v53 = vmul.f32 %v2628_v14, %v2628_v14  ;;  %2768 = vst [vmem:[%s4391_s29 + $0xe0] sm:$0xff] %v2628_v14  ;;  %v2173_v34 = vadd.f32 %v2135_v1, %v1947_v12 }
 0x2d8   : > { %v1912_v55 = vpop.f32.mrf.mxu1  ;;  %v2329_v19 = vpop.f32.mrf.mxu3 }
 0x2d9   : > { %v2729_v51 = vadd.f32 %v2728_v10, %v2698_v53  ;;  %v2367_v6 = vadd.f32 %v2329_v19, %v2173_v34  ;;  %v1948_v33 = vadd.f32 %v1912_v55, %v4362_v36 }
 0x2db   : > { %v2593_v9 = vadd.f32 %v2555_v39, %v2367_v6 }
 0x2dd   : > { %v2629_v4 = vadd.f32 %v4383_v23, %v2593_v9 }
 0x2de   : > { %v2138_v2 = vpop.f32.mrf.mxu2  ;;  %v2558_v57 = vpop.f32.mrf.mxu0 }
 0x2df   : > { %v2660_v3 = vadd.f32 %v2659_v37, %v2629_v4  ;;  %v2699_v42 = vmul.f32 %v2629_v4, %v2629_v4  ;;  %2769 = vst [vmem:[%s4391_s29 + $0xe8] sm:$0xff] %v2629_v4  ;;  %v2174_v17 = vadd.f32 %v2138_v2, %v1948_v33 }
 0x2e0   : > { %v2332_v46 = vpop.f32.mrf.mxu3  ;;  %v1915_v8 = vpop.f32.mrf.mxu1 }
 0x2e1   : > { %v2730_v16 = vadd.f32 %v2729_v51, %v2699_v42  ;;  %v2368_v28 = vadd.f32 %v2332_v46, %v2174_v17  ;;  %v1949_v27 = vadd.f32 %v1915_v8, %v4372_v24 }
 0x2e3   : > { %v2594_v25 = vadd.f32 %v2558_v57, %v2368_v28 }
 0x2e5   : > { %v2630_v63 = vadd.f32 %v4383_v23, %v2594_v25 }
 0x2e6   : > { %v2141_v36 = vpop.f32.mrf.mxu2  ;;  %v2561_v21 = vpop.f32.mrf.mxu0 }
 0x2e7   : > { %v2661_v49 = vadd.f32 %v2660_v3, %v2630_v63  ;;  %v2700_v18 = vmul.f32 %v2630_v63, %v2630_v63  ;;  %2770 = vst [vmem:[%s4391_s29 + $0xf0] sm:$0xff] %v2630_v63  ;;  %v2175_v29 = vadd.f32 %v2141_v36, %v1949_v27 }
 0x2e8   : > { %v2335_v62 = vpop.f32.mrf.mxu3 }
 0x2e9   : > { %v2731_v47 = vadd.f32 %v2730_v16, %v2700_v18  ;;  %v2369_v43 = vadd.f32 %v2335_v62, %v2175_v29 }
 0x2eb   : > { %v2595_v0 = vadd.f32 %v2561_v21, %v2369_v43 }
 0x2ed   : > { %v2631_v40 = vadd.f32 %v4383_v23, %v2595_v0 }
 0x2ef   : > { %v2662_v30 = vadd.f32 %v2661_v49, %v2631_v40  ;;  %v2701_v38 = vmul.f32 %v2631_v40, %v2631_v40  ;;  %2771 = vst [vmem:[%s4391_s29 + $0xf8] sm:$0xff] %v2631_v40 }
 0x2f1   : > { %v2663_v24 = vrot.slane %v2662_v30, 4  ;;  %v2732_v61 = vadd.f32 %v2731_v47, %v2701_v38 }
 0x2f3   : > { %v2664_v41 = vadd.f32 %v2663_v24, %v2662_v30  ;;  %v2733_v52 = vrot.slane %v2732_v61, 4 }
 0x2f5   : > { %v2665_v35 = vrot.slane %v2664_v41, 2  ;;  %v2734_v7 = vadd.f32 %v2733_v52, %v2732_v61 }
 0x2f7   : > { %v2666_v5 = vadd.f32 %v2665_v35, %v2664_v41  ;;  %v2735_v54 = vrot.slane %v2734_v7, 2 }
 0x2f9   : > { %v2667_v59 = vrot.slane %v2666_v5, 1  ;;  %v2736_v58 = vadd.f32 %v2735_v54, %v2734_v7 }
 0x2fb   : > { %v2668_v32 = vadd.f32 %v2667_v59, %v2666_v5  ;;  %v2737_v23 = vrot.slane %v2736_v58, 1 }
 0x2fd   : > { %2669 = vst [vmem:[%s238_s7] sm:$0x1] %v2668_v32  ;;  %v2738_v44 = vadd.f32 %v2737_v23, %v2736_v58 }
 0x2ff   : > { %2739 = vst [vmem:[%s241_s10] sm:$0x1] %v2738_v44 }
 0x300 PF: > { %s16_s18 = sadd.s32 1, %s3176_s18  }
 0x301   : > { %p13_p4 = scmp.ge.s32.totalorder %s16_s18, 4  }
 0x303   :  { %15 = sbr.rel (!%p13_p4) target bundleno = 1 (0x1), region = 94 }

</bundles_post_ra>
